<compile_context>
chip_gen: v7x
topology: tpu7x:2x2x1
jax: 0.10.0
libtpu: 0.0.40
codegen_flags: <defaults>
</compile_context>

<pallas_src>
import jax
import jax.numpy as jnp
from jax.experimental import pallas as pl
from jax.experimental.pallas import tpu as pltpu

RS1 = 32   # rows reserved per image at the conv1 stage (30 padded + 2 guard)
RS2 = 16   # rows reserved per image at the conv2 stage (14 pooled + 2 zero pad)


# ---------------------------------------------------------------------------
# Fused forward kernel: one grid step == TB images, everything stays in VMEM.
# ---------------------------------------------------------------------------
def _fused_cnn_kernel(x_ref, w1b_ref, b1_ref, sw1_ref, w2b_ref, b2_ref, sw2_ref,
                      wfc_ref, bfc_ref, o_ref,
                      xse_ref, acc1_ref, p1_ref, e_ref, acc2_ref, r2_ref, so_ref):
    f32 = jnp.float32
    tb = o_ref.shape[0]
    n1 = tb * RS1
    n2 = tb * RS2

    # Stage the padded input plus 8 zero guard rows so the kh-shifted reads below
    # never touch uninitialised VMEM.
    xse_ref[pl.ds(0, n1), :] = x_ref[...]
    xse_ref[pl.ds(n1, 8), :] = jnp.zeros((8, 30), f32)

    # ---- conv1 3x3 pad1 (1->8): 3 banded matmuls, TB images stacked along M ----
    acc1_ref[...] = jnp.dot(xse_ref[pl.ds(0, n1), :], w1b_ref[0],
                            preferred_element_type=f32)
    acc1_ref[...] += jnp.dot(xse_ref[pl.ds(1, n1), :], w1b_ref[1],
                             preferred_element_type=f32)
    acc1_ref[...] += jnp.dot(xse_ref[pl.ds(2, n1), :], w1b_ref[2],
                             preferred_element_type=f32)
    h1 = jnp.maximum(acc1_ref[...] + b1_ref[...], 0.0)            # (n1, 224)

    # ---- maxpool 2x2: adjacent-W max -> selection matmul (W downsample + conv2
    #      W zero pad), then adjacent-H max via a stride-2 row read --------------
    m1 = jnp.maximum(h1[:, 0:216], h1[:, 8:224])                  # (n1, 216)
    p1_ref[...] = jnp.dot(m1, sw1_ref[...], preferred_element_type=f32)   # (n1,128)
    ev = p1_ref[pl.ds(0, n2, 2), :]                               # rows 0,2,4,...
    od = p1_ref[pl.ds(1, n2, 2), :]                               # rows 1,3,5,...
    rid = jax.lax.broadcasted_iota(jnp.int32, (n2, 128), 0)
    pooled1 = jnp.where(jnp.bitwise_and(rid, RS2 - 1) < 14,
                        jnp.maximum(ev, od), 0.0)                 # (n2, 128)

    # Stage the pooled map with a zero row above and below (conv2 H zero padding).
    e_ref[pl.ds(0, 8), :] = jnp.zeros((8, 128), f32)
    e_ref[pl.ds(n2, 8), :] = jnp.zeros((8, 128), f32)
    e_ref[pl.ds(1, n2), :] = pooled1

    # ---- conv2 5x5 pad1 (8->16): 5 banded matmuls -------------------------------
    acc2_ref[...] = jnp.dot(e_ref[pl.ds(0, n2), :], w2b_ref[0],
                            preferred_element_type=f32)
    for kh in range(1, 5):
        acc2_ref[...] += jnp.dot(e_ref[pl.ds(kh, n2), :], w2b_ref[kh],
                                 preferred_element_type=f32)
    h2 = jnp.maximum(acc2_ref[...] + b2_ref[...], 0.0)            # (n2, 192)

    # ---- maxpool 2x2 ------------------------------------------------------------
    m2 = jnp.maximum(h2[:, 0:176], h2[:, 16:192])                 # (n2, 176)
    p2 = jnp.dot(m2, sw2_ref[...], preferred_element_type=f32)    # (n2, 96)
    r2_ref[pl.ds(n2, 16), :] = jnp.zeros((16, 96), f32)           # zero guard rows
    r2_ref[pl.ds(0, n2), :] = p2
    rmax = jnp.maximum(r2_ref[pl.ds(0, n2), :], r2_ref[pl.ds(1, n2), :])
    r2_ref[pl.ds(0, n2), :] = rmax                                # max over H pairs

    # ---- fc1 576->10 as ONE matmul: rebuild the NCHW-flattened feature vector in
    #      lanes (row RS2*b carries image b), hit the MXU once, then pick out the
    #      logit rows with a stride-16 read ---------------------------------------
    feat = jnp.concatenate([r2_ref[pl.ds(2 * j, n2), :] for j in range(6)],
                           axis=1)                                # (n2, 576)
    so_ref[...] = jnp.dot(feat, wfc_ref[...], preferred_element_type=f32)
    o_ref[...] = so_ref[pl.ds(0, tb, RS2), :] + bfc_ref[...]


# ---------------------------------------------------------------------------
# Host-side one-time weight packing (pure layout plumbing, tiny arrays).
# ---------------------------------------------------------------------------
def pack_params(params):
    f32 = jnp.float32
    w1, b1 = params["w1"].astype(f32), params["b1"].astype(f32)     # (3,3,1,8),(8,)
    w2, b2 = params["w2"].astype(f32), params["b2"].astype(f32)     # (5,5,8,16),(16,)
    wfc, bfc = params["wfc"].astype(f32), params["bfc"].astype(f32)  # (576,10),(10,)

    # conv1 banded taps: w1b[kh, xin, w*8+co] = w1[kh, xin-w, 0, co] if 0<=xin-w<3
    wout = jnp.arange(28)
    xin = jnp.arange(30)
    kw = xin[:, None] - wout[None, :]                                # (30, 28)
    valid = (kw >= 0) & (kw < 3)
    w1g = w1[:, :, 0, :][:, jnp.clip(kw, 0, 2), :]                   # (3, 30, 28, 8)
    w1b = jnp.where(valid[None, :, :, None], w1g, 0.0).reshape(3, 30, 224)
    b1r = jnp.tile(b1, 28).reshape(1, 224)                           # lane = w*8+co

    # pool1 W-downsample + conv2 W zero pad: 216 -> 128 lanes, out lane = (j+1)*8+c
    j1, c1 = jnp.arange(14), jnp.arange(8)
    rows = (2 * j1[:, None] * 8 + c1[None, :]).reshape(-1)
    cols = ((j1[:, None] + 1) * 8 + c1[None, :]).reshape(-1)
    sw1 = jnp.zeros((216, 128), f32).at[rows, cols].set(1.0)

    # conv2 banded taps: w2b[kh, xpos*8+ci, w*16+co] = w2[kh, xpos-w, ci, co]
    wo2 = jnp.arange(12)
    xp2 = jnp.arange(16)
    kw2 = xp2[:, None] - wo2[None, :]                                # (16, 12)
    valid2 = (kw2 >= 0) & (kw2 < 5)
    w2g = w2[:, jnp.clip(kw2, 0, 4), :, :]                           # (5,16,12,8,16)
    w2b = jnp.where(valid2[None, :, :, None, None], w2g, 0.0)
    w2b = jnp.transpose(w2b, (0, 1, 3, 2, 4)).reshape(5, 128, 192)
    b2r = jnp.tile(b2, 12).reshape(1, 192)                           # lane = w*16+co

    # pool2 W-downsample: 176 -> 96 lanes, out lane = j*16+c
    j2, c2 = jnp.arange(6), jnp.arange(16)
    rows2 = (2 * j2[:, None] * 16 + c2[None, :]).reshape(-1)
    cols2 = (j2[:, None] * 16 + c2[None, :]).reshape(-1)
    sw2 = jnp.zeros((176, 96), f32).at[rows2, cols2].set(1.0)

    # fc: feat lane = h*96 + w*16 + c ; PyTorch flat index = c*36 + h*6 + w
    wfc_stack = jnp.transpose(wfc.reshape(16, 6, 6, 10), (1, 2, 0, 3)).reshape(576, 10)
    bfc2 = bfc.reshape(1, 10)

    return (w1b, b1r, sw1, w2b, b2r, sw2, wfc_stack, bfc2)


# ---------------------------------------------------------------------------
# Forward pass
# ---------------------------------------------------------------------------
def cnn_forward(params, x_nchw, tb=8):
    B, C, H, W = x_nchw.shape
    assert (C, H, W) == (1, 28, 28), "fc1 expects 16*6*6 = 576 features => 28x28 input"
    packed = pack_params(params)

    num_blocks = (B + tb - 1) // tb
    bp = num_blocks * tb
    x = x_nchw.reshape(B, 28, 28).astype(jnp.float32)
    if bp != B:
        x = jnp.pad(x, ((0, bp - B), (0, 0), (0, 0)))
    # conv1 zero padding (1 px) + 2 zero guard rows per image, then stack all
    # images along the sublane axis: image b owns rows [32b, 32b+32).
    x2d = jnp.pad(x, ((0, 0), (1, 3), (1, 1))).reshape(bp * RS1, 30)

    n1, n2 = tb * RS1, tb * RS2
    flops_blk = 2 * (3 * n1 * 30 * 224 + n1 * 216 * 128
                     + 5 * n2 * 128 * 192 + n2 * 176 * 96 + n2 * 576 * 10)
    bytes_acc = 4 * (x2d.size + sum(a.size for a in packed) + bp * 10)

    def const_spec(arr):
        nd = arr.ndim
        # grid-invariant weights: single-buffered, fetched once.
        return pl.BlockSpec(arr.shape, lambda gi: (0,) * nd,
                            pipeline_mode=pl.Buffered(1))

    out = pl.pallas_call(
        _fused_cnn_kernel,
        out_shape=jax.ShapeDtypeStruct((bp, 10), jnp.float32),
        grid=(num_blocks,),
        in_specs=[pl.BlockSpec((n1, 30), lambda gi: (gi, 0))]
                 + [const_spec(a) for a in packed],
        out_specs=pl.BlockSpec((tb, 10), lambda gi: (gi, 0)),
        scratch_shapes=[
            pltpu.VMEM((n1 + 8, 30), jnp.float32),    # staged input + guard rows
            pltpu.VMEM((n1, 224), jnp.float32),       # conv1 accumulator
            pltpu.VMEM((n1, 128), jnp.float32),       # pool1-W output (strided-read src)
            pltpu.VMEM((n2 + 8, 128), jnp.float32),   # pooled map + conv2 H pad rows
            pltpu.VMEM((n2, 192), jnp.float32),       # conv2 accumulator
            pltpu.VMEM((n2 + 16, 96), jnp.float32),   # pool2 adjacent-H max staging
            pltpu.VMEM((n2, 10), jnp.float32),        # logits staging (row 16b = image b)
        ],
        compiler_params=pltpu.CompilerParams(dimension_semantics=("parallel",)),
        cost_estimate=pl.CostEstimate(flops=num_blocks * flops_blk,
                                      transcendentals=0,
                                      bytes_accessed=bytes_acc),
    )(x2d, *packed)
    return out[:B]
    # TODO(synk): optional bf16 cast of activations/taps for a further MXU/DMA win on
    # v6e/v7x (kept f32 here to preserve exact-reference tolerance).


def init_params(key):
    k1, k2, k3, k4, k5, k6 = jax.random.split(key, 6)
    return {
        # conv1: PyTorch (8,1,3,3) stored as (KH,KW,Cin,Cout)
        "w1": jax.random.normal(k1, (3, 3, 1, 8), jnp.float32) * 0.1,
        "b1": jax.random.normal(k2, (8,), jnp.float32) * 0.1,
        # conv2: PyTorch (16,8,5,5) stored as (KH,KW,Cin,Cout)
        "w2": jax.random.normal(k3, (5, 5, 8, 16), jnp.float32) * 0.05,
        "b2": jax.random.normal(k4, (16,), jnp.float32) * 0.05,
        # fc1:  PyTorch weight (10,576); stored transposed (576,10)
        "wfc": jax.random.normal(k5, (16 * 6 * 6, 10), jnp.float32) * 0.05,
        "bfc": jax.random.normal(k6, (10,), jnp.float32) * 0.05,
    }


# Pure-JAX reference (XLA conv / reduce_window) used as a sanity check.
def reference_forward(params, x_nchw):
    w1 = jnp.transpose(params["w1"], (3, 2, 0, 1))   # OIHW
    out = jax.lax.conv_general_dilated(
        x_nchw, w1, (1, 1), [(1, 1), (1, 1)],
        dimension_numbers=("NCHW", "OIHW", "NCHW"))
    out = jax.nn.relu(out + params["b1"].reshape(1, -1, 1, 1))
    out = jax.lax.reduce_window(out, -jnp.inf, jax.lax.max,
                                (1, 1, 2, 2), (1, 1, 2, 2), "VALID")
    w2 = jnp.transpose(params["w2"], (3, 2, 0, 1))
    out = jax.lax.conv_general_dilated(
        out, w2, (1, 1), [(1, 1), (1, 1)],
        dimension_numbers=("NCHW", "OIHW", "NCHW"))
    out = jax.nn.relu(out + params["b2"].reshape(1, -1, 1, 1))
    out = jax.lax.reduce_window(out, -jnp.inf, jax.lax.max,
                                (1, 1, 2, 2), (1, 1, 2, 2), "VALID")
    flat = out.reshape(out.shape[0], -1)
    return flat @ params["wfc"] + params["bfc"]


if __name__ == "__main__":
    key = jax.random.PRNGKey(0)
    pkey, xkey = jax.random.split(key)
    params = init_params(pkey)
    # 28x28 input (required by fc1: 16*6*6 = 576); 16 images -> 2 grid steps of 8.
    x = jax.random.normal(xkey, (16, 1, 28, 28), jnp.float32)

    y = jax.jit(cnn_forward)(params, x)
    y = jax.block_until_ready(y)

    y_ref = reference_forward(params, x)
    assert y.shape == (16, 10)
    err = float(jnp.max(jnp.abs(y - y_ref)))
    assert jnp.allclose(y, y_ref, atol=2e-2, rtol=2e-2), err
    print("KERNEL_OK")
</pallas_src>

<mosaic_0001>
module attributes {stable_mosaic.version = 11 : i64} {
  func.func @_fused_cnn_kernel(%arg0: i32, %arg1: memref<256x30xf32, #tpu.memory_space<vmem>>, %arg2: memref<3x30x224xf32, #tpu.memory_space<vmem>>, %arg3: memref<1x224xf32, #tpu.memory_space<vmem>>, %arg4: memref<216x128xf32, #tpu.memory_space<vmem>>, %arg5: memref<5x128x192xf32, #tpu.memory_space<vmem>>, %arg6: memref<1x192xf32, #tpu.memory_space<vmem>>, %arg7: memref<176x96xf32, #tpu.memory_space<vmem>>, %arg8: memref<576x10xf32, #tpu.memory_space<vmem>>, %arg9: memref<1x10xf32, #tpu.memory_space<vmem>>, %arg10: memref<8x10xf32, #tpu.memory_space<vmem>>, %arg11: memref<264x30xf32, #tpu.memory_space<vmem>>, %arg12: memref<256x224xf32, #tpu.memory_space<vmem>>, %arg13: memref<256x128xf32, #tpu.memory_space<vmem>>, %arg14: memref<136x128xf32, #tpu.memory_space<vmem>>, %arg15: memref<128x192xf32, #tpu.memory_space<vmem>>, %arg16: memref<144x96xf32, #tpu.memory_space<vmem>>, %arg17: memref<128x10xf32, #tpu.memory_space<vmem>>) attributes {dimension_semantics = [#tpu.dimension_semantics<parallel>], iteration_bounds = array<i64: 2>, scalar_prefetch = 0 : i64, scratch_operands = 7 : i64, tpu.core_type = #tpu.core_type<tc>, window_params = [{transform_indices = @transform_0, window_bounds = array<i64: 256, 30>}, {pipeline_mode = #tpu.pipeline_mode<synchronous>, transform_indices = @transform_1, window_bounds = array<i64: 3, 30, 224>}, {pipeline_mode = #tpu.pipeline_mode<synchronous>, transform_indices = @transform_2, window_bounds = array<i64: 1, 224>}, {pipeline_mode = #tpu.pipeline_mode<synchronous>, transform_indices = @transform_3, window_bounds = array<i64: 216, 128>}, {pipeline_mode = #tpu.pipeline_mode<synchronous>, transform_indices = @transform_4, window_bounds = array<i64: 5, 128, 192>}, {pipeline_mode = #tpu.pipeline_mode<synchronous>, transform_indices = @transform_5, window_bounds = array<i64: 1, 192>}, {pipeline_mode = #tpu.pipeline_mode<synchronous>, transform_indices = @transform_6, window_bounds = array<i64: 176, 96>}, {pipeline_mode = #tpu.pipeline_mode<synchronous>, transform_indices = @transform_7, window_bounds = array<i64: 576, 10>}, {pipeline_mode = #tpu.pipeline_mode<synchronous>, transform_indices = @transform_8, window_bounds = array<i64: 1, 10>}, {transform_indices = @transform_9, window_bounds = array<i64: 8, 10>}]} {
    %c0 = arith.constant 0 : index
    %c0_0 = arith.constant 0 : index
    %0 = vector.load %arg1[%c0, %c0_0] : memref<256x30xf32, #tpu.memory_space<vmem>>, vector<256x30xf32>
    %c0_1 = arith.constant 0 : index
    %c0_2 = arith.constant 0 : index
    %1 = vector.load %arg11[%c0_1, %c0_2] : memref<264x30xf32, #tpu.memory_space<vmem>>, vector<256x30xf32>
    tpu.vector_store %arg11[%c0_1, %c0_2], %0 {strides = array<i32>} : memref<264x30xf32, #tpu.memory_space<vmem>>, vector<256x30xf32>,
    %cst = arith.constant 0.000000e+00 : f32
    %2 = vector.broadcast %cst : f32 to vector<8x30xf32>
    %c256 = arith.constant 256 : index
    %c0_3 = arith.constant 0 : index
    %3 = vector.load %arg11[%c256, %c0_3] : memref<264x30xf32, #tpu.memory_space<vmem>>, vector<8x30xf32>
    tpu.vector_store %arg11[%c256, %c0_3], %2 {strides = array<i32>} : memref<264x30xf32, #tpu.memory_space<vmem>>, vector<8x30xf32>,
    %c0_4 = arith.constant 0 : index
    %c0_5 = arith.constant 0 : index
    %4 = vector.load %arg11[%c0_4, %c0_5] : memref<264x30xf32, #tpu.memory_space<vmem>>, vector<256x30xf32>
    %c0_6 = arith.constant 0 : index
    %c0_7 = arith.constant 0 : index
    %c0_8 = arith.constant 0 : index
    %5 = vector.load %arg2[%c0_6, %c0_7, %c0_8] : memref<3x30x224xf32, #tpu.memory_space<vmem>>, vector<1x30x224xf32>
    %6 = vector.shape_cast %5 : vector<1x30x224xf32> to vector<30x224xf32>
    %cst_9 = arith.constant dense<0.000000e+00> : vector<256x224xf32>
    %7 = tpu.matmul %4, %6, %cst_9 {dimension_numbers = #tpu.dot_dimension_numbers<[1], [0], [0], [1], [0, 0, 1, 1], [], []>} : vector<256x30xf32>, vector<30x224xf32>, vector<256x224xf32> -> vector<256x224xf32>
    %c0_10 = arith.constant 0 : index
    %c0_11 = arith.constant 0 : index
    %8 = vector.load %arg12[%c0_10, %c0_11] : memref<256x224xf32, #tpu.memory_space<vmem>>, vector<256x224xf32>
    tpu.vector_store %arg12[%c0_10, %c0_11], %7 {strides = array<i32>} : memref<256x224xf32, #tpu.memory_space<vmem>>, vector<256x224xf32>,
    %c0_12 = arith.constant 0 : index
    %c0_13 = arith.constant 0 : index
    %9 = vector.load %arg12[%c0_12, %c0_13] : memref<256x224xf32, #tpu.memory_space<vmem>>, vector<256x224xf32>
    %c1 = arith.constant 1 : index
    %c0_14 = arith.constant 0 : index
    %10 = vector.load %arg11[%c1, %c0_14] : memref<264x30xf32, #tpu.memory_space<vmem>>, vector<256x30xf32>
    %c1_15 = arith.constant 1 : index
    %c0_16 = arith.constant 0 : index
    %c0_17 = arith.constant 0 : index
    %11 = vector.load %arg2[%c1_15, %c0_16, %c0_17] : memref<3x30x224xf32, #tpu.memory_space<vmem>>, vector<1x30x224xf32>
    %12 = vector.shape_cast %11 : vector<1x30x224xf32> to vector<30x224xf32>
    %cst_18 = arith.constant dense<0.000000e+00> : vector<256x224xf32>
    %13 = tpu.matmul %10, %12, %cst_18 {dimension_numbers = #tpu.dot_dimension_numbers<[1], [0], [0], [1], [0, 0, 1, 1], [], []>} : vector<256x30xf32>, vector<30x224xf32>, vector<256x224xf32> -> vector<256x224xf32>
    %14 = arith.addf %9, %13 : vector<256x224xf32>
    %c0_19 = arith.constant 0 : index
    %c0_20 = arith.constant 0 : index
    %15 = vector.load %arg12[%c0_19, %c0_20] : memref<256x224xf32, #tpu.memory_space<vmem>>, vector<256x224xf32>
    tpu.vector_store %arg12[%c0_19, %c0_20], %14 {strides = array<i32>} : memref<256x224xf32, #tpu.memory_space<vmem>>, vector<256x224xf32>,
    %c0_21 = arith.constant 0 : index
    %c0_22 = arith.constant 0 : index
    %16 = vector.load %arg12[%c0_21, %c0_22] : memref<256x224xf32, #tpu.memory_space<vmem>>, vector<256x224xf32>
    %c2 = arith.constant 2 : index
    %c0_23 = arith.constant 0 : index
    %17 = vector.load %arg11[%c2, %c0_23] : memref<264x30xf32, #tpu.memory_space<vmem>>, vector<256x30xf32>
    %c2_24 = arith.constant 2 : index
    %c0_25 = arith.constant 0 : index
    %c0_26 = arith.constant 0 : index
    %18 = vector.load %arg2[%c2_24, %c0_25, %c0_26] : memref<3x30x224xf32, #tpu.memory_space<vmem>>, vector<1x30x224xf32>
    %19 = vector.shape_cast %18 : vector<1x30x224xf32> to vector<30x224xf32>
    %cst_27 = arith.constant dense<0.000000e+00> : vector<256x224xf32>
    %20 = tpu.matmul %17, %19, %cst_27 {dimension_numbers = #tpu.dot_dimension_numbers<[1], [0], [0], [1], [0, 0, 1, 1], [], []>} : vector<256x30xf32>, vector<30x224xf32>, vector<256x224xf32> -> vector<256x224xf32>
    %21 = arith.addf %16, %20 : vector<256x224xf32>
    %c0_28 = arith.constant 0 : index
    %c0_29 = arith.constant 0 : index
    %22 = vector.load %arg12[%c0_28, %c0_29] : memref<256x224xf32, #tpu.memory_space<vmem>>, vector<256x224xf32>
    tpu.vector_store %arg12[%c0_28, %c0_29], %21 {strides = array<i32>} : memref<256x224xf32, #tpu.memory_space<vmem>>, vector<256x224xf32>,
    %c0_30 = arith.constant 0 : index
    %c0_31 = arith.constant 0 : index
    %23 = vector.load %arg12[%c0_30, %c0_31] : memref<256x224xf32, #tpu.memory_space<vmem>>, vector<256x224xf32>
    %c0_32 = arith.constant 0 : index
    %c0_33 = arith.constant 0 : index
    %24 = vector.load %arg3[%c0_32, %c0_33] : memref<1x224xf32, #tpu.memory_space<vmem>>, vector<1x224xf32>
    %25 = vector.broadcast %24 : vector<1x224xf32> to vector<256x224xf32>
    %26 = arith.addf %23, %25 : vector<256x224xf32>
    %cst_34 = arith.constant 0.000000e+00 : f32
    %27 = vector.broadcast %cst_34 : f32 to vector<256x224xf32>
    %28 = arith.maximumf %26, %27 : vector<256x224xf32>
    %29 = vector.extract_strided_slice %28 {offsets = [0, 0], sizes = [256, 216], strides = [1, 1]} : vector<256x224xf32> to vector<256x216xf32>
    %30 = vector.extract_strided_slice %28 {offsets = [0, 8], sizes = [256, 216], strides = [1, 1]} : vector<256x224xf32> to vector<256x216xf32>
    %31 = arith.maximumf %29, %30 : vector<256x216xf32>
    %c0_35 = arith.constant 0 : index
    %c0_36 = arith.constant 0 : index
    %32 = vector.load %arg4[%c0_35, %c0_36] : memref<216x128xf32, #tpu.memory_space<vmem>>, vector<216x128xf32>
    %cst_37 = arith.constant dense<0.000000e+00> : vector<256x128xf32>
    %33 = tpu.matmul %31, %32, %cst_37 {dimension_numbers = #tpu.dot_dimension_numbers<[1], [0], [0], [1], [0, 0, 1, 1], [], []>} : vector<256x216xf32>, vector<216x128xf32>, vector<256x128xf32> -> vector<256x128xf32>
    %c0_38 = arith.constant 0 : index
    %c0_39 = arith.constant 0 : index
    %34 = vector.load %arg13[%c0_38, %c0_39] : memref<256x128xf32, #tpu.memory_space<vmem>>, vector<256x128xf32>
    tpu.vector_store %arg13[%c0_38, %c0_39], %33 {strides = array<i32>} : memref<256x128xf32, #tpu.memory_space<vmem>>, vector<256x128xf32>,
    %c0_40 = arith.constant 0 : index
    %c0_41 = arith.constant 0 : index
    %35 = tpu.strided_load %arg13[%c0_40, %c0_41] {strides = array<i32: 2, 1>} : memref<256x128xf32, #tpu.memory_space<vmem>>, vector<128x128xf32>
    %c1_42 = arith.constant 1 : index
    %c0_43 = arith.constant 0 : index
    %36 = tpu.strided_load %arg13[%c1_42, %c0_43] {strides = array<i32: 2, 1>} : memref<256x128xf32, #tpu.memory_space<vmem>>, vector<128x128xf32>
    %37 = tpu.iota {dimensions = array<i32: 0>} : vector<128x128xi32>
    %c15_i32 = arith.constant 15 : i32
    %38 = vector.broadcast %c15_i32 : i32 to vector<128x128xi32>
    %39 = arith.andi %37, %38 : vector<128x128xi32>
    %c14_i32 = arith.constant 14 : i32
    %40 = vector.broadcast %c14_i32 : i32 to vector<128x128xi32>
    %41 = arith.cmpi slt, %39, %40 : vector<128x128xi32>
    %42 = arith.maximumf %35, %36 : vector<128x128xf32>
    %cst_44 = arith.constant 0.000000e+00 : f32
    %43 = vector.broadcast %cst_44 : f32 to vector<128x128xf32>
    %44 = arith.select %41, %42, %43 : vector<128x128xi1>, vector<128x128xf32>
    %cst_45 = arith.constant 0.000000e+00 : f32
    %45 = vector.broadcast %cst_45 : f32 to vector<8x128xf32>
    %c0_46 = arith.constant 0 : index
    %c0_47 = arith.constant 0 : index
    %46 = vector.load %arg14[%c0_46, %c0_47] : memref<136x128xf32, #tpu.memory_space<vmem>>, vector<8x128xf32>
    tpu.vector_store %arg14[%c0_46, %c0_47], %45 {strides = array<i32>} : memref<136x128xf32, #tpu.memory_space<vmem>>, vector<8x128xf32>,
    %cst_48 = arith.constant 0.000000e+00 : f32
    %47 = vector.broadcast %cst_48 : f32 to vector<8x128xf32>
    %c128 = arith.constant 128 : index
    %c0_49 = arith.constant 0 : index
    %48 = vector.load %arg14[%c128, %c0_49] : memref<136x128xf32, #tpu.memory_space<vmem>>, vector<8x128xf32>
    tpu.vector_store %arg14[%c128, %c0_49], %47 {strides = array<i32>} : memref<136x128xf32, #tpu.memory_space<vmem>>, vector<8x128xf32>,
    %c1_50 = arith.constant 1 : index
    %c0_51 = arith.constant 0 : index
    %49 = vector.load %arg14[%c1_50, %c0_51] : memref<136x128xf32, #tpu.memory_space<vmem>>, vector<128x128xf32>
    tpu.vector_store %arg14[%c1_50, %c0_51], %44 {strides = array<i32>} : memref<136x128xf32, #tpu.memory_space<vmem>>, vector<128x128xf32>,
    %c0_52 = arith.constant 0 : index
    %c0_53 = arith.constant 0 : index
    %50 = vector.load %arg14[%c0_52, %c0_53] : memref<136x128xf32, #tpu.memory_space<vmem>>, vector<128x128xf32>
    %c0_54 = arith.constant 0 : index
    %c0_55 = arith.constant 0 : index
    %c0_56 = arith.constant 0 : index
    %51 = vector.load %arg5[%c0_54, %c0_55, %c0_56] : memref<5x128x192xf32, #tpu.memory_space<vmem>>, vector<1x128x192xf32>
    %52 = vector.shape_cast %51 : vector<1x128x192xf32> to vector<128x192xf32>
    %cst_57 = arith.constant dense<0.000000e+00> : vector<128x192xf32>
    %53 = tpu.matmul %50, %52, %cst_57 {dimension_numbers = #tpu.dot_dimension_numbers<[1], [0], [0], [1], [0, 0, 1, 1], [], []>} : vector<128x128xf32>, vector<128x192xf32>, vector<128x192xf32> -> vector<128x192xf32>
    %c0_58 = arith.constant 0 : index
    %c0_59 = arith.constant 0 : index
    %54 = vector.load %arg15[%c0_58, %c0_59] : memref<128x192xf32, #tpu.memory_space<vmem>>, vector<128x192xf32>
    tpu.vector_store %arg15[%c0_58, %c0_59], %53 {strides = array<i32>} : memref<128x192xf32, #tpu.memory_space<vmem>>, vector<128x192xf32>,
    %c0_60 = arith.constant 0 : index
    %c0_61 = arith.constant 0 : index
    %55 = vector.load %arg15[%c0_60, %c0_61] : memref<128x192xf32, #tpu.memory_space<vmem>>, vector<128x192xf32>
    %c1_62 = arith.constant 1 : index
    %c0_63 = arith.constant 0 : index
    %56 = vector.load %arg14[%c1_62, %c0_63] : memref<136x128xf32, #tpu.memory_space<vmem>>, vector<128x128xf32>
    %c1_64 = arith.constant 1 : index
    %c0_65 = arith.constant 0 : index
    %c0_66 = arith.constant 0 : index
    %57 = vector.load %arg5[%c1_64, %c0_65, %c0_66] : memref<5x128x192xf32, #tpu.memory_space<vmem>>, vector<1x128x192xf32>
    %58 = vector.shape_cast %57 : vector<1x128x192xf32> to vector<128x192xf32>
    %cst_67 = arith.constant dense<0.000000e+00> : vector<128x192xf32>
    %59 = tpu.matmul %56, %58, %cst_67 {dimension_numbers = #tpu.dot_dimension_numbers<[1], [0], [0], [1], [0, 0, 1, 1], [], []>} : vector<128x128xf32>, vector<128x192xf32>, vector<128x192xf32> -> vector<128x192xf32>
    %60 = arith.addf %55, %59 : vector<128x192xf32>
    %c0_68 = arith.constant 0 : index
    %c0_69 = arith.constant 0 : index
    %61 = vector.load %arg15[%c0_68, %c0_69] : memref<128x192xf32, #tpu.memory_space<vmem>>, vector<128x192xf32>
    tpu.vector_store %arg15[%c0_68, %c0_69], %60 {strides = array<i32>} : memref<128x192xf32, #tpu.memory_space<vmem>>, vector<128x192xf32>,
    %c0_70 = arith.constant 0 : index
    %c0_71 = arith.constant 0 : index
    %62 = vector.load %arg15[%c0_70, %c0_71] : memref<128x192xf32, #tpu.memory_space<vmem>>, vector<128x192xf32>
    %c2_72 = arith.constant 2 : index
    %c0_73 = arith.constant 0 : index
    %63 = vector.load %arg14[%c2_72, %c0_73] : memref<136x128xf32, #tpu.memory_space<vmem>>, vector<128x128xf32>
    %c2_74 = arith.constant 2 : index
    %c0_75 = arith.constant 0 : index
    %c0_76 = arith.constant 0 : index
    %64 = vector.load %arg5[%c2_74, %c0_75, %c0_76] : memref<5x128x192xf32, #tpu.memory_space<vmem>>, vector<1x128x192xf32>
    %65 = vector.shape_cast %64 : vector<1x128x192xf32> to vector<128x192xf32>
    %cst_77 = arith.constant dense<0.000000e+00> : vector<128x192xf32>
    %66 = tpu.matmul %63, %65, %cst_77 {dimension_numbers = #tpu.dot_dimension_numbers<[1], [0], [0], [1], [0, 0, 1, 1], [], []>} : vector<128x128xf32>, vector<128x192xf32>, vector<128x192xf32> -> vector<128x192xf32>
    %67 = arith.addf %62, %66 : vector<128x192xf32>
    %c0_78 = arith.constant 0 : index
    %c0_79 = arith.constant 0 : index
    %68 = vector.load %arg15[%c0_78, %c0_79] : memref<128x192xf32, #tpu.memory_space<vmem>>, vector<128x192xf32>
    tpu.vector_store %arg15[%c0_78, %c0_79], %67 {strides = array<i32>} : memref<128x192xf32, #tpu.memory_space<vmem>>, vector<128x192xf32>,
    %c0_80 = arith.constant 0 : index
    %c0_81 = arith.constant 0 : index
    %69 = vector.load %arg15[%c0_80, %c0_81] : memref<128x192xf32, #tpu.memory_space<vmem>>, vector<128x192xf32>
    %c3 = arith.constant 3 : index
    %c0_82 = arith.constant 0 : index
    %70 = vector.load %arg14[%c3, %c0_82] : memref<136x128xf32, #tpu.memory_space<vmem>>, vector<128x128xf32>
    %c3_83 = arith.constant 3 : index
    %c0_84 = arith.constant 0 : index
    %c0_85 = arith.constant 0 : index
    %71 = vector.load %arg5[%c3_83, %c0_84, %c0_85] : memref<5x128x192xf32, #tpu.memory_space<vmem>>, vector<1x128x192xf32>
    %72 = vector.shape_cast %71 : vector<1x128x192xf32> to vector<128x192xf32>
    %cst_86 = arith.constant dense<0.000000e+00> : vector<128x192xf32>
    %73 = tpu.matmul %70, %72, %cst_86 {dimension_numbers = #tpu.dot_dimension_numbers<[1], [0], [0], [1], [0, 0, 1, 1], [], []>} : vector<128x128xf32>, vector<128x192xf32>, vector<128x192xf32> -> vector<128x192xf32>
    %74 = arith.addf %69, %73 : vector<128x192xf32>
    %c0_87 = arith.constant 0 : index
    %c0_88 = arith.constant 0 : index
    %75 = vector.load %arg15[%c0_87, %c0_88] : memref<128x192xf32, #tpu.memory_space<vmem>>, vector<128x192xf32>
    tpu.vector_store %arg15[%c0_87, %c0_88], %74 {strides = array<i32>} : memref<128x192xf32, #tpu.memory_space<vmem>>, vector<128x192xf32>,
    %c0_89 = arith.constant 0 : index
    %c0_90 = arith.constant 0 : index
    %76 = vector.load %arg15[%c0_89, %c0_90] : memref<128x192xf32, #tpu.memory_space<vmem>>, vector<128x192xf32>
    %c4 = arith.constant 4 : index
    %c0_91 = arith.constant 0 : index
    %77 = vector.load %arg14[%c4, %c0_91] : memref<136x128xf32, #tpu.memory_space<vmem>>, vector<128x128xf32>
    %c4_92 = arith.constant 4 : index
    %c0_93 = arith.constant 0 : index
    %c0_94 = arith.constant 0 : index
    %78 = vector.load %arg5[%c4_92, %c0_93, %c0_94] : memref<5x128x192xf32, #tpu.memory_space<vmem>>, vector<1x128x192xf32>
    %79 = vector.shape_cast %78 : vector<1x128x192xf32> to vector<128x192xf32>
    %cst_95 = arith.constant dense<0.000000e+00> : vector<128x192xf32>
    %80 = tpu.matmul %77, %79, %cst_95 {dimension_numbers = #tpu.dot_dimension_numbers<[1], [0], [0], [1], [0, 0, 1, 1], [], []>} : vector<128x128xf32>, vector<128x192xf32>, vector<128x192xf32> -> vector<128x192xf32>
    %81 = arith.addf %76, %80 : vector<128x192xf32>
    %c0_96 = arith.constant 0 : index
    %c0_97 = arith.constant 0 : index
    %82 = vector.load %arg15[%c0_96, %c0_97] : memref<128x192xf32, #tpu.memory_space<vmem>>, vector<128x192xf32>
    tpu.vector_store %arg15[%c0_96, %c0_97], %81 {strides = array<i32>} : memref<128x192xf32, #tpu.memory_space<vmem>>, vector<128x192xf32>,
    %c0_98 = arith.constant 0 : index
    %c0_99 = arith.constant 0 : index
    %83 = vector.load %arg15[%c0_98, %c0_99] : memref<128x192xf32, #tpu.memory_space<vmem>>, vector<128x192xf32>
    %c0_100 = arith.constant 0 : index
    %c0_101 = arith.constant 0 : index
    %84 = vector.load %arg6[%c0_100, %c0_101] : memref<1x192xf32, #tpu.memory_space<vmem>>, vector<1x192xf32>
    %85 = vector.broadcast %84 : vector<1x192xf32> to vector<128x192xf32>
    %86 = arith.addf %83, %85 : vector<128x192xf32>
    %cst_102 = arith.constant 0.000000e+00 : f32
    %87 = vector.broadcast %cst_102 : f32 to vector<128x192xf32>
    %88 = arith.maximumf %86, %87 : vector<128x192xf32>
    %89 = vector.extract_strided_slice %88 {offsets = [0, 0], sizes = [128, 176], strides = [1, 1]} : vector<128x192xf32> to vector<128x176xf32>
    %90 = vector.extract_strided_slice %88 {offsets = [0, 16], sizes = [128, 176], strides = [1, 1]} : vector<128x192xf32> to vector<128x176xf32>
    %91 = arith.maximumf %89, %90 : vector<128x176xf32>
    %c0_103 = arith.constant 0 : index
    %c0_104 = arith.constant 0 : index
    %92 = vector.load %arg7[%c0_103, %c0_104] : memref<176x96xf32, #tpu.memory_space<vmem>>, vector<176x96xf32>
    %cst_105 = arith.constant dense<0.000000e+00> : vector<128x96xf32>
    %93 = tpu.matmul %91, %92, %cst_105 {dimension_numbers = #tpu.dot_dimension_numbers<[1], [0], [0], [1], [0, 0, 1, 1], [], []>} : vector<128x176xf32>, vector<176x96xf32>, vector<128x96xf32> -> vector<128x96xf32>
    %cst_106 = arith.constant 0.000000e+00 : f32
    %94 = vector.broadcast %cst_106 : f32 to vector<16x96xf32>
    %c128_107 = arith.constant 128 : index
    %c0_108 = arith.constant 0 : index
    %95 = vector.load %arg16[%c128_107, %c0_108] : memref<144x96xf32, #tpu.memory_space<vmem>>, vector<16x96xf32>
    tpu.vector_store %arg16[%c128_107, %c0_108], %94 {strides = array<i32>} : memref<144x96xf32, #tpu.memory_space<vmem>>, vector<16x96xf32>,
    %c0_109 = arith.constant 0 : index
    %c0_110 = arith.constant 0 : index
    %96 = vector.load %arg16[%c0_109, %c0_110] : memref<144x96xf32, #tpu.memory_space<vmem>>, vector<128x96xf32>
    tpu.vector_store %arg16[%c0_109, %c0_110], %93 {strides = array<i32>} : memref<144x96xf32, #tpu.memory_space<vmem>>, vector<128x96xf32>,
    %c0_111 = arith.constant 0 : index
    %c0_112 = arith.constant 0 : index
    %97 = vector.load %arg16[%c0_111, %c0_112] : memref<144x96xf32, #tpu.memory_space<vmem>>, vector<128x96xf32>
    %c1_113 = arith.constant 1 : index
    %c0_114 = arith.constant 0 : index
    %98 = vector.load %arg16[%c1_113, %c0_114] : memref<144x96xf32, #tpu.memory_space<vmem>>, vector<128x96xf32>
    %99 = arith.maximumf %97, %98 : vector<128x96xf32>
    %c0_115 = arith.constant 0 : index
    %c0_116 = arith.constant 0 : index
    %100 = vector.load %arg16[%c0_115, %c0_116] : memref<144x96xf32, #tpu.memory_space<vmem>>, vector<128x96xf32>
    tpu.vector_store %arg16[%c0_115, %c0_116], %99 {strides = array<i32>} : memref<144x96xf32, #tpu.memory_space<vmem>>, vector<128x96xf32>,
    %c0_117 = arith.constant 0 : index
    %c0_118 = arith.constant 0 : index
    %101 = vector.load %arg16[%c0_117, %c0_118] : memref<144x96xf32, #tpu.memory_space<vmem>>, vector<128x96xf32>
    %c2_119 = arith.constant 2 : index
    %c0_120 = arith.constant 0 : index
    %102 = vector.load %arg16[%c2_119, %c0_120] : memref<144x96xf32, #tpu.memory_space<vmem>>, vector<128x96xf32>
    %c4_121 = arith.constant 4 : index
    %c0_122 = arith.constant 0 : index
    %103 = vector.load %arg16[%c4_121, %c0_122] : memref<144x96xf32, #tpu.memory_space<vmem>>, vector<128x96xf32>
    %c6 = arith.constant 6 : index
    %c0_123 = arith.constant 0 : index
    %104 = vector.load %arg16[%c6, %c0_123] : memref<144x96xf32, #tpu.memory_space<vmem>>, vector<128x96xf32>
    %c8 = arith.constant 8 : index
    %c0_124 = arith.constant 0 : index
    %105 = vector.load %arg16[%c8, %c0_124] : memref<144x96xf32, #tpu.memory_space<vmem>>, vector<128x96xf32>
    %c10 = arith.constant 10 : index
    %c0_125 = arith.constant 0 : index
    %106 = vector.load %arg16[%c10, %c0_125] : memref<144x96xf32, #tpu.memory_space<vmem>>, vector<128x96xf32>
    %107 = tpu.concatenate %101, %102, %103, %104, %105, %106 in 1 : vector<128x96xf32>, vector<128x96xf32>, vector<128x96xf32>, vector<128x96xf32>, vector<128x96xf32>, vector<128x96xf32> -> vector<128x576xf32>
    %c0_126 = arith.constant 0 : index
    %c0_127 = arith.constant 0 : index
    %108 = vector.load %arg8[%c0_126, %c0_127] : memref<576x10xf32, #tpu.memory_space<vmem>>, vector<576x10xf32>
    %cst_128 = arith.constant dense<0.000000e+00> : vector<128x10xf32>
    %109 = tpu.matmul %107, %108, %cst_128 {dimension_numbers = #tpu.dot_dimension_numbers<[1], [0], [0], [1], [0, 0, 1, 1], [], []>} : vector<128x576xf32>, vector<576x10xf32>, vector<128x10xf32> -> vector<128x10xf32>
    %c0_129 = arith.constant 0 : index
    %c0_130 = arith.constant 0 : index
    %110 = vector.load %arg17[%c0_129, %c0_130] : memref<128x10xf32, #tpu.memory_space<vmem>>, vector<128x10xf32>
    tpu.vector_store %arg17[%c0_129, %c0_130], %109 {strides = array<i32>} : memref<128x10xf32, #tpu.memory_space<vmem>>, vector<128x10xf32>,
    %c0_131 = arith.constant 0 : index
    %c0_132 = arith.constant 0 : index
    %111 = tpu.strided_load %arg17[%c0_131, %c0_132] {strides = array<i32: 16, 1>} : memref<128x10xf32, #tpu.memory_space<vmem>>, vector<8x10xf32>
    %c0_133 = arith.constant 0 : index
    %c0_134 = arith.constant 0 : index
    %112 = vector.load %arg9[%c0_133, %c0_134] : memref<1x10xf32, #tpu.memory_space<vmem>>, vector<1x10xf32>
    %113 = vector.broadcast %112 : vector<1x10xf32> to vector<8x10xf32>
    %114 = arith.addf %111, %113 : vector<8x10xf32>
    %c0_135 = arith.constant 0 : index
    %c0_136 = arith.constant 0 : index
    %115 = vector.load %arg10[%c0_135, %c0_136] : memref<8x10xf32, #tpu.memory_space<vmem>>, vector<8x10xf32>
    tpu.vector_store %arg10[%c0_135, %c0_136], %114 {strides = array<i32>} : memref<8x10xf32, #tpu.memory_space<vmem>>, vector<8x10xf32>,
    return
  }
  func.func @transform_0(%arg0: i32) -> (i32, i32) {
    %c0_i32 = arith.constant 0 : i32
    %c0_i32_0 = arith.constant 0 : i32
    return %arg0, %c0_i32 : i32, i32
  }
  func.func @transform_1(%arg0: i32) -> (i32, i32, i32) {
    %c0_i32 = arith.constant 0 : i32
    %c0_i32_0 = arith.constant 0 : i32
    %c0_i32_1 = arith.constant 0 : i32
    %c0_i32_2 = arith.constant 0 : i32
    return %c0_i32, %c0_i32_0, %c0_i32_1 : i32, i32, i32
  }
  func.func @transform_2(%arg0: i32) -> (i32, i32) {
    %c0_i32 = arith.constant 0 : i32
    %c0_i32_0 = arith.constant 0 : i32
    %c0_i32_1 = arith.constant 0 : i32
    return %c0_i32, %c0_i32_0 : i32, i32
  }
  func.func @transform_3(%arg0: i32) -> (i32, i32) {
    %c0_i32 = arith.constant 0 : i32
    %c0_i32_0 = arith.constant 0 : i32
    %c0_i32_1 = arith.constant 0 : i32
    return %c0_i32, %c0_i32_0 : i32, i32
  }
  func.func @transform_4(%arg0: i32) -> (i32, i32, i32) {
    %c0_i32 = arith.constant 0 : i32
    %c0_i32_0 = arith.constant 0 : i32
    %c0_i32_1 = arith.constant 0 : i32
    %c0_i32_2 = arith.constant 0 : i32
    return %c0_i32, %c0_i32_0, %c0_i32_1 : i32, i32, i32
  }
  func.func @transform_5(%arg0: i32) -> (i32, i32) {
    %c0_i32 = arith.constant 0 : i32
    %c0_i32_0 = arith.constant 0 : i32
    %c0_i32_1 = arith.constant 0 : i32
    return %c0_i32, %c0_i32_0 : i32, i32
  }
  func.func @transform_6(%arg0: i32) -> (i32, i32) {
    %c0_i32 = arith.constant 0 : i32
    %c0_i32_0 = arith.constant 0 : i32
    %c0_i32_1 = arith.constant 0 : i32
    return %c0_i32, %c0_i32_0 : i32, i32
  }
  func.func @transform_7(%arg0: i32) -> (i32, i32) {
    %c0_i32 = arith.constant 0 : i32
    %c0_i32_0 = arith.constant 0 : i32
    %c0_i32_1 = arith.constant 0 : i32
    return %c0_i32, %c0_i32_0 : i32, i32
  }
  func.func @transform_8(%arg0: i32) -> (i32, i32) {
    %c0_i32 = arith.constant 0 : i32
    %c0_i32_0 = arith.constant 0 : i32
    %c0_i32_1 = arith.constant 0 : i32
    return %c0_i32, %c0_i32_0 : i32, i32
  }
  func.func @transform_9(%arg0: i32) -> (i32, i32) {
    %c0_i32 = arith.constant 0 : i32
    %c0_i32_0 = arith.constant 0 : i32
    return %arg0, %c0_i32 : i32, i32
  }
}

</mosaic_0001>

<bundles_post_ra>
// kernel: tile.13
= control target key start
LH: loop header
LB: loop body
LE: loop exit
PB: predicated region body
PF: predicated region fallthrough
CT: control target
= control target key end

     0   :  { %s40_s0 = inlined_call_operand.vmem [shape: f32[8], index: 0, kind: input, shape index: {}]   ;;  %s41_s1 = inlined_call_operand.vmem [shape: f32[28,8], index: 1, kind: output, shape index: {}]  }
   0x1   :  { %v4_v0 = vld [vmem:[%s40_s0] ss:$0 sm:$0xff] }
   0x2   :  { %5 = vst [vmem:[%s41_s1] sm:$0xff] %v4_v0  ;;  %12 = vst [vmem:[%s41_s1 + $0x8] sm:$0xff] %v4_v0 }
   0x3   :  { %13 = vst [vmem:[%s41_s1 + $0x10] sm:$0xff] %v4_v0  ;;  %14 = vst [vmem:[%s41_s1 + $0x18] sm:$0xff] %v4_v0 }

// kernel: tile.14
= control target key start
LH: loop header
LB: loop body
LE: loop exit
PB: predicated region body
PF: predicated region fallthrough
CT: control target
= control target key end

     0   :  { %s149_s10 = smov 120   ;;  %s150_s11 = smov 104   ;;  %vm4_vm0 = vcmask 64512   ;;  %vm10_vm1 = vcmask 1048512   ;;  %vm16_vm2 = vcmask 982912   ;;  %vm22_vm3 = vcmask 917312   ;;  %s228_s0 = inlined_call_operand.vmem [shape: f32[28,8], index: 0, kind: input, shape index: {}]   ;;  %s229_s1 = inlined_call_operand.vmem [shape: f32[1,224], index: 1, kind: output, shape index: {}]  }
   0x1   :  { %v118_v0 = vld [vmem:[%s228_s0 + $0xf] sm:$0x1]   ;;  %v120_v1 = vld [vmem:[%s228_s0 + $0xd] sm:$0x1]   ;;  %v119_v2 = vld [vmem:[%s228_s0 + $0xe] sm:$0x1]  }
   0x2   :  { %8 = vrot.lane.b32.xlu0 %v118_v0, %s149_s10  ;;  %20 = vrot.lane.b32.xlu1 %v120_v1, %s150_s11  ;;  %v121_v3 = vld [vmem:[%s228_s0 + $0xc] sm:$0x1]   ;;  %s31_s16 = smov 3  ;;  %s38_s17 = smov 3  ;;  %vm28_vm4 = vcmask 851712   ;;  %vm35_vm5 = vcmask 786112  }
   0x3   :  { %s151_s18 = smov 112   ;;  %s152_s19 = smov 96   ;;  %v122_v4 = vld [vmem:[%s228_s0 + $0xb] ss:$16 sm:%s31_s16]   ;;  %v123_v5 = vld [vmem:[%s228_s0 + $0xa] ss:$16 sm:%s38_s17]  }
   0x4   :  { %s45_s24 = smov 3  ;;  %s52_s25 = smov 3  ;;  %vm42_vm6 = vcmask 720512   ;;  %vm49_vm7 = vcmask 654912   ;;  %vm56_vm8 = vcmask 589312   ;;  %vm63_vm9 = vcmask 523712  }
   0x5   :  { %s153_s26 = smov 88   ;;  %s154_s27 = smov 80   ;;  %v124_v6 = vld [vmem:[%s228_s0 + $0x9] ss:$16 sm:%s45_s24]   ;;  %v125_v7 = vld [vmem:[%s228_s0 + $0x8] ss:$16 sm:%s52_s25]  }
   0x6   :  { %14 = vrot.lane.b32.xlu0 %v119_v2, %s151_s18  ;;  %26 = vrot.lane.b32.xlu1 %v121_v3, %s152_s19  ;;  %s59_s3 = smov 3  ;;  %s66_s4 = smov 3  ;;  %vm70_vm10 = vcmask 458112   ;;  %vm77_vm11 = vcmask 392512   ;;  %vm84_vm12 = vcmask 326912   ;;  %vm91_vm13 = vcmask 261312  }
   0x7   :  { %s155_s5 = smov 72   ;;  %s156_s6 = smov 64   ;;  %v126_v8 = vld [vmem:[%s228_s0 + $0x7] ss:$16 sm:%s59_s3]   ;;  %v127_v9 = vld [vmem:[%s228_s0 + $0x6] ss:$16 sm:%s66_s4]  }
   0x8   :  { %s2_s9 = smov 3  ;;  %s73_s14 = smov 3  ;;  %vm98_vm14 = vcmask 195712   ;;  %vm105_vm15 = vcmask 130112  }
   0x9   :  { %v3_v10 = vld [vmem:[%s228_s0] ss:$16 sm:%s2_s9]   ;;  %s80_s15 = smov 3  ;;  %s157_s16 = smov 56   ;;  %v128_v11 = vld [vmem:[%s228_s0 + $0x5] ss:$16 sm:%s73_s14]  }
   0xa   :  { %33 = vrot.lane.b32.xlu0 %v122_v4, %s153_s26  ;;  %40 = vrot.lane.b32.xlu1 %v123_v5, %s154_s27  ;;  %5 = vst.msk [vmem:[#allocation0] ss:$8 sm:$0x3] %vm4_vm0, %v3_v10   ;;  %s158_s17 = smov 48   ;;  %v129_v12 = vld [vmem:[%s228_s0 + $0x4] ss:$16 sm:%s80_s15]  }
   0xb   :  { %s87_s22 = smov 3  ;;  %s94_s23 = smov 3 }
   0xc   :  { %s159_s24 = smov 40   ;;  %s160_s25 = smov 32   ;;  %v130_v13 = vld [vmem:[%s228_s0 + $0x3] ss:$16 sm:%s87_s22]   ;;  %v131_v14 = vld [vmem:[%s228_s0 + $0x2] ss:$16 sm:%s94_s23]  }
   0xd   :  { %s101_s30 = smov 3  ;;  %s161_s2 = smov 24  }
   0xe   :  { %47 = vrot.lane.b32.xlu0 %v124_v6, %s155_s5  ;;  %54 = vrot.lane.b32.xlu1 %v125_v7, %s156_s6  ;;  %s162_s3 = smov 16   ;;  %v132_v15 = vld [vmem:[%s228_s0 + $0x1] ss:$16 sm:%s101_s30]   ;;  %s163_s0 = smov 8  }
  0x12   :  { %61 = vrot.lane.b32.xlu0 %v126_v8, %s157_s16  ;;  %68 = vrot.lane.b32.xlu1 %v127_v9, %s158_s17 }
  0x16   :  { %75 = vrot.lane.b32.xlu0 %v128_v11, %s159_s24  ;;  %82 = vrot.lane.b32.xlu1 %v129_v12, %s160_s25 }
  0x1a   :  { %89 = vrot.lane.b32.xlu0 %v130_v13, %s161_s2  ;;  %96 = vrot.lane.b32.xlu1 %v131_v14, %s162_s3 }
  0x1e   :  { %103 = vrot.lane.b32.xlu0 %v132_v15, %s163_s0 }
  0x74   :  { %v9_v16 = vpop.permute.xlu0 %8   ;;  %v21_v17 = vpop.permute.xlu1 %20  }
  0x75   :  { %11 = vst.msk [vmem:[#allocation0] sm:$0x1] %vm10_vm1, %v9_v16  }
  0x78   :  { %v15_v18 = vpop.permute.xlu0 %14   ;;  %v27_v19 = vpop.permute.xlu1 %26  }
  0x79   :  { %17 = vst.msk [vmem:[#allocation0] sm:$0x1] %vm16_vm2, %v15_v18  }
  0x7a   :  { %23 = vst.msk [vmem:[#allocation0] sm:$0x1] %vm22_vm3, %v21_v17  }
  0x7b   :  { %29 = vst.msk [vmem:[#allocation0] sm:$0x1] %vm28_vm4, %v27_v19  }
  0x7c   :  { %v34_v20 = vpop.permute.xlu0 %33   ;;  %v41_v21 = vpop.permute.xlu1 %40  }
  0x7d   :  { %36 = vst.msk [vmem:[#allocation0] ss:$8 sm:$0x3] %vm35_vm5, %v34_v20  }
  0x7e   :  { %43 = vst.msk [vmem:[#allocation0] ss:$8 sm:$0x3] %vm42_vm6, %v41_v21  }
  0x80   :  { %v48_v22 = vpop.permute.xlu0 %47   ;;  %v55_v23 = vpop.permute.xlu1 %54  }
  0x81   :  { %50 = vst.msk [vmem:[#allocation0] ss:$8 sm:$0x3] %vm49_vm7, %v48_v22  }
  0x82   :  { %57 = vst.msk [vmem:[#allocation0] ss:$8 sm:$0x3] %vm56_vm8, %v55_v23  }
  0x84   :  { %v62_v24 = vpop.permute.xlu0 %61   ;;  %v69_v25 = vpop.permute.xlu1 %68  }
  0x85   :  { %64 = vst.msk [vmem:[#allocation0] ss:$8 sm:$0x3] %vm63_vm9, %v62_v24  }
  0x86   :  { %71 = vst.msk [vmem:[#allocation0] ss:$8 sm:$0x3] %vm70_vm10, %v69_v25  }
  0x88   :  { %v76_v26 = vpop.permute.xlu0 %75   ;;  %v83_v27 = vpop.permute.xlu1 %82  }
  0x89   :  { %78 = vst.msk [vmem:[#allocation0] ss:$8 sm:$0x3] %vm77_vm11, %v76_v26  }
  0x8a   :  { %85 = vst.msk [vmem:[#allocation0] ss:$8 sm:$0x3] %vm84_vm12, %v83_v27  }
  0x8c   :  { %v90_v28 = vpop.permute.xlu0 %89   ;;  %v97_v29 = vpop.permute.xlu1 %96  }
  0x8d   :  { %92 = vst.msk [vmem:[#allocation0] ss:$8 sm:$0x3] %vm91_vm13, %v90_v28  }
  0x8e   :  { %99 = vst.msk [vmem:[#allocation0] ss:$8 sm:$0x3] %vm98_vm14, %v97_v29  }
  0x90   :  { %v104_v30 = vpop.permute.xlu0 %103  }
  0x91   :  { %106 = vst.msk [vmem:[#allocation0] ss:$8 sm:$0x3] %vm105_vm15, %v104_v30  }
  0x98   :  { %v110_v31 = vld [vmem:[#allocation0] sm:$0x1]  ;;  %v114_v32 = vld [vmem:[#allocation0 + $0x8] sm:$0x1] }
  0x99   :  { %112 = vst [vmem:[%s229_s1] sm:$0x1] %v110_v31  ;;  %133 = vst [vmem:[%s229_s1 + $0x1] sm:$0x1] %v114_v32 }

// kernel: tile.18
= control target key start
LH: loop header
LB: loop body
LE: loop exit
PB: predicated region body
PF: predicated region fallthrough
CT: control target
= control target key end

     0   :  { %s28_s0 = inlined_call_operand.vmem [shape: f32[16], index: 0, kind: input, shape index: {}]   ;;  %s29_s1 = inlined_call_operand.vmem [shape: f32[12,16], index: 1, kind: output, shape index: {}]  }
   0x1   :  { %v4_v0 = vld [vmem:[%s28_s0] ss:$0 sm:$0xff] }
   0x2   :  { %5 = vst [vmem:[%s29_s1] sm:$0xff] %v4_v0  ;;  %8 = vst [vmem:[%s29_s1 + $0x8] sm:$0xff] %v4_v0 }

// kernel: tile.19
= control target key start
LH: loop header
LB: loop body
LE: loop exit
PB: predicated region body
PF: predicated region fallthrough
CT: control target
= control target key end

     0   :  { %s77_s10 = smov 112   ;;  %s78_s11 = smov 80   ;;  %vm4_vm0 = vcmask 130048   ;;  %vm10_vm1 = vcmask 1048448   ;;  %vm16_vm2 = vcmask 917248   ;;  %vm22_vm3 = vcmask 786048   ;;  %s124_s0 = inlined_call_operand.vmem [shape: f32[12,16], index: 0, kind: input, shape index: {}]   ;;  %s125_s1 = inlined_call_operand.vmem [shape: f32[1,192], index: 1, kind: output, shape index: {}]  }
   0x1   :  { %v62_v0 = vld [vmem:[%s124_s0 + $0x7] sm:$0x1]   ;;  %v64_v1 = vld [vmem:[%s124_s0 + $0x5] sm:$0x1]   ;;  %v63_v2 = vld [vmem:[%s124_s0 + $0x6] sm:$0x1]  }
   0x2   :  { %8 = vrot.lane.b32.xlu0 %v62_v0, %s77_s10  ;;  %20 = vrot.lane.b32.xlu1 %v64_v1, %s78_s11  ;;  %v65_v3 = vld [vmem:[%s124_s0 + $0x4] sm:$0x1]   ;;  %s31_s16 = smov 3  ;;  %s38_s17 = smov 3  ;;  %vm28_vm4 = vcmask 654848   ;;  %vm35_vm5 = vcmask 523648  }
   0x3   :  { %s79_s18 = smov 96   ;;  %s80_s19 = smov 64   ;;  %v66_v4 = vld [vmem:[%s124_s0 + $0x3] ss:$8 sm:%s31_s16]   ;;  %v67_v5 = vld [vmem:[%s124_s0 + $0x2] ss:$8 sm:%s38_s17]  }
   0x4   :  { %s2_s22 = smov 3  ;;  %s45_s27 = smov 3  ;;  %vm42_vm6 = vcmask 392448   ;;  %vm49_vm7 = vcmask 261248  }
   0x5   :  { %v3_v6 = vld [vmem:[%s124_s0] ss:$8 sm:%s2_s22]   ;;  %s81_s28 = smov 48   ;;  %s82_s29 = smov 32   ;;  %v68_v7 = vld [vmem:[%s124_s0 + $0x1] ss:$8 sm:%s45_s27]  }
   0x6   :  { %14 = vrot.lane.b32.xlu0 %v63_v2, %s79_s18  ;;  %26 = vrot.lane.b32.xlu1 %v65_v3, %s80_s19  ;;  %5 = vst.msk [vmem:[#allocation0] ss:$8 sm:$0x3] %vm4_vm0, %v3_v6   ;;  %s83_s0 = smov 16  }
   0xa   :  { %33 = vrot.lane.b32.xlu0 %v66_v4, %s81_s28  ;;  %40 = vrot.lane.b32.xlu1 %v67_v5, %s82_s29 }
   0xe   :  { %47 = vrot.lane.b32.xlu0 %v68_v7, %s83_s0 }
  0x74   :  { %v9_v8 = vpop.permute.xlu0 %8   ;;  %v21_v9 = vpop.permute.xlu1 %20  }
  0x75   :  { %11 = vst.msk [vmem:[#allocation0] sm:$0x1] %vm10_vm1, %v9_v8  }
  0x78   :  { %v15_v10 = vpop.permute.xlu0 %14   ;;  %v27_v11 = vpop.permute.xlu1 %26  }
  0x79   :  { %17 = vst.msk [vmem:[#allocation0] sm:$0x1] %vm16_vm2, %v15_v10  }
  0x7a   :  { %23 = vst.msk [vmem:[#allocation0] sm:$0x1] %vm22_vm3, %v21_v9  }
  0x7b   :  { %29 = vst.msk [vmem:[#allocation0] sm:$0x1] %vm28_vm4, %v27_v11  }
  0x7c   :  { %v34_v12 = vpop.permute.xlu0 %33   ;;  %v41_v13 = vpop.permute.xlu1 %40  }
  0x7d   :  { %36 = vst.msk [vmem:[#allocation0] ss:$8 sm:$0x3] %vm35_vm5, %v34_v12  }
  0x7e   :  { %43 = vst.msk [vmem:[#allocation0] ss:$8 sm:$0x3] %vm42_vm6, %v41_v13  }
  0x80   :  { %v48_v14 = vpop.permute.xlu0 %47  }
  0x81   :  { %50 = vst.msk [vmem:[#allocation0] ss:$8 sm:$0x3] %vm49_vm7, %v48_v14  }
  0x88   :  { %v54_v15 = vld [vmem:[#allocation0] sm:$0x1]  ;;  %v58_v16 = vld [vmem:[#allocation0 + $0x8] sm:$0x1] }
  0x89   :  { %56 = vst [vmem:[%s125_s1] sm:$0x1] %v54_v15  ;;  %69 = vst [vmem:[%s125_s1 + $0x1] sm:$0x1] %v58_v16 }

// kernel: cnn_forward.1
= control target key start
LH: loop header
LB: loop body
LE: loop exit
PB: predicated region body
PF: predicated region fallthrough
CT: control target
= control target key end

     0   :  { %14 = vsyncpa [#allocation10], 0  ;;  %s10417_s0 = inlined_call_operand.vmem [shape: f32[512,30], index: 0, kind: input, shape index: {}]   ;;  %s10418_s1 = inlined_call_operand.vmem [shape: f32[3,30,224], index: 1, kind: input, shape index: {}]   ;;  %s10419_s2 = inlined_call_operand.vmem [shape: f32[1,224], index: 2, kind: input, shape index: {}]   ;;  %s10420_s3 = inlined_call_operand.vmem [shape: f32[216,128], index: 3, kind: input, shape index: {}]   ;;  %s10421_s4 = inlined_call_operand.vmem [shape: f32[5,128,192], index: 4, kind: input, shape index: {}]   ;;  %s10422_s5 = inlined_call_operand.vmem [shape: f32[1,192], index: 5, kind: input, shape index: {}]   ;;  %s10423_s6 = inlined_call_operand.vmem [shape: f32[176,96], index: 6, kind: input, shape index: {}]   ;;  %s10424_s7 = inlined_call_operand.vmem [shape: f32[576,10], index: 7, kind: input, shape index: {}]   ;;  %s10425_s8 = inlined_call_operand.vmem [shape: f32[1,10], index: 8, kind: input, shape index: {}]   ;;  %s10426_s9 = inlined_call_operand.hbm [shape: f32[16,10], index: 9, kind: output, shape index: {}]  }
   0x1   :  { %16 = vsyncpa [#allocation10 + $0x1], 0  ;;  %s7276_s30 = smov 0   ;;  %s7278_s10 = smov 0  }
   0x2   :  { %s7280_s11 = smov 0   ;;  %s7282_s12 = smov 0  }
   0x3 LB: > { %s7297_s13 = sadd.s32 4294967295, %s7215_s12   ;;  %s6154_s14 = sadd.s32 4294967294, %s7215_s12   ;;  %s7215_s12 = sphi %s7282_s12, %s10650_s12   ;;  %s7211_s11 = sphi %s7280_s11, %s10649_s11   ;;  %s7207_s10 = sphi %s7278_s10, %s10648_s10   ;;  %s7203_s30 = sphi %s7276_s30, %s10647_s30  }
   0x4   : > { %s7301_s15 = sadd.s32 1, %s7215_s12   ;;  %s223_s16 = sadd.s32 1, %s7211_s11 }
   0x5   : > { %s220_s17 = ssub.s32 %s7215_s12, %s7301_s15  ;;  %p233_p0 = scmp.ne.s32.totalorder %s7211_s11, %s7207_s10 }
   0x6   : > { %p221_p1 = scmp.eq.s32.totalorder %s220_s17, 0  ;;  %p234_p2 = scmp.eq.s32.totalorder %s7297_s13, 1 }
   0x7   : > { %p239_p3 = scmp.ne.s32.totalorder %s7207_s10, %s7203_s30  ;;  %p240_p4 = scmp.eq.s32.totalorder %s6154_s14, 1 }
   0x8   : > { %s7312_s18 = scalar_select %p221_p1, %s7211_s11, %s223_s16  }
   0x9   : > { %p7314_p5 = por %p234_p2, %p233_p0  ;;  %p7318_p6 = por %p240_p4, %p239_p3 }
   0xa   : > { %p6157_p7 = scmp.ge.s32.totalorder %s7215_s12, 1  ;;  %p291_p8 = scmp.lt.s32.totalorder %s7215_s12, 3 }
   0xc   : > { %p292_p9 = pnand %p6157_p7, %p291_p8 }
   0xe   : > { %295 = sbr.rel (%p292_p9) target bundleno = 1965 (0x7ad), region = 56 }
  0x15   : > { %v432_v0 = vld [vmem:[%s10418_s1 + $0x8] sm:$0xff]  ;;  %v434_v1 = vld [vmem:[%s10418_s1 + $0x18] sm:$0xff]  ;;  %v431_v2 = vld [vmem:[%s10418_s1] sm:$0xff]  ;;  %vm535_vm0 = vcmask 1045504   ;;  %v7217_v7 = vmov 0.0   ;;  %s6159_s21 = sshll.u32 %s7297_s13, 5 }
  0x16   : > { %v6700_v3 = vpack.c.bf16 %v434_v1, %v432_v0  ;;  %v433_v4 = vld [vmem:[%s10418_s1 + $0x10] sm:$0xff]  ;;  %v436_v5 = vld [vmem:[%s10418_s1 + $0x28] sm:$0xff]  ;;  %v438_v6 = vld [vmem:[%s10418_s1 + $0x38] sm:$0x3f]  ;;  %606 = vmatprep.mubr.f32.mxu0 %v7217_v7  ;;  %3130 = vst [vmem:[#allocation5] sm:$0xff] %v7217_v7  ;;  %774 = vmatprep.mubr.f32.mxu1 %v7217_v7  ;;  %vm365_vm1 = vcmask 244736  }
  0x17   : > { %3131 = vst [vmem:[#allocation5 + $0x80] sm:$0xff] %v7217_v7  ;;  %v6702_v8 = vpack.c.bf16 %v433_v4, %v431_v2  ;;  %v6704_v9 = vpack.c.bf16 %v438_v6, %v436_v5  ;;  %vm7218_vm2 = vmmov 1   ;;  %v435_v11 = vld [vmem:[%s10418_s1 + $0x20] sm:$0xff]  ;;  %v437_v12 = vld [vmem:[%s10418_s1 + $0x30] sm:$0x3f]  ;;  %p328_p10 = scmp.lt.s32.totalorder %s6159_s21, 63 }
  0x18   : > { %vm7348_vm3 = vmpackc.low %vm535_vm0, %vm7218_vm2  ;;  %398 = vst.msk [vmem:[#allocation2 + $0x100] sm:$0xff] %vm365_vm1, %v7217_v7  ;;  %6701 = vmatprep.subr.bf16.mxu0 %v6700_v3  ;;  %7042 = vmatprep.subr.bf16.mxu1 %v6700_v3  ;;  %v6238_v13 = vld [vmem:[%s10418_s1 + $0x88] sm:$0xff]  ;;  %v6240_v14 = vld [vmem:[%s10418_s1 + $0x98] sm:$0xff]  ;;  %v6707_v15 = vpack.c.bf16 %v437_v12, %v435_v11  ;;  %vm800_vm4 = vcmask 785408   ;;  %s7220_s24 = smov 120   ;;  %vm2444_vm5 = vcmask 982016  }
  0x19   : > { %6703 = vmatpush1.bf16.msra.mxu0 %v6702_v8  ;;  %7044 = vmatpush1.bf16.msra.mxu1 %v6702_v8  ;;  %s10652_s21 = smov (!%p328_p10, %s6159_s21), 63  ;;  %v6196_v16 = vld [vmem:[%s10418_s1 + $0x48] sm:$0xff]  ;;  %v6198_v17 = vld [vmem:[%s10418_s1 + $0x58] sm:$0xff]  ;;  %v6720_v18 = vpack.c.bf16 %v6240_v14, %v6238_v13  ;;  %v6237_v23 = vld [vmem:[%s10418_s1 + $0x80] sm:$0xff]  ;;  %5115 = vst.msk [vmem:[#allocation7 + $0x80] sm:$0xff] %vm800_vm4, %v7217_v7  ;;  %vm2632_vm6 = vcmask 719872  }
  0x1a   : > { %6706 = vmatprep.subr.msk.bf16.mxu0 %vm7348_vm3, %v6704_v9  ;;  %7043 = vmatprep.subr.msk.bf16.mxu1 %vm7348_vm3, %v6704_v9  ;;  %v6710_v19 = vpack.c.bf16 %v6198_v17, %v6196_v16  ;;  %s6160_s23 = sshll.u32 %s10652_s21, 3  ;;  %v6239_v24 = vld [vmem:[%s10418_s1 + $0x90] sm:$0xff]  ;;  %v6195_v28 = vld [vmem:[%s10418_s1 + $0x40] sm:$0xff]  ;;  %v6200_v33 = vld [vmem:[%s10418_s1 + $0x68] sm:$0xff]  ;;  %5116 = vst.msk [vmem:[#allocation7 + $0x88] sm:$0xff] %vm800_vm4, %v7217_v7  ;;  %vm3358_vm15 = vcmask 523264  }
  0x1b   : > { %s7379_s26 = scalar_lea.vmem %s10417_s0, %s6160_s23  ;;  %v6197_v29 = vld [vmem:[%s10418_s1 + $0x50] sm:$0xff]  ;;  %v6202_v34 = vld [vmem:[%s10418_s1 + $0x78] sm:$0x3f]  ;;  %v6242_v38 = vld [vmem:[%s10418_s1 + $0xa8] sm:$0xff]  ;;  %v6722_v46 = vpack.c.bf16 %v6239_v24, %v6237_v23  ;;  %s7221_s22 = smov 112   ;;  %vm4818_vm0 = vcmask 916480  }
  0x1c   : > { %v333_v20 = vld [vmem:[%s7379_s26] sm:$0xff]  ;;  %v334_v22 = vld [vmem:[%s7379_s26 + $0x8] sm:$0xff]  ;;  %v335_v26 = vld [vmem:[%s7379_s26 + $0x10] sm:$0xff]  ;;  %v6712_v52 = vpack.c.bf16 %v6197_v29, %v6195_v28  ;;  %v6714_v58 = vpack.c.bf16 %v6202_v34, %v6200_v33  ;;  %s7222_s14 = smov 96   ;;  %s7223_s21 = smov 64   ;;  %vm5491_vm2 = vcmask 261120  }
  0x1d   : > { %6709 = vmatpush1.bf16.msk.msra.mxu0 %vm7348_vm3, %v6707_v15  ;;  %7045 = vmatpush1.bf16.msk.msra.mxu1 %vm7348_vm3, %v6707_v15  ;;  %v361_v21 = vld [vmem:[%s7379_s26 + $0xe0] sm:$0xff]  ;;  %366 = vst.msk [vmem:[#allocation2] sm:$0xff] %vm365_vm1, %v333_v20  ;;  %367 = vst.msk [vmem:[#allocation2 + $0x8] sm:$0xff] %vm365_vm1, %v334_v22  ;;  %v362_v25 = vld [vmem:[%s7379_s26 + $0xe8] sm:$0xff]  ;;  %s7224_s28 = smov 32  }
  0x1e   : > { %6721 = vmatprep.subr.bf16.mxu0 %v6720_v18  ;;  %394 = vst.msk [vmem:[#allocation2 + $0xe0] sm:$0xff] %vm365_vm1, %v361_v21  ;;  %v363_v27 = vld [vmem:[%s7379_s26 + $0xf0] sm:$0xff]  ;;  %6711 = vmatprep.subr.bf16.mxu1 %v6710_v19  ;;  %395 = vst.msk [vmem:[#allocation2 + $0xe8] sm:$0xff] %vm365_vm1, %v362_v25  ;;  %v336_v30 = vld [vmem:[%s7379_s26 + $0x18] sm:$0xff] }
  0x1f   : > { %368 = vst.msk [vmem:[#allocation2 + $0x10] sm:$0xff] %vm365_vm1, %v335_v26  ;;  %396 = vst.msk [vmem:[#allocation2 + $0xf0] sm:$0xff] %vm365_vm1, %v363_v27  ;;  %v364_v31 = vld [vmem:[%s7379_s26 + $0xf8] sm:$0xff]  ;;  %v337_v32 = vld [vmem:[%s7379_s26 + $0x20] sm:$0xff] }
  0x20   : > { %369 = vst.msk [vmem:[#allocation2 + $0x18] sm:$0xff] %vm365_vm1, %v336_v30  ;;  %397 = vst.msk [vmem:[#allocation2 + $0xf8] sm:$0xff] %vm365_vm1, %v364_v31  ;;  %v338_v35 = vld [vmem:[%s7379_s26 + $0x28] sm:$0xff]  ;;  %v339_v36 = vld [vmem:[%s7379_s26 + $0x30] sm:$0xff] }
  0x21   : > { %370 = vst.msk [vmem:[#allocation2 + $0x20] sm:$0xff] %vm365_vm1, %v337_v32  ;;  %v340_v37 = vld [vmem:[%s7379_s26 + $0x38] sm:$0xff]  ;;  %371 = vst.msk [vmem:[#allocation2 + $0x28] sm:$0xff] %vm365_vm1, %v338_v35  ;;  %v341_v40 = vld [vmem:[%s7379_s26 + $0x40] sm:$0xff] }
  0x22   : > { %v6244_v39 = vld [vmem:[%s10418_s1 + $0xb8] sm:$0x3f]  ;;  %372 = vst.msk [vmem:[#allocation2 + $0x30] sm:$0xff] %vm365_vm1, %v339_v36  ;;  %373 = vst.msk [vmem:[#allocation2 + $0x38] sm:$0xff] %vm365_vm1, %v340_v37  ;;  %v342_v41 = vld [vmem:[%s7379_s26 + $0x48] sm:$0xff] }
  0x23   : > { %v343_v42 = vld [vmem:[%s7379_s26 + $0x50] sm:$0xff]  ;;  %374 = vst.msk [vmem:[#allocation2 + $0x40] sm:$0xff] %vm365_vm1, %v341_v40  ;;  %375 = vst.msk [vmem:[#allocation2 + $0x48] sm:$0xff] %vm365_vm1, %v342_v41  ;;  %v344_v43 = vld [vmem:[%s7379_s26 + $0x58] sm:$0xff]  ;;  %v6724_v59 = vpack.c.bf16 %v6244_v39, %v6242_v38 }
  0x24   : > { %376 = vst.msk [vmem:[#allocation2 + $0x50] sm:$0xff] %vm365_vm1, %v343_v42  ;;  %v345_v44 = vld [vmem:[%s7379_s26 + $0x60] sm:$0xff]  ;;  %v346_v45 = vld [vmem:[%s7379_s26 + $0x68] sm:$0xff]  ;;  %v6201_v48 = vld [vmem:[%s10418_s1 + $0x70] sm:$0x3f] }
  0x25   : > { %v6199_v47 = vld [vmem:[%s10418_s1 + $0x60] sm:$0xff]  ;;  %377 = vst.msk [vmem:[#allocation2 + $0x58] sm:$0xff] %vm365_vm1, %v344_v43  ;;  %378 = vst.msk [vmem:[#allocation2 + $0x60] sm:$0xff] %vm365_vm1, %v345_v44  ;;  %v347_v49 = vld [vmem:[%s7379_s26 + $0x70] sm:$0xff] }
  0x26   : > { %379 = vst.msk [vmem:[#allocation2 + $0x68] sm:$0xff] %vm365_vm1, %v346_v45  ;;  %v6241_v50 = vld [vmem:[%s10418_s1 + $0xa0] sm:$0xff]  ;;  %v348_v51 = vld [vmem:[%s7379_s26 + $0x78] sm:$0xff]  ;;  %380 = vst.msk [vmem:[#allocation2 + $0x70] sm:$0xff] %vm365_vm1, %v347_v49  ;;  %v6717_v63 = vpack.c.bf16 %v6201_v48, %v6199_v47 }
  0x27   : > { %381 = vst.msk [vmem:[#allocation2 + $0x78] sm:$0xff] %vm365_vm1, %v348_v51  ;;  %v349_v53 = vld [vmem:[%s7379_s26 + $0x80] sm:$0xff]  ;;  %v350_v54 = vld [vmem:[%s7379_s26 + $0x88] sm:$0xff]  ;;  %v351_v55 = vld [vmem:[%s7379_s26 + $0x90] sm:$0xff] }
  0x28   : > { %v399_v56 = vld [vmem:[#allocation2] sm:$0xff]  ;;  %v6243_v60 = vld [vmem:[%s10418_s1 + $0xb0] sm:$0x3f]  ;;  %382 = vst.msk [vmem:[#allocation2 + $0x80] sm:$0xff] %vm365_vm1, %v349_v53  ;;  %383 = vst.msk [vmem:[#allocation2 + $0x88] sm:$0xff] %vm365_vm1, %v350_v54 }
  0x29   : > { %v427_v57 = vld [vmem:[#allocation2 + $0xe0] sm:$0xff]  ;;  %384 = vst.msk [vmem:[#allocation2 + $0x90] sm:$0xff] %vm365_vm1, %v351_v55  ;;  %6163 = vmatmul.mubr.msk.f32.vlgmr.msra.gmra.mrb[0].mxu0 %vm365_vm1, %v399_v56  ;;  %v400_v61 = vld [vmem:[#allocation2 + $0x8] sm:$0xff]  ;;  %v6727_v0 = vpack.c.bf16 %v6243_v60, %v6241_v50  ;;  %v401_v1 = vld [vmem:[#allocation2 + $0x10] sm:$0xff] }
  0x2a   : > { %6191 = vmatmul.mubr.msk.f32.vlgmr.msra.gmra.mrb[0].mxu1 %vm365_vm1, %v427_v57  ;;  %6723 = vmatpush1.bf16.msra.mxu0 %v6722_v46  ;;  %v428_v62 = vld [vmem:[#allocation2 + $0xe8] sm:$0xff]  ;;  %v429_v2 = vld [vmem:[#allocation2 + $0xf0] sm:$0xff]  ;;  %v402_v3 = vld [vmem:[#allocation2 + $0x18] sm:$0xff] }
  0x2b   : > { %612 = vmatprep.mubr.f32.mxu0 %v7217_v7  ;;  %780 = vmatprep.mubr.f32.mxu1 %v7217_v7  ;;  %v430_v4 = vld [vmem:[#allocation2 + $0xf8] sm:$0xff]  ;;  %v403_v6 = vld [vmem:[#allocation2 + $0x20] sm:$0xff]  ;;  %v354_v10 = vld [vmem:[%s7379_s26 + $0xa8] sm:$0xff] }
  0x2c   : > { %6713 = vmatpush1.bf16.msra.mxu1 %v6712_v52  ;;  %6726 = vmatprep.subr.msk.bf16.mxu0 %vm7348_vm3, %v6724_v59  ;;  %v352_v5 = vld [vmem:[%s7379_s26 + $0x98] sm:$0xff]  ;;  %v353_v8 = vld [vmem:[%s7379_s26 + $0xa0] sm:$0xff]  ;;  %v355_v11 = vld [vmem:[%s7379_s26 + $0xb0] sm:$0xff]  ;;  %387 = vst.msk [vmem:[#allocation2 + $0xa8] sm:$0xff] %vm365_vm1, %v354_v10 }
  0x2d   : > { %6716 = vmatprep.subr.msk.bf16.mxu1 %vm7348_vm3, %v6714_v58  ;;  %6164 = vmatmul.mubr.msk.f32.gmra.mrb[2].mxu0 %vm365_vm1, %v400_v61  ;;  %385 = vst.msk [vmem:[#allocation2 + $0x98] sm:$0xff] %vm365_vm1, %v352_v5  ;;  %v928_v9 = vld [vmem:[#allocation2 + $0x1] sm:$0xff]  ;;  %386 = vst.msk [vmem:[#allocation2 + $0xa0] sm:$0xff] %vm365_vm1, %v353_v8  ;;  %v356_v12 = vld [vmem:[%s7379_s26 + $0xb8] sm:$0xff] }
  0x2e   : > { %6192 = vmatmul.mubr.msk.f32.gmra.mrb[2].mxu1 %vm365_vm1, %v428_v62  ;;  %618 = vmatprep.mubr.f32.mxu0 %v7217_v7  ;;  %388 = vst.msk [vmem:[#allocation2 + $0xb0] sm:$0xff] %vm365_vm1, %v355_v11  ;;  %v357_v13 = vld [vmem:[%s7379_s26 + $0xc0] sm:$0xff]  ;;  %v358_v14 = vld [vmem:[%s7379_s26 + $0xc8] sm:$0xff]  ;;  %389 = vst.msk [vmem:[#allocation2 + $0xb8] sm:$0xff] %vm365_vm1, %v356_v12 }
  0x2f   : > { %786 = vmatprep.mubr.f32.mxu1 %v7217_v7  ;;  %6729 = vmatpush1.bf16.msk.msra.mxu0 %vm7348_vm3, %v6727_v0  ;;  %390 = vst.msk [vmem:[#allocation2 + $0xc0] sm:$0xff] %vm365_vm1, %v357_v13  ;;  %391 = vst.msk [vmem:[#allocation2 + $0xc8] sm:$0xff] %vm365_vm1, %v358_v14  ;;  %v359_v15 = vld [vmem:[%s7379_s26 + $0xd0] sm:$0xff]  ;;  %v360_v16 = vld [vmem:[%s7379_s26 + $0xd8] sm:$0xff] }
  0x30   : > { %6719 = vmatpush1.bf16.msk.msra.mxu1 %vm7348_vm3, %v6717_v63  ;;  %392 = vst.msk [vmem:[#allocation2 + $0xd0] sm:$0xff] %vm365_vm1, %v359_v15  ;;  %393 = vst.msk [vmem:[#allocation2 + $0xd8] sm:$0xff] %vm365_vm1, %v360_v16  ;;  %v404_v17 = vld [vmem:[#allocation2 + $0x28] sm:$0xff]  ;;  %v405_v19 = vld [vmem:[#allocation2 + $0x30] sm:$0xff]  ;;  %vm6048_vm3 = vcmask 80896  }
  0x31   : > { %6165 = vmatmul.mubr.msk.f32.gmra.mrb[4].mxu0 %vm365_vm1, %v401_v1  ;;  %v929_v18 = vld [vmem:[#allocation2 + $0x9] sm:$0xff]  ;;  %v930_v20 = vld [vmem:[#allocation2 + $0x11] sm:$0xff]  ;;  %v931_v22 = vld [vmem:[#allocation2 + $0x19] sm:$0xff] }
  0x32   : > { %6193 = vmatmul.mubr.msk.f32.gmra.mrb[4].mxu1 %vm365_vm1, %v429_v2  ;;  %624 = vmatprep.mubr.f32.mxu0 %v7217_v7  ;;  %v406_v21 = vld [vmem:[#allocation2 + $0x38] sm:$0xff]  ;;  %v407_v23 = vld [vmem:[#allocation2 + $0x40] sm:$0xff]  ;;  %v408_v25 = vld [vmem:[#allocation2 + $0x48] sm:$0xff] }
  0x33   : > { %792 = vmatprep.mubr.f32.mxu1 %v7217_v7  ;;  %v932_v24 = vld [vmem:[#allocation2 + $0x21] sm:$0xff]  ;;  %v933_v26 = vld [vmem:[#allocation2 + $0x29] sm:$0xff]  ;;  %v934_v28 = vld [vmem:[#allocation2 + $0x31] sm:$0xff] }
  0x34   : > { %v409_v27 = vld [vmem:[#allocation2 + $0x50] sm:$0xff]  ;;  %v410_v29 = vld [vmem:[#allocation2 + $0x58] sm:$0xff]  ;;  %v411_v31 = vld [vmem:[#allocation2 + $0x60] sm:$0xff] }
  0x35   : > { %6166 = vmatmul.mubr.msk.f32.gmra.mrb[6].mxu0 %vm365_vm1, %v402_v3  ;;  %v935_v30 = vld [vmem:[#allocation2 + $0x39] sm:$0xff]  ;;  %v936_v32 = vld [vmem:[#allocation2 + $0x41] sm:$0xff]  ;;  %v937_v34 = vld [vmem:[#allocation2 + $0x49] sm:$0xff] }
  0x36   : > { %6194 = vmatmul.mubr.msk.f32.gmra.mrb[6].mxu1 %vm365_vm1, %v430_v4  ;;  %630 = vmatprep.mubr.f32.mxu0 %v7217_v7  ;;  %v412_v33 = vld [vmem:[#allocation2 + $0x68] sm:$0xff]  ;;  %v413_v35 = vld [vmem:[#allocation2 + $0x70] sm:$0xff]  ;;  %v414_v37 = vld [vmem:[#allocation2 + $0x78] sm:$0xff] }
  0x37   : > { %1135 = vmatprep.mubr.f32.mxu1 %v7217_v7  ;;  %v938_v36 = vld [vmem:[#allocation2 + $0x51] sm:$0xff]  ;;  %v939_v38 = vld [vmem:[#allocation2 + $0x59] sm:$0xff]  ;;  %v940_v40 = vld [vmem:[#allocation2 + $0x61] sm:$0xff] }
  0x38   : > { %v415_v39 = vld [vmem:[#allocation2 + $0x80] sm:$0xff]  ;;  %v416_v41 = vld [vmem:[#allocation2 + $0x88] sm:$0xff]  ;;  %v417_v43 = vld [vmem:[#allocation2 + $0x90] sm:$0xff] }
  0x39   : > { %6167 = vmatmul.mubr.msk.f32.gmra.mrb[8].mxu0 %vm365_vm1, %v403_v6  ;;  %v941_v42 = vld [vmem:[#allocation2 + $0x69] sm:$0xff]  ;;  %v942_v44 = vld [vmem:[#allocation2 + $0x71] sm:$0xff]  ;;  %v943_v46 = vld [vmem:[#allocation2 + $0x79] sm:$0xff] }
  0x3a   : > { %6205 = vmatmul.mubr.msk.f32.vlgmr.msra.gmra.mrb[8].mxu1 %vm365_vm1, %v928_v9  ;;  %636 = vmatprep.mubr.f32.mxu0 %v7217_v7  ;;  %v418_v45 = vld [vmem:[#allocation2 + $0x98] sm:$0xff]  ;;  %v419_v47 = vld [vmem:[#allocation2 + $0xa0] sm:$0xff]  ;;  %v420_v49 = vld [vmem:[#allocation2 + $0xa8] sm:$0xff] }
  0x3b   : > { %1141 = vmatprep.mubr.f32.mxu1 %v7217_v7  ;;  %v944_v48 = vld [vmem:[#allocation2 + $0x81] sm:$0xff]  ;;  %v945_v50 = vld [vmem:[#allocation2 + $0x89] sm:$0xff]  ;;  %v946_v52 = vld [vmem:[#allocation2 + $0x91] sm:$0xff] }
  0x3c   : > { %v421_v51 = vld [vmem:[#allocation2 + $0xb0] sm:$0xff]  ;;  %v422_v53 = vld [vmem:[#allocation2 + $0xb8] sm:$0xff]  ;;  %v423_v55 = vld [vmem:[#allocation2 + $0xc0] sm:$0xff] }
  0x3d   : > { %6168 = vmatmul.mubr.msk.f32.gmra.mrb[10].mxu0 %vm365_vm1, %v404_v17  ;;  %v947_v54 = vld [vmem:[#allocation2 + $0x99] sm:$0xff]  ;;  %v948_v56 = vld [vmem:[#allocation2 + $0xa1] sm:$0xff]  ;;  %v949_v58 = vld [vmem:[#allocation2 + $0xa9] sm:$0xff] }
  0x3e   : > { %6206 = vmatmul.mubr.msk.f32.gmra.mrb[10].mxu1 %vm365_vm1, %v929_v18  ;;  %642 = vmatprep.mubr.f32.mxu0 %v7217_v7  ;;  %v424_v57 = vld [vmem:[#allocation2 + $0xc8] sm:$0xff]  ;;  %v425_v59 = vld [vmem:[#allocation2 + $0xd0] sm:$0xff]  ;;  %v426_v61 = vld [vmem:[#allocation2 + $0xd8] sm:$0xff] }
  0x3f   : > { %1147 = vmatprep.mubr.f32.mxu1 %v7217_v7  ;;  %v950_v60 = vld [vmem:[#allocation2 + $0xb1] sm:$0xff]  ;;  %v951_v62 = vld [vmem:[#allocation2 + $0xb9] sm:$0xff]  ;;  %v952_v63 = vld [vmem:[#allocation2 + $0xc1] sm:$0xff] }
  0x40   : > { %v1520_v0 = vld [vmem:[#allocation2 + $0x2] sm:$0xff]  ;;  %v1521_v2 = vld [vmem:[#allocation2 + $0xa] sm:$0xff]  ;;  %v1522_v4 = vld [vmem:[#allocation2 + $0x12] sm:$0xff] }
  0x41   : > { %6169 = vmatmul.mubr.msk.f32.gmra.mrb[12].mxu0 %vm365_vm1, %v405_v19  ;;  %v953_v1 = vld [vmem:[#allocation2 + $0xc9] sm:$0xff]  ;;  %v954_v3 = vld [vmem:[#allocation2 + $0xd1] sm:$0xff]  ;;  %v955_v5 = vld [vmem:[#allocation2 + $0xd9] sm:$0xff] }
  0x42   : > { %6207 = vmatmul.mubr.msk.f32.gmra.mrb[12].mxu1 %vm365_vm1, %v930_v20  ;;  %648 = vmatprep.mubr.f32.mxu0 %v7217_v7  ;;  %v1523_v6 = vld [vmem:[#allocation2 + $0x1a] sm:$0xff]  ;;  %v1524_v9 = vld [vmem:[#allocation2 + $0x22] sm:$0xff]  ;;  %v1525_v11 = vld [vmem:[#allocation2 + $0x2a] sm:$0xff] }
  0x43   : > { %1153 = vmatprep.mubr.f32.mxu1 %v7217_v7  ;;  %v956_v8 = vld [vmem:[#allocation2 + $0xe1] sm:$0xff]  ;;  %v957_v10 = vld [vmem:[#allocation2 + $0xe9] sm:$0xff]  ;;  %v958_v12 = vld [vmem:[#allocation2 + $0xf1] sm:$0xff] }
  0x44   : > { %v1526_v13 = vld [vmem:[#allocation2 + $0x32] sm:$0xff]  ;;  %v1527_v15 = vld [vmem:[#allocation2 + $0x3a] sm:$0xff]  ;;  %v1528_v16 = vld [vmem:[#allocation2 + $0x42] sm:$0xff] }
  0x45   : > { %6170 = vmatmul.mubr.msk.f32.gmra.mrb[14].mxu0 %vm365_vm1, %v406_v21  ;;  %v959_v14 = vld [vmem:[#allocation2 + $0xf9] sm:$0xff]  ;;  %v1529_v17 = vld [vmem:[#allocation2 + $0x4a] sm:$0xff]  ;;  %v1532_v20 = vld [vmem:[#allocation2 + $0x62] sm:$0xff] }
  0x46   : > { %6208 = vmatmul.mubr.msk.f32.gmra.mrb[14].mxu1 %vm365_vm1, %v931_v22  ;;  %654 = vmatprep.mubr.f32.mxu0 %v7217_v7  ;;  %v1530_v18 = vld [vmem:[#allocation2 + $0x52] sm:$0xff]  ;;  %v1531_v19 = vld [vmem:[#allocation2 + $0x5a] sm:$0xff]  ;;  %v1533_v21 = vld [vmem:[#allocation2 + $0x6a] sm:$0xff] }
  0x47   : > { %1159 = vmatprep.mubr.f32.mxu1 %v7217_v7  ;;  %v1534_v22 = vld [vmem:[#allocation2 + $0x72] sm:$0xff] }
  0x49   : > { %6171 = vmatmul.mubr.msk.f32.gmra.mrb[16].mxu0 %vm365_vm1, %v407_v23  ;;  %v1535_v23 = vld [vmem:[#allocation2 + $0x7a] sm:$0xff] }
  0x4a   : > { %6209 = vmatmul.mubr.msk.f32.gmra.mrb[16].mxu1 %vm365_vm1, %v932_v24  ;;  %660 = vmatprep.mubr.f32.mxu0 %v7217_v7  ;;  %v1536_v24 = vld [vmem:[#allocation2 + $0x82] sm:$0xff] }
  0x4b   : > { %1165 = vmatprep.mubr.f32.mxu1 %v7217_v7 }
  0x4d   : > { %6172 = vmatmul.mubr.msk.f32.gmra.mrb[18].mxu0 %vm365_vm1, %v408_v25  ;;  %v1537_v25 = vld [vmem:[#allocation2 + $0x8a] sm:$0xff] }
  0x4e   : > { %6210 = vmatmul.mubr.msk.f32.gmra.mrb[18].mxu1 %vm365_vm1, %v933_v26  ;;  %666 = vmatprep.mubr.f32.mxu0 %v7217_v7  ;;  %v1538_v26 = vld [vmem:[#allocation2 + $0x92] sm:$0xff] }
  0x4f   : > { %1171 = vmatprep.mubr.f32.mxu1 %v7217_v7 }
  0x51   : > { %6173 = vmatmul.mubr.msk.f32.gmra.mrb[20].mxu0 %vm365_vm1, %v409_v27  ;;  %v1539_v27 = vld [vmem:[#allocation2 + $0x9a] sm:$0xff] }
  0x52   : > { %6211 = vmatmul.mubr.msk.f32.gmra.mrb[20].mxu1 %vm365_vm1, %v934_v28  ;;  %672 = vmatprep.mubr.f32.mxu0 %v7217_v7  ;;  %v1540_v28 = vld [vmem:[#allocation2 + $0xa2] sm:$0xff] }
  0x53   : > { %1177 = vmatprep.mubr.f32.mxu1 %v7217_v7 }
  0x55   : > { %6174 = vmatmul.mubr.msk.f32.gmra.mrb[22].mxu0 %vm365_vm1, %v410_v29  ;;  %v1541_v29 = vld [vmem:[#allocation2 + $0xaa] sm:$0xff] }
  0x56   : > { %6212 = vmatmul.mubr.msk.f32.gmra.mrb[22].mxu1 %vm365_vm1, %v935_v30  ;;  %678 = vmatprep.mubr.f32.mxu0 %v7217_v7  ;;  %v1542_v30 = vld [vmem:[#allocation2 + $0xb2] sm:$0xff] }
  0x57   : > { %1183 = vmatprep.mubr.f32.mxu1 %v7217_v7 }
  0x59   : > { %6175 = vmatmul.mubr.msk.f32.gmra.mrb[24].mxu0 %vm365_vm1, %v411_v31  ;;  %v1543_v31 = vld [vmem:[#allocation2 + $0xba] sm:$0xff] }
  0x5a   : > { %6213 = vmatmul.mubr.msk.f32.gmra.mrb[24].mxu1 %vm365_vm1, %v936_v32  ;;  %684 = vmatprep.mubr.f32.mxu0 %v7217_v7  ;;  %v1544_v32 = vld [vmem:[#allocation2 + $0xc2] sm:$0xff] }
  0x5b   : > { %1189 = vmatprep.mubr.f32.mxu1 %v7217_v7 }
  0x5d   : > { %6176 = vmatmul.mubr.msk.f32.gmra.mrb[26].mxu0 %vm365_vm1, %v412_v33  ;;  %v10429_v33 = vmov 0.0|0.0  }
  0x5e   : > { %6214 = vmatmul.mubr.msk.f32.gmra.mrb[26].mxu1 %vm365_vm1, %v937_v34  ;;  %690 = vmatprep.mubr.f32.mxu0 %v7217_v7  ;;  %v2605_v34 = vld [vmem:[%s10420_s3] sm:$0xff] }
  0x5f   : > { %1195 = vmatprep.mubr.f32.mxu1 %v7217_v7  ;;  %6730 = vmatprep.subr.bf16.mxu1 %v10429_v33 }
  0x61   : > { %6177 = vmatmul.mubr.msk.f32.gmra.mrb[28].mxu0 %vm365_vm1, %v413_v35  ;;  %v2606_v35 = vld [vmem:[%s10420_s3 + $0x8] sm:$0xff] }
  0x62   : > { %6215 = vmatmul.mubr.msk.f32.gmra.mrb[28].mxu1 %vm365_vm1, %v938_v36  ;;  %696 = vmatprep.mubr.f32.mxu0 %v7217_v7  ;;  %v6731_v36 = vpack.c.bf16 %v2606_v35, %v2605_v34 }
  0x63   : > { %1201 = vmatprep.mubr.f32.mxu1 %v7217_v7 }
  0x64   : > { %6732 = vmatpush1.bf16.msra.mxu1 %v6731_v36 }
  0x65   : > { %6178 = vmatmul.mubr.msk.f32.gmra.mrb[30].mxu0 %vm365_vm1, %v414_v37  ;;  %v1545_v37 = vld [vmem:[#allocation2 + $0xca] sm:$0xff]  ;;  %6733 = vmatprep.subr.bf16.mxu1 %v10429_v33 }
  0x66   : > { %6216 = vmatmul.mubr.msk.f32.gmra.mrb[30].mxu1 %vm365_vm1, %v939_v38  ;;  %702 = vmatprep.mubr.f32.mxu0 %v7217_v7 }
  0x67   : > { %1207 = vmatprep.mubr.f32.mxu1 %v7217_v7 }
  0x69   : > { %6179 = vmatmul.mubr.msk.f32.gmra.mrb[32].mxu0 %vm365_vm1, %v415_v39 }
  0x6a   : > { %6217 = vmatmul.mubr.msk.f32.gmra.mrb[32].mxu1 %vm365_vm1, %v940_v40  ;;  %708 = vmatprep.mubr.f32.mxu0 %v7217_v7 }
  0x6b   : > { %1213 = vmatprep.mubr.f32.mxu1 %v7217_v7 }
  0x6d   : > { %6180 = vmatmul.mubr.msk.f32.gmra.mrb[34].mxu0 %vm365_vm1, %v416_v41 }
  0x6e   : > { %6218 = vmatmul.mubr.msk.f32.gmra.mrb[34].mxu1 %vm365_vm1, %v941_v42  ;;  %714 = vmatprep.mubr.f32.mxu0 %v7217_v7  ;;  %v1546_v42 = vld [vmem:[#allocation2 + $0xd2] sm:$0xff] }
  0x6f   : > { %1219 = vmatprep.mubr.f32.mxu1 %v7217_v7 }
  0x71   : > { %6181 = vmatmul.mubr.msk.f32.gmra.mrb[36].mxu0 %vm365_vm1, %v417_v43 }
  0x72   : > { %6219 = vmatmul.mubr.msk.f32.gmra.mrb[36].mxu1 %vm365_vm1, %v942_v44  ;;  %720 = vmatprep.mubr.f32.mxu0 %v7217_v7 }
  0x73   : > { %1225 = vmatprep.mubr.f32.mxu1 %v7217_v7 }
  0x75   : > { %6182 = vmatmul.mubr.msk.f32.gmra.mrb[38].mxu0 %vm365_vm1, %v418_v45  ;;  %v2607_v45 = vld [vmem:[%s10420_s3 + $0x10] sm:$0xff] }
  0x76   : > { %6220 = vmatmul.mubr.msk.f32.gmra.mrb[38].mxu1 %vm365_vm1, %v943_v46  ;;  %726 = vmatprep.mubr.f32.mxu0 %v7217_v7  ;;  %v2608_v46 = vld [vmem:[%s10420_s3 + $0x18] sm:$0xff] }
  0x77   : > { %1231 = vmatprep.mubr.f32.mxu1 %v7217_v7 }
  0x79   : > { %6183 = vmatmul.mubr.msk.f32.gmra.mrb[40].mxu0 %vm365_vm1, %v419_v47 }
  0x7a   : > { %6221 = vmatmul.mubr.msk.f32.gmra.mrb[40].mxu1 %vm365_vm1, %v944_v48  ;;  %732 = vmatprep.mubr.f32.mxu0 %v7217_v7 }
  0x7b   : > { %1237 = vmatprep.mubr.f32.mxu1 %v7217_v7 }
  0x7d   : > { %6184 = vmatmul.mubr.msk.f32.gmra.mrb[42].mxu0 %vm365_vm1, %v420_v49  ;;  %v6734_v49 = vpack.c.bf16 %v2608_v46, %v2607_v45 }
  0x7e   : > { %6222 = vmatmul.mubr.msk.f32.gmra.mrb[42].mxu1 %vm365_vm1, %v945_v50  ;;  %738 = vmatprep.mubr.f32.mxu0 %v7217_v7  ;;  %v1547_v50 = vld [vmem:[#allocation2 + $0xda] sm:$0xff] }
  0x7f   : > { %1243 = vmatprep.mubr.f32.mxu1 %v7217_v7  ;;  %6735 = vmatpush1.bf16.msra.mxu1 %v6734_v49 }
  0x80   : > { %6736 = vmatprep.subr.bf16.mxu1 %v10429_v33 }
  0x81   : > { %6185 = vmatmul.mubr.msk.f32.gmra.mrb[44].mxu0 %vm365_vm1, %v421_v51 }
  0x82   : > { %6223 = vmatmul.mubr.msk.f32.gmra.mrb[44].mxu1 %vm365_vm1, %v946_v52  ;;  %744 = vmatprep.mubr.f32.mxu0 %v7217_v7 }
  0x83   : > { %1249 = vmatprep.mubr.f32.mxu1 %v7217_v7 }
  0x85   : > { %6186 = vmatmul.mubr.msk.f32.gmra.mrb[46].mxu0 %vm365_vm1, %v422_v53 }
  0x86   : > { %6224 = vmatmul.mubr.msk.f32.gmra.mrb[46].mxu1 %vm365_vm1, %v947_v54  ;;  %750 = vmatprep.mubr.f32.mxu0 %v7217_v7 }
  0x87   : > { %1255 = vmatprep.mubr.f32.mxu1 %v7217_v7 }
  0x89   : > { %6187 = vmatmul.mubr.msk.f32.gmra.mrb[48].mxu0 %vm365_vm1, %v423_v55  ;;  %v1548_v55 = vld [vmem:[#allocation2 + $0xe2] sm:$0xff] }
  0x8a   : > { %6225 = vmatmul.mubr.msk.f32.gmra.mrb[48].mxu1 %vm365_vm1, %v948_v56  ;;  %756 = vmatprep.mubr.f32.mxu0 %v7217_v7 }
  0x8b   : > { %1261 = vmatprep.mubr.f32.mxu1 %v7217_v7 }
  0x8d   : > { %6188 = vmatmul.mubr.msk.f32.gmra.mrb[50].mxu0 %vm365_vm1, %v424_v57 }
  0x8e   : > { %6226 = vmatmul.mubr.msk.f32.gmra.mrb[50].mxu1 %vm365_vm1, %v949_v58  ;;  %762 = vmatprep.mubr.f32.mxu0 %v7217_v7 }
  0x8f   : > { %1267 = vmatprep.mubr.f32.mxu1 %v7217_v7 }
  0x91   : > { %6189 = vmatmul.mubr.msk.f32.gmra.mrb[52].mxu0 %vm365_vm1, %v425_v59 }
  0x92   : > { %6227 = vmatmul.mubr.msk.f32.gmra.mrb[52].mxu1 %vm365_vm1, %v950_v60  ;;  %768 = vmatprep.mubr.f32.mxu0 %v7217_v7  ;;  %v1549_v60 = vld [vmem:[#allocation2 + $0xea] sm:$0xff] }
  0x93   : > { %1273 = vmatprep.mubr.f32.mxu1 %v7217_v7 }
  0x95   : > { %6190 = vmatmul.mubr.msk.f32.gmra.mrb[54].mxu0 %vm365_vm1, %v426_v61  ;;  %v2609_v61 = vld [vmem:[%s10420_s3 + $0x20] sm:$0xff] }
  0x96   : > { %6228 = vmatmul.mubr.msk.f32.gmra.mrb[54].mxu1 %vm365_vm1, %v951_v62  ;;  %1727 = vmatprep.mubr.f32.mxu0 %v7217_v7  ;;  %v2610_v62 = vld [vmem:[%s10420_s3 + $0x28] sm:$0xff] }
  0x97   : > { %1279 = vmatprep.mubr.f32.mxu1 %v7217_v7 }
  0x99   : > { %6247 = vmatmul.mubr.msk.f32.vlgmr.msra.gmra.mrb[56].mxu0 %vm365_vm1, %v1520_v0 }
  0x9a   : > { %6229 = vmatmul.mubr.msk.f32.gmra.mrb[56].mxu1 %vm365_vm1, %v952_v63  ;;  %1733 = vmatprep.mubr.f32.mxu0 %v7217_v7 }
  0x9b   : > { %1285 = vmatprep.mubr.f32.mxu1 %v7217_v7 }
  0x9d   : > { %6248 = vmatmul.mubr.msk.f32.gmra.mrb[58].mxu0 %vm365_vm1, %v1521_v2 }
  0x9e   : > { %6230 = vmatmul.mubr.msk.f32.gmra.mrb[58].mxu1 %vm365_vm1, %v953_v1  ;;  %1739 = vmatprep.mubr.f32.mxu0 %v7217_v7  ;;  %v6737_v1 = vpack.c.bf16 %v2610_v62, %v2609_v61 }
  0x9f   : > { %1291 = vmatprep.mubr.f32.mxu1 %v7217_v7 }
  0xa0   : > { %6738 = vmatpush1.bf16.msra.mxu1 %v6737_v1 }
  0xa1   : > { %6249 = vmatmul.mubr.msk.f32.gmra.mrb[60].mxu0 %vm365_vm1, %v1522_v4  ;;  %6739 = vmatprep.subr.bf16.mxu1 %v10429_v33 }
  0xa2   : > { %6231 = vmatmul.mubr.msk.f32.gmra.mrb[60].mxu1 %vm365_vm1, %v954_v3  ;;  %1745 = vmatprep.mubr.f32.mxu0 %v7217_v7 }
  0xa3   : > { %1297 = vmatprep.mubr.f32.mxu1 %v7217_v7 }
  0xa5   : > { %6250 = vmatmul.mubr.msk.f32.gmra.mrb[62].mxu0 %vm365_vm1, %v1523_v6 }
  0xa6   : > { %6232 = vmatmul.mubr.msk.f32.gmra.mrb[62].mxu1 %vm365_vm1, %v955_v5  ;;  %1751 = vmatprep.mubr.f32.mxu0 %v7217_v7 }
  0xa7   : > { %1303 = vmatprep.mubr.f32.mxu1 %v7217_v7 }
  0xa9   : > { %6251 = vmatmul.mubr.msk.f32.gmra.mrb[64].mxu0 %vm365_vm1, %v1524_v9 }
  0xaa   : > { %6233 = vmatmul.mubr.msk.f32.gmra.mrb[64].mxu1 %vm365_vm1, %v956_v8  ;;  %1757 = vmatprep.mubr.f32.mxu0 %v7217_v7  ;;  %v1550_v8 = vld [vmem:[#allocation2 + $0xf2] sm:$0xff] }
  0xab   : > { %1309 = vmatprep.mubr.f32.mxu1 %v7217_v7 }
  0xad   : > { %6252 = vmatmul.mubr.msk.f32.gmra.mrb[66].mxu0 %vm365_vm1, %v1525_v11 }
  0xae   : > { %6234 = vmatmul.mubr.msk.f32.gmra.mrb[66].mxu1 %vm365_vm1, %v957_v10  ;;  %1763 = vmatprep.mubr.f32.mxu0 %v7217_v7 }
  0xaf   : > { %1315 = vmatprep.mubr.f32.mxu1 %v7217_v7 }
  0xb1   : > { %6253 = vmatmul.mubr.msk.f32.gmra.mrb[68].mxu0 %vm365_vm1, %v1526_v13 }
  0xb2   : > { %6235 = vmatmul.mubr.msk.f32.gmra.mrb[68].mxu1 %vm365_vm1, %v958_v12  ;;  %1769 = vmatprep.mubr.f32.mxu0 %v7217_v7 }
  0xb3   : > { %1321 = vmatprep.mubr.f32.mxu1 %v7217_v7 }
  0xb5   : > { %6254 = vmatmul.mubr.msk.f32.gmra.mrb[70].mxu0 %vm365_vm1, %v1527_v15 }
  0xb6   : > { %6236 = vmatmul.mubr.msk.f32.gmra.mrb[70].mxu1 %vm365_vm1, %v959_v14  ;;  %1775 = vmatprep.mubr.f32.mxu0 %v7217_v7 }
  0xb9   : > { %6255 = vmatmul.mubr.msk.f32.gmra.mrb[72].mxu0 %vm365_vm1, %v1528_v16  ;;  %v1551_v16 = vld [vmem:[#allocation2 + $0xfa] sm:$0xff] }
  0xba   : > { %1781 = vmatprep.mubr.f32.mxu0 %v7217_v7 }
  0xbd   : > { %6256 = vmatmul.mubr.msk.f32.gmra.mrb[74].mxu0 %vm365_vm1, %v1529_v17 }
  0xbe   : > { %1787 = vmatprep.mubr.f32.mxu0 %v7217_v7 }
  0xc1   : > { %6257 = vmatmul.mubr.msk.f32.gmra.mrb[76].mxu0 %vm365_vm1, %v1530_v18 }
  0xc2   : > { %1793 = vmatprep.mubr.f32.mxu0 %v7217_v7 }
  0xc5   : > { %6258 = vmatmul.mubr.msk.f32.gmra.mrb[78].mxu0 %vm365_vm1, %v1531_v19  ;;  %v2611_v19 = vld [vmem:[%s10420_s3 + $0x30] sm:$0xff] }
  0xc6   : > { %1799 = vmatprep.mubr.f32.mxu0 %v7217_v7 }
  0xc9   : > { %6259 = vmatmul.mubr.msk.f32.gmra.mrb[80].mxu0 %vm365_vm1, %v1532_v20  ;;  %v2612_v20 = vld [vmem:[%s10420_s3 + $0x38] sm:$0xff] }
  0xca   : > { %1805 = vmatprep.mubr.f32.mxu0 %v7217_v7 }
  0xcd   : > { %6260 = vmatmul.mubr.msk.f32.gmra.mrb[82].mxu0 %vm365_vm1, %v1533_v21 }
  0xce   : > { %1811 = vmatprep.mubr.f32.mxu0 %v7217_v7 }
  0xd1   : > { %6261 = vmatmul.mubr.msk.f32.gmra.mrb[84].mxu0 %vm365_vm1, %v1534_v22 }
  0xd2   : > { %1817 = vmatprep.mubr.f32.mxu0 %v7217_v7 }
  0xd5   : > { %6262 = vmatmul.mubr.msk.f32.gmra.mrb[86].mxu0 %vm365_vm1, %v1535_v23 }
  0xd6   : > { %1823 = vmatprep.mubr.f32.mxu0 %v7217_v7 }
  0xd9   : > { %6263 = vmatmul.mubr.msk.f32.gmra.mrb[88].mxu0 %vm365_vm1, %v1536_v24 }
  0xda   : > { %1829 = vmatprep.mubr.f32.mxu0 %v7217_v7 }
  0xdd   : > { %6264 = vmatmul.mubr.msk.f32.gmra.mrb[90].mxu0 %vm365_vm1, %v1537_v25  ;;  %v6740_v25 = vpack.c.bf16 %v2612_v20, %v2611_v19  ;;  %v2618_v19 = vld [vmem:[%s10420_s3 + $0x68] sm:$0xff] }
  0xde   : > { %1835 = vmatprep.mubr.f32.mxu0 %v7217_v7 }
  0xdf   : > { %6741 = vmatpush1.bf16.msra.mxu1 %v6740_v25 }
  0xe0   : > { %6742 = vmatprep.subr.bf16.mxu1 %v10429_v33 }
  0xe1   : > { %6265 = vmatmul.mubr.msk.f32.gmra.mrb[92].mxu0 %vm365_vm1, %v1538_v26 }
  0xe2   : > { %1841 = vmatprep.mubr.f32.mxu0 %v7217_v7 }
  0xe5   : > { %6266 = vmatmul.mubr.msk.f32.gmra.mrb[94].mxu0 %vm365_vm1, %v1539_v27 }
  0xe6   : > { %1847 = vmatprep.mubr.f32.mxu0 %v7217_v7 }
  0xe9   : > { %6267 = vmatmul.mubr.msk.f32.gmra.mrb[96].mxu0 %vm365_vm1, %v1540_v28 }
  0xea   : > { %1853 = vmatprep.mubr.f32.mxu0 %v7217_v7 }
  0xed   : > { %6268 = vmatmul.mubr.msk.f32.gmra.mrb[98].mxu0 %vm365_vm1, %v1541_v29 }
  0xee   : > { %1859 = vmatprep.mubr.f32.mxu0 %v7217_v7 }
  0xf1   : > { %6269 = vmatmul.mubr.msk.f32.gmra.mrb[100].mxu0 %vm365_vm1, %v1542_v30 }
  0xf2   : > { %1865 = vmatprep.mubr.f32.mxu0 %v7217_v7 }
  0xf5   : > { %6270 = vmatmul.mubr.msk.f32.gmra.mrb[102].mxu0 %vm365_vm1, %v1543_v31 }
  0xf6   : > { %1871 = vmatprep.mubr.f32.mxu0 %v7217_v7 }
  0xf9   : > { %6271 = vmatmul.mubr.msk.f32.gmra.mrb[104].mxu0 %vm365_vm1, %v1544_v32 }
  0xfa   : > { %1877 = vmatprep.mubr.f32.mxu0 %v7217_v7 }
  0xfc   : > { %v608_v38 = vpop.f32.mrb[0].mxu0 }
  0xfd   : > { %v7681_v39 = vpop.f32.mrb[0].mxu1  ;;  %v610_v40 = vpop.f32.mrb[1].mxu0  ;;  %6272 = vmatmul.mubr.msk.f32.gmra.mrb[106].mxu0 %vm365_vm1, %v1545_v37  ;;  %v2614_v37 = vld [vmem:[%s10420_s3 + $0x48] sm:$0xff] }
  0xfe   : > { %v778_v41 = vpop.f32.mrb[1].mxu1  ;;  %801 = vst.msk [vmem:[#allocation3 + $0x8] sm:$0xff] %vm800_vm4, %v610_v40  ;;  %1883 = vmatprep.mubr.f32.mxu0 %v7217_v7 }
  0xff   : > { %857 = vst.msk [vmem:[#allocation3 + $0x1c8] sm:$0xff] %vm800_vm4, %v778_v41 }
 0x100   : > { %v614_v43 = vpop.f32.mrb[2].mxu0 }
 0x101   : > { %v7688_v44 = vpop.f32.mrb[2].mxu1  ;;  %v616_v47 = vpop.f32.mrb[3].mxu0  ;;  %6273 = vmatmul.mubr.msk.f32.gmra.mrb[108].mxu0 %vm365_vm1, %v1546_v42 }
 0x102   : > { %v784_v48 = vpop.f32.mrb[3].mxu1  ;;  %803 = vst.msk [vmem:[#allocation3 + $0x18] sm:$0xff] %vm800_vm4, %v616_v47  ;;  %1889 = vmatprep.mubr.f32.mxu0 %v7217_v7 }
 0x103   : > { %859 = vst.msk [vmem:[#allocation3 + $0x1d8] sm:$0xff] %vm800_vm4, %v784_v48 }
 0x104   : > { %v620_v51 = vpop.f32.mrb[4].mxu0 }
 0x105   : > { %v7700_v52 = vpop.f32.mrb[4].mxu1  ;;  %v622_v53 = vpop.f32.mrb[5].mxu0  ;;  %6274 = vmatmul.mubr.msk.f32.gmra.mrb[110].mxu0 %vm365_vm1, %v1547_v50  ;;  %v865_v4 = vld [vmem:[#allocation3 + $0x8] sm:$0xff] }
 0x106   : > { %v790_v54 = vpop.f32.mrb[5].mxu1  ;;  %805 = vst.msk [vmem:[#allocation3 + $0x28] sm:$0xff] %vm800_vm4, %v622_v53  ;;  %1895 = vmatprep.mubr.f32.mxu0 %v7217_v7 }
 0x107   : > { %861 = vst.msk [vmem:[#allocation3 + $0x1e8] sm:$0xff] %vm800_vm4, %v790_v54 }
 0x108   : > { %v626_v56 = vpop.f32.mrb[6].mxu0 }
 0x109   : > { %v7707_v57 = vpop.f32.mrb[6].mxu1  ;;  %v628_v58 = vpop.f32.mrb[7].mxu0  ;;  %6275 = vmatmul.mubr.msk.f32.gmra.mrb[112].mxu0 %vm365_vm1, %v1548_v55  ;;  %v867_v13 = vld [vmem:[#allocation3 + $0x18] sm:$0xff] }
 0x10a   : > { %v796_v59 = vpop.f32.mrb[7].mxu1  ;;  %807 = vst.msk [vmem:[#allocation3 + $0x38] sm:$0xff] %vm800_vm4, %v628_v58  ;;  %1901 = vmatprep.mubr.f32.mxu0 %v7217_v7  ;;  %v2616_v58 = vld [vmem:[%s10420_s3 + $0x58] sm:$0xff] }
 0x10b   : > { %863 = vst.msk [vmem:[#allocation3 + $0x1f8] sm:$0xff] %vm800_vm4, %v796_v59 }
 0x10c   : > { %v632_v63 = vpop.f32.mrb[8].mxu0 }
 0x10d   : > { %v1137_v0 = vpop.f32.mrb[8].mxu1  ;;  %v634_v3 = vpop.f32.mrb[9].mxu0  ;;  %6276 = vmatmul.mubr.msk.f32.gmra.mrb[114].mxu0 %vm365_vm1, %v1549_v60  ;;  %v869_v23 = vld [vmem:[#allocation3 + $0x28] sm:$0xff] }
 0x10e   : > { %v7719_v2 = vadd.f32 %v1137_v0, %v608_v38  ;;  %v1139_v5 = vpop.f32.mrb[9].mxu1  ;;  %809 = vst.msk [vmem:[#allocation3 + $0x48] sm:$0xff] %vm800_vm4, %v634_v3  ;;  %1907 = vmatprep.mubr.f32.mxu0 %v7217_v7 }
 0x10f   : > { %v1329_v6 = vadd.f32 %v1139_v5, %v865_v4 }
 0x110   : > { %v638_v9 = vpop.f32.mrb[10].mxu0 }
 0x111   : > { %1393 = vst.msk [vmem:[#allocation3 + $0x8] sm:$0xff] %vm800_vm4, %v1329_v6  ;;  %v1143_v10 = vpop.f32.mrb[10].mxu1  ;;  %v640_v12 = vpop.f32.mrb[11].mxu0  ;;  %6277 = vmatmul.mubr.msk.f32.gmra.mrb[116].mxu0 %vm365_vm1, %v1550_v8  ;;  %v871_v31 = vld [vmem:[#allocation3 + $0x38] sm:$0xff] }
 0x112   : > { %v7726_v11 = vadd.f32 %v1143_v10, %v614_v43  ;;  %v1145_v14 = vpop.f32.mrb[11].mxu1  ;;  %811 = vst.msk [vmem:[#allocation3 + $0x58] sm:$0xff] %vm800_vm4, %v640_v12  ;;  %1913 = vmatprep.mubr.f32.mxu0 %v7217_v7 }
 0x113   : > { %v1331_v15 = vadd.f32 %v1145_v14, %v867_v13 }
 0x114   : > { %v644_v17 = vpop.f32.mrb[12].mxu0 }
 0x115   : > { %1395 = vst.msk [vmem:[#allocation3 + $0x18] sm:$0xff] %vm800_vm4, %v1331_v15  ;;  %v1149_v18 = vpop.f32.mrb[12].mxu1  ;;  %v646_v22 = vpop.f32.mrb[13].mxu0  ;;  %6278 = vmatmul.mubr.msk.f32.gmra.mrb[118].mxu0 %vm365_vm1, %v1551_v16  ;;  %v873_v41 = vld [vmem:[#allocation3 + $0x48] sm:$0xff]  ;;  %vm4921_vm1 = vcmask 392192  }
 0x116   : > { %v7738_v21 = vadd.f32 %v1149_v18, %v620_v51  ;;  %v1151_v24 = vpop.f32.mrb[13].mxu1  ;;  %813 = vst.msk [vmem:[#allocation3 + $0x68] sm:$0xff] %vm800_vm4, %v646_v22  ;;  %3260 = vmatprep.mubr.f32.mxu0 %v7217_v7  ;;  %v2613_v7 = vld [vmem:[%s10420_s3 + $0x40] sm:$0xff] }
 0x117   : > { %v1333_v26 = vadd.f32 %v1151_v24, %v869_v23  ;;  %v6743_v43 = vpack.c.bf16 %v2614_v37, %v2613_v7  ;;  %v2617_v18 = vld [vmem:[%s10420_s3 + $0x60] sm:$0xff] }
 0x118   : > { %v650_v27 = vpop.f32.mrb[14].mxu0  ;;  %v6749_v23 = vpack.c.bf16 %v2618_v19, %v2617_v18 }
 0x119   : > { %1397 = vst.msk [vmem:[#allocation3 + $0x28] sm:$0xff] %vm800_vm4, %v1333_v26  ;;  %v1155_v28 = vpop.f32.mrb[14].mxu1  ;;  %v652_v30 = vpop.f32.mrb[15].mxu0  ;;  %6744 = vmatpush1.bf16.msra.mxu1 %v6743_v43  ;;  %v875_v50 = vld [vmem:[#allocation3 + $0x58] sm:$0xff] }
 0x11a   : > { %v7745_v29 = vadd.f32 %v1155_v28, %v626_v56  ;;  %v1157_v32 = vpop.f32.mrb[15].mxu1  ;;  %815 = vst.msk [vmem:[#allocation3 + $0x78] sm:$0xff] %vm800_vm4, %v652_v30  ;;  %6745 = vmatprep.subr.bf16.mxu1 %v10429_v33  ;;  %v2615_v56 = vld [vmem:[%s10420_s3 + $0x50] sm:$0xff] }
 0x11b   : > { %v1335_v34 = vadd.f32 %v1157_v32, %v871_v31 }
 0x11c   : > { %v656_v35 = vpop.f32.mrb[16].mxu0 }
 0x11d   : > { %1399 = vst.msk [vmem:[#allocation3 + $0x38] sm:$0xff] %vm800_vm4, %v1335_v34  ;;  %v1161_v36 = vpop.f32.mrb[16].mxu1  ;;  %v658_v40 = vpop.f32.mrb[17].mxu0  ;;  %v877_v61 = vld [vmem:[#allocation3 + $0x68] sm:$0xff] }
 0x11e   : > { %v7755_v38 = vadd.f32 %v1161_v36, %v632_v63  ;;  %v1163_v42 = vpop.f32.mrb[17].mxu1  ;;  %817 = vst.msk [vmem:[#allocation3 + $0x88] sm:$0xff] %vm800_vm4, %v658_v40  ;;  %v6746_v63 = vpack.c.bf16 %v2616_v58, %v2615_v56 }
 0x11f   : > { %v1337_v45 = vadd.f32 %v1163_v42, %v873_v41  ;;  %v2619_v41 = vld [vmem:[%s10420_s3 + $0x70] sm:$0xff]  ;;  %v2620_v42 = vld [vmem:[%s10420_s3 + $0x78] sm:$0xff] }
 0x120   : > { %v662_v46 = vpop.f32.mrb[18].mxu0  ;;  %6747 = vmatpush1.bf16.msra.mxu1 %v6746_v63  ;;  %v2621_v63 = vld [vmem:[%s10420_s3 + $0x80] sm:$0xff] }
 0x121   : > { %1401 = vst.msk [vmem:[#allocation3 + $0x48] sm:$0xff] %vm800_vm4, %v1337_v45  ;;  %v1167_v47 = vpop.f32.mrb[18].mxu1  ;;  %v664_v49 = vpop.f32.mrb[19].mxu0  ;;  %6748 = vmatprep.subr.bf16.mxu1 %v10429_v33  ;;  %v879_v6 = vld [vmem:[#allocation3 + $0x78] sm:$0xff] }
 0x122   : > { %v7760_v48 = vadd.f32 %v1167_v47, %v638_v9  ;;  %v1169_v51 = vpop.f32.mrb[19].mxu1  ;;  %819 = vst.msk [vmem:[#allocation3 + $0x98] sm:$0xff] %vm800_vm4, %v664_v49  ;;  %v6752_v49 = vpack.c.bf16 %v2620_v42, %v2619_v41 }
 0x123   : > { %v1339_v53 = vadd.f32 %v1169_v51, %v875_v50 }
 0x124   : > { %v668_v54 = vpop.f32.mrb[20].mxu0  ;;  %6750 = vmatpush1.bf16.msra.mxu1 %v6749_v23 }
 0x125   : > { %1403 = vst.msk [vmem:[#allocation3 + $0x58] sm:$0xff] %vm800_vm4, %v1339_v53  ;;  %v1173_v55 = vpop.f32.mrb[20].mxu1  ;;  %v670_v60 = vpop.f32.mrb[21].mxu0  ;;  %v881_v15 = vld [vmem:[#allocation3 + $0x88] sm:$0xff]  ;;  %6751 = vmatprep.subr.bf16.mxu1 %v10429_v33 }
 0x126   : > { %v7770_v59 = vadd.f32 %v1173_v55, %v644_v17  ;;  %v1175_v62 = vpop.f32.mrb[21].mxu1  ;;  %821 = vst.msk [vmem:[#allocation3 + $0xa8] sm:$0xff] %vm800_vm4, %v670_v60 }
 0x127   : > { %v1341_v0 = vadd.f32 %v1175_v62, %v877_v61 }
 0x128   : > { %v674_v1 = vpop.f32.mrb[22].mxu0  ;;  %6753 = vmatpush1.bf16.msra.mxu1 %v6752_v49 }
 0x129   : > { %1405 = vst.msk [vmem:[#allocation3 + $0x68] sm:$0xff] %vm800_vm4, %v1341_v0  ;;  %v1179_v3 = vpop.f32.mrb[22].mxu1  ;;  %v676_v5 = vpop.f32.mrb[23].mxu0  ;;  %v883_v26 = vld [vmem:[#allocation3 + $0x98] sm:$0xff]  ;;  %6754 = vmatprep.subr.bf16.mxu1 %v10429_v33  ;;  %v2622_v0 = vld [vmem:[%s10420_s3 + $0x88] sm:$0xff] }
 0x12a   : > { %v7775_v4 = vadd.f32 %v1179_v3, %v650_v27  ;;  %v1181_v8 = vpop.f32.mrb[23].mxu1  ;;  %823 = vst.msk [vmem:[#allocation3 + $0xb8] sm:$0xff] %vm800_vm4, %v676_v5 }
 0x12b   : > { %v1343_v9 = vadd.f32 %v1181_v8, %v879_v6  ;;  %v6755_v8 = vpack.c.bf16 %v2622_v0, %v2621_v63 }
 0x12c   : > { %v680_v10 = vpop.f32.mrb[24].mxu0 }
 0x12d   : > { %1407 = vst.msk [vmem:[#allocation3 + $0x78] sm:$0xff] %vm800_vm4, %v1343_v9  ;;  %v1185_v12 = vpop.f32.mrb[24].mxu1  ;;  %v682_v14 = vpop.f32.mrb[25].mxu0  ;;  %6756 = vmatpush1.bf16.msra.mxu1 %v6755_v8 }
 0x12e   : > { %v7779_v13 = vadd.f32 %v1185_v12, %v656_v35  ;;  %v1187_v16 = vpop.f32.mrb[25].mxu1  ;;  %825 = vst.msk [vmem:[#allocation3 + $0xc8] sm:$0xff] %vm800_vm4, %v682_v14  ;;  %v885_v35 = vld [vmem:[#allocation3 + $0xa8] sm:$0xff]  ;;  %6757 = vmatprep.subr.bf16.mxu1 %v10429_v33 }
 0x12f   : > { %v1345_v17 = vadd.f32 %v1187_v16, %v881_v15 }
 0x130   : > { %v686_v20 = vpop.f32.mrb[26].mxu0 }
 0x131   : > { %1409 = vst.msk [vmem:[#allocation3 + $0x88] sm:$0xff] %vm800_vm4, %v1345_v17  ;;  %v1191_v22 = vpop.f32.mrb[26].mxu1  ;;  %v688_v25 = vpop.f32.mrb[27].mxu0 }
 0x132   : > { %v7789_v24 = vadd.f32 %v1191_v22, %v662_v46  ;;  %v1193_v27 = vpop.f32.mrb[27].mxu1  ;;  %827 = vst.msk [vmem:[#allocation3 + $0xd8] sm:$0xff] %vm800_vm4, %v688_v25  ;;  %v887_v46 = vld [vmem:[#allocation3 + $0xb8] sm:$0xff] }
 0x133   : > { %v1347_v28 = vadd.f32 %v1193_v27, %v883_v26 }
 0x134   : > { %v692_v30 = vpop.f32.mrb[28].mxu0 }
 0x135   : > { %1411 = vst.msk [vmem:[#allocation3 + $0x98] sm:$0xff] %vm800_vm4, %v1347_v28  ;;  %v1197_v31 = vpop.f32.mrb[28].mxu1  ;;  %v694_v34 = vpop.f32.mrb[29].mxu0  ;;  %v889_v56 = vld [vmem:[#allocation3 + $0xc8] sm:$0xff] }
 0x136   : > { %v7794_v32 = vadd.f32 %v1197_v31, %v668_v54  ;;  %v1199_v36 = vpop.f32.mrb[29].mxu1  ;;  %829 = vst.msk [vmem:[#allocation3 + $0xe8] sm:$0xff] %vm800_vm4, %v694_v34  ;;  %v2623_v28 = vld [vmem:[%s10420_s3 + $0x90] sm:$0xff] }
 0x137   : > { %v1349_v7 = vadd.f32 %v1199_v36, %v885_v35 }
 0x138   : > { %v698_v37 = vpop.f32.mrb[30].mxu0 }
 0x139   : > { %1413 = vst.msk [vmem:[#allocation3 + $0xa8] sm:$0xff] %vm800_vm4, %v1349_v7  ;;  %v1203_v40 = vpop.f32.mrb[30].mxu1  ;;  %v700_v45 = vpop.f32.mrb[31].mxu0  ;;  %v891_v5 = vld [vmem:[#allocation3 + $0xd8] sm:$0xff] }
 0x13a   : > { %v7804_v43 = vadd.f32 %v1203_v40, %v674_v1  ;;  %v1205_v47 = vpop.f32.mrb[31].mxu1  ;;  %831 = vst.msk [vmem:[#allocation3 + $0xf8] sm:$0xff] %vm800_vm4, %v700_v45 }
 0x13b   : > { %v1351_v50 = vadd.f32 %v1205_v47, %v887_v46 }
 0x13c   : > { %v704_v51 = vpop.f32.mrb[32].mxu0 }
 0x13d   : > { %1415 = vst.msk [vmem:[#allocation3 + $0xb8] sm:$0xff] %vm800_vm4, %v1351_v50  ;;  %v1209_v53 = vpop.f32.mrb[32].mxu1  ;;  %v706_v55 = vpop.f32.mrb[33].mxu0  ;;  %v893_v16 = vld [vmem:[#allocation3 + $0xe8] sm:$0xff] }
 0x13e   : > { %v7809_v54 = vadd.f32 %v1209_v53, %v680_v10  ;;  %v1211_v58 = vpop.f32.mrb[33].mxu1  ;;  %833 = vst.msk [vmem:[#allocation3 + $0x108] sm:$0xff] %vm800_vm4, %v706_v55 }
 0x13f   : > { %v1353_v60 = vadd.f32 %v1211_v58, %v889_v56  ;;  %v2625_v56 = vld [vmem:[%s10420_s3 + $0xa0] sm:$0xff]  ;;  %v2626_v58 = vld [vmem:[%s10420_s3 + $0xa8] sm:$0xff] }
 0x140   : > { %v710_v61 = vpop.f32.mrb[34].mxu0  ;;  %v6761_v0 = vpack.c.bf16 %v2626_v58, %v2625_v56 }
 0x141   : > { %1417 = vst.msk [vmem:[#allocation3 + $0xc8] sm:$0xff] %vm800_vm4, %v1353_v60  ;;  %v1215_v62 = vpop.f32.mrb[34].mxu1  ;;  %v712_v3 = vpop.f32.mrb[35].mxu0  ;;  %v895_v25 = vld [vmem:[#allocation3 + $0xf8] sm:$0xff] }
 0x142   : > { %v7819_v1 = vadd.f32 %v1215_v62, %v686_v20  ;;  %v1217_v6 = vpop.f32.mrb[35].mxu1  ;;  %835 = vst.msk [vmem:[#allocation3 + $0x118] sm:$0xff] %vm800_vm4, %v712_v3 }
 0x143   : > { %v1355_v9 = vadd.f32 %v1217_v6, %v891_v5 }
 0x144   : > { %v716_v10 = vpop.f32.mrb[36].mxu0 }
 0x145   : > { %1419 = vst.msk [vmem:[#allocation3 + $0xd8] sm:$0xff] %vm800_vm4, %v1355_v9  ;;  %v1221_v12 = vpop.f32.mrb[36].mxu1  ;;  %v718_v15 = vpop.f32.mrb[37].mxu0 }
 0x146   : > { %v7824_v14 = vadd.f32 %v1221_v12, %v692_v30  ;;  %v1223_v17 = vpop.f32.mrb[37].mxu1  ;;  %837 = vst.msk [vmem:[#allocation3 + $0x128] sm:$0xff] %vm800_vm4, %v718_v15  ;;  %v2624_v30 = vld [vmem:[%s10420_s3 + $0x98] sm:$0xff] }
 0x147   : > { %v1357_v18 = vadd.f32 %v1223_v17, %v893_v16  ;;  %v6758_v35 = vpack.c.bf16 %v2624_v30, %v2623_v28  ;;  %v2114_v30 = vlaneseq }
 0x148   : > { %v722_v19 = vpop.f32.mrb[38].mxu0 }
 0x149   : > { %1421 = vst.msk [vmem:[#allocation3 + $0xe8] sm:$0xff] %vm800_vm4, %v1357_v18  ;;  %v1227_v20 = vpop.f32.mrb[38].mxu1  ;;  %v724_v23 = vpop.f32.mrb[39].mxu0  ;;  %6759 = vmatpush1.bf16.msra.mxu1 %v6758_v35  ;;  %v899_v49 = vld [vmem:[#allocation3 + $0x118] sm:$0xff]  ;;  %v2627_v18 = vld [vmem:[%s10420_s3 + $0xb0] sm:$0xff] }
 0x14a   : > { %v7828_v22 = vadd.f32 %v1227_v20, %v698_v37  ;;  %v1229_v26 = vpop.f32.mrb[39].mxu1  ;;  %839 = vst.msk [vmem:[#allocation3 + $0x138] sm:$0xff] %vm800_vm4, %v724_v23  ;;  %v897_v37 = vld [vmem:[#allocation3 + $0x108] sm:$0xff]  ;;  %6760 = vmatprep.subr.bf16.mxu1 %v10429_v33  ;;  %v2628_v20 = vld [vmem:[%s10420_s3 + $0xb8] sm:$0xff] }
 0x14b   : > { %v1359_v27 = vadd.f32 %v1229_v26, %v895_v25 }
 0x14c   : > { %v728_v31 = vpop.f32.mrb[40].mxu0 }
 0x14d   : > { %1423 = vst.msk [vmem:[#allocation3 + $0xf8] sm:$0xff] %vm800_vm4, %v1359_v27  ;;  %v1233_v34 = vpop.f32.mrb[40].mxu1  ;;  %v730_v7 = vpop.f32.mrb[41].mxu0  ;;  %v901_v62 = vld [vmem:[#allocation3 + $0x128] sm:$0xff]  ;;  %6762 = vmatpush1.bf16.msra.mxu1 %v6761_v0  ;;  %v6764_v27 = vpack.c.bf16 %v2628_v20, %v2627_v18 }
 0x14e   : > { %v7838_v36 = vadd.f32 %v1233_v34, %v704_v51  ;;  %v1235_v40 = vpop.f32.mrb[41].mxu1  ;;  %841 = vst.msk [vmem:[#allocation3 + $0x148] sm:$0xff] %vm800_vm4, %v730_v7  ;;  %6763 = vmatprep.subr.bf16.mxu1 %v10429_v33 }
 0x14f   : > { %v1361_v41 = vadd.f32 %v1235_v40, %v897_v37 }
 0x150   : > { %v734_v42 = vpop.f32.mrb[42].mxu0 }
 0x151   : > { %1425 = vst.msk [vmem:[#allocation3 + $0x108] sm:$0xff] %vm800_vm4, %v1361_v41  ;;  %v1239_v45 = vpop.f32.mrb[42].mxu1  ;;  %v736_v47 = vpop.f32.mrb[43].mxu0  ;;  %v903_v12 = vld [vmem:[#allocation3 + $0x138] sm:$0xff]  ;;  %6765 = vmatpush1.bf16.msra.mxu1 %v6764_v27 }
 0x152   : > { %v7843_v46 = vadd.f32 %v1239_v45, %v710_v61  ;;  %v1241_v50 = vpop.f32.mrb[43].mxu1  ;;  %843 = vst.msk [vmem:[#allocation3 + $0x158] sm:$0xff] %vm800_vm4, %v736_v47  ;;  %6766 = vmatprep.subr.bf16.mxu1 %v10429_v33  ;;  %v7876_v45 = vshrl.u32 %v2114_v30, 7  ;;  %v1457_v30 = vld [vmem:[#allocation3 + $0x8] sm:$0xff] }
 0x153   : > { %v1363_v51 = vadd.f32 %v1241_v50, %v899_v49  ;;  %v2629_v50 = vld [vmem:[%s10420_s3 + $0xc0] sm:$0xff] }
 0x154   : > { %v740_v53 = vpop.f32.mrb[44].mxu0  ;;  %10525 = vst [vmem:[#allocation12_spill] sm:$0xff] %v7876_v45 }
 0x155   : > { %1427 = vst.msk [vmem:[#allocation3 + $0x118] sm:$0xff] %vm800_vm4, %v1363_v51  ;;  %v1245_v55 = vpop.f32.mrb[44].mxu1  ;;  %v742_v61 = vpop.f32.mrb[45].mxu0  ;;  %v905_v25 = vld [vmem:[#allocation3 + $0x148] sm:$0xff] }
 0x156   : > { %v7853_v60 = vadd.f32 %v1245_v55, %v716_v10  ;;  %v1247_v63 = vpop.f32.mrb[45].mxu1  ;;  %845 = vst.msk [vmem:[#allocation3 + $0x168] sm:$0xff] %vm800_vm4, %v742_v61 }
 0x157   : > { %v1365_v3 = vadd.f32 %v1247_v63, %v901_v62  ;;  %v10428_v63 = vsub.s32 0, %v7876_v45 }
 0x158   : > { %v746_v5 = vpop.f32.mrb[46].mxu0 }
 0x159   : > { %1429 = vst.msk [vmem:[#allocation3 + $0x128] sm:$0xff] %vm800_vm4, %v1365_v3  ;;  %v1251_v6 = vpop.f32.mrb[46].mxu1  ;;  %v748_v9 = vpop.f32.mrb[47].mxu0 }
 0x15a   : > { %v7858_v8 = vadd.f32 %v1251_v6, %v722_v19  ;;  %v1253_v10 = vpop.f32.mrb[47].mxu1  ;;  %847 = vst.msk [vmem:[#allocation3 + $0x178] sm:$0xff] %vm800_vm4, %v748_v9  ;;  %v7143_v6 = vld [vmem:[#allocation5] sm:$0xff] }
 0x15b   : > { %v1367_v15 = vadd.f32 %v1253_v10, %v903_v12 }
 0x15c   : > { %v752_v16 = vpop.f32.mrb[48].mxu0 }
 0x15d   : > { %1431 = vst.msk [vmem:[#allocation3 + $0x138] sm:$0xff] %vm800_vm4, %v1367_v15  ;;  %v1257_v17 = vpop.f32.mrb[48].mxu1  ;;  %v754_v23 = vpop.f32.mrb[49].mxu0  ;;  %v909_v56 = vld [vmem:[#allocation3 + $0x168] sm:$0xff] }
 0x15e   : > { %v7868_v19 = vadd.f32 %v1257_v17, %v728_v31  ;;  %v1259_v26 = vpop.f32.mrb[49].mxu1  ;;  %849 = vst.msk [vmem:[#allocation3 + $0x188] sm:$0xff] %vm800_vm4, %v754_v23  ;;  %v907_v31 = vld [vmem:[#allocation3 + $0x158] sm:$0xff] }
 0x15f   : > { %v1369_v28 = vadd.f32 %v1259_v26, %v905_v25  ;;  %v2631_v25 = vld [vmem:[%s10420_s3 + $0xd0] sm:$0xff] }
 0x160   : > { %v758_v34 = vpop.f32.mrb[50].mxu0 }
 0x161   : > { %1433 = vst.msk [vmem:[#allocation3 + $0x148] sm:$0xff] %vm800_vm4, %v1369_v28  ;;  %v1263_v35 = vpop.f32.mrb[50].mxu1  ;;  %v760_v37 = vpop.f32.mrb[51].mxu0  ;;  %v911_v10 = vld [vmem:[#allocation3 + $0x178] sm:$0xff] }
 0x162   : > { %v7873_v7 = vadd.f32 %v1263_v35, %v734_v42  ;;  %v1265_v40 = vpop.f32.mrb[51].mxu1  ;;  %851 = vst.msk [vmem:[#allocation3 + $0x198] sm:$0xff] %vm800_vm4, %v760_v37  ;;  %v2630_v42 = vld [vmem:[%s10420_s3 + $0xc8] sm:$0xff] }
 0x163   : > { %v1371_v41 = vadd.f32 %v1265_v40, %v907_v31  ;;  %v6767_v61 = vpack.c.bf16 %v2630_v42, %v2629_v50 }
 0x164   : > { %v764_v47 = vpop.f32.mrb[52].mxu0 }
 0x165   : > { %1435 = vst.msk [vmem:[#allocation3 + $0x158] sm:$0xff] %vm800_vm4, %v1371_v41  ;;  %v1269_v49 = vpop.f32.mrb[52].mxu1  ;;  %v766_v55 = vpop.f32.mrb[53].mxu0  ;;  %6768 = vmatpush1.bf16.msra.mxu1 %v6767_v61  ;;  %v913_v27 = vld [vmem:[#allocation3 + $0x188] sm:$0xff] }
 0x166   : > { %v7885_v51 = vadd.f32 %v1269_v49, %v740_v53  ;;  %v1271_v58 = vpop.f32.mrb[53].mxu1  ;;  %853 = vst.msk [vmem:[#allocation3 + $0x1a8] sm:$0xff] %vm800_vm4, %v766_v55  ;;  %v2112_v53 = vld [vmem:[%s10419_s2] sm:$0x3]  ;;  %2781 = vmatprep.subr.mxu1 %v7143_v6 }
 0x167   : > { %v1373_v62 = vadd.f32 %v1271_v58, %v909_v56  ;;  %v7900_v18 = vrot.slane %v2112_v53, %v10428_v63  ;;  %v1459_v56 = vld [vmem:[#allocation3 + $0x18] sm:$0xff] }
 0x168   : > { %v7890_v0 = vpop.f32.mrb[54].mxu0 }
 0x169   : > { %1437 = vst.msk [vmem:[#allocation3 + $0x168] sm:$0xff] %vm800_vm4, %v1373_v62  ;;  %v1275_v3 = vpop.f32.mrb[54].mxu1  ;;  %v772_v12 = vpop.f32.mrb[55].mxu0  ;;  %2782 = vmatpush1.msra.mxu1 %v2631_v25  ;;  %v915_v42 = vld [vmem:[#allocation3 + $0x198] sm:$0xff] }
 0x16a   : > { %v7895_v9 = vadd.f32 %v1275_v3, %v746_v5  ;;  %v1277_v15 = vpop.f32.mrb[55].mxu1  ;;  %855 = vst.msk [vmem:[#allocation3 + $0x1b8] sm:$0xff] %vm800_vm4, %v772_v12 }
 0x16b   : > { %v1375_v17 = vadd.f32 %v1277_v15, %v911_v10 }
 0x16c   : > { %v1729_v23 = vpop.f32.mrb[56].mxu0 }
 0x16d   : > { %1439 = vst.msk [vmem:[#allocation3 + $0x178] sm:$0xff] %vm800_vm4, %v1375_v17  ;;  %v1281_v20 = vpop.f32.mrb[56].mxu1  ;;  %v1920_v26 = vadd.f32 %v1729_v23, %v7719_v2  ;;  %v1731_v35 = vpop.f32.mrb[57].mxu0  ;;  %v917_v17 = vld [vmem:[#allocation3 + $0x1a8] sm:$0xff] }
 0x16e   : > { %v7906_v5 = vadd.f32 %v1281_v20, %v752_v16  ;;  %v1283_v28 = vpop.f32.mrb[57].mxu1  ;;  %v1921_v31 = vadd.f32 %v1731_v35, %v1457_v30  ;;  %v10427_v16 = vsub.s32 1, %v7876_v45  ;;  %v1461_v23 = vld [vmem:[#allocation3 + $0x28] sm:$0xff] }
 0x16f   : > { %v1377_v37 = vadd.f32 %v1283_v28, %v913_v27  ;;  %v7910_v40 = vadd.f32 %v7900_v18, %v1920_v26 }
 0x170   : > { %1985 = vst.msk [vmem:[#allocation3 + $0x8] sm:$0xff] %vm800_vm4, %v1921_v31  ;;  %v1735_v49 = vpop.f32.mrb[58].mxu0  ;;  %v7929_v12 = vrot.slane %v2112_v53, %v10427_v16 }
 0x171   : > { %1441 = vst.msk [vmem:[#allocation3 + $0x188] sm:$0xff] %vm800_vm4, %v1377_v37  ;;  %v1287_v41 = vpop.f32.mrb[58].mxu1  ;;  %v1922_v2 = vadd.f32 %v1735_v49, %v7726_v11  ;;  %v1737_v58 = vpop.f32.mrb[59].mxu0  ;;  %v10459_v61 = vmax.f32 %v7910_v40, 0.0  ;;  %v919_v31 = vld [vmem:[#allocation3 + $0x1b8] sm:$0xff] }
 0x172   : > { %v7915_v50 = vadd.f32 %v1287_v41, %v758_v34  ;;  %v1289_v55 = vpop.f32.mrb[59].mxu1  ;;  %v1923_v3 = vadd.f32 %v1737_v58, %v1459_v56  ;;  %v1463_v49 = vld [vmem:[#allocation3 + $0x38] sm:$0xff] }
 0x173   : > { %v1379_v62 = vadd.f32 %v1289_v55, %v915_v42  ;;  %2316 = vrot.lane.b32.xlu0 %v10459_v61, %s7220_s24  ;;  %v7923_v6 = vadd.f32 %v7900_v18, %v1922_v2 }
 0x174   : > { %1987 = vst.msk [vmem:[#allocation3 + $0x18] sm:$0xff] %vm800_vm4, %v1923_v3  ;;  %v1741_v34 = vpop.f32.mrb[60].mxu0 }
 0x175   : > { %1443 = vst.msk [vmem:[#allocation3 + $0x198] sm:$0xff] %vm800_vm4, %v1379_v62  ;;  %v1293_v11 = vpop.f32.mrb[60].mxu1  ;;  %v1924_v15 = vadd.f32 %v1741_v34, %v7738_v21  ;;  %v1743_v25 = vpop.f32.mrb[61].mxu0  ;;  %v10453_v26 = vmax.f32 %v7923_v6, 0.0 }
 0x176   : > { %v7931_v10 = vadd.f32 %v1293_v11, %v764_v47  ;;  %v1295_v20 = vpop.f32.mrb[61].mxu1  ;;  %v1925_v28 = vadd.f32 %v1743_v25, %v1461_v23 }
 0x177   : > { %v1381_v27 = vadd.f32 %v1295_v20, %v917_v17  ;;  %v2049_v30 = vld [vmem:[#allocation3 + $0x8] sm:$0xff]  ;;  %2320 = vrot.lane.b32.xlu1 %v10453_v26, %s7220_s24  ;;  %v7949_v58 = vadd.f32 %v7900_v18, %v1924_v15 }
 0x178   : > { %1989 = vst.msk [vmem:[#allocation3 + $0x28] sm:$0xff] %vm800_vm4, %v1925_v28  ;;  %v1747_v53 = vpop.f32.mrb[62].mxu0  ;;  %v7941_v21 = vadd.f32 %v7929_v12, %v2049_v30  ;;  %v921_v15 = vld [vmem:[#allocation3 + $0x1c8] sm:$0xff] }
 0x179   : > { %1445 = vst.msk [vmem:[#allocation3 + $0x1a8] sm:$0xff] %vm800_vm4, %v1381_v27  ;;  %v1299_v47 = vpop.f32.mrb[62].mxu1  ;;  %v1926_v37 = vadd.f32 %v1747_v53, %v7745_v29  ;;  %v1749_v2 = vpop.f32.mrb[63].mxu0  ;;  %v1465_v20 = vld [vmem:[#allocation3 + $0x48] sm:$0xff] }
 0x17a   : > { %v7944_v35 = vadd.f32 %v1299_v47, %v7890_v0  ;;  %v1301_v41 = vpop.f32.mrb[63].mxu1  ;;  %v1927_v55 = vadd.f32 %v1749_v2, %v1463_v49  ;;  %v10462_v56 = vmax.f32 %v7941_v21, 0.0  ;;  %v10447_v47 = vmax.f32 %v7949_v58, 0.0  ;;  %v923_v49 = vld [vmem:[#allocation3 + $0x1d8] sm:$0xff] }
 0x17b   : > { %v1383_v42 = vadd.f32 %v1301_v41, %v919_v31  ;;  %v2051_v62 = vld [vmem:[#allocation3 + $0x18] sm:$0xff]  ;;  %v7964_v25 = vadd.f32 %v7900_v18, %v1926_v37 }
 0x17c   : > { %1991 = vst.msk [vmem:[#allocation3 + $0x38] sm:$0xff] %vm800_vm4, %v1927_v55  ;;  %v1753_v3 = vpop.f32.mrb[64].mxu0  ;;  %2318 = vrot.lane.b32.xlu0 %v10462_v56, %s7220_s24  ;;  %v7957_v29 = vadd.f32 %v7929_v12, %v2051_v62 }
 0x17d   : > { %1447 = vst.msk [vmem:[#allocation3 + $0x1b8] sm:$0xff] %vm800_vm4, %v1383_v42  ;;  %v1305_v0 = vpop.f32.mrb[64].mxu1  ;;  %v1928_v34 = vadd.f32 %v1753_v3, %v7755_v38  ;;  %v1755_v23 = vpop.f32.mrb[65].mxu0  ;;  %v1467_v42 = vld [vmem:[#allocation3 + $0x58] sm:$0xff]  ;;  %v10441_v62 = vmax.f32 %v7964_v25, 0.0 }
 0x17e   : > { %v7960_v11 = vadd.f32 %v1305_v0, %v7681_v39  ;;  %v1307_v17 = vpop.f32.mrb[65].mxu1  ;;  %v1929_v28 = vadd.f32 %v1755_v23, %v1465_v20  ;;  %v10456_v30 = vmax.f32 %v7957_v29, 0.0 }
 0x17f   : > { %v1385_v27 = vadd.f32 %v1307_v17, %v921_v15  ;;  %v2053_v53 = vld [vmem:[#allocation3 + $0x28] sm:$0xff]  ;;  %v7986_v17 = vadd.f32 %v7900_v18, %v1928_v34 }
 0x180   : > { %1993 = vst.msk [vmem:[#allocation3 + $0x48] sm:$0xff] %vm800_vm4, %v1929_v28  ;;  %v1759_v38 = vpop.f32.mrb[66].mxu0  ;;  %2322 = vrot.lane.b32.xlu1 %v10456_v30, %s7220_s24  ;;  %2324 = vrot.lane.b32.xlu0 %v10447_v47, %s7220_s24  ;;  %v7977_v37 = vadd.f32 %v7929_v12, %v2053_v53  ;;  %v925_v28 = vld [vmem:[#allocation3 + $0x1e8] sm:$0xff] }
 0x181   : > { %1449 = vst.msk [vmem:[#allocation3 + $0x1c8] sm:$0xff] %vm800_vm4, %v1385_v27  ;;  %v1311_v39 = vpop.f32.mrb[66].mxu1  ;;  %v1930_v41 = vadd.f32 %v1759_v38, %v7760_v48  ;;  %v1761_v55 = vpop.f32.mrb[67].mxu0 }
 0x182   : > { %v7980_v31 = vadd.f32 %v1311_v39, %v7688_v44  ;;  %v1313_v2 = vpop.f32.mrb[67].mxu1  ;;  %v1931_v3 = vadd.f32 %v1761_v55, %v1467_v42  ;;  %v10450_v15 = vmax.f32 %v7977_v37, 0.0  ;;  %v1469_v39 = vld [vmem:[#allocation3 + $0x68] sm:$0xff] }
 0x183   : > { %v1387_v0 = vadd.f32 %v1313_v2, %v923_v49  ;;  %v2055_v20 = vld [vmem:[#allocation3 + $0x38] sm:$0xff]  ;;  %v8004_v49 = vadd.f32 %v7900_v18, %v1930_v41 }
 0x184   : > { %1995 = vst.msk [vmem:[#allocation3 + $0x58] sm:$0xff] %vm800_vm4, %v1931_v3  ;;  %v1765_v48 = vpop.f32.mrb[68].mxu0  ;;  %2326 = vrot.lane.b32.xlu1 %v10450_v15, %s7220_s24  ;;  %2328 = vrot.lane.b32.xlu0 %v10441_v62, %s7220_s24  ;;  %v7997_v23 = vadd.f32 %v7929_v12, %v2055_v20 }
 0x185   : > { %1451 = vst.msk [vmem:[#allocation3 + $0x1d8] sm:$0xff] %vm800_vm4, %v1387_v0  ;;  %v1317_v44 = vpop.f32.mrb[68].mxu1  ;;  %v1932_v27 = vadd.f32 %v1765_v48, %v7770_v59  ;;  %v1767_v38 = vpop.f32.mrb[69].mxu0  ;;  %v10435_v0 = vmax.f32 %v7986_v17, 0.0  ;;  %v927_v48 = vld [vmem:[#allocation3 + $0x1f8] sm:$0xff] }
 0x186   : > { %v8000_v34 = vadd.f32 %v1317_v44, %v7700_v52  ;;  %v1319_v53 = vpop.f32.mrb[69].mxu1  ;;  %v1933_v42 = vadd.f32 %v1767_v38, %v1469_v39  ;;  %v10444_v55 = vmax.f32 %v7997_v23, 0.0  ;;  %v10431_v38 = vmax.f32 %v8004_v49, 0.0 }
 0x187   : > { %v1389_v2 = vadd.f32 %v1319_v53, %v925_v28  ;;  %v2057_v3 = vld [vmem:[#allocation3 + $0x48] sm:$0xff]  ;;  %v1471_v53 = vld [vmem:[#allocation3 + $0x78] sm:$0xff]  ;;  %v8026_v63 = vadd.f32 %v7900_v18, %v1932_v27 }
 0x188   : > { %1997 = vst.msk [vmem:[#allocation3 + $0x68] sm:$0xff] %vm800_vm4, %v1933_v42  ;;  %v1771_v59 = vpop.f32.mrb[70].mxu0  ;;  %2330 = vrot.lane.b32.xlu1 %v10444_v55, %s7220_s24  ;;  %2332 = vrot.lane.b32.xlu0 %v10435_v0, %s7220_s24  ;;  %v8017_v41 = vadd.f32 %v7929_v12, %v2057_v3 }
 0x189   : > { %1453 = vst.msk [vmem:[#allocation3 + $0x1e8] sm:$0xff] %vm800_vm4, %v1389_v2  ;;  %v1323_v52 = vpop.f32.mrb[70].mxu1  ;;  %v1934_v44 = vadd.f32 %v1771_v59, %v7775_v4  ;;  %v1773_v39 = vpop.f32.mrb[71].mxu0 }
 0x18a   : > { %v8020_v20 = vadd.f32 %v1323_v52, %v7707_v57  ;;  %v1325_v28 = vpop.f32.mrb[71].mxu1  ;;  %v1935_v42 = vadd.f32 %v1773_v39, %v1471_v53  ;;  %v10438_v16 = vmax.f32 %v8017_v41, 0.0  ;;  %v1473_v52 = vld [vmem:[#allocation3 + $0x88] sm:$0xff]  ;;  %v10433_v53 = vmax.f32 %v8026_v63, 0.0 }
 0x18b   : > { %v1391_v2 = vadd.f32 %v1325_v28, %v927_v48  ;;  %v2059_v3 = vld [vmem:[#allocation3 + $0x58] sm:$0xff]  ;;  %v8043_v39 = vadd.f32 %v7900_v18, %v1934_v44 }
 0x18c   : > { %1999 = vst.msk [vmem:[#allocation3 + $0x78] sm:$0xff] %vm800_vm4, %v1935_v42  ;;  %v1777_v57 = vpop.f32.mrb[72].mxu0  ;;  %2334 = vrot.lane.b32.xlu1 %v10438_v16, %s7220_s24  ;;  %2336 = vrot.lane.b32.xlu0 %v10431_v38, %s7220_s24  ;;  %v8037_v4 = vadd.f32 %v7929_v12, %v2059_v3 }
 0x18d   : > { %1455 = vst.msk [vmem:[#allocation3 + $0x1f8] sm:$0xff] %vm800_vm4, %v1391_v2  ;;  %v1936_v27 = vadd.f32 %v1777_v57, %v7779_v13  ;;  %v1779_v59 = vpop.f32.mrb[73].mxu0  ;;  %v1475_v57 = vld [vmem:[#allocation3 + $0x98] sm:$0xff] }
 0x18e   : > { %v1937_v48 = vadd.f32 %v1779_v59, %v1473_v52  ;;  %v10432_v28 = vmax.f32 %v8037_v4, 0.0 }
 0x18f   : > { %v2061_v2 = vld [vmem:[#allocation3 + $0x68] sm:$0xff]  ;;  %v8059_v33 = vadd.f32 %v7900_v18, %v1936_v27 }
 0x190   : > { %2001 = vst.msk [vmem:[#allocation3 + $0x88] sm:$0xff] %vm800_vm4, %v1937_v48  ;;  %v1783_v42 = vpop.f32.mrb[74].mxu0  ;;  %2338 = vrot.lane.b32.xlu1 %v10432_v28, %s7220_s24  ;;  %2340 = vrot.lane.b32.xlu0 %v10433_v53, %s7220_s24  ;;  %v8053_v13 = vadd.f32 %v7929_v12, %v2061_v2  ;;  %v10436_v48 = vmax.f32 %v8043_v39, 0.0 }
 0x191   : > { %v1938_v3 = vadd.f32 %v1783_v42, %v7789_v24  ;;  %v1785_v44 = vpop.f32.mrb[75].mxu0  ;;  %v1477_v42 = vld [vmem:[#allocation3 + $0xa8] sm:$0xff] }
 0x192   : > { %v1939_v52 = vadd.f32 %v1785_v44, %v1475_v57  ;;  %v10434_v59 = vmax.f32 %v8053_v13, 0.0 }
 0x193   : > { %v2063_v38 = vld [vmem:[#allocation3 + $0x78] sm:$0xff]  ;;  %v8075_v53 = vadd.f32 %v7900_v18, %v1938_v3 }
 0x194   : > { %2003 = vst.msk [vmem:[#allocation3 + $0x98] sm:$0xff] %vm800_vm4, %v1939_v52  ;;  %v1789_v28 = vpop.f32.mrb[76].mxu0  ;;  %2342 = vrot.lane.b32.xlu1 %v10434_v59, %s7220_s24  ;;  %2344 = vrot.lane.b32.xlu0 %v10436_v48, %s7220_s24  ;;  %v8069_v24 = vadd.f32 %v7929_v12, %v2063_v38  ;;  %v10439_v52 = vmax.f32 %v8059_v33, 0.0 }
 0x195   : > { %v1940_v2 = vadd.f32 %v1789_v28, %v7794_v32  ;;  %v1791_v27 = vpop.f32.mrb[77].mxu0  ;;  %v1479_v28 = vld [vmem:[#allocation3 + $0xb8] sm:$0xff] }
 0x196   : > { %v1941_v57 = vadd.f32 %v1791_v27, %v1477_v42  ;;  %v10437_v44 = vmax.f32 %v8069_v24, 0.0 }
 0x197   : > { %v2065_v59 = vld [vmem:[#allocation3 + $0x88] sm:$0xff]  ;;  %v8091_v48 = vadd.f32 %v7900_v18, %v1940_v2 }
 0x198   : > { %2005 = vst.msk [vmem:[#allocation3 + $0xa8] sm:$0xff] %vm800_vm4, %v1941_v57  ;;  %v1795_v0 = vpop.f32.mrb[78].mxu0  ;;  %2346 = vrot.lane.b32.xlu1 %v10437_v44, %s7220_s24  ;;  %2348 = vrot.lane.b32.xlu0 %v10439_v52, %s7220_s24  ;;  %v8085_v32 = vadd.f32 %v7929_v12, %v2065_v59  ;;  %v10442_v57 = vmax.f32 %v8075_v53, 0.0  ;;  %v1481_v59 = vld [vmem:[#allocation3 + $0xc8] sm:$0xff] }
 0x199   : > { %v1942_v38 = vadd.f32 %v1795_v0, %v7804_v43  ;;  %v1797_v3 = vpop.f32.mrb[79].mxu0 }
 0x19a   : > { %v1943_v42 = vadd.f32 %v1797_v3, %v1479_v28  ;;  %v10440_v27 = vmax.f32 %v8085_v32, 0.0 }
 0x19b   : > { %v2067_v44 = vld [vmem:[#allocation3 + $0x98] sm:$0xff]  ;;  %v8107_v52 = vadd.f32 %v7900_v18, %v1942_v38 }
 0x19c   : > { %2007 = vst.msk [vmem:[#allocation3 + $0xb8] sm:$0xff] %vm800_vm4, %v1943_v42  ;;  %v1801_v16 = vpop.f32.mrb[80].mxu0  ;;  %2350 = vrot.lane.b32.xlu1 %v10440_v27, %s7220_s24  ;;  %2352 = vrot.lane.b32.xlu0 %v10442_v57, %s7220_s24  ;;  %v8101_v43 = vadd.f32 %v7929_v12, %v2067_v44  ;;  %v10445_v42 = vmax.f32 %v8091_v48, 0.0  ;;  %v1483_v44 = vld [vmem:[#allocation3 + $0xd8] sm:$0xff] }
 0x19d   : > { %v1944_v0 = vadd.f32 %v1801_v16, %v7809_v54  ;;  %v1803_v2 = vpop.f32.mrb[81].mxu0 }
 0x19e   : > { %v1945_v28 = vadd.f32 %v1803_v2, %v1481_v59  ;;  %v10443_v3 = vmax.f32 %v8101_v43, 0.0 }
 0x19f   : > { %v2069_v27 = vld [vmem:[#allocation3 + $0xa8] sm:$0xff]  ;;  %v8123_v57 = vadd.f32 %v7900_v18, %v1944_v0 }
 0x1a0   : > { %2009 = vst.msk [vmem:[#allocation3 + $0xc8] sm:$0xff] %vm800_vm4, %v1945_v28  ;;  %v1807_v62 = vpop.f32.mrb[82].mxu0  ;;  %2354 = vrot.lane.b32.xlu1 %v10443_v3, %s7220_s24  ;;  %2356 = vrot.lane.b32.xlu0 %v10445_v42, %s7220_s24  ;;  %v8117_v54 = vadd.f32 %v7929_v12, %v2069_v27  ;;  %v10448_v28 = vmax.f32 %v8107_v52, 0.0  ;;  %v1485_v27 = vld [vmem:[#allocation3 + $0xe8] sm:$0xff] }
 0x1a1   : > { %v1946_v16 = vadd.f32 %v1807_v62, %v7819_v1  ;;  %v1809_v38 = vpop.f32.mrb[83].mxu0 }
 0x1a2   : > { %v1947_v59 = vadd.f32 %v1809_v38, %v1483_v44  ;;  %v10446_v2 = vmax.f32 %v8117_v54, 0.0 }
 0x1a3   : > { %v2071_v3 = vld [vmem:[#allocation3 + $0xb8] sm:$0xff]  ;;  %v8139_v42 = vadd.f32 %v7900_v18, %v1946_v16 }
 0x1a4   : > { %2011 = vst.msk [vmem:[#allocation3 + $0xd8] sm:$0xff] %vm800_vm4, %v1947_v59  ;;  %v1813_v55 = vpop.f32.mrb[84].mxu0  ;;  %2358 = vrot.lane.b32.xlu1 %v10446_v2, %s7220_s24  ;;  %2360 = vrot.lane.b32.xlu0 %v10448_v28, %s7220_s24  ;;  %v8133_v1 = vadd.f32 %v7929_v12, %v2071_v3  ;;  %v10451_v59 = vmax.f32 %v8123_v57, 0.0  ;;  %v1487_v3 = vld [vmem:[#allocation3 + $0xf8] sm:$0xff] }
 0x1a5   : > { %v1948_v62 = vadd.f32 %v1813_v55, %v7824_v14  ;;  %v1815_v0 = vpop.f32.mrb[85].mxu0 }
 0x1a6   : > { %v1949_v44 = vadd.f32 %v1815_v0, %v1485_v27  ;;  %v10449_v38 = vmax.f32 %v8133_v1, 0.0 }
 0x1a7   : > { %v2073_v2 = vld [vmem:[#allocation3 + $0xc8] sm:$0xff]  ;;  %v8155_v28 = vadd.f32 %v7900_v18, %v1948_v62 }
 0x1a8   : > { %2013 = vst.msk [vmem:[#allocation3 + $0xe8] sm:$0xff] %vm800_vm4, %v1949_v44  ;;  %v1819_v47 = vpop.f32.mrb[86].mxu0  ;;  %2362 = vrot.lane.b32.xlu1 %v10449_v38, %s7220_s24  ;;  %2364 = vrot.lane.b32.xlu0 %v10451_v59, %s7220_s24  ;;  %v8149_v14 = vadd.f32 %v7929_v12, %v2073_v2  ;;  %v10454_v44 = vmax.f32 %v8139_v42, 0.0  ;;  %v1489_v2 = vld [vmem:[#allocation3 + $0x108] sm:$0xff] }
 0x1a9   : > { %v1950_v55 = vadd.f32 %v1819_v47, %v7828_v22  ;;  %v1821_v16 = vpop.f32.mrb[87].mxu0 }
 0x1aa   : > { %v1951_v27 = vadd.f32 %v1821_v16, %v1487_v3  ;;  %v10452_v0 = vmax.f32 %v8149_v14, 0.0 }
 0x1ab   : > { %v2075_v38 = vld [vmem:[#allocation3 + $0xd8] sm:$0xff]  ;;  %v8171_v59 = vadd.f32 %v7900_v18, %v1950_v55 }
 0x1ac   : > { %2015 = vst.msk [vmem:[#allocation3 + $0xf8] sm:$0xff] %vm800_vm4, %v1951_v27  ;;  %v1825_v15 = vpop.f32.mrb[88].mxu0  ;;  %2366 = vrot.lane.b32.xlu1 %v10452_v0, %s7220_s24  ;;  %2368 = vrot.lane.b32.xlu0 %v10454_v44, %s7220_s24  ;;  %v8165_v22 = vadd.f32 %v7929_v12, %v2075_v38  ;;  %v10457_v27 = vmax.f32 %v8155_v28, 0.0  ;;  %v1491_v38 = vld [vmem:[#allocation3 + $0x118] sm:$0xff] }
 0x1ad   : > { %v1952_v47 = vadd.f32 %v1825_v15, %v7838_v36  ;;  %v1827_v62 = vpop.f32.mrb[89].mxu0 }
 0x1ae   : > { %v1953_v3 = vadd.f32 %v1827_v62, %v1489_v2  ;;  %v10455_v16 = vmax.f32 %v8165_v22, 0.0 }
 0x1af   : > { %v2077_v0 = vld [vmem:[#allocation3 + $0xe8] sm:$0xff]  ;;  %v8187_v44 = vadd.f32 %v7900_v18, %v1952_v47 }
 0x1b0   : > { %2017 = vst.msk [vmem:[#allocation3 + $0x108] sm:$0xff] %vm800_vm4, %v1953_v3  ;;  %v1831_v26 = vpop.f32.mrb[90].mxu0  ;;  %2370 = vrot.lane.b32.xlu1 %v10455_v16, %s7220_s24  ;;  %2372 = vrot.lane.b32.xlu0 %v10457_v27, %s7220_s24  ;;  %v8181_v36 = vadd.f32 %v7929_v12, %v2077_v0  ;;  %v10460_v3 = vmax.f32 %v8171_v59, 0.0  ;;  %v1493_v0 = vld [vmem:[#allocation3 + $0x128] sm:$0xff] }
 0x1b1   : > { %v1954_v15 = vadd.f32 %v1831_v26, %v7843_v46  ;;  %v1833_v55 = vpop.f32.mrb[91].mxu0 }
 0x1b2   : > { %v1955_v2 = vadd.f32 %v1833_v55, %v1491_v38  ;;  %v10458_v62 = vmax.f32 %v8181_v36, 0.0 }
 0x1b3   : > { %v2079_v16 = vld [vmem:[#allocation3 + $0xf8] sm:$0xff]  ;;  %v8203_v27 = vadd.f32 %v7900_v18, %v1954_v15 }
 0x1b4   : > { %2019 = vst.msk [vmem:[#allocation3 + $0x118] sm:$0xff] %vm800_vm4, %v1955_v2  ;;  %v1837_v30 = vpop.f32.mrb[92].mxu0  ;;  %2374 = vrot.lane.b32.xlu1 %v10458_v62, %s7220_s24  ;;  %2376 = vrot.lane.b32.xlu0 %v10460_v3, %s7220_s24  ;;  %v8197_v46 = vadd.f32 %v7929_v12, %v2079_v16  ;;  %v10463_v2 = vmax.f32 %v8187_v44, 0.0  ;;  %v1495_v16 = vld [vmem:[#allocation3 + $0x138] sm:$0xff] }
 0x1b5   : > { %v1956_v26 = vadd.f32 %v1837_v30, %v7853_v60  ;;  %v1839_v47 = vpop.f32.mrb[93].mxu0 }
 0x1b6   : > { %v1957_v38 = vadd.f32 %v1839_v47, %v1493_v0  ;;  %v10461_v55 = vmax.f32 %v8197_v46, 0.0 }
 0x1b7   : > { %v2081_v62 = vld [vmem:[#allocation3 + $0x108] sm:$0xff]  ;;  %v8219_v3 = vadd.f32 %v7900_v18, %v1956_v26 }
 0x1b8   : > { %2021 = vst.msk [vmem:[#allocation3 + $0x128] sm:$0xff] %vm800_vm4, %v1957_v38  ;;  %v1843_v61 = vpop.f32.mrb[94].mxu0  ;;  %2378 = vrot.lane.b32.xlu1 %v10461_v55, %s7220_s24  ;;  %2380 = vrot.lane.b32.xlu0 %v10463_v2, %s7220_s24  ;;  %v8213_v60 = vadd.f32 %v7929_v12, %v2081_v62  ;;  %v10467_v38 = vmax.f32 %v8203_v27, 0.0  ;;  %v1497_v62 = vld [vmem:[#allocation3 + $0x148] sm:$0xff] }
 0x1b9   : > { %v1958_v30 = vadd.f32 %v1843_v61, %v7858_v8  ;;  %v1845_v15 = vpop.f32.mrb[95].mxu0  ;;  %10526 = vst [vmem:[#allocation13_spill] sm:$0xff] %v8219_v3 }
 0x1ba   : > { %v1959_v0 = vadd.f32 %v1845_v15, %v1495_v16  ;;  %v10464_v47 = vmax.f32 %v8213_v60, 0.0 }
 0x1bb   : > { %v2083_v55 = vld [vmem:[#allocation3 + $0x118] sm:$0xff]  ;;  %v8235_v2 = vadd.f32 %v7900_v18, %v1958_v30 }
 0x1bc   : > { %2023 = vst.msk [vmem:[#allocation3 + $0x138] sm:$0xff] %vm800_vm4, %v1959_v0  ;;  %v1849_v56 = vpop.f32.mrb[96].mxu0  ;;  %2382 = vrot.lane.b32.xlu1 %v10464_v47, %s7220_s24  ;;  %2384 = vrot.lane.b32.xlu0 %v10467_v38, %s7220_s24  ;;  %v8229_v8 = vadd.f32 %v7929_v12, %v2083_v55  ;;  %v10470_v0 = vmax.f32 %v8219_v3, 0.0  ;;  %v1499_v55 = vld [vmem:[#allocation3 + $0x158] sm:$0xff] }
 0x1bd   : > { %v1960_v61 = vadd.f32 %v1849_v56, %v7868_v19  ;;  %v1851_v26 = vpop.f32.mrb[97].mxu0  ;;  %10527 = vst [vmem:[#allocation14_spill] sm:$0xff] %v8235_v2 }
 0x1be   : > { %v1961_v16 = vadd.f32 %v1851_v26, %v1497_v62  ;;  %v10468_v15 = vmax.f32 %v8229_v8, 0.0 }
 0x1bf   : > { %v2085_v47 = vld [vmem:[#allocation3 + $0x128] sm:$0xff]  ;;  %v8251_v38 = vadd.f32 %v7900_v18, %v1960_v61 }
 0x1c0   : > { %2025 = vst.msk [vmem:[#allocation3 + $0x148] sm:$0xff] %vm800_vm4, %v1961_v16  ;;  %v1855_v45 = vpop.f32.mrb[98].mxu0  ;;  %2386 = vrot.lane.b32.xlu1 %v10468_v15, %s7220_s24  ;;  %2388 = vrot.lane.b32.xlu0 %v10470_v0, %s7220_s24  ;;  %v8245_v19 = vadd.f32 %v7929_v12, %v2085_v47  ;;  %v10473_v16 = vmax.f32 %v8235_v2, 0.0  ;;  %v1501_v47 = vld [vmem:[#allocation3 + $0x168] sm:$0xff] }
 0x1c1   : > { %v1962_v56 = vadd.f32 %v1855_v45, %v7873_v7  ;;  %v1857_v30 = vpop.f32.mrb[99].mxu0  ;;  %10528 = vst [vmem:[#allocation15_spill] sm:$0xff] %v8251_v38 }
 0x1c2   : > { %v1963_v62 = vadd.f32 %v1857_v30, %v1499_v55  ;;  %v10471_v26 = vmax.f32 %v8245_v19, 0.0 }
 0x1c3   : > { %v2087_v15 = vld [vmem:[#allocation3 + $0x138] sm:$0xff]  ;;  %v8267_v0 = vadd.f32 %v7900_v18, %v1962_v56 }
 0x1c4   : > { %2027 = vst.msk [vmem:[#allocation3 + $0x158] sm:$0xff] %vm800_vm4, %v1963_v62  ;;  %v1861_v3 = vpop.f32.mrb[100].mxu0  ;;  %2390 = vrot.lane.b32.xlu1 %v10471_v26, %s7220_s24  ;;  %2392 = vrot.lane.b32.xlu0 %v10473_v16, %s7220_s24  ;;  %v8261_v7 = vadd.f32 %v7929_v12, %v2087_v15  ;;  %v10476_v62 = vmax.f32 %v8251_v38, 0.0  ;;  %v1503_v15 = vld [vmem:[#allocation3 + $0x178] sm:$0xff] }
 0x1c5   : > { %v1964_v45 = vadd.f32 %v1861_v3, %v7885_v51  ;;  %v1863_v61 = vpop.f32.mrb[101].mxu0  ;;  %10529 = vst [vmem:[#allocation16_spill] sm:$0xff] %v8267_v0 }
 0x1c6   : > { %v1965_v55 = vadd.f32 %v1863_v61, %v1501_v47  ;;  %v10474_v30 = vmax.f32 %v8261_v7, 0.0 }
 0x1c7   : > { %v2089_v26 = vld [vmem:[#allocation3 + $0x148] sm:$0xff]  ;;  %v8283_v16 = vadd.f32 %v7900_v18, %v1964_v45 }
 0x1c8   : > { %2029 = vst.msk [vmem:[#allocation3 + $0x168] sm:$0xff] %vm800_vm4, %v1965_v55  ;;  %v1867_v2 = vpop.f32.mrb[102].mxu0  ;;  %2394 = vrot.lane.b32.xlu1 %v10474_v30, %s7220_s24  ;;  %2396 = vrot.lane.b32.xlu0 %v10476_v62, %s7220_s24  ;;  %v8277_v51 = vadd.f32 %v7929_v12, %v2089_v26  ;;  %v10479_v55 = vmax.f32 %v8267_v0, 0.0  ;;  %v1505_v26 = vld [vmem:[#allocation3 + $0x188] sm:$0xff] }
 0x1c9   : > { %v1966_v3 = vadd.f32 %v1867_v2, %v7895_v9  ;;  %v1869_v56 = vpop.f32.mrb[103].mxu0  ;;  %10530 = vst [vmem:[#allocation17_spill] sm:$0xff] %v8283_v16 }
 0x1ca   : > { %v1967_v47 = vadd.f32 %v1869_v56, %v1503_v15  ;;  %v10477_v61 = vmax.f32 %v8277_v51, 0.0 }
 0x1cb   : > { %v2091_v30 = vld [vmem:[#allocation3 + $0x158] sm:$0xff]  ;;  %v8299_v62 = vadd.f32 %v7900_v18, %v1966_v3 }
 0x1cc   : > { %2031 = vst.msk [vmem:[#allocation3 + $0x178] sm:$0xff] %vm800_vm4, %v1967_v47  ;;  %v1873_v38 = vpop.f32.mrb[104].mxu0  ;;  %2398 = vrot.lane.b32.xlu1 %v10477_v61, %s7220_s24  ;;  %2400 = vrot.lane.b32.xlu0 %v10479_v55, %s7220_s24  ;;  %v8293_v9 = vadd.f32 %v7929_v12, %v2091_v30  ;;  %v10482_v47 = vmax.f32 %v8283_v16, 0.0  ;;  %v1507_v30 = vld [vmem:[#allocation3 + $0x198] sm:$0xff] }
 0x1cd   : > { %v1968_v2 = vadd.f32 %v1873_v38, %v7906_v5  ;;  %v1875_v45 = vpop.f32.mrb[105].mxu0  ;;  %10531 = vst [vmem:[#allocation18_spill] sm:$0xff] %v8299_v62 }
 0x1ce   : > { %v1969_v15 = vadd.f32 %v1875_v45, %v1505_v26  ;;  %v10480_v56 = vmax.f32 %v8293_v9, 0.0 }
 0x1cf   : > { %v2093_v61 = vld [vmem:[#allocation3 + $0x168] sm:$0xff]  ;;  %v8315_v55 = vadd.f32 %v7900_v18, %v1968_v2 }
 0x1d0   : > { %2033 = vst.msk [vmem:[#allocation3 + $0x188] sm:$0xff] %vm800_vm4, %v1969_v15  ;;  %v1879_v0 = vpop.f32.mrb[106].mxu0  ;;  %2402 = vrot.lane.b32.xlu1 %v10480_v56, %s7220_s24  ;;  %2404 = vrot.lane.b32.xlu0 %v10482_v47, %s7220_s24  ;;  %v8309_v5 = vadd.f32 %v7929_v12, %v2093_v61  ;;  %v10485_v15 = vmax.f32 %v8299_v62, 0.0  ;;  %v1509_v61 = vld [vmem:[#allocation3 + $0x1a8] sm:$0xff] }
 0x1d1   : > { %v1970_v38 = vadd.f32 %v1879_v0, %v7915_v50  ;;  %v1881_v3 = vpop.f32.mrb[107].mxu0  ;;  %10532 = vst [vmem:[#allocation19_spill] sm:$0xff] %v8315_v55 }
 0x1d2   : > { %v1971_v26 = vadd.f32 %v1881_v3, %v1507_v30  ;;  %v10483_v45 = vmax.f32 %v8309_v5, 0.0 }
 0x1d3   : > { %v2095_v56 = vld [vmem:[#allocation3 + $0x178] sm:$0xff]  ;;  %v8331_v47 = vadd.f32 %v7900_v18, %v1970_v38 }
 0x1d4   : > { %2035 = vst.msk [vmem:[#allocation3 + $0x198] sm:$0xff] %vm800_vm4, %v1971_v26  ;;  %v1885_v16 = vpop.f32.mrb[108].mxu0  ;;  %2406 = vrot.lane.b32.xlu1 %v10483_v45, %s7220_s24  ;;  %2408 = vrot.lane.b32.xlu0 %v10485_v15, %s7220_s24  ;;  %v8325_v50 = vadd.f32 %v7929_v12, %v2095_v56  ;;  %v10488_v26 = vmax.f32 %v8315_v55, 0.0  ;;  %v1511_v56 = vld [vmem:[#allocation3 + $0x1b8] sm:$0xff] }
 0x1d5   : > { %v1972_v0 = vadd.f32 %v1885_v16, %v7931_v10  ;;  %v1887_v2 = vpop.f32.mrb[109].mxu0  ;;  %10533 = vst [vmem:[#allocation20_spill] sm:$0xff] %v8331_v47 }
 0x1d6   : > { %v1973_v30 = vadd.f32 %v1887_v2, %v1509_v61  ;;  %v10486_v3 = vmax.f32 %v8325_v50, 0.0 }
 0x1d7   : > { %v2097_v45 = vld [vmem:[#allocation3 + $0x188] sm:$0xff]  ;;  %v8347_v15 = vadd.f32 %v7900_v18, %v1972_v0 }
 0x1d8   : > { %2037 = vst.msk [vmem:[#allocation3 + $0x1a8] sm:$0xff] %vm800_vm4, %v1973_v30  ;;  %v1891_v62 = vpop.f32.mrb[110].mxu0  ;;  %2410 = vrot.lane.b32.xlu1 %v10486_v3, %s7220_s24  ;;  %2412 = vrot.lane.b32.xlu0 %v10488_v26, %s7220_s24  ;;  %v8341_v10 = vadd.f32 %v7929_v12, %v2097_v45  ;;  %v10491_v30 = vmax.f32 %v8331_v47, 0.0  ;;  %v1513_v45 = vld [vmem:[#allocation3 + $0x1c8] sm:$0xff] }
 0x1d9   : > { %v1974_v16 = vadd.f32 %v1891_v62, %v7944_v35  ;;  %v1893_v38 = vpop.f32.mrb[111].mxu0  ;;  %10534 = vst [vmem:[#allocation21_spill] sm:$0xff] %v8347_v15 }
 0x1da   : > { %v1975_v61 = vadd.f32 %v1893_v38, %v1511_v56  ;;  %v10489_v2 = vmax.f32 %v8341_v10, 0.0 }
 0x1db   : > { %v2099_v3 = vld [vmem:[#allocation3 + $0x198] sm:$0xff]  ;;  %v8363_v26 = vadd.f32 %v7900_v18, %v1974_v16 }
 0x1dc   : > { %2039 = vst.msk [vmem:[#allocation3 + $0x1b8] sm:$0xff] %vm800_vm4, %v1975_v61  ;;  %v1897_v55 = vpop.f32.mrb[112].mxu0  ;;  %2414 = vrot.lane.b32.xlu1 %v10489_v2, %s7220_s24  ;;  %2416 = vrot.lane.b32.xlu0 %v10491_v30, %s7220_s24  ;;  %v8357_v35 = vadd.f32 %v7929_v12, %v2099_v3  ;;  %v10494_v61 = vmax.f32 %v8347_v15, 0.0  ;;  %v1515_v3 = vld [vmem:[#allocation3 + $0x1d8] sm:$0xff] }
 0x1dd   : > { %v1976_v62 = vadd.f32 %v1897_v55, %v7960_v11  ;;  %v1899_v0 = vpop.f32.mrb[113].mxu0  ;;  %10535 = vst [vmem:[#allocation22_spill] sm:$0xff] %v8363_v26 }
 0x1de   : > { %v1977_v56 = vadd.f32 %v1899_v0, %v1513_v45  ;;  %v10492_v38 = vmax.f32 %v8357_v35, 0.0 }
 0x1df   : > { %v2101_v2 = vld [vmem:[#allocation3 + $0x1a8] sm:$0xff]  ;;  %v8379_v30 = vadd.f32 %v7900_v18, %v1976_v62 }
 0x1e0   : > { %2041 = vst.msk [vmem:[#allocation3 + $0x1c8] sm:$0xff] %vm800_vm4, %v1977_v56  ;;  %v1903_v47 = vpop.f32.mrb[114].mxu0  ;;  %2418 = vrot.lane.b32.xlu1 %v10492_v38, %s7220_s24  ;;  %2420 = vrot.lane.b32.xlu0 %v10494_v61, %s7220_s24  ;;  %v8373_v11 = vadd.f32 %v7929_v12, %v2101_v2  ;;  %v10497_v56 = vmax.f32 %v8363_v26, 0.0  ;;  %v1517_v2 = vld [vmem:[#allocation3 + $0x1e8] sm:$0xff] }
 0x1e1   : > { %v1978_v55 = vadd.f32 %v1903_v47, %v7980_v31  ;;  %v1905_v16 = vpop.f32.mrb[115].mxu0  ;;  %10537 = vst [vmem:[#allocation24_spill] sm:$0xff] %v8379_v30 }
 0x1e2   : > { %10536 = vst [vmem:[#allocation23_spill] sm:$0xff] %v8373_v11  ;;  %v1979_v45 = vadd.f32 %v1905_v16, %v1515_v3  ;;  %v10495_v0 = vmax.f32 %v8373_v11, 0.0  ;;  %v10499_v16 = vmax.f32 %v8379_v30, 0.0 }
 0x1e3   : > { %v2103_v38 = vld [vmem:[#allocation3 + $0x1b8] sm:$0xff]  ;;  %v8395_v61 = vadd.f32 %v7900_v18, %v1978_v55 }
 0x1e4   : > { %2043 = vst.msk [vmem:[#allocation3 + $0x1d8] sm:$0xff] %vm800_vm4, %v1979_v45  ;;  %v1909_v15 = vpop.f32.mrb[116].mxu0  ;;  %2422 = vrot.lane.b32.xlu1 %v10495_v0, %s7220_s24  ;;  %2424 = vrot.lane.b32.xlu0 %v10497_v56, %s7220_s24  ;;  %v8389_v31 = vadd.f32 %v7929_v12, %v2103_v38  ;;  %v1519_v38 = vld [vmem:[#allocation3 + $0x1f8] sm:$0xff] }
 0x1e5   : > { %v1980_v47 = vadd.f32 %v1909_v15, %v8000_v34  ;;  %v1911_v62 = vpop.f32.mrb[117].mxu0  ;;  %10539 = vst [vmem:[#allocation26_spill] sm:$0xff] %v8395_v61 }
 0x1e6   : > { %10538 = vst [vmem:[#allocation25_spill] sm:$0xff] %v8389_v31  ;;  %v1981_v3 = vadd.f32 %v1911_v62, %v1517_v2  ;;  %v10502_v45 = vmax.f32 %v8389_v31, 0.0  ;;  %v2317_v62 = vpop.permute.xlu0 %2316 }
 0x1e7   : > { %v2105_v0 = vld [vmem:[#allocation3 + $0x1c8] sm:$0xff]  ;;  %v8411_v30 = vadd.f32 %v7900_v18, %v1980_v47 }
 0x1e8   : > { %2045 = vst.msk [vmem:[#allocation3 + $0x1e8] sm:$0xff] %vm800_vm4, %v1981_v3  ;;  %v1915_v26 = vpop.f32.mrb[118].mxu0  ;;  %2428 = vrot.lane.b32.xlu0 %v10499_v16, %s7220_s24  ;;  %2426 = vrot.lane.b32.xlu1 %v10502_v45, %s7220_s24  ;;  %v8405_v34 = vadd.f32 %v7929_v12, %v2105_v0  ;;  %v10500_v3 = vmax.f32 %v8395_v61, 0.0  ;;  %v10543_v45 = vmax.f32 %v7941_v21, 0.0  ;;  %v3169_v61 = vld [vmem:[%s10421_s4 + $0x28] sm:$0xff] }
 0x1e9   : > { %v1982_v15 = vadd.f32 %v1915_v26, %v8020_v20  ;;  %v1917_v55 = vpop.f32.mrb[119].mxu0  ;;  %10541 = vst [vmem:[#allocation28_spill] sm:$0xff] %v8411_v30  ;;  %v2321_v0 = vpop.permute.xlu1 %2320  ;;  %v10545_v11 = vmax.f32 %v8411_v30, 0.0 }
 0x1ea   : > { %10540 = vst [vmem:[#allocation27_spill] sm:$0xff] %v8405_v34  ;;  %v1983_v2 = vadd.f32 %v1917_v55, %v1519_v38  ;;  %v10501_v56 = vmax.f32 %v8405_v34, 0.0  ;;  %v10544_v34 = vmax.f32 %v7910_v40, 0.0  ;;  %v3168_v40 = vld [vmem:[%s10421_s4 + $0x20] sm:$0xff] }
 0x1eb   : > { %v2107_v16 = vld [vmem:[#allocation3 + $0x1d8] sm:$0xff]  ;;  %v8426_v55 = vadd.f32 %v7900_v18, %v1982_v15  ;;  %v3166_v15 = vld [vmem:[%s10421_s4 + $0x10] sm:$0xff] }
 0x1ec   : > { %2047 = vst.msk [vmem:[#allocation3 + $0x1f8] sm:$0xff] %vm800_vm4, %v1983_v2  ;;  %2432 = vrot.lane.b32.xlu0 %v10500_v3, %s7220_s24  ;;  %2430 = vrot.lane.b32.xlu1 %v10501_v56, %s7220_s24  ;;  %v8421_v20 = vadd.f32 %v7929_v12, %v2107_v16  ;;  %v3165_v2 = vld [vmem:[%s10421_s4 + $0x8] sm:$0xff]  ;;  %v3167_v3 = vld [vmem:[%s10421_s4 + $0x18] sm:$0xff] }
 0x1ed   : > { %10542 = vst [vmem:[#allocation29_spill] sm:$0xff] %v8426_v55  ;;  %v3164_v16 = vld [vmem:[%s10421_s4] sm:$0xff]  ;;  %v6769_v18 = vpack.c.bf16 %v3167_v3, %v3165_v2  ;;  %v3171_v3 = vld [vmem:[%s10421_s4 + $0x38] sm:$0xff]  ;;  %v10548_v30 = vmax.f32 %v8426_v55, 0.0  ;;  %v10551_v55 = vmax.f32 %v7977_v37, 0.0 }
 0x1ee   : > { %v2319_v26 = vpop.permute.xlu0 %2318  ;;  %v10546_v21 = vmax.f32 %v8421_v20, 0.0 }
 0x1ef   : > { %v2445_v56 = vsel %vm2444_vm5, %v2317_v62, %v2319_v26  ;;  %v2542_v38 = vmax.f32 %v10543_v45, %v2319_v26  ;;  %v2109_v47 = vld [vmem:[#allocation3 + $0x1e8] sm:$0xff]  ;;  %v6771_v62 = vpack.c.bf16 %v3166_v15, %v3164_v16  ;;  %6770 = vmatprep.subr.bf16.mxu0 %v6769_v18  ;;  %v3175_v26 = vld [vmem:[%s10421_s4 + $0x58] sm:$0xff]  ;;  %v3172_v18 = vld [vmem:[%s10421_s4 + $0x40] sm:$0xff] }
 0x1f0   : > { %v2541_v31 = vmax.f32 %v10544_v34, %v2445_v56  ;;  %2436 = vrot.lane.b32.xlu0 %v10545_v11, %s7220_s24  ;;  %2434 = vrot.lane.b32.xlu1 %v10546_v21, %s7220_s24  ;;  %v8455_v45 = vadd.f32 %v7929_v12, %v2109_v47  ;;  %v6773_v11 = vpack.c.bf16 %v3171_v3, %v3169_v61  ;;  %v3170_v56 = vld [vmem:[%s10421_s4 + $0x30] sm:$0xff]  ;;  %v3173_v34 = vld [vmem:[%s10421_s4 + $0x48] sm:$0xff]  ;;  %v10547_v3 = vmax.f32 %v7957_v29, 0.0 }
 0x1f1   : > { %6279 = vmatprep.mubr.msk.f32.mxu1 %vm2632_vm6, %v2542_v38  ;;  %6772 = vmatpush1.bf16.msra.mxu0 %v6771_v62  ;;  %v6775_v61 = vpack.c.bf16 %v3170_v56, %v3168_v40  ;;  %v3174_v15 = vld [vmem:[%s10421_s4 + $0x50] sm:$0xff]  ;;  %v6777_v62 = vpack.c.bf16 %v3175_v26, %v3173_v34  ;;  %v6314_v40 = vld [vmem:[%s10421_s4 + $0x118] sm:$0xff]  ;;  %v6311_v56 = vld [vmem:[%s10421_s4 + $0x100] sm:$0xff]  ;;  %v10550_v29 = vmax.f32 %v7923_v6, 0.0 }
 0x1f2   : > { %2794 = vmatmul.mubr.f32.vlgmr.msra.gmra.mrb[72].mxu1 %v2541_v31  ;;  %v2323_v47 = vpop.permute.xlu1 %2322  ;;  %v2325_v2 = vpop.permute.xlu0 %2324  ;;  %v6312_v31 = vld [vmem:[%s10421_s4 + $0x108] sm:$0xff]  ;;  %6774 = vmatprep.subr.bf16.mxu0 %v6773_v11  ;;  %v6318_v6 = vld [vmem:[%s10421_s4 + $0x138] sm:$0xff] }
 0x1f3   : > { %v2446_v21 = vsel %vm2444_vm5, %v2321_v0, %v2323_v47  ;;  %v2544_v16 = vmax.f32 %v10547_v3, %v2323_v47  ;;  %v2111_v38 = vld [vmem:[#allocation3 + $0x1f8] sm:$0xff]  ;;  %v10549_v0 = vmax.f32 %v8455_v45, 0.0  ;;  %v6801_v26 = vpack.c.bf16 %v6314_v40, %v6312_v31  ;;  %v6313_v47 = vld [vmem:[%s10421_s4 + $0x110] sm:$0xff]  ;;  %v6316_v3 = vld [vmem:[%s10421_s4 + $0x128] sm:$0xff] }
 0x1f4   : > { %2440 = vrot.lane.b32.xlu0 %v10548_v30, %s7220_s24  ;;  %v2543_v11 = vmax.f32 %v10550_v29, %v2446_v21  ;;  %v8502_v34 = vadd.f32 %v7929_v12, %v2111_v38  ;;  %v6803_v30 = vpack.c.bf16 %v6313_v47, %v6311_v56  ;;  %v6315_v12 = vld [vmem:[%s10421_s4 + $0x120] sm:$0xff]  ;;  %v6317_v38 = vld [vmem:[%s10421_s4 + $0x130] sm:$0xff]  ;;  %v6805_v56 = vpack.c.bf16 %v6318_v6, %v6316_v3  ;;  %v6322_v29 = vld [vmem:[%s10421_s4 + $0x158] sm:$0xff] }
 0x1f5   : > { %2438 = vrot.lane.b32.xlu1 %v10549_v0, %s7220_s24  ;;  %6280 = vmatprep.mubr.msk.f32.mxu1 %vm2632_vm6, %v2544_v16  ;;  %v6779_v16 = vpack.c.bf16 %v3174_v15, %v3172_v18  ;;  %v6320_v0 = vld [vmem:[%s10421_s4 + $0x148] sm:$0xff]  ;;  %v6807_v15 = vpack.c.bf16 %v6317_v38, %v6315_v12  ;;  %v10555_v38 = vmax.f32 %v8017_v41, 0.0 }
 0x1f6   : > { %2799 = vmatmul.mubr.f32.gmra.mrb[74].mxu1 %v2543_v11  ;;  %v2327_v31 = vpop.permute.xlu1 %2326  ;;  %v2329_v21 = vpop.permute.xlu0 %2328  ;;  %v2251_v40 = vmax.f32 %v8502_v34, 0.0  ;;  %6776 = vmatpush1.bf16.msra.mxu0 %v6775_v61  ;;  %v10552_v61 = vmax.f32 %v7949_v58, 0.0  ;;  %v6809_v3 = vpack.c.bf16 %v6322_v29, %v6320_v0  ;;  %v10557_v29 = vmax.f32 %v8037_v4, 0.0 }
 0x1f7   : > { %v2447_v47 = vsel %vm2444_vm5, %v2325_v2, %v2327_v31  ;;  %v2546_v11 = vmax.f32 %v10551_v55, %v2327_v31  ;;  %6778 = vmatprep.subr.bf16.mxu0 %v6777_v62  ;;  %6802 = vmatprep.subr.bf16.mxu1 %v6801_v26  ;;  %v10553_v55 = vmax.f32 %v7997_v23, 0.0  ;;  %v10554_v26 = vmax.f32 %v7964_v25, 0.0 }
 0x1f8   : > { %v2545_v18 = vmax.f32 %v10552_v61, %v2447_v47  ;;  %6804 = vmatpush1.bf16.msra.mxu1 %v6803_v30 }
 0x1f9   : > { %2442 = vrot.lane.b32.xlu1 %v2251_v40, %s7220_s24  ;;  %6281 = vmatprep.mubr.msk.f32.mxu1 %vm2632_vm6, %v2546_v11  ;;  %v10558_v11 = vmax.f32 %v8004_v49, 0.0 }
 0x1fa   : > { %6806 = vmatprep.subr.bf16.mxu1 %v6805_v56  ;;  %2804 = vmatmul.mubr.f32.gmra.mrb[76].mxu1 %v2545_v18  ;;  %v2331_v2 = vpop.permute.xlu1 %2330  ;;  %v2333_v6 = vpop.permute.xlu0 %2332 }
 0x1fb   : > { %6780 = vmatpush1.bf16.msra.mxu0 %v6779_v16  ;;  %v2448_v37 = vsel %vm2444_vm5, %v2329_v21, %v2331_v2  ;;  %v2548_v62 = vmax.f32 %v10553_v55, %v2331_v2  ;;  %v10556_v21 = vmax.f32 %v7986_v17, 0.0  ;;  %v10560_v2 = vmax.f32 %v8026_v63, 0.0 }
 0x1fc   : > { %v2547_v31 = vmax.f32 %v10554_v26, %v2448_v37  ;;  %6808 = vmatpush1.bf16.msra.mxu1 %v6807_v15  ;;  %v10559_v15 = vmax.f32 %v8053_v13, 0.0  ;;  %v10561_v55 = vmax.f32 %v8069_v24, 0.0  ;;  %v10562_v26 = vmax.f32 %v8043_v39, 0.0 }
 0x1fd   : > { %6282 = vmatprep.mubr.msk.f32.mxu1 %vm2632_vm6, %v2548_v62  ;;  %6810 = vmatprep.subr.bf16.mxu1 %v6809_v3 }
 0x1fe   : > { %2809 = vmatmul.mubr.f32.gmra.mrb[78].mxu1 %v2547_v31  ;;  %v2335_v58 = vpop.permute.xlu1 %2334  ;;  %v2337_v30 = vpop.permute.xlu0 %2336 }
 0x1ff   : > { %v2449_v12 = vsel %vm2444_vm5, %v2333_v6, %v2335_v58  ;;  %v2550_v16 = vmax.f32 %v10555_v38, %v2335_v58  ;;  %v10564_v38 = vmax.f32 %v8059_v33, 0.0 }
 0x200   : > { %v2549_v56 = vmax.f32 %v10556_v21, %v2449_v12 }
 0x201   : > { %6283 = vmatprep.mubr.msk.f32.mxu1 %vm2632_vm6, %v2550_v16 }
 0x202   : > { %2814 = vmatmul.mubr.f32.gmra.mrb[80].mxu1 %v2549_v56  ;;  %v2339_v25 = vpop.permute.xlu1 %2338  ;;  %v2341_v23 = vpop.permute.xlu0 %2340  ;;  %v10565_v56 = vmax.f32 %v8101_v43, 0.0 }
 0x203   : > { %v2450_v0 = vsel %vm2444_vm5, %v2337_v30, %v2339_v25  ;;  %v2552_v47 = vmax.f32 %v10557_v29, %v2339_v25  ;;  %v10563_v30 = vmax.f32 %v8085_v32, 0.0 }
 0x204   : > { %v2551_v61 = vmax.f32 %v10558_v11, %v2450_v0 }
 0x205   : > { %6284 = vmatprep.mubr.msk.f32.mxu1 %vm2632_vm6, %v2552_v47  ;;  %v10567_v47 = vmax.f32 %v8117_v54, 0.0 }
 0x206   : > { %2819 = vmatmul.mubr.f32.gmra.mrb[82].mxu1 %v2551_v61  ;;  %v2343_v41 = vpop.permute.xlu1 %2342  ;;  %v2345_v18 = vpop.permute.xlu0 %2344  ;;  %v10568_v61 = vmax.f32 %v8091_v48, 0.0 }
 0x207   : > { %v2451_v17 = vsel %vm2444_vm5, %v2341_v23, %v2343_v41  ;;  %v2554_v3 = vmax.f32 %v10559_v15, %v2343_v41  ;;  %v10566_v23 = vmax.f32 %v8075_v53, 0.0 }
 0x208   : > { %v2553_v6 = vmax.f32 %v10560_v2, %v2451_v17  ;;  %v10569_v17 = vmax.f32 %v8133_v1, 0.0 }
 0x209   : > { %6285 = vmatprep.mubr.msk.f32.mxu1 %vm2632_vm6, %v2554_v3  ;;  %v10570_v3 = vmax.f32 %v8107_v52, 0.0 }
 0x20a   : > { %2824 = vmatmul.mubr.f32.gmra.mrb[84].mxu1 %v2553_v6  ;;  %v2347_v4 = vpop.permute.xlu1 %2346  ;;  %v2349_v37 = vpop.permute.xlu0 %2348 }
 0x20b   : > { %v2452_v49 = vsel %vm2444_vm5, %v2345_v18, %v2347_v4  ;;  %v2556_v62 = vmax.f32 %v10561_v55, %v2347_v4  ;;  %v10571_v4 = vmax.f32 %v8149_v14, 0.0 }
 0x20c   : > { %v2555_v31 = vmax.f32 %v10562_v26, %v2452_v49  ;;  %v10572_v49 = vmax.f32 %v8123_v57, 0.0  ;;  %v10573_v26 = vmax.f32 %v8165_v22, 0.0 }
 0x20d   : > { %6286 = vmatprep.mubr.msk.f32.mxu1 %vm2632_vm6, %v2556_v62 }
 0x20e   : > { %2829 = vmatmul.mubr.f32.gmra.mrb[86].mxu1 %v2555_v31  ;;  %v2351_v13 = vpop.permute.xlu1 %2350  ;;  %v2353_v58 = vpop.permute.xlu0 %2352 }
 0x20f   : > { %v2453_v63 = vsel %vm2444_vm5, %v2349_v37, %v2351_v13  ;;  %v2558_v12 = vmax.f32 %v10563_v30, %v2351_v13  ;;  %v10574_v13 = vmax.f32 %v8139_v42, 0.0  ;;  %v10575_v30 = vmax.f32 %v8181_v36, 0.0 }
 0x210   : > { %v2557_v16 = vmax.f32 %v10564_v38, %v2453_v63  ;;  %v10576_v38 = vmax.f32 %v8155_v28, 0.0 }
 0x211   : > { %6287 = vmatprep.mubr.msk.f32.mxu1 %vm2632_vm6, %v2558_v12 }
 0x212   : > { %2834 = vmatmul.mubr.f32.gmra.mrb[88].mxu1 %v2557_v16  ;;  %v2355_v24 = vpop.permute.xlu1 %2354  ;;  %v2357_v21 = vpop.permute.xlu0 %2356 }
 0x213   : > { %v2454_v39 = vsel %vm2444_vm5, %v2353_v58, %v2355_v24  ;;  %v2560_v25 = vmax.f32 %v10565_v56, %v2355_v24  ;;  %v10578_v56 = vmax.f32 %v8171_v59, 0.0 }
 0x214   : > { %v2559_v0 = vmax.f32 %v10566_v23, %v2454_v39 }
 0x215   : > { %6288 = vmatprep.mubr.msk.f32.mxu1 %vm2632_vm6, %v2560_v25 }
 0x216   : > { %2839 = vmatmul.mubr.f32.gmra.mrb[90].mxu1 %v2559_v0  ;;  %v2359_v32 = vpop.permute.xlu1 %2358  ;;  %v2361_v29 = vpop.permute.xlu0 %2360  ;;  %v10579_v0 = vmax.f32 %v8213_v60, 0.0 }
 0x217   : > { %v2455_v33 = vsel %vm2444_vm5, %v2357_v21, %v2359_v32  ;;  %v2562_v11 = vmax.f32 %v10567_v47, %v2359_v32  ;;  %v10577_v21 = vmax.f32 %v8197_v46, 0.0 }
 0x218   : > { %v2561_v41 = vmax.f32 %v10568_v61, %v2455_v33 }
 0x219   : > { %6289 = vmatprep.mubr.msk.f32.mxu1 %vm2632_vm6, %v2562_v11  ;;  %v10581_v11 = vmax.f32 %v8229_v8, 0.0 }
 0x21a   : > { %2844 = vmatmul.mubr.f32.gmra.mrb[92].mxu1 %v2561_v41  ;;  %v2363_v43 = vpop.permute.xlu1 %2362  ;;  %v2365_v18 = vpop.permute.xlu0 %2364  ;;  %v10582_v41 = vmax.f32 %v8203_v27, 0.0  ;;  %v6319_v27 = vld [vmem:[%s10421_s4 + $0x140] sm:$0xff] }
 0x21b   : > { %v2456_v53 = vsel %vm2444_vm5, %v2361_v29, %v2363_v43  ;;  %v2564_v15 = vmax.f32 %v10569_v17, %v2363_v43  ;;  %v10580_v29 = vmax.f32 %v8187_v44, 0.0 }
 0x21c   : > { %v2563_v2 = vmax.f32 %v10570_v3, %v2456_v53  ;;  %v10583_v53 = vmax.f32 %v8245_v19, 0.0  ;;  %v10586_v19 = vmax.f32 %v8261_v7, 0.0 }
 0x21d   : > { %6290 = vmatprep.mubr.msk.f32.mxu1 %vm2632_vm6, %v2564_v15  ;;  %v10584_v15 = vld [vmem:[#allocation13_spill] sm:$0xff] }
 0x21e   : > { %2849 = vmatmul.mubr.f32.gmra.mrb[94].mxu1 %v2563_v2  ;;  %v2367_v54 = vpop.permute.xlu1 %2366  ;;  %v2369_v6 = vpop.permute.xlu0 %2368  ;;  %v10585_v3 = vmax.f32 %v10584_v15, 0.0  ;;  %v6331_v15 = vld [vmem:[%s10421_s4 + $0x1a0] sm:$0xff] }
 0x21f   : > { %v2457_v48 = vsel %vm2444_vm5, %v2365_v18, %v2367_v54  ;;  %v2566_v37 = vmax.f32 %v10571_v4, %v2367_v54 }
 0x220   : > { %v2565_v55 = vmax.f32 %v10572_v49, %v2457_v48  ;;  %v10587_v49 = vld [vmem:[#allocation14_spill] sm:$0xff] }
 0x221   : > { %6291 = vmatprep.mubr.msk.f32.mxu1 %vm2632_vm6, %v2566_v37 }
 0x222   : > { %2854 = vmatmul.mubr.f32.gmra.mrb[96].mxu1 %v2565_v55  ;;  %v2371_v1 = vpop.permute.xlu1 %2370  ;;  %v2373_v62 = vpop.permute.xlu0 %2372  ;;  %v10588_v55 = vmax.f32 %v10587_v49, 0.0  ;;  %v3180_v49 = vld [vmem:[%s10421_s4 + $0x80] sm:$0xff] }
 0x223   : > { %v2458_v52 = vsel %vm2444_vm5, %v2369_v6, %v2371_v1  ;;  %v2568_v31 = vmax.f32 %v10573_v26, %v2371_v1  ;;  %v6321_v6 = vld [vmem:[%s10421_s4 + $0x150] sm:$0xff] }
 0x224   : > { %v2567_v58 = vmax.f32 %v10574_v13, %v2458_v52  ;;  %v6811_v37 = vpack.c.bf16 %v6321_v6, %v6319_v27  ;;  %v6326_v52 = vld [vmem:[%s10421_s4 + $0x178] sm:$0xff]  ;;  %v6323_v13 = vld [vmem:[%s10421_s4 + $0x160] sm:$0xff] }
 0x225   : > { %6292 = vmatprep.mubr.msk.f32.mxu1 %vm2632_vm6, %v2568_v31  ;;  %v3183_v6 = vld [vmem:[%s10421_s4 + $0x98] sm:$0xff] }
 0x226   : > { %2859 = vmatmul.mubr.f32.gmra.mrb[98].mxu1 %v2567_v58  ;;  %v2375_v14 = vpop.permute.xlu1 %2374  ;;  %v2377_v63 = vpop.permute.xlu0 %2376  ;;  %v6325_v58 = vld [vmem:[%s10421_s4 + $0x170] sm:$0xff] }
 0x227   : > { %v2459_v57 = vsel %vm2444_vm5, %v2373_v62, %v2375_v14  ;;  %v2570_v12 = vmax.f32 %v10575_v30, %v2375_v14  ;;  %6812 = vmatpush1.bf16.msra.mxu1 %v6811_v37  ;;  %v6324_v62 = vld [vmem:[%s10421_s4 + $0x168] sm:$0xff]  ;;  %v6815_v30 = vpack.c.bf16 %v6325_v58, %v6323_v13  ;;  %v6335_v13 = vld [vmem:[%s10421_s4 + $0x1c0] sm:$0xff]  ;;  %v6337_v58 = vld [vmem:[%s10421_s4 + $0x1d0] sm:$0xff] }
 0x228   : > { %v2569_v16 = vmax.f32 %v10576_v38, %v2459_v57  ;;  %v6813_v7 = vpack.c.bf16 %v6326_v52, %v6324_v62  ;;  %v10598_v52 = vmax.f32 %v8325_v50, 0.0  ;;  %v3185_v50 = vld [vmem:[%s10421_s4 + $0xa8] sm:$0xff] }
 0x229   : > { %6293 = vmatprep.mubr.msk.f32.mxu1 %vm2632_vm6, %v2570_v12  ;;  %v10590_v12 = vld [vmem:[#allocation15_spill] sm:$0xff] }
 0x22a   : > { %2864 = vmatmul.mubr.f32.gmra.mrb[100].mxu1 %v2569_v16  ;;  %v2379_v22 = vpop.permute.xlu1 %2378  ;;  %v2381_v24 = vpop.permute.xlu0 %2380  ;;  %v10591_v38 = vmax.f32 %v10590_v12, 0.0  ;;  %6814 = vmatprep.subr.bf16.mxu1 %v6813_v7  ;;  %v3187_v12 = vld [vmem:[%s10421_s4 + $0xb8] sm:$0xff] }
 0x22b   : > { %v2460_v42 = vsel %vm2444_vm5, %v2377_v63, %v2379_v22  ;;  %v2572_v39 = vmax.f32 %v10577_v21, %v2379_v22  ;;  %v10589_v63 = vmax.f32 %v8277_v51, 0.0  ;;  %6816 = vmatpush1.bf16.msra.mxu1 %v6815_v30  ;;  %v6328_v22 = vld [vmem:[%s10421_s4 + $0x188] sm:$0xff]  ;;  %v6827_v30 = vpack.c.bf16 %v6337_v58, %v6335_v13  ;;  %v10613_v58 = vld [vmem:[#allocation22_spill] sm:$0xff] }
 0x22c   : > { %v2571_v25 = vmax.f32 %v10578_v56, %v2460_v42  ;;  %v6329_v56 = vld [vmem:[%s10421_s4 + $0x190] sm:$0xff] }
 0x22d   : > { %6294 = vmatprep.mubr.msk.f32.mxu1 %vm2632_vm6, %v2572_v39  ;;  %v6327_v39 = vld [vmem:[%s10421_s4 + $0x180] sm:$0xff] }
 0x22e   : > { %2869 = vmatmul.mubr.f32.gmra.mrb[102].mxu1 %v2571_v25  ;;  %v2383_v36 = vpop.permute.xlu1 %2382  ;;  %v2385_v23 = vpop.permute.xlu0 %2384 }
 0x22f   : > { %v2461_v28 = vsel %vm2444_vm5, %v2381_v24, %v2383_v36  ;;  %v2574_v32 = vmax.f32 %v10579_v0, %v2383_v36  ;;  %v6330_v24 = vld [vmem:[%s10421_s4 + $0x198] sm:$0xff]  ;;  %v10592_v36 = vmax.f32 %v8293_v9, 0.0  ;;  %v10593_v0 = vld [vmem:[#allocation16_spill] sm:$0xff]  ;;  %v6332_v9 = vld [vmem:[%s10421_s4 + $0x1a8] sm:$0xff] }
 0x230   : > { %v2573_v33 = vmax.f32 %v10580_v29, %v2461_v28  ;;  %v6817_v21 = vpack.c.bf16 %v6330_v24, %v6328_v22  ;;  %v6819_v28 = vpack.c.bf16 %v6329_v56, %v6327_v39  ;;  %v6789_v24 = vpack.c.bf16 %v3187_v12, %v3185_v50  ;;  %v10615_v12 = vld [vmem:[#allocation27_spill] sm:$0xff] }
 0x231   : > { %6295 = vmatprep.mubr.msk.f32.mxu1 %vm2632_vm6, %v2574_v32  ;;  %v10594_v32 = vmax.f32 %v10593_v0, 0.0  ;;  %v10601_v56 = vmax.f32 %v8341_v10, 0.0  ;;  %v6341_v0 = vld [vmem:[%s10421_s4 + $0x1f0] sm:$0xff]  ;;  %v3189_v10 = vld [vmem:[%s10421_s4 + $0xc8] sm:$0xff] }
 0x232   : > { %2874 = vmatmul.mubr.f32.gmra.mrb[104].mxu1 %v2573_v33  ;;  %v2387_v46 = vpop.permute.xlu1 %2386  ;;  %v2389_v47 = vpop.permute.xlu0 %2388  ;;  %6818 = vmatprep.subr.bf16.mxu1 %v6817_v21  ;;  %v3177_v33 = vld [vmem:[%s10421_s4 + $0x68] sm:$0xff]  ;;  %v6342_v21 = vld [vmem:[%s10421_s4 + $0x1f8] sm:$0xff] }
 0x233   : > { %v2462_v59 = vsel %vm2444_vm5, %v2385_v23, %v2387_v46  ;;  %v2576_v61 = vmax.f32 %v10581_v11, %v2387_v46  ;;  %v3179_v46 = vld [vmem:[%s10421_s4 + $0x78] sm:$0xff]  ;;  %6820 = vmatpush1.bf16.msra.mxu1 %v6819_v28  ;;  %v6339_v28 = vld [vmem:[%s10421_s4 + $0x1e0] sm:$0xff] }
 0x234   : > { %v2575_v43 = vmax.f32 %v10582_v41, %v2462_v59  ;;  %v6781_v11 = vpack.c.bf16 %v3179_v46, %v3177_v33  ;;  %v3178_v41 = vld [vmem:[%s10421_s4 + $0x70] sm:$0xff]  ;;  %v6831_v46 = vpack.c.bf16 %v6341_v0, %v6339_v28 }
 0x235   : > { %6296 = vmatprep.mubr.msk.f32.mxu1 %vm2632_vm6, %v2576_v61  ;;  %v3176_v61 = vld [vmem:[%s10421_s4 + $0x60] sm:$0xff] }
 0x236   : > { %2879 = vmatmul.mubr.f32.gmra.mrb[106].mxu1 %v2575_v43  ;;  %v2391_v60 = vpop.permute.xlu1 %2390  ;;  %v2393_v18 = vpop.permute.xlu0 %2392  ;;  %v6334_v43 = vld [vmem:[%s10421_s4 + $0x1b8] sm:$0xff]  ;;  %6782 = vmatprep.subr.bf16.mxu0 %v6781_v11 }
 0x237   : > { %v2463_v44 = vsel %vm2444_vm5, %v2389_v47, %v2391_v60  ;;  %v2578_v17 = vmax.f32 %v10583_v53, %v2391_v60  ;;  %v6783_v53 = vpack.c.bf16 %v3178_v41, %v3176_v61  ;;  %v3188_v61 = vld [vmem:[%s10421_s4 + $0xc0] sm:$0xff]  ;;  %v3190_v41 = vld [vmem:[%s10421_s4 + $0xd0] sm:$0xff] }
 0x238   : > { %v2577_v2 = vmax.f32 %v10585_v3, %v2463_v44  ;;  %v6333_v3 = vld [vmem:[%s10421_s4 + $0x1b0] sm:$0xff] }
 0x239   : > { %6297 = vmatprep.mubr.msk.f32.mxu1 %vm2632_vm6, %v2578_v17  ;;  %v6821_v17 = vpack.c.bf16 %v6334_v43, %v6332_v9  ;;  %v6823_v27 = vpack.c.bf16 %v6333_v3, %v6331_v15  ;;  %6784 = vmatpush1.bf16.msra.mxu0 %v6783_v53  ;;  %v3191_v9 = vld [vmem:[%s10421_s4 + $0xd8] sm:$0xff]  ;;  %v10605_v53 = vld [vmem:[#allocation20_spill] sm:$0xff]  ;;  %v3193_v3 = vld [vmem:[%s10421_s4 + $0xe8] sm:$0xff] }
 0x23a   : > { %2884 = vmatmul.mubr.f32.gmra.mrb[108].mxu1 %v2577_v2  ;;  %v2395_v8 = vpop.permute.xlu1 %2394  ;;  %v2397_v54 = vpop.permute.xlu0 %2396  ;;  %v10596_v2 = vld [vmem:[#allocation17_spill] sm:$0xff]  ;;  %v6793_v11 = vpack.c.bf16 %v3191_v9, %v3189_v10 }
 0x23b   : > { %v2464_v48 = vsel %vm2444_vm5, %v2393_v18, %v2395_v8  ;;  %v2580_v4 = vmax.f32 %v10586_v19, %v2395_v8  ;;  %v10595_v18 = vmax.f32 %v8309_v5, 0.0  ;;  %v10597_v8 = vmax.f32 %v10596_v2, 0.0  ;;  %v3181_v5 = vld [vmem:[%s10421_s4 + $0x88] sm:$0xff]  ;;  %6822 = vmatprep.subr.bf16.mxu1 %v6821_v17  ;;  %v3195_v2 = vld [vmem:[%s10421_s4 + $0xf8] sm:$0xff] }
 0x23c   : > { %v2579_v1 = vmax.f32 %v10588_v55, %v2464_v48  ;;  %v6336_v48 = vld [vmem:[%s10421_s4 + $0x1c8] sm:$0xff]  ;;  %v6785_v37 = vpack.c.bf16 %v3183_v6, %v3181_v5  ;;  %v3182_v55 = vld [vmem:[%s10421_s4 + $0x90] sm:$0xff]  ;;  %6824 = vmatpush1.bf16.msra.mxu1 %v6823_v27  ;;  %v10606_v17 = vmax.f32 %v10605_v53, 0.0  ;;  %v3192_v27 = vld [vmem:[%s10421_s4 + $0xe0] sm:$0xff] }
 0x23d   : > { %6298 = vmatprep.mubr.msk.f32.mxu1 %vm2632_vm6, %v2580_v4  ;;  %v3194_v5 = vld [vmem:[%s10421_s4 + $0xf0] sm:$0xff] }
 0x23e   : > { %2889 = vmatmul.mubr.f32.gmra.mrb[110].mxu1 %v2579_v1  ;;  %v2399_v26 = vpop.permute.xlu1 %2398  ;;  %v2401_v31 = vpop.permute.xlu0 %2400  ;;  %v6338_v1 = vld [vmem:[%s10421_s4 + $0x1d8] sm:$0xff]  ;;  %6786 = vmatprep.subr.bf16.mxu0 %v6785_v37  ;;  %v6799_v37 = vpack.c.bf16 %v3194_v5, %v3192_v27  ;;  %v6377_v27 = vld [vmem:[%s10421_s4 + $0x310] sm:$0xff]  ;;  %v6380_v5 = vld [vmem:[%s10421_s4 + $0x328] sm:$0xff] }
 0x23f   : > { %v2465_v14 = vsel %vm2444_vm5, %v2397_v54, %v2399_v26  ;;  %v2582_v57 = vmax.f32 %v10589_v63, %v2399_v26  ;;  %v6825_v7 = vpack.c.bf16 %v6338_v1, %v6336_v48  ;;  %v10607_v48 = vld [vmem:[#allocation23_spill] sm:$0xff] }
 0x240   : > { %v2581_v16 = vmax.f32 %v10591_v38, %v2465_v14  ;;  %v10599_v14 = vld [vmem:[#allocation18_spill] sm:$0xff]  ;;  %v6340_v38 = vld [vmem:[%s10421_s4 + $0x1e8] sm:$0xff] }
 0x241   : > { %6299 = vmatprep.mubr.msk.f32.mxu1 %vm2632_vm6, %v2582_v57  ;;  %v10600_v63 = vmax.f32 %v10599_v14, 0.0  ;;  %6826 = vmatprep.subr.bf16.mxu1 %v6825_v7  ;;  %v10614_v14 = vmax.f32 %v10613_v58, 0.0 }
 0x242   : > { %2894 = vmatmul.mubr.f32.gmra.mrb[112].mxu1 %v2581_v16  ;;  %v2403_v42 = vpop.permute.xlu1 %2402  ;;  %v2405_v51 = vpop.permute.xlu0 %2404 }
 0x243   : > { %v2466_v25 = vsel %vm2444_vm5, %v2401_v31, %v2403_v42  ;;  %v2584_v23 = vmax.f32 %v10592_v36, %v2403_v42  ;;  %v6787_v31 = vpack.c.bf16 %v3182_v55, %v3180_v49  ;;  %v3184_v42 = vld [vmem:[%s10421_s4 + $0xa0] sm:$0xff]  ;;  %6828 = vmatpush1.bf16.msra.mxu1 %v6827_v30  ;;  %v10609_v49 = vld [vmem:[#allocation21_spill] sm:$0xff] }
 0x244   : > { %v2583_v29 = vmax.f32 %v10594_v32, %v2466_v25  ;;  %v10602_v32 = vld [vmem:[#allocation19_spill] sm:$0xff]  ;;  %v10610_v55 = vmax.f32 %v10609_v49, 0.0 }
 0x245   : > { %6300 = vmatprep.mubr.msk.f32.mxu1 %vm2632_vm6, %v2584_v23  ;;  %6788 = vmatpush1.bf16.msra.mxu0 %v6787_v31  ;;  %v6829_v23 = vpack.c.bf16 %v6342_v21, %v6340_v38  ;;  %v10611_v31 = vld [vmem:[#allocation25_spill] sm:$0xff]  ;;  %v10616_v38 = vmax.f32 %v10615_v12, 0.0  ;;  %v6345_v12 = vld [vmem:[%s10421_s4 + $0x210] sm:$0xff] }
 0x246   : > { %2899 = vmatmul.mubr.f32.gmra.mrb[114].mxu1 %v2583_v29  ;;  %v2407_v47 = vpop.permute.xlu1 %2406  ;;  %v2409_v59 = vpop.permute.xlu0 %2408  ;;  %v10603_v29 = vmax.f32 %v10602_v32, 0.0  ;;  %6790 = vmatprep.subr.bf16.mxu0 %v6789_v24  ;;  %v10612_v7 = vmax.f32 %v10611_v31, 0.0  ;;  %v6381_v31 = vld [vmem:[%s10421_s4 + $0x330] sm:$0xff] }
 0x247   : > { %v2467_v60 = vsel %vm2444_vm5, %v2405_v51, %v2407_v47  ;;  %v2586_v44 = vmax.f32 %v10595_v18, %v2407_v47  ;;  %v3186_v51 = vld [vmem:[%s10421_s4 + $0xb0] sm:$0xff]  ;;  %6830 = vmatprep.subr.bf16.mxu1 %v6829_v23 }
 0x248   : > { %v2585_v54 = vmax.f32 %v10597_v8, %v2467_v60  ;;  %v6791_v36 = vpack.c.bf16 %v3186_v51, %v3184_v42  ;;  %v10604_v60 = vmax.f32 %v8357_v35, 0.0  ;;  %6832 = vmatpush1.bf16.msra.mxu1 %v6831_v46  ;;  %v10623_v46 = vld [vmem:[#allocation28_spill] sm:$0xff] }
 0x249   : > { %6301 = vmatprep.mubr.msk.f32.mxu1 %vm2632_vm6, %v2586_v44  ;;  %v6795_v44 = vpack.c.bf16 %v3190_v41, %v3188_v61  ;;  %v10624_v10 = vmax.f32 %v10623_v46, 0.0  ;;  %v10625_v61 = vld [vmem:[#allocation29_spill] sm:$0xff]  ;;  %v6352_v46 = vld [vmem:[%s10421_s4 + $0x248] sm:$0xff] }
 0x24a   : > { %2904 = vmatmul.mubr.f32.gmra.mrb[116].mxu1 %v2585_v54  ;;  %v2411_v19 = vpop.permute.xlu1 %2410  ;;  %v2413_v4 = vpop.permute.xlu0 %2412  ;;  %6792 = vmatpush1.bf16.msra.mxu0 %v6791_v36  ;;  %v6797_v54 = vpack.c.bf16 %v3195_v2, %v3193_v3  ;;  %v10620_v36 = vld [vmem:[#allocation26_spill] sm:$0xff]  ;;  %v10626_v41 = vmax.f32 %v10625_v61, 0.0 }
 0x24b   : > { %v2468_v62 = vsel %vm2444_vm5, %v2409_v59, %v2411_v19  ;;  %v2588_v26 = vmax.f32 %v10598_v52, %v2411_v19  ;;  %6794 = vmatprep.subr.bf16.mxu0 %v6793_v11  ;;  %v10608_v19 = vmax.f32 %v10607_v48, 0.0  ;;  %v10621_v23 = vmax.f32 %v10620_v36, 0.0  ;;  %v10627_v48 = vld [vmem:[#allocation12_spill] sm:$0xff] }
 0x24c   : > { %v2587_v57 = vmax.f32 %v10600_v63, %v2468_v62 }
 0x24d   : > { %6302 = vmatprep.mubr.msk.f32.mxu1 %vm2632_vm6, %v2588_v26 }
 0x24e   : > { %2909 = vmatmul.mubr.f32.gmra.mrb[118].mxu1 %v2587_v57  ;;  %v2415_v16 = vpop.permute.xlu1 %2414  ;;  %v2417_v22 = vpop.permute.xlu0 %2416  ;;  %6796 = vmatpush1.bf16.msra.mxu0 %v6795_v44  ;;  %v6378_v44 = vld [vmem:[%s10421_s4 + $0x318] sm:$0xff] }
 0x24f   : > { %v2469_v39 = vsel %vm2444_vm5, %v2413_v4, %v2415_v16  ;;  %v2590_v25 = vmax.f32 %v10601_v56, %v2415_v16  ;;  %6798 = vmatprep.subr.bf16.mxu0 %v6797_v54  ;;  %v6375_v54 = vld [vmem:[%s10421_s4 + $0x300] sm:$0xff] }
 0x250   : > { %v2589_v33 = vmax.f32 %v10603_v29, %v2469_v39  ;;  %v10619_v39 = vmax.f32 %v8421_v20, 0.0  ;;  %v10622_v29 = vmax.f32 %v8455_v45, 0.0  ;;  %v8836_v45 = vld [vmem:[#allocation5] sm:$0xff] }
 0x251   : > { %6303 = vmatprep.mubr.msk.f32.mxu1 %vm2632_vm6, %v2590_v25 }
 0x252   : > { %2914 = vmatmul.mubr.f32.gmra.mrb[120].mxu1 %v2589_v33  ;;  %v2419_v47 = vpop.permute.xlu1 %2418  ;;  %v2421_v59 = vpop.permute.xlu0 %2420  ;;  %6800 = vmatpush1.bf16.msra.mxu0 %v6799_v37 }
 0x253   : > { %v2470_v43 = vsel %vm2444_vm5, %v2417_v22, %v2419_v47  ;;  %v2592_v18 = vmax.f32 %v10604_v60, %v2419_v47  ;;  %v10617_v22 = vld [vmem:[#allocation24_spill] sm:$0xff]  ;;  %v6344_v60 = vld [vmem:[%s10421_s4 + $0x208] sm:$0xff] }
 0x254   : > { %v2591_v15 = vmax.f32 %v10606_v17, %v2470_v43  ;;  %v10618_v24 = vmax.f32 %v10617_v22, 0.0 }
 0x255   : > { %6304 = vmatprep.mubr.msk.f32.mxu1 %vm2632_vm6, %v2592_v18  ;;  %v6346_v18 = vld [vmem:[%s10421_s4 + $0x218] sm:$0xff] }
 0x256   : > { %2919 = vmatmul.mubr.f32.gmra.mrb[122].mxu1 %v2591_v15  ;;  %v2423_v35 = vpop.permute.xlu1 %2422  ;;  %v2425_v8 = vpop.permute.xlu0 %2424  ;;  %v6833_v34 = vpack.c.bf16 %v6346_v18, %v6344_v60 }
 0x257   : > { %v2471_v6 = vsel %vm2444_vm5, %v2421_v59, %v2423_v35  ;;  %v2594_v4 = vmax.f32 %v10608_v19, %v2423_v35  ;;  %v3051_v19 = vadd.s32 8, %v10627_v48 }
 0x258   : > { %v2593_v1 = vmax.f32 %v10610_v55, %v2471_v6  ;;  %6834 = vmatprep.subr.bf16.mxu0 %v6833_v34  ;;  %v6382_v6 = vld [vmem:[%s10421_s4 + $0x338] sm:$0xff]  ;;  %v6867_v55 = vpack.c.bf16 %v6377_v27, %v6375_v54  ;;  %v6351_v34 = vld [vmem:[%s10421_s4 + $0x240] sm:$0xff]  ;;  %v6396_v54 = vld [vmem:[%s10421_s4 + $0x3a8] sm:$0xff] }
 0x259   : > { %6305 = vmatprep.mubr.msk.f32.mxu1 %vm2632_vm6, %v2594_v4  ;;  %v3067_v58 = vand.u32 15, %v3051_v19  ;;  %v6398_v19 = vld [vmem:[%s10421_s4 + $0x3b8] sm:$0xff] }
 0x25a   : > { %2924 = vmatmul.mubr.f32.gmra.mrb[124].mxu1 %v2593_v1  ;;  %v2429_v62 = vpop.permute.xlu0 %2428  ;;  %v2427_v52 = vpop.permute.xlu1 %2426 }
 0x25b   : > { %v2472_v26 = vsel %vm2444_vm5, %v2425_v8, %v2427_v52  ;;  %v2596_v13 = vmax.f32 %v10612_v7, %v2427_v52  ;;  %v6869_v52 = vpack.c.bf16 %v6382_v6, %v6380_v5  ;;  %v6384_v7 = vld [vmem:[%s10421_s4 + $0x348] sm:$0xff]  ;;  %vm8889_vm7 = vcmp.lt.s32.totalorder %v3067_v58, 14 }
 0x25c   : > { %v2595_v63 = vmax.f32 %v10614_v14, %v2472_v26  ;;  %v6379_v26 = vld [vmem:[%s10421_s4 + $0x320] sm:$0xff]  ;;  %v6885_v58 = vpack.c.bf16 %v6398_v19, %v6396_v54 }
 0x25d   : > { %6306 = vmatprep.mubr.msk.f32.mxu1 %vm2632_vm6, %v2596_v13  ;;  %v6386_v13 = vld [vmem:[%s10421_s4 + $0x358] sm:$0xff] }
 0x25e   : > { %v2433_v57 = vpop.permute.xlu0 %2432  ;;  %2929 = vmatmul.mubr.f32.gmra.mrb[126].mxu1 %v2595_v63  ;;  %v2431_v30 = vpop.permute.xlu1 %2430  ;;  %v6871_v63 = vpack.c.bf16 %v6381_v31, %v6379_v26  ;;  %v6362_v26 = vld [vmem:[%s10421_s4 + $0x298] sm:$0xff] }
 0x25f   : > { %v2473_v50 = vsel %vm2444_vm5, %v2429_v62, %v2431_v30  ;;  %v2598_v16 = vmax.f32 %v10616_v38, %v2431_v30  ;;  %v6343_v30 = vld [vmem:[%s10421_s4 + $0x200] sm:$0xff]  ;;  %v6348_v38 = vld [vmem:[%s10421_s4 + $0x228] sm:$0xff] }
 0x260   : > { %v2597_v42 = vmax.f32 %v10618_v24, %v2473_v50  ;;  %v6873_v50 = vpack.c.bf16 %v6386_v13, %v6384_v7  ;;  %v6383_v24 = vld [vmem:[%s10421_s4 + $0x340] sm:$0xff] }
 0x261   : > { %6307 = vmatprep.mubr.msk.f32.mxu1 %vm2632_vm6, %v2598_v16  ;;  %v6350_v16 = vld [vmem:[%s10421_s4 + $0x238] sm:$0xff] }
 0x262   : > { %2934 = vmatmul.mubr.f32.gmra.mrb[128].mxu1 %v2597_v42  ;;  %v2435_v51 = vpop.permute.xlu1 %2434  ;;  %v2437_v25 = vpop.permute.xlu0 %2436  ;;  %v6385_v42 = vld [vmem:[%s10421_s4 + $0x350] sm:$0xff] }
 0x263   : > { %v2474_v21 = vsel %vm2444_vm5, %v2433_v57, %v2435_v51  ;;  %v2600_v56 = vmax.f32 %v10619_v39, %v2435_v51  ;;  %v6388_v51 = vld [vmem:[%s10421_s4 + $0x368] sm:$0xff] }
 0x264   : > { %v2599_v28 = vmax.f32 %v10621_v23, %v2474_v21 }
 0x265   : > { %6308 = vmatprep.mubr.msk.f32.mxu1 %vm2632_vm6, %v2600_v56 }
 0x266   : > { %2939 = vmatmul.mubr.f32.gmra.mrb[130].mxu1 %v2599_v28  ;;  %v2441_v20 = vpop.permute.xlu0 %2440  ;;  %v6835_v28 = vpack.c.bf16 %v6345_v12, %v6343_v30  ;;  %v6400_v30 = vld [vmem:[%s10421_s4 + $0x3c8] sm:$0xff] }
 0x267   : > { %v2439_v0 = vpop.permute.xlu1 %2438 }
 0x268   : > { %v2475_v32 = vsel %vm2444_vm5, %v2437_v25, %v2439_v0  ;;  %v2602_v33 = vmax.f32 %v10622_v29, %v2439_v0  ;;  %v6390_v25 = vld [vmem:[%s10421_s4 + $0x378] sm:$0xff]  ;;  %v6347_v0 = vld [vmem:[%s10421_s4 + $0x220] sm:$0xff]  ;;  %v6837_v29 = vpack.c.bf16 %v6350_v16, %v6348_v38 }
 0x269   : > { %v2601_v9 = vmax.f32 %v10624_v10, %v2475_v32  ;;  %v6875_v10 = vpack.c.bf16 %v6385_v42, %v6383_v24  ;;  %v6359_v16 = vld [vmem:[%s10421_s4 + $0x280] sm:$0xff]  ;;  %v6361_v24 = vld [vmem:[%s10421_s4 + $0x290] sm:$0xff]  ;;  %v6364_v42 = vld [vmem:[%s10421_s4 + $0x2a8] sm:$0xff] }
 0x26a   : > { %6309 = vmatprep.mubr.msk.f32.mxu1 %vm2632_vm6, %v2602_v33  ;;  %v6349_v33 = vld [vmem:[%s10421_s4 + $0x230] sm:$0xff] }
 0x26b   : > { %2944 = vmatmul.mubr.f32.gmra.mrb[132].mxu1 %v2601_v9  ;;  %v2443_v47 = vpop.permute.xlu1 %2442  ;;  %v6839_v18 = vpack.c.bf16 %v6349_v33, %v6347_v0 }
 0x26c   : > { %v2476_v59 = vsel %vm2444_vm5, %v2441_v20, %v2443_v47  ;;  %v2604_v11 = vmax.f32 %v2251_v40, %v2443_v47  ;;  %v6376_v40 = vld [vmem:[%s10421_s4 + $0x308] sm:$0xff]  ;;  %v6354_v20 = vld [vmem:[%s10421_s4 + $0x258] sm:$0xff]  ;;  %v6877_v47 = vpack.c.bf16 %v6390_v25, %v6388_v51  ;;  %v6399_v25 = vld [vmem:[%s10421_s4 + $0x3c0] sm:$0xff] }
 0x26d   : > { %v2603_v43 = vmax.f32 %v10626_v41, %v2476_v59  ;;  %v6865_v53 = vpack.c.bf16 %v6378_v44, %v6376_v40  ;;  %v6387_v59 = vld [vmem:[%s10421_s4 + $0x360] sm:$0xff]  ;;  %v6392_v41 = vld [vmem:[%s10421_s4 + $0x388] sm:$0xff]  ;;  %v6841_v40 = vpack.c.bf16 %v6354_v20, %v6352_v46  ;;  %v6353_v44 = vld [vmem:[%s10421_s4 + $0x250] sm:$0xff] }
 0x26e   : > { %6310 = vmatprep.mubr.msk.f32.mxu1 %vm2632_vm6, %v2604_v11  ;;  %v6389_v11 = vld [vmem:[%s10421_s4 + $0x370] sm:$0xff]  ;;  %v6366_v51 = vld [vmem:[%s10421_s4 + $0x2b8] sm:$0xff] }
 0x26f   : > { %2949 = vmatmul.mubr.f32.gmra.mrb[134].mxu1 %v2603_v43  ;;  %6866 = vmatprep.subr.bf16.mxu1 %v6865_v53  ;;  %v6394_v43 = vld [vmem:[%s10421_s4 + $0x398] sm:$0xff]  ;;  %v6356_v53 = vld [vmem:[%s10421_s4 + $0x268] sm:$0xff] }
 0x270   : > { %3535 = vmatprep.mubr.f32.mxu1 %v8836_v45 }
 0x2c5   : > { %v2795_v17 = vpop.f32.mrb[72].mxu1 }
 0x2c6   : > { %2954 = vst [vmem:[#allocation4] sm:$0xff] %v2795_v17  ;;  %v2797_v15 = vpop.f32.mrb[73].mxu1  ;;  %v6358_v17 = vld [vmem:[%s10421_s4 + $0x278] sm:$0xff] }
 0x2c7   : > { %v6879_v15 = vpack.c.bf16 %v6389_v11, %v6387_v59  ;;  %v6365_v59 = vld [vmem:[%s10421_s4 + $0x2b0] sm:$0xff]  ;;  %v6368_v11 = vld [vmem:[%s10421_s4 + $0x2c8] sm:$0xff] }
 0x2c9   : > { %v2800_v3 = vpop.f32.mrb[74].mxu1 }
 0x2ca   : > { %2955 = vst [vmem:[#allocation4 + $0x8] sm:$0xff] %v2800_v3  ;;  %v2802_v2 = vpop.f32.mrb[75].mxu1  ;;  %v3053_v3 = vadd.s32 24, %v10627_v48 }
 0x2cb   : > { %v6881_v2 = vpack.c.bf16 %v6394_v43, %v6392_v41  ;;  %v6370_v43 = vld [vmem:[%s10421_s4 + $0x2d8] sm:$0xff] }
 0x2cc   : > { %v3069_v13 = vand.u32 15, %v3053_v3  ;;  %v6369_v3 = vld [vmem:[%s10421_s4 + $0x2d0] sm:$0xff] }
 0x2cd   : > { %v2805_v35 = vpop.f32.mrb[76].mxu1 }
 0x2ce   : > { %2956 = vst [vmem:[#allocation4 + $0x10] sm:$0xff] %v2805_v35  ;;  %v2807_v8 = vpop.f32.mrb[77].mxu1  ;;  %v6391_v35 = vld [vmem:[%s10421_s4 + $0x380] sm:$0xff]  ;;  %vm8998_vm8 = vcmp.lt.s32.totalorder %v3069_v13, 14 }
 0x2cf   : > { %v6393_v8 = vld [vmem:[%s10421_s4 + $0x390] sm:$0xff] }
 0x2d0   : > { %v6883_v31 = vpack.c.bf16 %v6393_v8, %v6391_v35  ;;  %v6372_v35 = vld [vmem:[%s10421_s4 + $0x2e8] sm:$0xff]  ;;  %v6374_v8 = vld [vmem:[%s10421_s4 + $0x2f8] sm:$0xff] }
 0x2d1   : > { %v2986_v4 = vld [vmem:[#allocation4] ss:$2 sm:$0xff]  ;;  %v3018_v37 = vld [vmem:[#allocation4 + $0x1] ss:$2 sm:$0xff]  ;;  %v2810_v49 = vpop.f32.mrb[78].mxu1 }
 0x2d2   : > { %v3098_v1 = vmax.f32 %v2986_v4, %v3018_v37  ;;  %2957 = vst [vmem:[#allocation4 + $0x18] sm:$0xff] %v2810_v49  ;;  %v2812_v62 = vpop.f32.mrb[79].mxu1  ;;  %v6843_v49 = vpack.c.bf16 %v6353_v44, %v6351_v34  ;;  %v6405_v34 = vld [vmem:[%s10421_s4 + $0x3f0] sm:$0xff] }
 0x2d3   : > { %v6357_v62 = vld [vmem:[%s10421_s4 + $0x270] sm:$0xff] }
 0x2d4   : > { %3132 = vst [vmem:[#allocation5 + $0x1] sm:$0xff] %v3098_v1  ;;  %3536 = vmatmul.mubr.f32.vlgmr.msra.gmra.mrb[136].mxu1 %v3098_v1  ;;  %v6845_v1 = vpack.c.bf16 %v6358_v17, %v6356_v53  ;;  %v6857_v17 = vpack.c.bf16 %v6370_v43, %v6368_v11 }
 0x2d5   : > { %v2815_v14 = vpop.f32.mrb[80].mxu1  ;;  %3541 = vmatprep.mubr.f32.mxu1 %v8836_v45  ;;  %6868 = vmatpush1.bf16.msra.mxu1 %v6867_v55  ;;  %v6355_v55 = vld [vmem:[%s10421_s4 + $0x260] sm:$0xff] }
 0x2d6   : > { %2958 = vst [vmem:[#allocation4 + $0x20] sm:$0xff] %v2815_v14  ;;  %v2817_v57 = vpop.f32.mrb[81].mxu1  ;;  %6870 = vmatprep.subr.bf16.mxu1 %v6869_v52  ;;  %v6360_v52 = vld [vmem:[%s10421_s4 + $0x288] sm:$0xff]  ;;  %v6395_v14 = vld [vmem:[%s10421_s4 + $0x3a0] sm:$0xff]  ;;  %v6847_v38 = vpack.c.bf16 %v6357_v62, %v6355_v55 }
 0x2d7   : > { %v6849_v22 = vpack.c.bf16 %v6362_v26, %v6360_v52  ;;  %v6371_v55 = vld [vmem:[%s10421_s4 + $0x2e0] sm:$0xff]  ;;  %v6408_v52 = vld [vmem:[%s10421_s4 + $0x408] sm:$0xff]  ;;  %v6410_v26 = vld [vmem:[%s10421_s4 + $0x418] sm:$0xff] }
 0x2d9   : > { %v2988_v21 = vld [vmem:[#allocation4 + $0x10] ss:$2 sm:$0xff]  ;;  %v3020_v39 = vld [vmem:[#allocation4 + $0x11] ss:$2 sm:$0xff]  ;;  %v2820_v56 = vpop.f32.mrb[82].mxu1  ;;  %6872 = vmatpush1.bf16.msra.mxu1 %v6871_v63  ;;  %v6397_v63 = vld [vmem:[%s10421_s4 + $0x3b0] sm:$0xff] }
 0x2da   : > { %v3099_v36 = vmax.f32 %v2988_v21, %v3020_v39  ;;  %2959 = vst [vmem:[#allocation4 + $0x28] sm:$0xff] %v2820_v56  ;;  %v2822_v23 = vpop.f32.mrb[83].mxu1  ;;  %6874 = vmatprep.subr.bf16.mxu1 %v6873_v50  ;;  %v6402_v50 = vld [vmem:[%s10421_s4 + $0x3d8] sm:$0xff]  ;;  %v6887_v21 = vpack.c.bf16 %v6397_v63, %v6395_v14  ;;  %v6897_v63 = vpack.c.bf16 %v6410_v26, %v6408_v52 }
 0x2db   : > { %v3148_v32 = vld [vmem:[#allocation5] sm:$0xff]  ;;  %v6889_v56 = vpack.c.bf16 %v6402_v50, %v6400_v30 }
 0x2dc   : > { %3261 = vmatmul.mubr.f32.vlgmr.msra.gmra.mrb[120].mxu0 %v3148_v32  ;;  %v3115_v9 = vsel %vm8889_vm7, %v3099_v36, 0.0  ;;  %7145 = vmatmul.mubr.msk.f32.gmra.mrb[138].mxu1 %vm8889_vm7, %v3099_v36  ;;  %v6401_v36 = vld [vmem:[%s10421_s4 + $0x3d0] sm:$0xff]  ;;  %v6404_v23 = vld [vmem:[%s10421_s4 + $0x3e8] sm:$0xff] }
 0x2dd   : > { %v2825_v61 = vpop.f32.mrb[84].mxu1  ;;  %3266 = vmatprep.mubr.f32.mxu0 %v8836_v45  ;;  %3133 = vst [vmem:[#allocation5 + $0x9] sm:$0xff] %v3115_v9  ;;  %3547 = vmatprep.mubr.f32.mxu1 %v8836_v45  ;;  %v6363_v9 = vld [vmem:[%s10421_s4 + $0x2a0] sm:$0xff] }
 0x2de   : > { %2960 = vst [vmem:[#allocation4 + $0x30] sm:$0xff] %v2825_v61  ;;  %v2827_v60 = vpop.f32.mrb[85].mxu1  ;;  %6836 = vmatpush1.bf16.msra.mxu0 %v6835_v28  ;;  %6876 = vmatpush1.bf16.msra.mxu1 %v6875_v10  ;;  %v6851_v10 = vpack.c.bf16 %v6361_v24, %v6359_v16  ;;  %v6891_v61 = vpack.c.bf16 %v6401_v36, %v6399_v25 }
 0x2df   : > { %6838 = vmatprep.subr.bf16.mxu0 %v6837_v29  ;;  %6878 = vmatprep.subr.bf16.mxu1 %v6877_v47  ;;  %v6406_v29 = vld [vmem:[%s10421_s4 + $0x3f8] sm:$0xff]  ;;  %v6853_v47 = vpack.c.bf16 %v6366_v51, %v6364_v42  ;;  %v6855_v53 = vpack.c.bf16 %v6365_v59, %v6363_v9 }
 0x2e0   : > { %v6893_v60 = vpack.c.bf16 %v6406_v29, %v6404_v23 }
 0x2e1   : > { %v2990_v27 = vld [vmem:[#allocation4 + $0x20] ss:$2 sm:$0xff]  ;;  %v3022_v5 = vld [vmem:[#allocation4 + $0x21] ss:$2 sm:$0xff]  ;;  %v2830_v6 = vpop.f32.mrb[86].mxu1 }
 0x2e2   : > { %v3100_v4 = vmax.f32 %v2990_v27, %v3022_v5  ;;  %2961 = vst [vmem:[#allocation4 + $0x38] sm:$0xff] %v2830_v6  ;;  %v2832_v37 = vpop.f32.mrb[87].mxu1  ;;  %6840 = vmatpush1.bf16.msra.mxu0 %v6839_v18  ;;  %6880 = vmatpush1.bf16.msra.mxu1 %v6879_v15  ;;  %v6403_v18 = vld [vmem:[%s10421_s4 + $0x3e0] sm:$0xff]  ;;  %v3055_v6 = vadd.s32 40, %v10627_v48 }
 0x2e3   : > { %6842 = vmatprep.subr.bf16.mxu0 %v6841_v40  ;;  %6882 = vmatprep.subr.bf16.mxu1 %v6881_v2  ;;  %v6367_v15 = vld [vmem:[%s10421_s4 + $0x2c0] sm:$0xff]  ;;  %v6895_v2 = vpack.c.bf16 %v6405_v34, %v6403_v18 }
 0x2e4   : > { %3134 = vst [vmem:[#allocation5 + $0x11] sm:$0xff] %v3100_v4  ;;  %v3149_v7 = vld [vmem:[#allocation5 + $0x8] sm:$0xff]  ;;  %3548 = vmatmul.mubr.f32.gmra.mrb[140].mxu1 %v3100_v4  ;;  %v6859_v37 = vpack.c.bf16 %v6369_v3, %v6367_v15  ;;  %v3071_v13 = vand.u32 15, %v3055_v6 }
 0x2e5   : > { %v2835_v57 = vpop.f32.mrb[88].mxu1  ;;  %3267 = vmatmul.mubr.f32.gmra.mrb[122].mxu0 %v3149_v7  ;;  %3553 = vmatprep.mubr.f32.mxu1 %v8836_v45 }
 0x2e6   : > { %2962 = vst [vmem:[#allocation4 + $0x40] sm:$0xff] %v2835_v57  ;;  %v2837_v12 = vpop.f32.mrb[89].mxu1  ;;  %3272 = vmatprep.mubr.f32.mxu0 %v8836_v45  ;;  %6844 = vmatpush1.bf16.msra.mxu0 %v6843_v49  ;;  %v6861_v49 = vpack.c.bf16 %v6374_v8, %v6372_v35  ;;  %vm3087_vm9 = vcmp.lt.s32.totalorder %v3071_v13, 14 }
 0x2e7   : > { %6846 = vmatprep.subr.bf16.mxu0 %v6845_v1  ;;  %6884 = vmatpush1.bf16.msra.mxu1 %v6883_v31  ;;  %v6373_v1 = vld [vmem:[%s10421_s4 + $0x2f0] sm:$0xff]  ;;  %v10632_v31 = vmov 0.0|0.0  }
 0x2e8   : > { %6886 = vmatprep.subr.bf16.mxu1 %v6885_v58  ;;  %v6863_v14 = vpack.c.bf16 %v6373_v1, %v6371_v55 }
 0x2e9   : > { %v2992_v28 = vld [vmem:[#allocation4 + $0x30] ss:$2 sm:$0xff]  ;;  %v3024_v0 = vld [vmem:[#allocation4 + $0x31] ss:$2 sm:$0xff]  ;;  %v2840_v32 = vpop.f32.mrb[90].mxu1 }
 0x2ea   : > { %v3101_v33 = vmax.f32 %v2992_v28, %v3024_v0  ;;  %2963 = vst [vmem:[#allocation4 + $0x48] sm:$0xff] %v2840_v32  ;;  %v2842_v46 = vpop.f32.mrb[91].mxu1  ;;  %6848 = vmatpush1.bf16.msra.mxu0 %v6847_v38 }
 0x2eb   : > { %v3150_v20 = vld [vmem:[#allocation5 + $0x10] sm:$0xff]  ;;  %6850 = vmatprep.subr.bf16.mxu0 %v6849_v22  ;;  %6888 = vmatpush1.bf16.msra.mxu1 %v6887_v21 }
 0x2ec   : > { %3273 = vmatmul.mubr.f32.gmra.mrb[124].mxu0 %v3150_v20  ;;  %v3117_v41 = vsel %vm8998_vm8, %v3101_v33, 0.0  ;;  %6890 = vmatprep.subr.bf16.mxu1 %v6889_v56  ;;  %v3057_v56 = vadd.s32 56, %v10627_v48 }
 0x2ed   : > { %v2845_v40 = vpop.f32.mrb[92].mxu1  ;;  %3278 = vmatprep.mubr.f32.mxu0 %v8836_v45  ;;  %3135 = vst [vmem:[#allocation5 + $0x19] sm:$0xff] %v3117_v41  ;;  %7146 = vmatmul.mubr.msk.f32.gmra.mrb[142].mxu1 %vm8998_vm8, %v3101_v33 }
 0x2ee   : > { %2964 = vst [vmem:[#allocation4 + $0x50] sm:$0xff] %v2845_v40  ;;  %v2847_v44 = vpop.f32.mrb[93].mxu1  ;;  %3559 = vmatprep.mubr.f32.mxu1 %v8836_v45  ;;  %6852 = vmatpush1.bf16.msra.mxu0 %v6851_v10  ;;  %v3073_v0 = vand.u32 15, %v3057_v56 }
 0x2ef   : > { %6854 = vmatprep.subr.bf16.mxu0 %v6853_v47  ;;  %6892 = vmatpush1.bf16.msra.mxu1 %v6891_v61 }
 0x2f0   : > { %6894 = vmatprep.subr.bf16.mxu1 %v6893_v60  ;;  %vm3089_vm10 = vcmp.lt.s32.totalorder %v3073_v0, 14  ;;  %v3059_v60 = vadd.s32 72, %v10627_v48 }
 0x2f1   : > { %v2994_v54 = vld [vmem:[#allocation4 + $0x40] ss:$2 sm:$0xff]  ;;  %v3026_v27 = vld [vmem:[#allocation4 + $0x41] ss:$2 sm:$0xff]  ;;  %v2850_v5 = vpop.f32.mrb[94].mxu1 }
 0x2f2   : > { %v3102_v19 = vmax.f32 %v2994_v54, %v3026_v27  ;;  %2965 = vst [vmem:[#allocation4 + $0x58] sm:$0xff] %v2850_v5  ;;  %v2852_v4 = vpop.f32.mrb[95].mxu1  ;;  %6856 = vmatpush1.bf16.msra.mxu0 %v6855_v53  ;;  %v3075_v53 = vand.u32 15, %v3059_v60 }
 0x2f3   : > { %6858 = vmatprep.subr.bf16.mxu0 %v6857_v17  ;;  %6896 = vmatpush1.bf16.msra.mxu1 %v6895_v2 }
 0x2f4   : > { %3136 = vst [vmem:[#allocation5 + $0x21] sm:$0xff] %v3102_v19  ;;  %v3151_v62 = vld [vmem:[#allocation5 + $0x18] sm:$0xff]  ;;  %3560 = vmatmul.mubr.f32.gmra.mrb[144].mxu1 %v3102_v19  ;;  %6929 = vmatprep.subr.bf16.mxu1 %v10632_v31  ;;  %vm3091_vm11 = vcmp.lt.s32.totalorder %v3075_v53, 14 }
 0x2f5   : > { %v2855_v7 = vpop.f32.mrb[96].mxu1  ;;  %3279 = vmatmul.mubr.f32.gmra.mrb[126].mxu0 %v3151_v62  ;;  %3565 = vmatprep.mubr.f32.mxu1 %v8836_v45 }
 0x2f6   : > { %2966 = vst [vmem:[#allocation4 + $0x60] sm:$0xff] %v2855_v7  ;;  %v2857_v58 = vpop.f32.mrb[97].mxu1  ;;  %3284 = vmatprep.mubr.f32.mxu0 %v8836_v45  ;;  %6860 = vmatpush1.bf16.msra.mxu0 %v6859_v37 }
 0x2f7   : > { %6862 = vmatprep.subr.bf16.mxu0 %v6861_v49  ;;  %v3061_v49 = vadd.s32 88, %v10627_v48 }
 0x2f9   : > { %v2996_v57 = vld [vmem:[#allocation4 + $0x50] ss:$2 sm:$0xff]  ;;  %v3028_v30 = vld [vmem:[#allocation4 + $0x51] ss:$2 sm:$0xff]  ;;  %v2860_v50 = vpop.f32.mrb[98].mxu1  ;;  %v3077_v26 = vand.u32 15, %v3061_v49 }
 0x2fa   : > { %v3103_v12 = vmax.f32 %v2996_v57, %v3028_v30  ;;  %2967 = vst [vmem:[#allocation4 + $0x68] sm:$0xff] %v2860_v50  ;;  %v2862_v38 = vpop.f32.mrb[99].mxu1  ;;  %6864 = vmatpush1.bf16.msra.mxu0 %v6863_v14  ;;  %v6416_v49 = vld [vmem:[%s10421_s4 + $0x448] sm:$0xff] }
 0x2fb   : > { %v3152_v16 = vld [vmem:[#allocation5 + $0x20] sm:$0xff]  ;;  %6898 = vmatprep.subr.bf16.mxu0 %v6897_v63  ;;  %vm3093_vm12 = vcmp.lt.s32.totalorder %v3077_v26, 14  ;;  %v6415_v26 = vld [vmem:[%s10421_s4 + $0x440] sm:$0xff] }
 0x2fc   : > { %3285 = vmatmul.mubr.f32.gmra.mrb[128].mxu0 %v3152_v16  ;;  %v3119_v22 = vsel %vm3087_vm9, %v3103_v12, 0.0  ;;  %7147 = vmatmul.mubr.msk.f32.gmra.mrb[146].mxu1 %vm3087_vm9, %v3103_v12 }
 0x2fd   : > { %v2865_v24 = vpop.f32.mrb[100].mxu1  ;;  %3290 = vmatprep.mubr.f32.mxu0 %v8836_v45  ;;  %3137 = vst [vmem:[#allocation5 + $0x29] sm:$0xff] %v3119_v22  ;;  %3571 = vmatprep.mubr.f32.mxu1 %v8836_v45 }
 0x2fe   : > { %2968 = vst [vmem:[#allocation4 + $0x70] sm:$0xff] %v2865_v24  ;;  %v2867_v42 = vpop.f32.mrb[101].mxu1 }
 0x2ff   : > { %v3063_v42 = vadd.s32 104, %v10627_v48 }
 0x301   : > { %v2998_v51 = vld [vmem:[#allocation4 + $0x60] ss:$2 sm:$0xff]  ;;  %v3030_v21 = vld [vmem:[#allocation4 + $0x61] ss:$2 sm:$0xff]  ;;  %v2870_v39 = vpop.f32.mrb[102].mxu1 }
 0x302   : > { %v3104_v25 = vmax.f32 %v2998_v51, %v3030_v21  ;;  %2969 = vst [vmem:[#allocation4 + $0x78] sm:$0xff] %v2870_v39  ;;  %v2872_v36 = vpop.f32.mrb[103].mxu1 }
 0x304   : > { %3138 = vst [vmem:[#allocation5 + $0x31] sm:$0xff] %v3104_v25  ;;  %v3153_v23 = vld [vmem:[#allocation5 + $0x28] sm:$0xff]  ;;  %3572 = vmatmul.mubr.f32.gmra.mrb[148].mxu1 %v3104_v25  ;;  %v3079_v25 = vand.u32 15, %v3063_v42  ;;  %v6423_v42 = vld [vmem:[%s10421_s4 + $0x480] sm:$0xff] }
 0x305   : > { %v2875_v28 = vpop.f32.mrb[104].mxu1  ;;  %3291 = vmatmul.mubr.f32.gmra.mrb[130].mxu0 %v3153_v23  ;;  %3577 = vmatprep.mubr.f32.mxu1 %v8836_v45 }
 0x306   : > { %2970 = vst [vmem:[#allocation4 + $0x80] sm:$0xff] %v2875_v28  ;;  %v2877_v32 = vpop.f32.mrb[105].mxu1  ;;  %3296 = vmatprep.mubr.f32.mxu0 %v8836_v45  ;;  %vm3095_vm13 = vcmp.lt.s32.totalorder %v3079_v25, 14  ;;  %v6428_v25 = vld [vmem:[%s10421_s4 + $0x4a8] sm:$0xff] }
 0x309   : > { %v3000_v29 = vld [vmem:[#allocation4 + $0x70] ss:$2 sm:$0xff]  ;;  %v3032_v33 = vld [vmem:[#allocation4 + $0x71] ss:$2 sm:$0xff]  ;;  %v2880_v46 = vpop.f32.mrb[106].mxu1 }
 0x30a   : > { %v3105_v10 = vmax.f32 %v3000_v29, %v3032_v33  ;;  %2971 = vst [vmem:[#allocation4 + $0x88] sm:$0xff] %v2880_v46  ;;  %v2882_v9 = vpop.f32.mrb[107].mxu1 }
 0x30b   : > { %v3154_v20 = vld [vmem:[#allocation5 + $0x30] sm:$0xff] }
 0x30c   : > { %3297 = vmatmul.mubr.f32.gmra.mrb[132].mxu0 %v3154_v20  ;;  %v3121_v47 = vsel %vm3089_vm10, %v3105_v10, 0.0  ;;  %7148 = vmatmul.mubr.msk.f32.gmra.mrb[150].mxu1 %vm3089_vm10, %v3105_v10 }
 0x30d   : > { %v2885_v59 = vpop.f32.mrb[108].mxu1  ;;  %3302 = vmatprep.mubr.f32.mxu0 %v8836_v45  ;;  %3139 = vst [vmem:[#allocation5 + $0x39] sm:$0xff] %v3121_v47  ;;  %3583 = vmatprep.mubr.f32.mxu1 %v8836_v45 }
 0x30e   : > { %2972 = vst [vmem:[#allocation4 + $0x90] sm:$0xff] %v2885_v59  ;;  %v2887_v11 = vpop.f32.mrb[109].mxu1 }
 0x30f   : > { %v3065_v11 = vadd.s32 120, %v10627_v48 }
 0x311   : > { %v3002_v61 = vld [vmem:[#allocation4 + $0x80] ss:$2 sm:$0xff]  ;;  %v3034_v41 = vld [vmem:[#allocation4 + $0x81] ss:$2 sm:$0xff]  ;;  %v2890_v43 = vpop.f32.mrb[110].mxu1  ;;  %v3081_v60 = vand.u32 15, %v3065_v11 }
 0x312   : > { %v3106_v18 = vmax.f32 %v3002_v61, %v3034_v41  ;;  %2973 = vst [vmem:[#allocation4 + $0x98] sm:$0xff] %v2890_v43  ;;  %v2892_v34 = vpop.f32.mrb[111].mxu1 }
 0x313   : > { %vm3097_vm14 = vcmp.lt.s32.totalorder %v3081_v60, 14 }
 0x314   : > { %3140 = vst [vmem:[#allocation5 + $0x41] sm:$0xff] %v3106_v18  ;;  %v3155_v40 = vld [vmem:[#allocation5 + $0x38] sm:$0xff]  ;;  %3584 = vmatmul.mubr.f32.gmra.mrb[152].mxu1 %v3106_v18 }
 0x315   : > { %v2895_v44 = vpop.f32.mrb[112].mxu1  ;;  %3303 = vmatmul.mubr.f32.gmra.mrb[134].mxu0 %v3155_v40  ;;  %3589 = vmatprep.mubr.f32.mxu1 %v8836_v45 }
 0x316   : > { %2974 = vst [vmem:[#allocation4 + $0xa0] sm:$0xff] %v2895_v44  ;;  %v2897_v17 = vpop.f32.mrb[113].mxu1  ;;  %3308 = vmatprep.mubr.f32.mxu0 %v8836_v45 }
 0x317   : > { %v4034_v17 = vld [vmem:[#allocation5 + $0x3] sm:$0xff] }
 0x319   : > { %v3004_v15 = vld [vmem:[#allocation4 + $0x90] ss:$2 sm:$0xff]  ;;  %v3036_v3 = vld [vmem:[#allocation4 + $0x91] ss:$2 sm:$0xff]  ;;  %v2900_v2 = vpop.f32.mrb[114].mxu1 }
 0x31a   : > { %v3107_v35 = vmax.f32 %v3004_v15, %v3036_v3  ;;  %2975 = vst [vmem:[#allocation4 + $0xa8] sm:$0xff] %v2900_v2  ;;  %v2902_v8 = vpop.f32.mrb[115].mxu1  ;;  %v6407_v15 = vld [vmem:[%s10421_s4 + $0x400] sm:$0xff]  ;;  %v6409_v3 = vld [vmem:[%s10421_s4 + $0x410] sm:$0xff]  ;;  %v6412_v2 = vld [vmem:[%s10421_s4 + $0x428] sm:$0xff] }
 0x31b   : > { %v3156_v54 = vld [vmem:[#allocation5 + $0x40] sm:$0xff]  ;;  %v4035_v8 = vld [vmem:[#allocation5 + $0xb] sm:$0xff] }
 0x31c   : > { %3309 = vmatmul.mubr.f32.gmra.mrb[136].mxu0 %v3156_v54  ;;  %v3123_v27 = vsel %vm3091_vm11, %v3107_v35, 0.0  ;;  %7149 = vmatmul.mubr.msk.f32.gmra.mrb[154].mxu1 %vm3091_vm11, %v3107_v35  ;;  %v6414_v54 = vld [vmem:[%s10421_s4 + $0x438] sm:$0xff] }
 0x31d   : > { %v2905_v5 = vpop.f32.mrb[116].mxu1  ;;  %3314 = vmatprep.mubr.f32.mxu0 %v8836_v45  ;;  %3141 = vst [vmem:[#allocation5 + $0x49] sm:$0xff] %v3123_v27  ;;  %3595 = vmatprep.mubr.f32.mxu1 %v8836_v45  ;;  %v6899_v27 = vpack.c.bf16 %v6409_v3, %v6407_v15  ;;  %v3735_v15 = vld [vmem:[#allocation5 + $0x3a] sm:$0xff] }
 0x31e   : > { %2976 = vst [vmem:[#allocation4 + $0xb0] sm:$0xff] %v2905_v5  ;;  %v2907_v6 = vpop.f32.mrb[117].mxu1  ;;  %v3728_v5 = vld [vmem:[#allocation5 + $0x2] sm:$0xff] }
 0x31f   : > { %v6901_v6 = vpack.c.bf16 %v6414_v54, %v6412_v2 }
 0x321   : > { %v3006_v19 = vld [vmem:[#allocation4 + $0xa0] ss:$2 sm:$0xff]  ;;  %v3038_v4 = vld [vmem:[#allocation4 + $0xa1] ss:$2 sm:$0xff]  ;;  %v2910_v37 = vpop.f32.mrb[118].mxu1 }
 0x322   : > { %v3108_v55 = vmax.f32 %v3006_v19, %v3038_v4  ;;  %2977 = vst [vmem:[#allocation4 + $0xb8] sm:$0xff] %v2910_v37  ;;  %v2912_v1 = vpop.f32.mrb[119].mxu1  ;;  %v6411_v19 = vld [vmem:[%s10421_s4 + $0x420] sm:$0xff]  ;;  %v6413_v4 = vld [vmem:[%s10421_s4 + $0x430] sm:$0xff] }
 0x323   : > { %v4036_v37 = vld [vmem:[#allocation5 + $0x13] sm:$0xff]  ;;  %v6903_v1 = vpack.c.bf16 %v6413_v4, %v6411_v19 }
 0x324   : > { %3142 = vst [vmem:[#allocation5 + $0x51] sm:$0xff] %v3108_v55  ;;  %v3157_v62 = vld [vmem:[#allocation5 + $0x48] sm:$0xff]  ;;  %3596 = vmatmul.mubr.f32.gmra.mrb[156].mxu1 %v3108_v55  ;;  %v6418_v55 = vld [vmem:[%s10421_s4 + $0x458] sm:$0xff] }
 0x325   : > { %v2915_v52 = vpop.f32.mrb[120].mxu1  ;;  %3315 = vmatmul.mubr.f32.gmra.mrb[138].mxu0 %v3157_v62  ;;  %3601 = vmatprep.mubr.f32.mxu1 %v8836_v45  ;;  %v3729_v62 = vld [vmem:[#allocation5 + $0xa] sm:$0xff]  ;;  %v3736_v2 = vld [vmem:[#allocation5 + $0x42] sm:$0xff] }
 0x326   : > { %2978 = vst [vmem:[#allocation4 + $0xc0] sm:$0xff] %v2915_v52  ;;  %v2917_v7 = vpop.f32.mrb[121].mxu1  ;;  %3320 = vmatprep.mubr.f32.mxu0 %v8836_v45  ;;  %v6905_v52 = vpack.c.bf16 %v6418_v55, %v6416_v49 }
 0x327   : > { %v6417_v7 = vld [vmem:[%s10421_s4 + $0x450] sm:$0xff] }
 0x329   : > { %v3008_v13 = vld [vmem:[#allocation4 + $0xb0] ss:$2 sm:$0xff]  ;;  %v3040_v58 = vld [vmem:[#allocation4 + $0xb1] ss:$2 sm:$0xff]  ;;  %v2920_v14 = vpop.f32.mrb[122].mxu1 }
 0x32a   : > { %v3109_v63 = vmax.f32 %v3008_v13, %v3040_v58  ;;  %2979 = vst [vmem:[#allocation4 + $0xc8] sm:$0xff] %v2920_v14  ;;  %v2922_v57 = vpop.f32.mrb[123].mxu1  ;;  %v4037_v13 = vld [vmem:[#allocation5 + $0x1b] sm:$0xff]  ;;  %v6422_v14 = vld [vmem:[%s10421_s4 + $0x478] sm:$0xff] }
 0x32b   : > { %v3158_v30 = vld [vmem:[#allocation5 + $0x50] sm:$0xff]  ;;  %v6420_v58 = vld [vmem:[%s10421_s4 + $0x468] sm:$0xff] }
 0x32c   : > { %3321 = vmatmul.mubr.f32.gmra.mrb[140].mxu0 %v3158_v30  ;;  %v3125_v50 = vsel %vm3093_vm12, %v3109_v63, 0.0  ;;  %7150 = vmatmul.mubr.msk.f32.gmra.mrb[158].mxu1 %vm3093_vm12, %v3109_v63  ;;  %v6907_v63 = vpack.c.bf16 %v6417_v7, %v6415_v26  ;;  %v6909_v57 = vpack.c.bf16 %v6422_v14, %v6420_v58  ;;  %v6419_v30 = vld [vmem:[%s10421_s4 + $0x460] sm:$0xff]  ;;  %v4043_v3 = vld [vmem:[#allocation5 + $0x4b] sm:$0xff] }
 0x32d   : > { %v2925_v12 = vpop.f32.mrb[124].mxu1  ;;  %3326 = vmatprep.mubr.f32.mxu0 %v8836_v45  ;;  %3143 = vst [vmem:[#allocation5 + $0x59] sm:$0xff] %v3125_v50  ;;  %3607 = vmatprep.mubr.f32.mxu1 %v8836_v45  ;;  %v3730_v50 = vld [vmem:[#allocation5 + $0x12] sm:$0xff]  ;;  %v4344_v14 = vld [vmem:[#allocation5 + $0x24] sm:$0xff] }
 0x32e   : > { %2980 = vst [vmem:[#allocation4 + $0xd0] sm:$0xff] %v2925_v12  ;;  %v2927_v38 = vpop.f32.mrb[125].mxu1  ;;  %v4038_v12 = vld [vmem:[#allocation5 + $0x23] sm:$0xff]  ;;  %v4341_v26 = vld [vmem:[#allocation5 + $0xc] sm:$0xff]  ;;  %v4342_v7 = vld [vmem:[#allocation5 + $0x14] sm:$0xff] }
 0x32f   : > { %v6421_v38 = vld [vmem:[%s10421_s4 + $0x470] sm:$0xff] }
 0x331   : > { %v3010_v16 = vld [vmem:[#allocation4 + $0xc0] ss:$2 sm:$0xff]  ;;  %v3042_v22 = vld [vmem:[#allocation4 + $0xc1] ss:$2 sm:$0xff]  ;;  %v2930_v24 = vpop.f32.mrb[126].mxu1 }
 0x332   : > { %v3110_v51 = vmax.f32 %v3010_v16, %v3042_v22  ;;  %2981 = vst [vmem:[#allocation4 + $0xd8] sm:$0xff] %v2930_v24  ;;  %v2932_v21 = vpop.f32.mrb[127].mxu1  ;;  %v6424_v16 = vld [vmem:[%s10421_s4 + $0x488] sm:$0xff]  ;;  %v6426_v22 = vld [vmem:[%s10421_s4 + $0x498] sm:$0xff]  ;;  %v6911_v24 = vpack.c.bf16 %v6421_v38, %v6419_v30 }
 0x333   : > { %v4039_v21 = vld [vmem:[#allocation5 + $0x2b] sm:$0xff]  ;;  %v4346_v38 = vld [vmem:[#allocation5 + $0x34] sm:$0xff] }
 0x334   : > { %3144 = vst [vmem:[#allocation5 + $0x61] sm:$0xff] %v3110_v51  ;;  %v3159_v39 = vld [vmem:[#allocation5 + $0x58] sm:$0xff]  ;;  %3608 = vmatmul.mubr.f32.gmra.mrb[160].mxu1 %v3110_v51 }
 0x335   : > { %v2935_v56 = vpop.f32.mrb[128].mxu1  ;;  %3327 = vmatmul.mubr.f32.gmra.mrb[142].mxu0 %v3159_v39  ;;  %3613 = vmatprep.mubr.f32.mxu1 %v8836_v45  ;;  %v3731_v51 = vld [vmem:[#allocation5 + $0x1a] sm:$0xff]  ;;  %v6913_v39 = vpack.c.bf16 %v6426_v22, %v6424_v16 }
 0x336   : > { %2982 = vst [vmem:[#allocation4 + $0xe0] sm:$0xff] %v2935_v56  ;;  %v2937_v36 = vpop.f32.mrb[129].mxu1  ;;  %3332 = vmatprep.mubr.f32.mxu0 %v8836_v45  ;;  %v6425_v56 = vld [vmem:[%s10421_s4 + $0x490] sm:$0xff] }
 0x337   : > { %v6430_v36 = vld [vmem:[%s10421_s4 + $0x4b8] sm:$0xff] }
 0x339   : > { %v3012_v23 = vld [vmem:[#allocation4 + $0xd0] ss:$2 sm:$0xff]  ;;  %v3044_v28 = vld [vmem:[#allocation4 + $0xd1] ss:$2 sm:$0xff]  ;;  %v2940_v0 = vpop.f32.mrb[130].mxu1 }
 0x33a   : > { %v3111_v32 = vmax.f32 %v3012_v23, %v3044_v28  ;;  %2983 = vst [vmem:[#allocation4 + $0xe8] sm:$0xff] %v2940_v0  ;;  %v2942_v29 = vpop.f32.mrb[131].mxu1  ;;  %v6915_v23 = vpack.c.bf16 %v6425_v56, %v6423_v42  ;;  %v6427_v28 = vld [vmem:[%s10421_s4 + $0x4a0] sm:$0xff]  ;;  %v3732_v0 = vld [vmem:[#allocation5 + $0x22] sm:$0xff] }
 0x33b   : > { %v3160_v33 = vld [vmem:[#allocation5 + $0x60] sm:$0xff]  ;;  %v6917_v29 = vpack.c.bf16 %v6430_v36, %v6428_v25 }
 0x33c   : > { %3333 = vmatmul.mubr.f32.gmra.mrb[144].mxu0 %v3160_v33  ;;  %v3127_v46 = vsel %vm3095_vm13, %v3111_v32, 0.0  ;;  %7151 = vmatmul.mubr.msk.f32.gmra.mrb[162].mxu1 %vm3095_vm13, %v3111_v32  ;;  %v4040_v32 = vld [vmem:[#allocation5 + $0x33] sm:$0xff]  ;;  %v6429_v33 = vld [vmem:[%s10421_s4 + $0x4b0] sm:$0xff]  ;;  %v4045_v54 = vld [vmem:[#allocation5 + $0x5b] sm:$0xff] }
 0x33d   : > { %3338 = vmatprep.mubr.f32.mxu0 %v8836_v45  ;;  %3145 = vst [vmem:[#allocation5 + $0x69] sm:$0xff] %v3127_v46  ;;  %3619 = vmatprep.mubr.f32.mxu1 %v8836_v45  ;;  %v6432_v46 = vld [vmem:[%s10421_s4 + $0x4c8] sm:$0xff] }
 0x33e   : > { %v2945_v10 = vpop.f32.mrb[132].mxu1 }
 0x33f   : > { %2984 = vst [vmem:[#allocation4 + $0xf0] sm:$0xff] %v2945_v10  ;;  %v2947_v9 = vpop.f32.mrb[133].mxu1  ;;  %v6434_v10 = vld [vmem:[%s10421_s4 + $0x4d8] sm:$0xff] }
 0x340   : > { %v6919_v9 = vpack.c.bf16 %v6429_v33, %v6427_v28  ;;  %v6921_v11 = vpack.c.bf16 %v6434_v10, %v6432_v46  ;;  %v4349_v28 = vld [vmem:[#allocation5 + $0x4c] sm:$0xff]  ;;  %v4350_v33 = vld [vmem:[#allocation5 + $0x54] sm:$0xff] }
 0x341   : > { %v3014_v20 = vld [vmem:[#allocation4 + $0xe0] ss:$2 sm:$0xff]  ;;  %v3046_v47 = vld [vmem:[#allocation4 + $0xe1] ss:$2 sm:$0xff] }
 0x342   : > { %v2950_v59 = vpop.f32.mrb[134].mxu1  ;;  %v3112_v61 = vmax.f32 %v3014_v20, %v3046_v47  ;;  %v6431_v20 = vld [vmem:[%s10421_s4 + $0x4c0] sm:$0xff]  ;;  %v3733_v47 = vld [vmem:[#allocation5 + $0x2a] sm:$0xff] }
 0x343   : > { %2985 = vst [vmem:[#allocation4 + $0xf8] sm:$0xff] %v2950_v59  ;;  %v2952_v41 = vpop.f32.mrb[135].mxu1  ;;  %v4041_v59 = vld [vmem:[#allocation5 + $0x3b] sm:$0xff] }
 0x344   : > { %3146 = vst [vmem:[#allocation5 + $0x71] sm:$0xff] %v3112_v61  ;;  %v3161_v43 = vld [vmem:[#allocation5 + $0x68] sm:$0xff]  ;;  %3620 = vmatmul.mubr.f32.gmra.mrb[164].mxu1 %v3112_v61  ;;  %v6436_v41 = vld [vmem:[%s10421_s4 + $0x4e8] sm:$0xff] }
 0x345   : > { %3339 = vmatmul.mubr.f32.gmra.mrb[146].mxu0 %v3161_v43  ;;  %3625 = vmatprep.mubr.f32.mxu1 %v8836_v45  ;;  %v6433_v61 = vld [vmem:[%s10421_s4 + $0x4d0] sm:$0xff]  ;;  %v6438_v43 = vld [vmem:[%s10421_s4 + $0x4f8] sm:$0xff] }
 0x346   : > { %3344 = vmatprep.mubr.f32.mxu0 %v8836_v45  ;;  %v6923_v60 = vpack.c.bf16 %v6433_v61, %v6431_v20  ;;  %v3740_v4 = vld [vmem:[#allocation5 + $0x62] sm:$0xff] }
 0x34a   : > { %v3016_v18 = vld [vmem:[#allocation4 + $0xf0] ss:$2 sm:$0xff]  ;;  %v3048_v34 = vld [vmem:[#allocation4 + $0xf1] ss:$2 sm:$0xff] }
 0x34b   : > { %v3113_v40 = vmax.f32 %v3016_v18, %v3048_v34  ;;  %v3162_v44 = vld [vmem:[#allocation5 + $0x70] sm:$0xff]  ;;  %v6435_v18 = vld [vmem:[%s10421_s4 + $0x4e0] sm:$0xff] }
 0x34c   : > { %3345 = vmatmul.mubr.f32.gmra.mrb[148].mxu0 %v3162_v44  ;;  %v3734_v34 = vld [vmem:[#allocation5 + $0x32] sm:$0xff]  ;;  %v6925_v44 = vpack.c.bf16 %v6438_v43, %v6436_v41  ;;  %v3741_v49 = vld [vmem:[#allocation5 + $0x6a] sm:$0xff] }
 0x34d   : > { %v3129_v53 = vsel %vm3097_vm14, %v3113_v40, 0.0  ;;  %3350 = vmatprep.mubr.f32.mxu0 %v8836_v45  ;;  %7152 = vmatmul.mubr.msk.f32.gmra.mrb[166].mxu1 %vm3097_vm14, %v3113_v40  ;;  %v4042_v40 = vld [vmem:[#allocation5 + $0x43] sm:$0xff]  ;;  %v4047_v19 = vld [vmem:[#allocation5 + $0x6b] sm:$0xff] }
 0x34e   : > { %3147 = vst [vmem:[#allocation5 + $0x79] sm:$0xff] %v3129_v53  ;;  %4147 = vmatprep.mubr.f32.mxu1 %v8836_v45  ;;  %v6437_v53 = vld [vmem:[%s10421_s4 + $0x4f0] sm:$0xff] }
 0x34f   : > { %v4352_v41 = vld [vmem:[#allocation5 + $0x64] sm:$0xff] }
 0x351   : > { %4148 = vmatmul.mubr.f32.vlgmr.msra.gmra.mrb[168].mxu1 %v4034_v17  ;;  %v6927_v17 = vpack.c.bf16 %v6437_v53, %v6435_v18 }
 0x352   : > { %4153 = vmatprep.mubr.f32.mxu1 %v8836_v45 }
 0x355   : > { %v3163_v35 = vld [vmem:[#allocation5 + $0x78] sm:$0xff]  ;;  %4154 = vmatmul.mubr.f32.gmra.mrb[170].mxu1 %v4035_v8  ;;  %v3737_v8 = vld [vmem:[#allocation5 + $0x4a] sm:$0xff] }
 0x356   : > { %3351 = vmatmul.mubr.f32.gmra.mrb[150].mxu0 %v3163_v35  ;;  %4159 = vmatprep.mubr.f32.mxu1 %v8836_v45  ;;  %v4044_v35 = vld [vmem:[#allocation5 + $0x53] sm:$0xff]  ;;  %v4049_v55 = vld [vmem:[#allocation5 + $0x7b] sm:$0xff] }
 0x357   : > { %3841 = vmatprep.mubr.f32.mxu0 %v8836_v45 }
 0x359   : > { %4160 = vmatmul.mubr.f32.gmra.mrb[172].mxu1 %v4036_v37  ;;  %v4048_v37 = vld [vmem:[#allocation5 + $0x73] sm:$0xff] }
 0x35a   : > { %3842 = vmatmul.mubr.f32.vlgmr.msra.gmra.mrb[152].mxu0 %v3728_v5  ;;  %4165 = vmatprep.mubr.f32.mxu1 %v8836_v45  ;;  %v4046_v5 = vld [vmem:[#allocation5 + $0x63] sm:$0xff] }
 0x35b   : > { %6900 = vmatpush1.bf16.msra.mxu0 %v6899_v27  ;;  %3847 = vmatprep.mubr.f32.mxu0 %v8836_v45  ;;  %v3738_v27 = vld [vmem:[#allocation5 + $0x52] sm:$0xff] }
 0x35c   : > { %6902 = vmatprep.subr.bf16.mxu0 %v6901_v6  ;;  %v3739_v6 = vld [vmem:[#allocation5 + $0x5a] sm:$0xff] }
 0x35d   : > { %4166 = vmatmul.mubr.f32.gmra.mrb[174].mxu1 %v4037_v13  ;;  %v4343_v13 = vld [vmem:[#allocation5 + $0x1c] sm:$0xff] }
 0x35e   : > { %3848 = vmatmul.mubr.f32.gmra.mrb[154].mxu0 %v3729_v62  ;;  %4171 = vmatprep.mubr.f32.mxu1 %v8836_v45  ;;  %v3743_v62 = vld [vmem:[#allocation5 + $0x7a] sm:$0xff] }
 0x35f   : > { %3853 = vmatprep.mubr.f32.mxu0 %v8836_v45  ;;  %6904 = vmatpush1.bf16.msra.mxu0 %v6903_v1  ;;  %v3742_v1 = vld [vmem:[#allocation5 + $0x72] sm:$0xff] }
 0x360   : > { %6906 = vmatprep.subr.bf16.mxu0 %v6905_v52  ;;  %v4340_v52 = vld [vmem:[#allocation5 + $0x4] sm:$0xff] }
 0x361   : > { %4172 = vmatmul.mubr.f32.gmra.mrb[176].mxu1 %v4038_v12 }
 0x362   : > { %3854 = vmatmul.mubr.f32.gmra.mrb[156].mxu0 %v3730_v50  ;;  %4177 = vmatprep.mubr.f32.mxu1 %v8836_v45 }
 0x363   : > { %3859 = vmatprep.mubr.f32.mxu0 %v8836_v45  ;;  %6908 = vmatpush1.bf16.msra.mxu0 %v6907_v63 }
 0x364   : > { %6910 = vmatprep.subr.bf16.mxu0 %v6909_v57  ;;  %v4345_v57 = vld [vmem:[#allocation5 + $0x2c] sm:$0xff] }
 0x365   : > { %4178 = vmatmul.mubr.f32.gmra.mrb[178].mxu1 %v4039_v21 }
 0x366   : > { %3860 = vmatmul.mubr.f32.gmra.mrb[158].mxu0 %v3731_v51  ;;  %4183 = vmatprep.mubr.f32.mxu1 %v8836_v45 }
 0x367   : > { %3865 = vmatprep.mubr.f32.mxu0 %v8836_v45  ;;  %6912 = vmatpush1.bf16.msra.mxu0 %v6911_v24  ;;  %v4347_v24 = vld [vmem:[#allocation5 + $0x3c] sm:$0xff] }
 0x368   : > { %6914 = vmatprep.subr.bf16.mxu0 %v6913_v39  ;;  %v4348_v39 = vld [vmem:[#allocation5 + $0x44] sm:$0xff] }
 0x369   : > { %4184 = vmatmul.mubr.f32.gmra.mrb[180].mxu1 %v4040_v32 }
 0x36a   : > { %3866 = vmatmul.mubr.f32.gmra.mrb[160].mxu0 %v3732_v0  ;;  %4189 = vmatprep.mubr.f32.mxu1 %v8836_v45 }
 0x36b   : > { %3871 = vmatprep.mubr.f32.mxu0 %v8836_v45  ;;  %6916 = vmatpush1.bf16.msra.mxu0 %v6915_v23 }
 0x36c   : > { %6918 = vmatprep.subr.bf16.mxu0 %v6917_v29 }
 0x36d   : > { %4190 = vmatmul.mubr.f32.gmra.mrb[182].mxu1 %v4041_v59 }
 0x36e   : > { %3872 = vmatmul.mubr.f32.gmra.mrb[162].mxu0 %v3733_v47  ;;  %4195 = vmatprep.mubr.f32.mxu1 %v8836_v45  ;;  %v4351_v47 = vld [vmem:[#allocation5 + $0x5c] sm:$0xff] }
 0x36f   : > { %3877 = vmatprep.mubr.f32.mxu0 %v8836_v45  ;;  %6920 = vmatpush1.bf16.msra.mxu0 %v6919_v9 }
 0x370   : > { %6922 = vmatprep.subr.bf16.mxu0 %v6921_v11 }
 0x371   : > { %4196 = vmatmul.mubr.f32.gmra.mrb[184].mxu1 %v4042_v40  ;;  %v4353_v40 = vld [vmem:[#allocation5 + $0x6c] sm:$0xff] }
 0x372   : > { %3878 = vmatmul.mubr.f32.gmra.mrb[164].mxu0 %v3734_v34  ;;  %4201 = vmatprep.mubr.f32.mxu1 %v8836_v45 }
 0x373   : > { %3883 = vmatprep.mubr.f32.mxu0 %v8836_v45  ;;  %6924 = vmatpush1.bf16.msra.mxu0 %v6923_v60 }
 0x374   : > { %6926 = vmatprep.subr.bf16.mxu0 %v6925_v44 }
 0x375   : > { %4202 = vmatmul.mubr.f32.gmra.mrb[186].mxu1 %v4043_v3 }
 0x376   : > { %3884 = vmatmul.mubr.f32.gmra.mrb[166].mxu0 %v3735_v15  ;;  %4207 = vmatprep.mubr.f32.mxu1 %v8836_v45  ;;  %v4354_v15 = vld [vmem:[#allocation5 + $0x74] sm:$0xff] }
 0x377   : > { %3889 = vmatprep.mubr.f32.mxu0 %v8836_v45  ;;  %6928 = vmatpush1.bf16.msra.mxu0 %v6927_v17 }
 0x379   : > { %4208 = vmatmul.mubr.f32.gmra.mrb[188].mxu1 %v4044_v35 }
 0x37a   : > { %3890 = vmatmul.mubr.f32.gmra.mrb[168].mxu0 %v3736_v2  ;;  %4213 = vmatprep.mubr.f32.mxu1 %v8836_v45 }
 0x37b   : > { %3895 = vmatprep.mubr.f32.mxu0 %v8836_v45 }
 0x37d   : > { %4214 = vmatmul.mubr.f32.gmra.mrb[190].mxu1 %v4045_v54  ;;  %v4355_v54 = vld [vmem:[#allocation5 + $0x7c] sm:$0xff] }
 0x37e   : > { %3896 = vmatmul.mubr.f32.gmra.mrb[170].mxu0 %v3737_v8  ;;  %4219 = vmatprep.mubr.f32.mxu1 %v8836_v45 }
 0x37f   : > { %3901 = vmatprep.mubr.f32.mxu0 %v8836_v45 }
 0x381   : > { %4220 = vmatmul.mubr.f32.gmra.mrb[192].mxu1 %v4046_v5 }
 0x382   : > { %3902 = vmatmul.mubr.f32.gmra.mrb[172].mxu0 %v3738_v27  ;;  %4225 = vmatprep.mubr.f32.mxu1 %v8836_v45 }
 0x383   : > { %3907 = vmatprep.mubr.f32.mxu0 %v8836_v45 }
 0x385   : > { %4226 = vmatmul.mubr.f32.gmra.mrb[194].mxu1 %v4047_v19 }
 0x386   : > { %3908 = vmatmul.mubr.f32.gmra.mrb[174].mxu0 %v3739_v6  ;;  %4231 = vmatprep.mubr.f32.mxu1 %v8836_v45 }
 0x387   : > { %3913 = vmatprep.mubr.f32.mxu0 %v8836_v45 }
 0x389   : > { %4232 = vmatmul.mubr.f32.gmra.mrb[196].mxu1 %v4048_v37 }
 0x38a   : > { %3914 = vmatmul.mubr.f32.gmra.mrb[176].mxu0 %v3740_v4  ;;  %4237 = vmatprep.mubr.f32.mxu1 %v8836_v45 }
 0x38b   : > { %3919 = vmatprep.mubr.f32.mxu0 %v8836_v45 }
 0x38d   : > { %4238 = vmatmul.mubr.f32.gmra.mrb[198].mxu1 %v4049_v55 }
 0x38e   : > { %3920 = vmatmul.mubr.f32.gmra.mrb[178].mxu0 %v3741_v49 }
 0x38f   : > { %3925 = vmatprep.mubr.f32.mxu0 %v8836_v45 }
 0x392   : > { %3926 = vmatmul.mubr.f32.gmra.mrb[180].mxu0 %v3742_v1 }
 0x393   : > { %3931 = vmatprep.mubr.f32.mxu0 %v8836_v45 }
 0x396   : > { %3932 = vmatmul.mubr.f32.gmra.mrb[182].mxu0 %v3743_v62 }
 0x397   : > { %4453 = vmatprep.mubr.f32.mxu0 %v8836_v45 }
 0x39a   : > { %4454 = vmatmul.mubr.f32.vlgmr.msra.gmra.mrb[184].mxu0 %v4340_v52 }
 0x39b   : > { %4459 = vmatprep.mubr.f32.mxu0 %v8836_v45 }
 0x39e   : > { %4460 = vmatmul.mubr.f32.gmra.mrb[186].mxu0 %v4341_v26 }
 0x39f   : > { %4465 = vmatprep.mubr.f32.mxu0 %v8836_v45 }
 0x3a2   : > { %4466 = vmatmul.mubr.f32.gmra.mrb[188].mxu0 %v4342_v7 }
 0x3a3   : > { %4471 = vmatprep.mubr.f32.mxu0 %v8836_v45 }
 0x3a6   : > { %4472 = vmatmul.mubr.f32.gmra.mrb[190].mxu0 %v4343_v13 }
 0x3a7   : > { %4477 = vmatprep.mubr.f32.mxu0 %v8836_v45  ;;  %v3537_v58 = vpop.f32.mrb[136].mxu1 }
 0x3a8   : > { %v3539_v63 = vpop.f32.mrb[137].mxu1 }
 0x3aa   : > { %4478 = vmatmul.mubr.f32.gmra.mrb[192].mxu0 %v4344_v14 }
 0x3ab   : > { %4483 = vmatprep.mubr.f32.mxu0 %v8836_v45 }
 0x3ae   : > { %4484 = vmatmul.mubr.f32.gmra.mrb[194].mxu0 %v4345_v57 }
 0x3af   : > { %4489 = vmatprep.mubr.f32.mxu0 %v8836_v45  ;;  %v3262_v30 = vpop.f32.mrb[120].mxu0  ;;  %v3543_v16 = vpop.f32.mrb[138].mxu1 }
 0x3b0   : > { %v9221_v50 = vadd.f32 %v3537_v58, %v3262_v30  ;;  %v3264_v12 = vpop.f32.mrb[121].mxu0  ;;  %v3545_v22 = vpop.f32.mrb[139].mxu1 }
 0x3b1   : > { %3359 = vst.msk [vmem:[#allocation6 + $0x8] sm:$0xff] %vm3358_vm15, %v3264_v12 }
 0x3b2   : > { %4490 = vmatmul.mubr.f32.gmra.mrb[196].mxu0 %v4346_v38 }
 0x3b3   : > { %4495 = vmatprep.mubr.f32.mxu0 %v8836_v45 }
 0x3b6   : > { %4496 = vmatmul.mubr.f32.gmra.mrb[198].mxu0 %v4347_v24 }
 0x3b7   : > { %4501 = vmatprep.mubr.f32.mxu0 %v8836_v45  ;;  %v3549_v42 = vpop.f32.mrb[140].mxu1 }
 0x3b8   : > { %v3391_v51 = vld [vmem:[#allocation6 + $0x8] sm:$0xff]  ;;  %v3268_v21 = vpop.f32.mrb[122].mxu0  ;;  %v3551_v56 = vpop.f32.mrb[141].mxu1 }
 0x3b9   : > { %v3633_v25 = vadd.f32 %v3539_v63, %v3391_v51  ;;  %v9226_v36 = vadd.f32 %v3543_v16, %v3268_v21  ;;  %v3270_v23 = vpop.f32.mrb[123].mxu0 }
 0x3ba   : > { %4502 = vmatmul.mubr.f32.gmra.mrb[200].mxu0 %v4348_v39  ;;  %3361 = vst.msk [vmem:[#allocation6 + $0x18] sm:$0xff] %vm3358_vm15, %v3270_v23 }
 0x3bb   : > { %4507 = vmatprep.mubr.f32.mxu0 %v8836_v45  ;;  %3665 = vst.msk [vmem:[#allocation6 + $0x8] sm:$0xff] %vm3358_vm15, %v3633_v25 }
 0x3be   : > { %4508 = vmatmul.mubr.f32.gmra.mrb[202].mxu0 %v4349_v28 }
 0x3bf   : > { %4513 = vmatprep.mubr.f32.mxu0 %v8836_v45  ;;  %v3274_v0 = vpop.f32.mrb[124].mxu0 }
 0x3c0   : > { %v9232_v32 = vadd.f32 %v3549_v42, %v3274_v0  ;;  %v3276_v29 = vpop.f32.mrb[125].mxu0  ;;  %v3555_v46 = vpop.f32.mrb[142].mxu1 }
 0x3c1   : > { %v3393_v10 = vld [vmem:[#allocation6 + $0x18] sm:$0xff]  ;;  %3363 = vst.msk [vmem:[#allocation6 + $0x28] sm:$0xff] %vm3358_vm15, %v3276_v29  ;;  %v3557_v9 = vpop.f32.mrb[143].mxu1 }
 0x3c2   : > { %4514 = vmatmul.mubr.f32.gmra.mrb[204].mxu0 %v4350_v33  ;;  %v3635_v20 = vadd.f32 %v3545_v22, %v3393_v10 }
 0x3c3   : > { %4519 = vmatprep.mubr.f32.mxu0 %v8836_v45 }
 0x3c4   : > { %3667 = vst.msk [vmem:[#allocation6 + $0x18] sm:$0xff] %vm3358_vm15, %v3635_v20 }
 0x3c6   : > { %4520 = vmatmul.mubr.f32.gmra.mrb[206].mxu0 %v4351_v47 }
 0x3c7   : > { %4525 = vmatprep.mubr.f32.mxu0 %v8836_v45  ;;  %v3561_v59 = vpop.f32.mrb[144].mxu1 }
 0x3c8   : > { %v3395_v11 = vld [vmem:[#allocation6 + $0x28] sm:$0xff]  ;;  %v3280_v61 = vpop.f32.mrb[126].mxu0  ;;  %v3563_v43 = vpop.f32.mrb[145].mxu1 }
 0x3c9   : > { %v3637_v60 = vadd.f32 %v3551_v56, %v3395_v11  ;;  %v9238_v18 = vadd.f32 %v3555_v46, %v3280_v61  ;;  %v3282_v34 = vpop.f32.mrb[127].mxu0 }
 0x3ca   : > { %4526 = vmatmul.mubr.f32.gmra.mrb[208].mxu0 %v4352_v41  ;;  %3365 = vst.msk [vmem:[#allocation6 + $0x38] sm:$0xff] %vm3358_vm15, %v3282_v34 }
 0x3cb   : > { %4531 = vmatprep.mubr.f32.mxu0 %v8836_v45  ;;  %3669 = vst.msk [vmem:[#allocation6 + $0x28] sm:$0xff] %vm3358_vm15, %v3637_v60 }
 0x3ce   : > { %4532 = vmatmul.mubr.f32.gmra.mrb[210].mxu0 %v4353_v40 }
 0x3cf   : > { %4537 = vmatprep.mubr.f32.mxu0 %v8836_v45  ;;  %v3286_v44 = vpop.f32.mrb[128].mxu0  ;;  %v3567_v3 = vpop.f32.mrb[146].mxu1 }
 0x3d0   : > { %v9244_v53 = vadd.f32 %v3561_v59, %v3286_v44  ;;  %v3288_v17 = vpop.f32.mrb[129].mxu0  ;;  %v3569_v35 = vpop.f32.mrb[147].mxu1 }
 0x3d1   : > { %v3397_v2 = vld [vmem:[#allocation6 + $0x38] sm:$0xff]  ;;  %3367 = vst.msk [vmem:[#allocation6 + $0x48] sm:$0xff] %vm3358_vm15, %v3288_v17 }
 0x3d2   : > { %4538 = vmatmul.mubr.f32.gmra.mrb[212].mxu0 %v4354_v15  ;;  %v3639_v8 = vadd.f32 %v3557_v9, %v3397_v2 }
 0x3d3   : > { %4543 = vmatprep.mubr.f32.mxu0 %v8836_v45 }
 0x3d4   : > { %3671 = vst.msk [vmem:[#allocation6 + $0x38] sm:$0xff] %vm3358_vm15, %v3639_v8 }
 0x3d6   : > { %4544 = vmatmul.mubr.f32.gmra.mrb[214].mxu0 %v4355_v54 }
 0x3d7   : > { %v3573_v27 = vpop.f32.mrb[148].mxu1 }
 0x3d8   : > { %v3399_v5 = vld [vmem:[#allocation6 + $0x48] sm:$0xff]  ;;  %v3292_v6 = vpop.f32.mrb[130].mxu0  ;;  %v3575_v19 = vpop.f32.mrb[149].mxu1 }
 0x3d9   : > { %v3641_v4 = vadd.f32 %v3563_v43, %v3399_v5  ;;  %v9249_v37 = vadd.f32 %v3567_v3, %v3292_v6  ;;  %v3294_v49 = vpop.f32.mrb[131].mxu0 }
 0x3da   : > { %3369 = vst.msk [vmem:[#allocation6 + $0x58] sm:$0xff] %vm3358_vm15, %v3294_v49 }
 0x3db   : > { %3673 = vst.msk [vmem:[#allocation6 + $0x48] sm:$0xff] %vm3358_vm15, %v3641_v4 }
 0x3df   : > { %v3298_v55 = vpop.f32.mrb[132].mxu0  ;;  %v3579_v62 = vpop.f32.mrb[150].mxu1 }
 0x3e0   : > { %v9253_v1 = vadd.f32 %v3573_v27, %v3298_v55  ;;  %v3300_v45 = vpop.f32.mrb[133].mxu0  ;;  %v3581_v26 = vpop.f32.mrb[151].mxu1 }
 0x3e1   : > { %v3401_v52 = vld [vmem:[#allocation6 + $0x58] sm:$0xff]  ;;  %3371 = vst.msk [vmem:[#allocation6 + $0x68] sm:$0xff] %vm3358_vm15, %v3300_v45 }
 0x3e2   : > { %v3643_v7 = vadd.f32 %v3569_v35, %v3401_v52 }
 0x3e4   : > { %3675 = vst.msk [vmem:[#allocation6 + $0x58] sm:$0xff] %vm3358_vm15, %v3643_v7 }
 0x3e7   : > { %v3585_v13 = vpop.f32.mrb[152].mxu1 }
 0x3e8   : > { %v3403_v58 = vld [vmem:[#allocation6 + $0x68] sm:$0xff]  ;;  %v3304_v14 = vpop.f32.mrb[134].mxu0  ;;  %v3587_v63 = vpop.f32.mrb[153].mxu1 }
 0x3e9   : > { %v3645_v57 = vadd.f32 %v3575_v19, %v3403_v58  ;;  %v9257_v30 = vadd.f32 %v3579_v62, %v3304_v14  ;;  %v3306_v12 = vpop.f32.mrb[135].mxu0 }
 0x3ea   : > { %3373 = vst.msk [vmem:[#allocation6 + $0x78] sm:$0xff] %vm3358_vm15, %v3306_v12 }
 0x3eb   : > { %3677 = vst.msk [vmem:[#allocation6 + $0x68] sm:$0xff] %vm3358_vm15, %v3645_v57 }
 0x3ef   : > { %v3310_v38 = vpop.f32.mrb[136].mxu0  ;;  %v3591_v24 = vpop.f32.mrb[154].mxu1 }
 0x3f0   : > { %v9261_v16 = vadd.f32 %v3585_v13, %v3310_v38  ;;  %v3312_v22 = vpop.f32.mrb[137].mxu0  ;;  %v3593_v51 = vpop.f32.mrb[155].mxu1 }
 0x3f1   : > { %v3405_v42 = vld [vmem:[#allocation6 + $0x78] sm:$0xff]  ;;  %3375 = vst.msk [vmem:[#allocation6 + $0x88] sm:$0xff] %vm3358_vm15, %v3312_v22 }
 0x3f2   : > { %v3647_v21 = vadd.f32 %v3581_v26, %v3405_v42 }
 0x3f4   : > { %3679 = vst.msk [vmem:[#allocation6 + $0x78] sm:$0xff] %vm3358_vm15, %v3647_v21 }
 0x3f7   : > { %v3597_v39 = vpop.f32.mrb[156].mxu1 }
 0x3f8   : > { %v3407_v56 = vld [vmem:[#allocation6 + $0x88] sm:$0xff]  ;;  %v3316_v25 = vpop.f32.mrb[138].mxu0  ;;  %v3599_v23 = vpop.f32.mrb[157].mxu1 }
 0x3f9   : > { %v3649_v28 = vadd.f32 %v3587_v63, %v3407_v56  ;;  %v9265_v0 = vadd.f32 %v3591_v24, %v3316_v25  ;;  %v3318_v29 = vpop.f32.mrb[139].mxu0  ;;  %v3697_v56 = vld [vmem:[#allocation6 + $0x8] sm:$0xff] }
 0x3fa   : > { %3377 = vst.msk [vmem:[#allocation6 + $0x98] sm:$0xff] %vm3358_vm15, %v3318_v29 }
 0x3fb   : > { %3681 = vst.msk [vmem:[#allocation6 + $0x88] sm:$0xff] %vm3358_vm15, %v3649_v28 }
 0x3ff   : > { %v3322_v33 = vpop.f32.mrb[140].mxu0  ;;  %v3603_v9 = vpop.f32.mrb[158].mxu1 }
 0x400   : > { %v9269_v46 = vadd.f32 %v3597_v39, %v3322_v33  ;;  %v3324_v10 = vpop.f32.mrb[141].mxu0  ;;  %v3605_v47 = vpop.f32.mrb[159].mxu1 }
 0x401   : > { %v3409_v20 = vld [vmem:[#allocation6 + $0x98] sm:$0xff]  ;;  %3379 = vst.msk [vmem:[#allocation6 + $0xa8] sm:$0xff] %vm3358_vm15, %v3324_v10 }
 0x402   : > { %v3651_v59 = vadd.f32 %v3593_v51, %v3409_v20  ;;  %v4900_v20 = vld [vmem:[%s10423_s6 + $0x8] sm:$0xff] }
 0x404   : > { %3683 = vst.msk [vmem:[#allocation6 + $0x98] sm:$0xff] %vm3358_vm15, %v3651_v59  ;;  %v3699_v59 = vld [vmem:[#allocation6 + $0x18] sm:$0xff] }
 0x407   : > { %v3609_v11 = vpop.f32.mrb[160].mxu1 }
 0x408   : > { %v3411_v61 = vld [vmem:[#allocation6 + $0xa8] sm:$0xff]  ;;  %v3328_v41 = vpop.f32.mrb[142].mxu0  ;;  %v3611_v43 = vpop.f32.mrb[161].mxu1 }
 0x409   : > { %v3653_v60 = vadd.f32 %v3599_v23, %v3411_v61  ;;  %v9273_v34 = vadd.f32 %v3603_v9, %v3328_v41  ;;  %v3330_v40 = vpop.f32.mrb[143].mxu0  ;;  %v4899_v9 = vld [vmem:[%s10423_s6] sm:$0xff] }
 0x40a   : > { %3381 = vst.msk [vmem:[#allocation6 + $0xb8] sm:$0xff] %vm3358_vm15, %v3330_v40  ;;  %v6930_v41 = vpack.c.bf16 %v4900_v20, %v4899_v9 }
 0x40b   : > { %3685 = vst.msk [vmem:[#allocation6 + $0xa8] sm:$0xff] %vm3358_vm15, %v3653_v60 }
 0x40c   : > { %6931 = vmatpush1.bf16.msra.mxu1 %v6930_v41 }
 0x40d   : > { %6932 = vmatprep.subr.bf16.mxu1 %v10632_v31 }
 0x40f   : > { %v3334_v44 = vpop.f32.mrb[144].mxu0  ;;  %v3615_v3 = vpop.f32.mrb[162].mxu1 }
 0x410   : > { %v9277_v17 = vadd.f32 %v3609_v11, %v3334_v44  ;;  %v3336_v15 = vpop.f32.mrb[145].mxu0  ;;  %v3617_v35 = vpop.f32.mrb[163].mxu1 }
 0x411   : > { %v3413_v2 = vld [vmem:[#allocation6 + $0xb8] sm:$0xff]  ;;  %3383 = vst.msk [vmem:[#allocation6 + $0xc8] sm:$0xff] %vm3358_vm15, %v3336_v15 }
 0x412   : > { %v3655_v8 = vadd.f32 %v3605_v47, %v3413_v2 }
 0x414   : > { %3687 = vst.msk [vmem:[#allocation6 + $0xb8] sm:$0xff] %vm3358_vm15, %v3655_v8 }
 0x417   : > { %v3621_v54 = vpop.f32.mrb[164].mxu1 }
 0x418   : > { %v3415_v27 = vld [vmem:[#allocation6 + $0xc8] sm:$0xff]  ;;  %v3340_v5 = vpop.f32.mrb[146].mxu0  ;;  %v3623_v6 = vpop.f32.mrb[165].mxu1 }
 0x419   : > { %v3657_v19 = vadd.f32 %v3611_v43, %v3415_v27  ;;  %v9281_v4 = vadd.f32 %v3615_v3, %v3340_v5  ;;  %v3342_v49 = vpop.f32.mrb[147].mxu0  ;;  %v4902_v3 = vld [vmem:[%s10423_s6 + $0x18] sm:$0xff] }
 0x41a   : > { %3385 = vst.msk [vmem:[#allocation6 + $0xd8] sm:$0xff] %vm3358_vm15, %v3342_v49 }
 0x41b   : > { %3689 = vst.msk [vmem:[#allocation6 + $0xc8] sm:$0xff] %vm3358_vm15, %v3657_v19 }
 0x41f   : > { %v3346_v55 = vpop.f32.mrb[148].mxu0 }
 0x420   : > { %v9285_v45 = vadd.f32 %v3621_v54, %v3346_v55  ;;  %v3348_v62 = vpop.f32.mrb[149].mxu0  ;;  %v3627_v52 = vpop.f32.mrb[166].mxu1 }
 0x421   : > { %v3417_v26 = vld [vmem:[#allocation6 + $0xd8] sm:$0xff]  ;;  %3387 = vst.msk [vmem:[#allocation6 + $0xe8] sm:$0xff] %vm3358_vm15, %v3348_v62  ;;  %v3629_v7 = vpop.f32.mrb[167].mxu1 }
 0x422   : > { %v3659_v13 = vadd.f32 %v3617_v35, %v3417_v26  ;;  %v3701_v35 = vld [vmem:[#allocation6 + $0x28] sm:$0xff]  ;;  %v4905_v26 = vld [vmem:[%s10423_s6 + $0x30] sm:$0xff] }
 0x424   : > { %3691 = vst.msk [vmem:[#allocation6 + $0xd8] sm:$0xff] %vm3358_vm15, %v3659_v13  ;;  %v4149_v58 = vpop.f32.mrb[168].mxu1  ;;  %v3703_v13 = vld [vmem:[#allocation6 + $0x38] sm:$0xff] }
 0x425   : > { %v4151_v14 = vpop.f32.mrb[169].mxu1 }
 0x428   : > { %v3419_v63 = vld [vmem:[#allocation6 + $0xe8] sm:$0xff]  ;;  %v4155_v12 = vpop.f32.mrb[170].mxu1 }
 0x429   : > { %v3352_v57 = vpop.f32.mrb[150].mxu0  ;;  %v3661_v38 = vadd.f32 %v3623_v6, %v3419_v63  ;;  %v4157_v42 = vpop.f32.mrb[171].mxu1 }
 0x42a   : > { %v9289_v22 = vadd.f32 %v3627_v52, %v3352_v57  ;;  %v3354_v24 = vpop.f32.mrb[151].mxu0  ;;  %v4904_v52 = vld [vmem:[%s10423_s6 + $0x28] sm:$0xff]  ;;  %v4906_v57 = vld [vmem:[%s10423_s6 + $0x38] sm:$0xff] }
 0x42b   : > { %3389 = vst.msk [vmem:[#allocation6 + $0xf8] sm:$0xff] %vm3358_vm15, %v3354_v24  ;;  %3693 = vst.msk [vmem:[#allocation6 + $0xe8] sm:$0xff] %vm3358_vm15, %v3661_v38 }
 0x42c   : > { %v4161_v21 = vpop.f32.mrb[172].mxu1 }
 0x42d   : > { %v3843_v51 = vpop.f32.mrb[152].mxu0  ;;  %v9294_v23 = vpop.f32.mrb[173].mxu1 }
 0x42e   : > { %v3938_v39 = vadd.f32 %v3843_v51, %v9221_v50  ;;  %v3845_v25 = vpop.f32.mrb[153].mxu0  ;;  %v6939_v51 = vpack.c.bf16 %v4906_v57, %v4905_v26  ;;  %v4914_v57 = vld [vmem:[%s10423_s6 + $0x78] sm:$0xff] }
 0x42f   : > { %v3939_v28 = vadd.f32 %v3845_v25, %v3697_v56  ;;  %v4907_v56 = vld [vmem:[%s10423_s6 + $0x40] sm:$0xff]  ;;  %v4908_v25 = vld [vmem:[%s10423_s6 + $0x48] sm:$0xff] }
 0x430   : > { %v9296_v29 = vadd.f32 %v4149_v58, %v3938_v39  ;;  %v4167_v10 = vpop.f32.mrb[174].mxu1 }
 0x431   : > { %3971 = vst.msk [vmem:[#allocation6 + $0x8] sm:$0xff] %vm3358_vm15, %v3939_v28  ;;  %v3849_v33 = vpop.f32.mrb[154].mxu0  ;;  %v9306_v61 = vpop.f32.mrb[175].mxu1 }
 0x432   : > { %v3421_v50 = vld [vmem:[#allocation6 + $0xf8] sm:$0xff]  ;;  %v3940_v47 = vadd.f32 %v3849_v33, %v9226_v36  ;;  %v3851_v11 = vpop.f32.mrb[155].mxu0  ;;  %v4901_v36 = vld [vmem:[%s10423_s6 + $0x10] sm:$0xff]  ;;  %v3705_v33 = vld [vmem:[#allocation6 + $0x48] sm:$0xff] }
 0x433   : > { %v3663_v43 = vadd.f32 %v3629_v7, %v3421_v50  ;;  %v3941_v60 = vadd.f32 %v3851_v11, %v3699_v59  ;;  %v6933_v27 = vpack.c.bf16 %v4902_v3, %v4901_v36 }
 0x434   : > { %v9308_v40 = vadd.f32 %v4155_v12, %v3940_v47  ;;  %v4173_v15 = vpop.f32.mrb[176].mxu1  ;;  %v6942_v47 = vpack.c.bf16 %v4908_v25, %v4907_v56 }
 0x435   : > { %3695 = vst.msk [vmem:[#allocation6 + $0xf8] sm:$0xff] %vm3358_vm15, %v3663_v43  ;;  %3973 = vst.msk [vmem:[#allocation6 + $0x18] sm:$0xff] %vm3358_vm15, %v3941_v60  ;;  %v3855_v44 = vpop.f32.mrb[156].mxu0  ;;  %v9320_v54 = vpop.f32.mrb[177].mxu1  ;;  %6934 = vmatpush1.bf16.msra.mxu1 %v6933_v27  ;;  %v4910_v43 = vld [vmem:[%s10423_s6 + $0x58] sm:$0xff] }
 0x436   : > { %v3942_v2 = vadd.f32 %v3855_v44, %v9232_v32  ;;  %v3857_v8 = vpop.f32.mrb[157].mxu0  ;;  %6935 = vmatprep.subr.bf16.mxu1 %v10632_v31  ;;  %v4903_v32 = vld [vmem:[%s10423_s6 + $0x20] sm:$0xff]  ;;  %v3707_v44 = vld [vmem:[#allocation6 + $0x58] sm:$0xff] }
 0x437   : > { %v3943_v5 = vadd.f32 %v3857_v8, %v3701_v35  ;;  %v6936_v63 = vpack.c.bf16 %v4904_v52, %v4903_v32 }
 0x438   : > { %v4003_v6 = vld [vmem:[#allocation6 + $0x8] sm:$0xff]  ;;  %v9322_v19 = vadd.f32 %v4161_v21, %v3942_v2  ;;  %v4179_v62 = vpop.f32.mrb[178].mxu1 }
 0x439   : > { %v4245_v49 = vadd.f32 %v4151_v14, %v4003_v6  ;;  %3975 = vst.msk [vmem:[#allocation6 + $0x28] sm:$0xff] %vm3358_vm15, %v3943_v5  ;;  %v3861_v55 = vpop.f32.mrb[158].mxu0  ;;  %v9336_v14 = vpop.f32.mrb[179].mxu1  ;;  %6937 = vmatpush1.bf16.msra.mxu1 %v6936_v63  ;;  %v4912_v6 = vld [vmem:[%s10423_s6 + $0x68] sm:$0xff] }
 0x43a   : > { %v3944_v7 = vadd.f32 %v3861_v55, %v9238_v18  ;;  %v3863_v58 = vpop.f32.mrb[159].mxu0  ;;  %6938 = vmatprep.subr.bf16.mxu1 %v10632_v31  ;;  %v3709_v55 = vld [vmem:[#allocation6 + $0x68] sm:$0xff] }
 0x43b   : > { %4277 = vst.msk [vmem:[#allocation6 + $0x8] sm:$0xff] %vm3358_vm15, %v4245_v49  ;;  %v3945_v12 = vadd.f32 %v3863_v58, %v3703_v13 }
 0x43c   : > { %v4005_v38 = vld [vmem:[#allocation6 + $0x18] sm:$0xff]  ;;  %v9342_v24 = vadd.f32 %v4167_v10, %v3944_v7  ;;  %v4185_v39 = vpop.f32.mrb[180].mxu1 }
 0x43d   : > { %v4247_v21 = vadd.f32 %v4157_v42, %v4005_v38  ;;  %3977 = vst.msk [vmem:[#allocation6 + $0x38] sm:$0xff] %vm3358_vm15, %v3945_v12  ;;  %v3867_v18 = vpop.f32.mrb[160].mxu0  ;;  %v9353_v9 = vpop.f32.mrb[181].mxu1  ;;  %6940 = vmatpush1.bf16.msra.mxu1 %v6939_v51  ;;  %v3711_v38 = vld [vmem:[#allocation6 + $0x78] sm:$0xff] }
 0x43e   : > { %v3946_v28 = vadd.f32 %v3867_v18, %v9244_v53  ;;  %v3869_v10 = vpop.f32.mrb[161].mxu0  ;;  %6941 = vmatprep.subr.bf16.mxu1 %v10632_v31  ;;  %v4909_v53 = vld [vmem:[%s10423_s6 + $0x50] sm:$0xff] }
 0x43f   : > { %4279 = vst.msk [vmem:[#allocation6 + $0x18] sm:$0xff] %vm3358_vm15, %v4247_v21  ;;  %v3947_v42 = vadd.f32 %v3869_v10, %v3705_v33  ;;  %v6945_v35 = vpack.c.bf16 %v4910_v43, %v4909_v53  ;;  %v4916_v10 = vld [vmem:[%s10423_s6 + $0x88] sm:$0xff] }
 0x440   : > { %v4007_v20 = vld [vmem:[#allocation6 + $0x28] sm:$0xff]  ;;  %v9356_v50 = vadd.f32 %v4173_v15, %v3946_v28  ;;  %v4191_v41 = vpop.f32.mrb[182].mxu1 }
 0x441   : > { %v4249_v59 = vadd.f32 %v9294_v23, %v4007_v20  ;;  %3979 = vst.msk [vmem:[#allocation6 + $0x48] sm:$0xff] %vm3358_vm15, %v3947_v42  ;;  %v3873_v11 = vpop.f32.mrb[162].mxu0  ;;  %v9368_v36 = vpop.f32.mrb[183].mxu1  ;;  %6943 = vmatpush1.bf16.msra.mxu1 %v6942_v47  ;;  %v3713_v20 = vld [vmem:[#allocation6 + $0x88] sm:$0xff] }
 0x442   : > { %v3948_v60 = vadd.f32 %v3873_v11, %v9249_v37  ;;  %v3875_v15 = vpop.f32.mrb[163].mxu0  ;;  %6944 = vmatprep.subr.bf16.mxu1 %v10632_v31  ;;  %v4911_v37 = vld [vmem:[%s10423_s6 + $0x60] sm:$0xff] }
 0x443   : > { %4281 = vst.msk [vmem:[#allocation6 + $0x28] sm:$0xff] %vm3358_vm15, %v4249_v59  ;;  %v3949_v23 = vadd.f32 %v3875_v15, %v3707_v44  ;;  %v6948_v7 = vpack.c.bf16 %v4912_v6, %v4911_v37  ;;  %v4918_v15 = vld [vmem:[%s10423_s6 + $0x98] sm:$0xff] }
 0x444   : > { %v4009_v3 = vld [vmem:[#allocation6 + $0x38] sm:$0xff]  ;;  %v9371_v2 = vadd.f32 %v4179_v62, %v3948_v60  ;;  %v4197_v5 = vpop.f32.mrb[184].mxu1 }
 0x445   : > { %v4251_v8 = vadd.f32 %v9306_v61, %v4009_v3  ;;  %3981 = vst.msk [vmem:[#allocation6 + $0x58] sm:$0xff] %vm3358_vm15, %v3949_v23  ;;  %v3879_v27 = vpop.f32.mrb[164].mxu0  ;;  %v9383_v32 = vpop.f32.mrb[185].mxu1  ;;  %6946 = vmatpush1.bf16.msra.mxu1 %v6945_v35  ;;  %v3715_v3 = vld [vmem:[#allocation6 + $0x98] sm:$0xff] }
 0x446   : > { %v3950_v49 = vadd.f32 %v3879_v27, %v9253_v1  ;;  %v3881_v62 = vpop.f32.mrb[165].mxu0  ;;  %6947 = vmatprep.subr.bf16.mxu1 %v10632_v31  ;;  %v4913_v1 = vld [vmem:[%s10423_s6 + $0x70] sm:$0xff] }
 0x447   : > { %4283 = vst.msk [vmem:[#allocation6 + $0x38] sm:$0xff] %vm3358_vm15, %v4251_v8  ;;  %v3951_v61 = vadd.f32 %v3881_v62, %v3709_v55  ;;  %v6951_v56 = vpack.c.bf16 %v4914_v57, %v4913_v1  ;;  %v4920_v62 = vld [vmem:[%s10423_s6 + $0xa8] sm:$0xff] }
 0x448   : > { %v4011_v52 = vld [vmem:[#allocation6 + $0x48] sm:$0xff]  ;;  %v9386_v26 = vadd.f32 %v4185_v39, %v3950_v49  ;;  %v4203_v63 = vpop.f32.mrb[186].mxu1 }
 0x449   : > { %v4253_v13 = vadd.f32 %v9320_v54, %v4011_v52  ;;  %3983 = vst.msk [vmem:[#allocation6 + $0x68] sm:$0xff] %vm3358_vm15, %v3951_v61  ;;  %v3885_v58 = vpop.f32.mrb[166].mxu0  ;;  %v9398_v21 = vpop.f32.mrb[187].mxu1  ;;  %6949 = vmatpush1.bf16.msra.mxu1 %v6948_v7  ;;  %v3717_v52 = vld [vmem:[#allocation6 + $0xa8] sm:$0xff] }
 0x44a   : > { %v3952_v12 = vadd.f32 %v3885_v58, %v9257_v30  ;;  %v3887_v51 = vpop.f32.mrb[167].mxu0  ;;  %6950 = vmatprep.subr.bf16.mxu1 %v10632_v31  ;;  %v4915_v30 = vld [vmem:[%s10423_s6 + $0x80] sm:$0xff] }
 0x44b   : > { %4285 = vst.msk [vmem:[#allocation6 + $0x48] sm:$0xff] %vm3358_vm15, %v4253_v13  ;;  %v3953_v54 = vadd.f32 %v3887_v51, %v3711_v38  ;;  %v6954_v53 = vpack.c.bf16 %v4916_v10, %v4915_v30  ;;  %v3719_v51 = vld [vmem:[#allocation6 + $0xb8] sm:$0xff]  ;;  %v3721_v10 = vld [vmem:[#allocation6 + $0xc8] sm:$0xff] }
 0x44c   : > { %v4013_v18 = vld [vmem:[#allocation6 + $0x58] sm:$0xff]  ;;  %v9401_v39 = vadd.f32 %v4191_v41, %v3952_v12  ;;  %v4209_v33 = vpop.f32.mrb[188].mxu1 }
 0x44d   : > { %v4255_v25 = vadd.f32 %v9336_v14, %v4013_v18  ;;  %3985 = vst.msk [vmem:[#allocation6 + $0x78] sm:$0xff] %vm3358_vm15, %v3953_v54  ;;  %v3891_v28 = vpop.f32.mrb[168].mxu0  ;;  %v9413_v59 = vpop.f32.mrb[189].mxu1  ;;  %6952 = vmatpush1.bf16.msra.mxu1 %v6951_v56 }
 0x44e   : > { %v3954_v42 = vadd.f32 %v3891_v28, %v9261_v16  ;;  %v3893_v47 = vpop.f32.mrb[169].mxu0  ;;  %6953 = vmatprep.subr.bf16.mxu1 %v10632_v31  ;;  %v4917_v16 = vld [vmem:[%s10423_s6 + $0x90] sm:$0xff] }
 0x44f   : > { %4287 = vst.msk [vmem:[#allocation6 + $0x58] sm:$0xff] %vm3358_vm15, %v4255_v25  ;;  %v3955_v14 = vadd.f32 %v3893_v47, %v3713_v20  ;;  %v6957_v37 = vpack.c.bf16 %v4918_v15, %v4917_v16 }
 0x450   : > { %v4015_v11 = vld [vmem:[#allocation6 + $0x68] sm:$0xff]  ;;  %v9416_v41 = vadd.f32 %v4197_v5, %v3954_v42  ;;  %v4215_v44 = vpop.f32.mrb[190].mxu1 }
 0x451   : > { %v4257_v43 = vadd.f32 %v9353_v9, %v4015_v11  ;;  %3987 = vst.msk [vmem:[#allocation6 + $0x88] sm:$0xff] %vm3358_vm15, %v3955_v14  ;;  %v3897_v60 = vpop.f32.mrb[170].mxu0  ;;  %v4217_v8 = vpop.f32.mrb[191].mxu1  ;;  %6955 = vmatpush1.bf16.msra.mxu1 %v6954_v53 }
 0x452   : > { %v3956_v23 = vadd.f32 %v3897_v60, %v9265_v0  ;;  %v3899_v35 = vpop.f32.mrb[171].mxu0  ;;  %6956 = vmatprep.subr.bf16.mxu1 %v10632_v31  ;;  %v4919_v0 = vld [vmem:[%s10423_s6 + $0xa0] sm:$0xff]  ;;  %v3723_v60 = vld [vmem:[#allocation6 + $0xd8] sm:$0xff] }
 0x453   : > { %4289 = vst.msk [vmem:[#allocation6 + $0x68] sm:$0xff] %vm3358_vm15, %v4257_v43  ;;  %v3957_v9 = vadd.f32 %v3899_v35, %v3715_v3  ;;  %v6960_v1 = vpack.c.bf16 %v4920_v62, %v4919_v0  ;;  %v3727_v62 = vld [vmem:[#allocation6 + $0xf8] sm:$0xff] }
 0x454   : > { %v4017_v27 = vld [vmem:[#allocation6 + $0x78] sm:$0xff]  ;;  %v9429_v5 = vadd.f32 %v4203_v63, %v3956_v23  ;;  %v4221_v55 = vpop.f32.mrb[192].mxu1 }
 0x455   : > { %v4259_v6 = vadd.f32 %v9368_v36, %v4017_v27  ;;  %3989 = vst.msk [vmem:[#allocation6 + $0x98] sm:$0xff] %vm3358_vm15, %v3957_v9  ;;  %v3903_v49 = vpop.f32.mrb[172].mxu0  ;;  %v4223_v13 = vpop.f32.mrb[193].mxu1  ;;  %6958 = vmatpush1.bf16.msra.mxu1 %v6957_v37  ;;  %v3725_v9 = vld [vmem:[#allocation6 + $0xe8] sm:$0xff] }
 0x456   : > { %v3958_v61 = vadd.f32 %v3903_v49, %v9269_v46  ;;  %v3905_v7 = vpop.f32.mrb[173].mxu0  ;;  %6959 = vmatprep.subr.bf16.mxu1 %v10632_v31 }
 0x457   : > { %4291 = vst.msk [vmem:[#allocation6 + $0x78] sm:$0xff] %vm3358_vm15, %v4259_v6  ;;  %v3959_v36 = vadd.f32 %v3905_v7, %v3717_v52 }
 0x458   : > { %v4019_v58 = vld [vmem:[#allocation6 + $0x88] sm:$0xff]  ;;  %v9442_v63 = vadd.f32 %v4209_v33, %v3958_v61  ;;  %v4227_v38 = vpop.f32.mrb[194].mxu1 }
 0x459   : > { %v4261_v57 = vadd.f32 %v9383_v32, %v4019_v58  ;;  %3991 = vst.msk [vmem:[#allocation6 + $0xa8] sm:$0xff] %vm3358_vm15, %v3959_v36  ;;  %v3909_v12 = vpop.f32.mrb[174].mxu0  ;;  %v4229_v18 = vpop.f32.mrb[195].mxu1  ;;  %6961 = vmatpush1.bf16.msra.mxu1 %v6960_v1  ;;  %v10633_v36 = vsub.s32 0, %v10627_v48 }
 0x45a   : > { %v3960_v46 = vadd.f32 %v3909_v12, %v9273_v34  ;;  %v3911_v54 = vpop.f32.mrb[175].mxu0  ;;  %v4309_v12 = vld [vmem:[#allocation6 + $0x8] sm:$0xff] }
 0x45b   : > { %4293 = vst.msk [vmem:[#allocation6 + $0x88] sm:$0xff] %vm3358_vm15, %v4261_v57  ;;  %v3961_v56 = vadd.f32 %v3911_v54, %v3719_v51 }
 0x45c   : > { %v4021_v25 = vld [vmem:[#allocation6 + $0x98] sm:$0xff]  ;;  %v9449_v28 = vadd.f32 %v4215_v44, %v3960_v46  ;;  %v4233_v30 = vpop.f32.mrb[196].mxu1 }
 0x45d   : > { %v4263_v32 = vadd.f32 %v9398_v21, %v4021_v25  ;;  %3993 = vst.msk [vmem:[#allocation6 + $0xb8] sm:$0xff] %vm3358_vm15, %v3961_v56  ;;  %v3915_v33 = vpop.f32.mrb[176].mxu0  ;;  %v4235_v42 = vpop.f32.mrb[197].mxu1  ;;  %v4311_v25 = vld [vmem:[#allocation6 + $0x18] sm:$0xff] }
 0x45e   : > { %v3962_v31 = vadd.f32 %v3915_v33, %v9277_v17  ;;  %v3917_v34 = vpop.f32.mrb[177].mxu0 }
 0x45f   : > { %4295 = vst.msk [vmem:[#allocation6 + $0x98] sm:$0xff] %vm3358_vm15, %v4263_v32  ;;  %v3963_v20 = vadd.f32 %v3917_v34, %v3721_v10  ;;  %v10634_v34 = vsub.s32 1, %v10627_v48 }
 0x460   : > { %v4023_v47 = vld [vmem:[#allocation6 + $0xa8] sm:$0xff]  ;;  %v9455_v14 = vadd.f32 %v4221_v55, %v3962_v31  ;;  %v4239_v53 = vpop.f32.mrb[198].mxu1 }
 0x461   : > { %v4265_v11 = vadd.f32 %v9413_v59, %v4023_v47  ;;  %3995 = vst.msk [vmem:[#allocation6 + $0xc8] sm:$0xff] %vm3358_vm15, %v3963_v20  ;;  %v3921_v21 = vpop.f32.mrb[178].mxu0  ;;  %v4241_v17 = vpop.f32.mrb[199].mxu1  ;;  %v4313_v47 = vld [vmem:[#allocation6 + $0x28] sm:$0xff] }
 0x462   : > { %v3964_v43 = vadd.f32 %v3921_v21, %v9281_v4  ;;  %v3923_v44 = vpop.f32.mrb[179].mxu0 }
 0x463   : > { %4297 = vst.msk [vmem:[#allocation6 + $0xa8] sm:$0xff] %vm3358_vm15, %v4265_v11  ;;  %v3965_v16 = vadd.f32 %v3923_v44, %v3723_v60 }
 0x464   : > { %v4025_v15 = vld [vmem:[#allocation6 + $0xb8] sm:$0xff]  ;;  %v9461_v23 = vadd.f32 %v4227_v38, %v3964_v43 }
 0x465   : > { %v4267_v3 = vadd.f32 %v4217_v8, %v4025_v15  ;;  %3997 = vst.msk [vmem:[#allocation6 + $0xd8] sm:$0xff] %vm3358_vm15, %v3965_v16  ;;  %v3927_v35 = vpop.f32.mrb[180].mxu0  ;;  %v4646_v8 = vld [vmem:[%s10422_s5] sm:$0x3] }
 0x466   : > { %v3966_v59 = vadd.f32 %v3927_v35, %v9285_v45  ;;  %v3929_v27 = vpop.f32.mrb[181].mxu0 }
 0x467   : > { %4299 = vst.msk [vmem:[#allocation6 + $0xb8] sm:$0xff] %vm3358_vm15, %v4267_v3  ;;  %v3967_v4 = vadd.f32 %v3929_v27, %v3725_v9 }
 0x468   : > { %v4027_v37 = vld [vmem:[#allocation6 + $0xc8] sm:$0xff]  ;;  %v9466_v6 = vadd.f32 %v4233_v30, %v3966_v59 }
 0x469   : > { %v4269_v49 = vadd.f32 %v4223_v13, %v4027_v37  ;;  %3999 = vst.msk [vmem:[#allocation6 + $0xe8] sm:$0xff] %vm3358_vm15, %v3967_v4  ;;  %v3933_v55 = vpop.f32.mrb[182].mxu0  ;;  %v9478_v13 = vrot.slane %v4646_v8, %v10633_v36  ;;  %v4317_v37 = vld [vmem:[#allocation6 + $0x48] sm:$0xff]  ;;  %v4319_v36 = vld [vmem:[#allocation6 + $0x58] sm:$0xff] }
 0x46a   : > { %v3968_v0 = vadd.f32 %v3933_v55, %v9289_v22  ;;  %v3935_v45 = vpop.f32.mrb[183].mxu0 }
 0x46b   : > { %4301 = vst.msk [vmem:[#allocation6 + $0xc8] sm:$0xff] %vm3358_vm15, %v4269_v49  ;;  %v3969_v61 = vadd.f32 %v3935_v45, %v3727_v62 }
 0x46c   : > { %v4029_v52 = vld [vmem:[#allocation6 + $0xd8] sm:$0xff]  ;;  %v9474_v7 = vadd.f32 %v4239_v53, %v3968_v0 }
 0x46d   : > { %v4271_v58 = vadd.f32 %v4229_v18, %v4029_v52  ;;  %4001 = vst.msk [vmem:[#allocation6 + $0xf8] sm:$0xff] %vm3358_vm15, %v3969_v61  ;;  %v4455_v1 = vpop.f32.mrb[184].mxu0 }
 0x46e   : > { %v4550_v57 = vadd.f32 %v4455_v1, %v9296_v29  ;;  %v4457_v22 = vpop.f32.mrb[185].mxu0 }
 0x46f   : > { %4303 = vst.msk [vmem:[#allocation6 + $0xd8] sm:$0xff] %vm3358_vm15, %v4271_v58  ;;  %v4551_v38 = vadd.f32 %v4457_v22, %v4309_v12 }
 0x470   : > { %v4031_v46 = vld [vmem:[#allocation6 + $0xe8] sm:$0xff]  ;;  %v9484_v51 = vadd.f32 %v9478_v13, %v4550_v57 }
 0x471   : > { %v4273_v54 = vadd.f32 %v4235_v42, %v4031_v46  ;;  %4583 = vst.msk [vmem:[#allocation6 + $0x8] sm:$0xff] %vm3358_vm15, %v4551_v38  ;;  %v4461_v56 = vpop.f32.mrb[186].mxu0  ;;  %v9499_v42 = vrot.slane %v4646_v8, %v10634_v34 }
 0x472   : > { %v4552_v18 = vadd.f32 %v4461_v56, %v9308_v40  ;;  %v4463_v32 = vpop.f32.mrb[187].mxu0  ;;  %v4690_v33 = vmax.f32 %v9484_v51, 0.0  ;;  %v4321_v56 = vld [vmem:[#allocation6 + $0x68] sm:$0xff] }
 0x473   : > { %4305 = vst.msk [vmem:[#allocation6 + $0xe8] sm:$0xff] %vm3358_vm15, %v4273_v54  ;;  %v4553_v29 = vadd.f32 %v4463_v32, %v4311_v25 }
 0x474   : > { %v4033_v30 = vld [vmem:[#allocation6 + $0xf8] sm:$0xff]  ;;  %4754 = vrot.lane.b32.xlu0 %v4690_v33, %s7221_s22  ;;  %v9494_v31 = vadd.f32 %v9478_v13, %v4552_v18 }
 0x475   : > { %v4275_v10 = vadd.f32 %v4241_v17, %v4033_v30  ;;  %4585 = vst.msk [vmem:[#allocation6 + $0x18] sm:$0xff] %vm3358_vm15, %v4553_v29  ;;  %v4467_v40 = vpop.f32.mrb[188].mxu0  ;;  %v4315_v17 = vld [vmem:[#allocation6 + $0x38] sm:$0xff] }
 0x476   : > { %v4554_v20 = vadd.f32 %v4467_v40, %v9322_v19  ;;  %v4469_v11 = vpop.f32.mrb[189].mxu0  ;;  %v4692_v21 = vmax.f32 %v9494_v31, 0.0 }
 0x477   : > { %4307 = vst.msk [vmem:[#allocation6 + $0xf8] sm:$0xff] %vm3358_vm15, %v4275_v10  ;;  %v4555_v53 = vadd.f32 %v4469_v11, %v4313_v47 }
 0x478   : > { %v4615_v43 = vld [vmem:[#allocation6 + $0x8] sm:$0xff]  ;;  %4758 = vrot.lane.b32.xlu0 %v4692_v21, %s7221_s22  ;;  %v9508_v60 = vadd.f32 %v9478_v13, %v4554_v20  ;;  %v4323_v20 = vld [vmem:[#allocation6 + $0x78] sm:$0xff] }
 0x479   : > { %4587 = vst.msk [vmem:[#allocation6 + $0x28] sm:$0xff] %vm3358_vm15, %v4555_v53  ;;  %v4473_v48 = vpop.f32.mrb[190].mxu0  ;;  %v9512_v19 = vadd.f32 %v9499_v42, %v4615_v43 }
 0x47a   : > { %v4556_v44 = vadd.f32 %v4473_v48, %v9342_v24  ;;  %v4475_v16 = vpop.f32.mrb[191].mxu0  ;;  %v4694_v15 = vmax.f32 %v9508_v60, 0.0 }
 0x47b   : > { %v4557_v3 = vadd.f32 %v4475_v16, %v4315_v17  ;;  %v4691_v35 = vmax.f32 %v9512_v19, 0.0 }
 0x47c   : > { %v4617_v59 = vld [vmem:[#allocation6 + $0x18] sm:$0xff]  ;;  %4762 = vrot.lane.b32.xlu0 %v4694_v15, %s7221_s22  ;;  %v9521_v9 = vadd.f32 %v9478_v13, %v4556_v44 }
 0x47d   : > { %4589 = vst.msk [vmem:[#allocation6 + $0x38] sm:$0xff] %vm3358_vm15, %v4557_v3  ;;  %v4479_v27 = vpop.f32.mrb[192].mxu0  ;;  %4756 = vrot.lane.b32.xlu1 %v4691_v35, %s7221_s22  ;;  %v9528_v24 = vadd.f32 %v9499_v42, %v4617_v59  ;;  %v4325_v3 = vld [vmem:[#allocation6 + $0x88] sm:$0xff] }
 0x47e   : > { %v4558_v4 = vadd.f32 %v4479_v27, %v9356_v50  ;;  %v4481_v49 = vpop.f32.mrb[193].mxu0  ;;  %v4696_v55 = vmax.f32 %v9521_v9, 0.0 }
 0x47f   : > { %v4559_v8 = vadd.f32 %v4481_v49, %v4317_v37  ;;  %v4693_v0 = vmax.f32 %v9528_v24, 0.0 }
 0x480   : > { %v4619_v62 = vld [vmem:[#allocation6 + $0x28] sm:$0xff]  ;;  %4766 = vrot.lane.b32.xlu0 %v4696_v55, %s7221_s22  ;;  %v9537_v45 = vadd.f32 %v9478_v13, %v4558_v4 }
 0x481   : > { %4591 = vst.msk [vmem:[#allocation6 + $0x48] sm:$0xff] %vm3358_vm15, %v4559_v8  ;;  %v4485_v61 = vpop.f32.mrb[194].mxu0  ;;  %4760 = vrot.lane.b32.xlu1 %v4693_v0, %s7221_s22  ;;  %v9544_v50 = vadd.f32 %v9499_v42, %v4619_v62 }
 0x482   : > { %v4560_v52 = vadd.f32 %v4485_v61, %v9371_v2  ;;  %v4487_v58 = vpop.f32.mrb[195].mxu0  ;;  %v4698_v1 = vmax.f32 %v9537_v45, 0.0 }
 0x483   : > { %v4561_v57 = vadd.f32 %v4487_v58, %v4319_v36  ;;  %v4695_v12 = vmax.f32 %v9544_v50, 0.0 }
 0x484   : > { %v4621_v22 = vld [vmem:[#allocation6 + $0x38] sm:$0xff]  ;;  %4770 = vrot.lane.b32.xlu0 %v4698_v1, %s7221_s22  ;;  %v9553_v38 = vadd.f32 %v9478_v13, %v4560_v52 }
 0x485   : > { %4593 = vst.msk [vmem:[#allocation6 + $0x58] sm:$0xff] %vm3358_vm15, %v4561_v57  ;;  %v4491_v46 = vpop.f32.mrb[196].mxu0  ;;  %4764 = vrot.lane.b32.xlu1 %v4695_v12, %s7221_s22  ;;  %v9560_v2 = vadd.f32 %v9499_v42, %v4621_v22  ;;  %v4327_v52 = vld [vmem:[#allocation6 + $0x98] sm:$0xff] }
 0x486   : > { %v4562_v54 = vadd.f32 %v4491_v46, %v9386_v26  ;;  %v4493_v18 = vpop.f32.mrb[197].mxu0  ;;  %v4700_v25 = vmax.f32 %v9553_v38, 0.0 }
 0x487   : > { %v4563_v32 = vadd.f32 %v4493_v18, %v4321_v56  ;;  %v4697_v29 = vmax.f32 %v9560_v2, 0.0 }
 0x488   : > { %v4623_v30 = vld [vmem:[#allocation6 + $0x48] sm:$0xff]  ;;  %4774 = vrot.lane.b32.xlu0 %v4700_v25, %s7221_s22  ;;  %v9569_v10 = vadd.f32 %v9478_v13, %v4562_v54 }
 0x489   : > { %4595 = vst.msk [vmem:[#allocation6 + $0x68] sm:$0xff] %vm3358_vm15, %v4563_v32  ;;  %v4497_v40 = vpop.f32.mrb[198].mxu0  ;;  %4768 = vrot.lane.b32.xlu1 %v4697_v29, %s7221_s22  ;;  %v9576_v26 = vadd.f32 %v9499_v42, %v4623_v30  ;;  %v4329_v32 = vld [vmem:[#allocation6 + $0xa8] sm:$0xff] }
 0x48a   : > { %v4564_v34 = vadd.f32 %v4497_v40, %v9401_v39  ;;  %v4499_v47 = vpop.f32.mrb[199].mxu0  ;;  %v4702_v11 = vmax.f32 %v9569_v10, 0.0 }
 0x48b   : > { %v4565_v53 = vadd.f32 %v4499_v47, %v4323_v20  ;;  %v4699_v43 = vmax.f32 %v9576_v26, 0.0 }
 0x48c   : > { %v4625_v48 = vld [vmem:[#allocation6 + $0x58] sm:$0xff]  ;;  %4778 = vrot.lane.b32.xlu0 %v4702_v11, %s7221_s22  ;;  %v9585_v44 = vadd.f32 %v9478_v13, %v4564_v34 }
 0x48d   : > { %4597 = vst.msk [vmem:[#allocation6 + $0x78] sm:$0xff] %vm3358_vm15, %v4565_v53  ;;  %v4503_v17 = vpop.f32.mrb[200].mxu0  ;;  %4772 = vrot.lane.b32.xlu1 %v4699_v43, %s7221_s22  ;;  %v9592_v39 = vadd.f32 %v9499_v42, %v4625_v48 }
 0x48e   : > { %v4566_v16 = vadd.f32 %v4503_v17, %v9416_v41  ;;  %v4505_v59 = vpop.f32.mrb[201].mxu0  ;;  %v4704_v27 = vmax.f32 %v9585_v44, 0.0 }
 0x48f   : > { %v4567_v4 = vadd.f32 %v4505_v59, %v4325_v3  ;;  %v4701_v37 = vmax.f32 %v9592_v39, 0.0 }
 0x490   : > { %v4627_v49 = vld [vmem:[#allocation6 + $0x68] sm:$0xff]  ;;  %4782 = vrot.lane.b32.xlu0 %v4704_v27, %s7221_s22  ;;  %v9601_v8 = vadd.f32 %v9478_v13, %v4566_v16  ;;  %v4331_v16 = vld [vmem:[#allocation6 + $0xb8] sm:$0xff] }
 0x491   : > { %4599 = vst.msk [vmem:[#allocation6 + $0x88] sm:$0xff] %vm3358_vm15, %v4567_v4  ;;  %v4509_v62 = vpop.f32.mrb[202].mxu0  ;;  %4776 = vrot.lane.b32.xlu1 %v4701_v37, %s7221_s22  ;;  %v9608_v41 = vadd.f32 %v9499_v42, %v4627_v49 }
 0x492   : > { %v4568_v61 = vadd.f32 %v4509_v62, %v9429_v5  ;;  %v4511_v36 = vpop.f32.mrb[203].mxu0  ;;  %v4706_v58 = vmax.f32 %v9601_v8, 0.0 }
 0x493   : > { %v4569_v57 = vadd.f32 %v4511_v36, %v4327_v52  ;;  %v4703_v22 = vmax.f32 %v9608_v41, 0.0 }
 0x494   : > { %v4629_v46 = vld [vmem:[#allocation6 + $0x78] sm:$0xff]  ;;  %4786 = vrot.lane.b32.xlu0 %v4706_v58, %s7221_s22  ;;  %v9617_v54 = vadd.f32 %v9478_v13, %v4568_v61 }
 0x495   : > { %4601 = vst.msk [vmem:[#allocation6 + $0x98] sm:$0xff] %vm3358_vm15, %v4569_v57  ;;  %v4515_v56 = vpop.f32.mrb[204].mxu0  ;;  %4780 = vrot.lane.b32.xlu1 %v4703_v22, %s7221_s22  ;;  %v9624_v5 = vadd.f32 %v9499_v42, %v4629_v46  ;;  %v4333_v57 = vld [vmem:[#allocation6 + $0xc8] sm:$0xff] }
 0x496   : > { %v4570_v18 = vadd.f32 %v4515_v56, %v9442_v63  ;;  %v4517_v30 = vpop.f32.mrb[205].mxu0  ;;  %v4708_v40 = vmax.f32 %v9617_v54, 0.0 }
 0x497   : > { %v4571_v34 = vadd.f32 %v4517_v30, %v4329_v32  ;;  %v4705_v20 = vmax.f32 %v9624_v5, 0.0 }
 0x498   : > { %v4631_v47 = vld [vmem:[#allocation6 + $0x88] sm:$0xff]  ;;  %4790 = vrot.lane.b32.xlu0 %v4708_v40, %s7221_s22  ;;  %v9633_v53 = vadd.f32 %v9478_v13, %v4570_v18 }
 0x499   : > { %4603 = vst.msk [vmem:[#allocation6 + $0xa8] sm:$0xff] %vm3358_vm15, %v4571_v34  ;;  %v4521_v48 = vpop.f32.mrb[206].mxu0  ;;  %4784 = vrot.lane.b32.xlu1 %v4705_v20, %s7221_s22  ;;  %v9640_v63 = vadd.f32 %v9499_v42, %v4631_v47 }
 0x49a   : > { %v4572_v17 = vadd.f32 %v4521_v48, %v9449_v28  ;;  %v4523_v3 = vpop.f32.mrb[207].mxu0  ;;  %v10519_v59 = vmax.f32 %v9633_v53, 0.0 }
 0x49b   : > { %v4573_v4 = vadd.f32 %v4523_v3, %v4331_v16  ;;  %v4707_v49 = vmax.f32 %v9640_v63, 0.0 }
 0x49c   : > { %v4633_v62 = vld [vmem:[#allocation6 + $0x98] sm:$0xff]  ;;  %4794 = vrot.lane.b32.xlu0 %v10519_v59, %s7221_s22  ;;  %v9649_v61 = vadd.f32 %v9478_v13, %v4572_v17 }
 0x49d   : > { %4605 = vst.msk [vmem:[#allocation6 + $0xb8] sm:$0xff] %vm3358_vm15, %v4573_v4  ;;  %v4527_v52 = vpop.f32.mrb[208].mxu0  ;;  %4788 = vrot.lane.b32.xlu1 %v4707_v49, %s7221_s22  ;;  %v9656_v28 = vadd.f32 %v9499_v42, %v4633_v62  ;;  %v4335_v17 = vld [vmem:[#allocation6 + $0xd8] sm:$0xff] }
 0x49e   : > { %v4574_v36 = vadd.f32 %v4527_v52, %v9455_v14  ;;  %v4529_v46 = vpop.f32.mrb[209].mxu0  ;;  %v10511_v56 = vmax.f32 %v9649_v61, 0.0 }
 0x49f   : > { %v4575_v18 = vadd.f32 %v4529_v46, %v4333_v57  ;;  %v4709_v32 = vmax.f32 %v9656_v28, 0.0 }
 0x4a0   : > { %v4635_v30 = vld [vmem:[#allocation6 + $0xa8] sm:$0xff]  ;;  %4798 = vrot.lane.b32.xlu0 %v10511_v56, %s7221_s22  ;;  %v9665_v34 = vadd.f32 %v9478_v13, %v4574_v36 }
 0x4a1   : > { %4607 = vst.msk [vmem:[#allocation6 + $0xc8] sm:$0xff] %vm3358_vm15, %v4575_v18  ;;  %v4533_v47 = vpop.f32.mrb[210].mxu0  ;;  %4792 = vrot.lane.b32.xlu1 %v4709_v32, %s7221_s22  ;;  %v9672_v14 = vadd.f32 %v9499_v42, %v4635_v30  ;;  %v4337_v18 = vld [vmem:[#allocation6 + $0xe8] sm:$0xff] }
 0x4a2   : > { %v4576_v48 = vadd.f32 %v4533_v47, %v9461_v23  ;;  %v4535_v16 = vpop.f32.mrb[211].mxu0  ;;  %v10509_v3 = vmax.f32 %v9665_v34, 0.0 }
 0x4a3   : > { %v4577_v4 = vadd.f32 %v4535_v16, %v4335_v17  ;;  %v10520_v62 = vmax.f32 %v9672_v14, 0.0 }
 0x4a4   : > { %v4637_v52 = vld [vmem:[#allocation6 + $0xb8] sm:$0xff]  ;;  %4802 = vrot.lane.b32.xlu0 %v10509_v3, %s7221_s22  ;;  %v9681_v36 = vadd.f32 %v9478_v13, %v4576_v48 }
 0x4a5   : > { %4609 = vst.msk [vmem:[#allocation6 + $0xd8] sm:$0xff] %vm3358_vm15, %v4577_v4  ;;  %v4539_v57 = vpop.f32.mrb[212].mxu0  ;;  %4796 = vrot.lane.b32.xlu1 %v10520_v62, %s7221_s22  ;;  %v9688_v23 = vadd.f32 %v9499_v42, %v4637_v52 }
 0x4a6   : > { %v4578_v46 = vadd.f32 %v4539_v57, %v9466_v6  ;;  %v4541_v30 = vpop.f32.mrb[213].mxu0  ;;  %v10510_v47 = vmax.f32 %v9681_v36, 0.0 }
 0x4a7   : > { %v4579_v17 = vadd.f32 %v4541_v30, %v4337_v18  ;;  %v10517_v48 = vmax.f32 %v9688_v23, 0.0  ;;  %v4339_v18 = vld [vmem:[#allocation6 + $0xf8] sm:$0xff] }
 0x4a8   : > { %v4639_v16 = vld [vmem:[#allocation6 + $0xc8] sm:$0xff]  ;;  %4806 = vrot.lane.b32.xlu0 %v10510_v47, %s7221_s22  ;;  %v9697_v4 = vadd.f32 %v9478_v13, %v4578_v46 }
 0x4a9   : > { %4611 = vst.msk [vmem:[#allocation6 + $0xe8] sm:$0xff] %vm3358_vm15, %v4579_v17  ;;  %v4545_v52 = vpop.f32.mrb[214].mxu0  ;;  %4800 = vrot.lane.b32.xlu1 %v10517_v48, %s7221_s22  ;;  %v9704_v6 = vadd.f32 %v9499_v42, %v4639_v16 }
 0x4aa   : > { %v4580_v57 = vadd.f32 %v4545_v52, %v9474_v7  ;;  %v4547_v30 = vpop.f32.mrb[215].mxu0  ;;  %v10513_v3 = vmax.f32 %v9697_v4, 0.0 }
 0x4ab   : > { %v4581_v47 = vadd.f32 %v4547_v30, %v4339_v18  ;;  %v10515_v46 = vmax.f32 %v9704_v6, 0.0 }
 0x4ac   : > { %v4641_v56 = vld [vmem:[#allocation6 + $0xd8] sm:$0xff]  ;;  %4810 = vrot.lane.b32.xlu0 %v10513_v3, %s7221_s22  ;;  %v9713_v17 = vadd.f32 %v9478_v13, %v4580_v57 }
 0x4ad   : > { %4613 = vst.msk [vmem:[#allocation6 + $0xf8] sm:$0xff] %vm3358_vm15, %v4581_v47  ;;  %4804 = vrot.lane.b32.xlu1 %v10515_v46, %s7221_s22  ;;  %v9720_v7 = vadd.f32 %v9499_v42, %v4641_v56 }
 0x4ae   : > { %v10512_v16 = vmax.f32 %v9713_v17, 0.0 }
 0x4af   : > { %v10514_v52 = vmax.f32 %v9720_v7, 0.0 }
 0x4b0   : > { %v4643_v18 = vld [vmem:[#allocation6 + $0xe8] sm:$0xff]  ;;  %4814 = vrot.lane.b32.xlu0 %v10512_v16, %s7221_s22 }
 0x4b1   : > { %4808 = vrot.lane.b32.xlu1 %v10514_v52, %s7221_s22  ;;  %v9731_v13 = vadd.f32 %v9499_v42, %v4643_v18 }
 0x4b3   : > { %v10516_v47 = vmax.f32 %v9731_v13, 0.0 }
 0x4b4   : > { %v4645_v56 = vld [vmem:[#allocation6 + $0xf8] sm:$0xff] }
 0x4b5   : > { %4812 = vrot.lane.b32.xlu1 %v10516_v47, %s7221_s22  ;;  %v9738_v57 = vadd.f32 %v9499_v42, %v4645_v56 }
 0x4b7   : > { %v10518_v30 = vmax.f32 %v9738_v57, 0.0 }
 0x4b9   : > { %4816 = vrot.lane.b32.xlu1 %v10518_v30, %s7221_s22 }
 0x4e6   : > { %v4755_v16 = vpop.permute.xlu0 %4754 }
 0x4ea   : > { %v4759_v3 = vpop.permute.xlu0 %4758 }
 0x4ee   : > { %v4763_v18 = vpop.permute.xlu0 %4762 }
 0x4ef   : > { %v4757_v52 = vpop.permute.xlu1 %4756 }
 0x4f0   : > { %v4819_v46 = vsel %vm4818_vm0, %v4755_v16, %v4757_v52  ;;  %v4868_v47 = vmax.f32 %v4691_v35, %v4757_v52 }
 0x4f1   : > { %v4867_v42 = vmax.f32 %v4690_v33, %v4819_v46 }
 0x4f2   : > { %6439 = vmatprep.mubr.msk.f32.mxu1 %vm4921_vm1, %v4868_v47  ;;  %v4767_v56 = vpop.permute.xlu0 %4766 }
 0x4f3   : > { %5035 = vmatmul.mubr.f32.vlgmr.msra.gmra.mrb[200].mxu1 %v4867_v42  ;;  %v4761_v48 = vpop.permute.xlu1 %4760 }
 0x4f4   : > { %v4820_v30 = vsel %vm4818_vm0, %v4759_v3, %v4761_v48  ;;  %v4870_v59 = vmax.f32 %v4693_v0, %v4761_v48 }
 0x4f5   : > { %v4869_v62 = vmax.f32 %v4692_v21, %v4820_v30  ;;  %v10636_v30 = vmax.f32 %v9633_v53, 0.0 }
 0x4f6   : > { %6440 = vmatprep.mubr.msk.f32.mxu1 %vm4921_vm1, %v4870_v59  ;;  %v4771_v19 = vpop.permute.xlu0 %4770 }
 0x4f7   : > { %5040 = vmatmul.mubr.f32.gmra.mrb[202].mxu1 %v4869_v62  ;;  %v4765_v35 = vpop.permute.xlu1 %4764 }
 0x4f8   : > { %v4821_v51 = vsel %vm4818_vm0, %v4763_v18, %v4765_v35  ;;  %v4872_v33 = vmax.f32 %v4695_v12, %v4765_v35 }
 0x4f9   : > { %v4871_v46 = vmax.f32 %v4694_v15, %v4821_v51  ;;  %v10639_v51 = vmax.f32 %v9704_v6, 0.0 }
 0x4fa   : > { %6441 = vmatprep.mubr.msk.f32.mxu1 %vm4921_vm1, %v4872_v33  ;;  %v4775_v24 = vpop.permute.xlu0 %4774 }
 0x4fb   : > { %5045 = vmatmul.mubr.f32.gmra.mrb[204].mxu1 %v4871_v46  ;;  %v4769_v0 = vpop.permute.xlu1 %4768  ;;  %v10640_v46 = vmax.f32 %v9665_v34, 0.0 }
 0x4fc   : > { %v4822_v31 = vsel %vm4818_vm0, %v4767_v56, %v4769_v0  ;;  %v4874_v21 = vmax.f32 %v4697_v29, %v4769_v0  ;;  %v10638_v56 = vmax.f32 %v9649_v61, 0.0  ;;  %v10641_v0 = vmax.f32 %v9720_v7, 0.0 }
 0x4fd   : > { %v4873_v59 = vmax.f32 %v4696_v55, %v4822_v31 }
 0x4fe   : > { %6442 = vmatprep.mubr.msk.f32.mxu1 %vm4921_vm1, %v4874_v21  ;;  %v4779_v50 = vpop.permute.xlu0 %4778  ;;  %v10642_v21 = vmax.f32 %v9681_v36, 0.0 }
 0x4ff   : > { %5050 = vmatmul.mubr.f32.gmra.mrb[206].mxu1 %v4873_v59  ;;  %v4773_v12 = vpop.permute.xlu1 %4772 }
 0x500   : > { %v4823_v60 = vsel %vm4818_vm0, %v4771_v19, %v4773_v12  ;;  %v4876_v15 = vmax.f32 %v4699_v43, %v4773_v12  ;;  %v10643_v12 = vmax.f32 %v9731_v13, 0.0  ;;  %v5526_v13 = vld [vmem:[%s10424_s7 + $0x88] sm:$0xff] }
 0x501   : > { %v4875_v3 = vmax.f32 %v4698_v1, %v4823_v60 }
 0x502   : > { %6443 = vmatprep.mubr.msk.f32.mxu1 %vm4921_vm1, %v4876_v15  ;;  %v4783_v2 = vpop.permute.xlu0 %4782  ;;  %v10644_v15 = vmax.f32 %v9697_v4, 0.0  ;;  %v5525_v4 = vld [vmem:[%s10424_s7 + $0x80] sm:$0xff] }
 0x503   : > { %5055 = vmatmul.mubr.f32.gmra.mrb[208].mxu1 %v4875_v3  ;;  %v4777_v29 = vpop.permute.xlu1 %4776 }
 0x504   : > { %v4824_v9 = vsel %vm4818_vm0, %v4775_v24, %v4777_v29  ;;  %v4878_v55 = vmax.f32 %v4701_v37, %v4777_v29  ;;  %v10645_v29 = vmax.f32 %v9738_v57, 0.0  ;;  %v6962_v57 = vpack.c.bf16 %v5526_v13, %v5525_v4 }
 0x505   : > { %v4877_v62 = vmax.f32 %v4700_v25, %v4824_v9 }
 0x506   : > { %6444 = vmatprep.mubr.msk.f32.mxu1 %vm4921_vm1, %v4878_v55  ;;  %v4787_v26 = vpop.permute.xlu0 %4786  ;;  %v10646_v55 = vmax.f32 %v9713_v17, 0.0  ;;  %v5510_v17 = vld [vmem:[%s10424_s7 + $0x8] sm:$0xff]  ;;  %6963 = vmatprep.subr.bf16.mxu0 %v6962_v57 }
 0x507   : > { %5060 = vmatmul.mubr.f32.gmra.mrb[210].mxu1 %v4877_v62  ;;  %v4781_v43 = vpop.permute.xlu1 %4780 }
 0x508   : > { %v4825_v45 = vsel %vm4818_vm0, %v4779_v50, %v4781_v43  ;;  %v4880_v1 = vmax.f32 %v4703_v22, %v4781_v43 }
 0x509   : > { %v4879_v48 = vmax.f32 %v4702_v11, %v4825_v45  ;;  %v5527_v45 = vld [vmem:[%s10424_s7 + $0x90] sm:$0xff] }
 0x50a   : > { %6445 = vmatprep.mubr.msk.f32.mxu1 %vm4921_vm1, %v4880_v1  ;;  %v4791_v39 = vpop.permute.xlu0 %4790  ;;  %v5528_v1 = vld [vmem:[%s10424_s7 + $0x98] sm:$0xff] }
 0x50b   : > { %5065 = vmatmul.mubr.f32.gmra.mrb[212].mxu1 %v4879_v48  ;;  %v4785_v37 = vpop.permute.xlu1 %4784  ;;  %v5511_v48 = vld [vmem:[%s10424_s7 + $0x10] sm:$0xff] }
 0x50c   : > { %v4826_v38 = vsel %vm4818_vm0, %v4783_v2, %v4785_v37  ;;  %v4882_v25 = vmax.f32 %v4705_v20, %v4785_v37  ;;  %v5512_v37 = vld [vmem:[%s10424_s7 + $0x18] sm:$0xff] }
 0x50d   : > { %v4881_v16 = vmax.f32 %v4704_v27, %v4826_v38  ;;  %v6968_v38 = vpack.c.bf16 %v5512_v37, %v5511_v48  ;;  %v5540_v48 = vld [vmem:[%s10424_s7 + $0xf8] sm:$0xff] }
 0x50e   : > { %6446 = vmatprep.mubr.msk.f32.mxu1 %vm4921_vm1, %v4882_v25  ;;  %v4795_v41 = vpop.permute.xlu0 %4794  ;;  %v5529_v25 = vld [vmem:[%s10424_s7 + $0xa0] sm:$0xff] }
 0x50f   : > { %5070 = vmatmul.mubr.f32.gmra.mrb[214].mxu1 %v4881_v16  ;;  %v4789_v22 = vpop.permute.xlu1 %4788  ;;  %v5530_v16 = vld [vmem:[%s10424_s7 + $0xa8] sm:$0xff] }
 0x510   : > { %v4827_v10 = vsel %vm4818_vm0, %v4787_v26, %v4789_v22  ;;  %v4884_v11 = vmax.f32 %v4707_v49, %v4789_v22  ;;  %v5509_v26 = vld [vmem:[%s10424_s7] sm:$0xff]  ;;  %v6970_v22 = vpack.c.bf16 %v5530_v16, %v5529_v25  ;;  %v5523_v25 = vld [vmem:[%s10424_s7 + $0x70] sm:$0xff]  ;;  %v5524_v16 = vld [vmem:[%s10424_s7 + $0x78] sm:$0xff] }
 0x511   : > { %v4883_v52 = vmax.f32 %v4706_v58, %v4827_v10  ;;  %v10635_v58 = vmax.f32 %v9672_v14, 0.0  ;;  %v6964_v43 = vpack.c.bf16 %v5510_v17, %v5509_v26  ;;  %v5514_v10 = vld [vmem:[%s10424_s7 + $0x28] sm:$0xff] }
 0x512   : > { %6447 = vmatprep.mubr.msk.f32.mxu1 %vm4921_vm1, %v4884_v11  ;;  %v4799_v20 = vpop.permute.xlu0 %4798 }
 0x513   : > { %5075 = vmatmul.mubr.f32.gmra.mrb[216].mxu1 %v4883_v52  ;;  %v4793_v5 = vpop.permute.xlu1 %4792  ;;  %6965 = vmatpush3.bf16.msra.mxu0 %v6964_v43  ;;  %v5531_v52 = vld [vmem:[%s10424_s7 + $0xb0] sm:$0xff] }
 0x514   : > { %v4828_v44 = vsel %vm4818_vm0, %v4791_v39, %v4793_v5  ;;  %v4886_v27 = vmax.f32 %v4709_v32, %v4793_v5  ;;  %v6966_v39 = vpack.c.bf16 %v5528_v1, %v5527_v45  ;;  %v5532_v5 = vld [vmem:[%s10424_s7 + $0xb8] sm:$0xff]  ;;  %v5539_v1 = vld [vmem:[%s10424_s7 + $0xf0] sm:$0xff] }
 0x515   : > { %v4885_v47 = vmax.f32 %v4708_v40, %v4828_v44  ;;  %v10637_v40 = vmax.f32 %v9688_v23, 0.0  ;;  %v6974_v44 = vpack.c.bf16 %v5532_v5, %v5531_v52  ;;  %v6990_v37 = vpack.c.bf16 %v5540_v48, %v5539_v1  ;;  %v5547_v5 = vld [vmem:[%s10424_s7 + $0x130] sm:$0xff] }
 0x516   : > { %6448 = vmatprep.mubr.msk.f32.mxu1 %vm4921_vm1, %v4886_v27  ;;  %v4803_v42 = vpop.permute.xlu0 %4802  ;;  %6967 = vmatprep.subr.bf16.mxu0 %v6966_v39  ;;  %v5516_v27 = vld [vmem:[%s10424_s7 + $0x38] sm:$0xff]  ;;  %v5563_v39 = vld [vmem:[%s10424_s7 + $0x1b0] sm:$0xff]  ;;  %v6992_v52 = vpack.c.bf16 %v5524_v16, %v5523_v25  ;;  %v5569_v16 = vld [vmem:[%s10424_s7 + $0x1e0] sm:$0xff] }
 0x517   : > { %5080 = vmatmul.mubr.f32.gmra.mrb[218].mxu1 %v4885_v47  ;;  %v4797_v63 = vpop.permute.xlu1 %4796  ;;  %6969 = vmatpush3.bf16.msra.mxu0 %v6968_v38  ;;  %v5564_v38 = vld [vmem:[%s10424_s7 + $0x1b8] sm:$0xff] }
 0x518   : > { %v4829_v8 = vsel %vm4818_vm0, %v4795_v41, %v4797_v63  ;;  %v4888_v49 = vmax.f32 %v10635_v58, %v4797_v63  ;;  %v5513_v41 = vld [vmem:[%s10424_s7 + $0x20] sm:$0xff]  ;;  %6971 = vmatprep.subr.bf16.mxu0 %v6970_v22 }
 0x519   : > { %v4887_v18 = vmax.f32 %v10636_v30, %v4829_v8  ;;  %v6972_v11 = vpack.c.bf16 %v5514_v10, %v5513_v41  ;;  %v5533_v63 = vld [vmem:[%s10424_s7 + $0xc0] sm:$0xff]  ;;  %v5534_v8 = vld [vmem:[%s10424_s7 + $0xc8] sm:$0xff] }
 0x51a   : > { %6449 = vmatprep.mubr.msk.f32.mxu1 %vm4921_vm1, %v4888_v49  ;;  %v4807_v35 = vpop.permute.xlu0 %4806  ;;  %v5557_v58 = vld [vmem:[%s10424_s7 + $0x180] sm:$0xff]  ;;  %v6978_v49 = vpack.c.bf16 %v5534_v8, %v5533_v63  ;;  %v5558_v30 = vld [vmem:[%s10424_s7 + $0x188] sm:$0xff] }
 0x51b   : > { %5085 = vmatmul.mubr.f32.gmra.mrb[220].mxu1 %v4887_v18  ;;  %v4801_v28 = vpop.permute.xlu1 %4800  ;;  %6973 = vmatpush3.bf16.msra.mxu0 %v6972_v11  ;;  %v5517_v18 = vld [vmem:[%s10424_s7 + $0x40] sm:$0xff]  ;;  %v7006_v11 = vpack.c.bf16 %v5564_v38, %v5563_v39 }
 0x51c   : > { %v4830_v54 = vsel %vm4818_vm0, %v4799_v20, %v4801_v28  ;;  %v4890_v32 = vmax.f32 %v10637_v40, %v4801_v28  ;;  %v5515_v20 = vld [vmem:[%s10424_s7 + $0x30] sm:$0xff]  ;;  %6975 = vmatprep.subr.bf16.mxu0 %v6974_v44  ;;  %v6994_v28 = vpack.c.bf16 %v5558_v30, %v5557_v58  ;;  %v5541_v40 = vld [vmem:[%s10424_s7 + $0x100] sm:$0xff] }
 0x51d   : > { %v4889_v19 = vmax.f32 %v10638_v56, %v4830_v54  ;;  %v6976_v47 = vpack.c.bf16 %v5516_v27, %v5515_v20  ;;  %v5535_v56 = vld [vmem:[%s10424_s7 + $0xd0] sm:$0xff]  ;;  %v5548_v27 = vld [vmem:[%s10424_s7 + $0x138] sm:$0xff] }
 0x51e   : > { %6450 = vmatprep.mubr.msk.f32.mxu1 %vm4921_vm1, %v4890_v32  ;;  %v4811_v50 = vpop.permute.xlu0 %4810  ;;  %v5542_v32 = vld [vmem:[%s10424_s7 + $0x108] sm:$0xff]  ;;  %6995 = vmatprep.subr.bf16.mxu1 %v6994_v28 }
 0x51f   : > { %5090 = vmatmul.mubr.f32.gmra.mrb[222].mxu1 %v4889_v19  ;;  %v4805_v14 = vpop.permute.xlu1 %4804  ;;  %6977 = vmatpush3.bf16.msra.mxu0 %v6976_v47  ;;  %v6996_v19 = vpack.c.bf16 %v5542_v32, %v5541_v40  ;;  %v7008_v47 = vpack.c.bf16 %v5548_v27, %v5547_v5  ;;  %v5554_v5 = vld [vmem:[%s10424_s7 + $0x168] sm:$0xff] }
 0x520   : > { %v4831_v53 = vsel %vm4818_vm0, %v4803_v42, %v4805_v14  ;;  %v4892_v33 = vmax.f32 %v10639_v51, %v4805_v14  ;;  %v5518_v42 = vld [vmem:[%s10424_s7 + $0x48] sm:$0xff]  ;;  %6979 = vmatprep.subr.bf16.mxu0 %v6978_v49  ;;  %v5536_v14 = vld [vmem:[%s10424_s7 + $0xd8] sm:$0xff] }
 0x521   : > { %v4891_v24 = vmax.f32 %v10640_v46, %v4831_v53  ;;  %v6980_v54 = vpack.c.bf16 %v5518_v42, %v5517_v18  ;;  %v5560_v53 = vld [vmem:[%s10424_s7 + $0x198] sm:$0xff]  ;;  %v6982_v51 = vpack.c.bf16 %v5536_v14, %v5535_v56  ;;  %v5519_v46 = vld [vmem:[%s10424_s7 + $0x50] sm:$0xff]  ;;  %6997 = vmatpush3.bf16.msra.mxu1 %v6996_v19  ;;  %v5566_v56 = vld [vmem:[%s10424_s7 + $0x1c8] sm:$0xff] }
 0x522   : > { %6451 = vmatprep.mubr.msk.f32.mxu1 %vm4921_vm1, %v4892_v33  ;;  %v4815_v7 = vpop.permute.xlu0 %4814  ;;  %v5573_v19 = vld [vmem:[%s10424_s7 + $0x200] sm:$0xff]  ;;  %v5574_v14 = vld [vmem:[%s10424_s7 + $0x208] sm:$0xff] }
 0x523   : > { %5095 = vmatmul.mubr.f32.gmra.mrb[224].mxu1 %v4891_v24  ;;  %v4809_v23 = vpop.permute.xlu1 %4808  ;;  %6981 = vmatpush3.bf16.msra.mxu0 %v6980_v54  ;;  %v5520_v24 = vld [vmem:[%s10424_s7 + $0x58] sm:$0xff]  ;;  %v5565_v54 = vld [vmem:[%s10424_s7 + $0x1c0] sm:$0xff] }
 0x524   : > { %v4832_v61 = vsel %vm4818_vm0, %v4807_v35, %v4809_v23  ;;  %v4894_v31 = vmax.f32 %v10641_v0, %v4809_v23  ;;  %v5559_v35 = vld [vmem:[%s10424_s7 + $0x190] sm:$0xff]  ;;  %v6984_v23 = vpack.c.bf16 %v5520_v24, %v5519_v46  ;;  %v5544_v0 = vld [vmem:[%s10424_s7 + $0x118] sm:$0xff]  ;;  %6983 = vmatprep.subr.bf16.mxu0 %v6982_v51  ;;  %v10006_v51 = vpack.c.bf16 %v5574_v14, %v5573_v19  ;;  %v5550_v46 = vld [vmem:[%s10424_s7 + $0x148] sm:$0xff] }
 0x525   : > { %v4893_v59 = vmax.f32 %v10642_v21, %v4832_v61  ;;  %v6998_v33 = vpack.c.bf16 %v5560_v53, %v5559_v35  ;;  %v5543_v61 = vld [vmem:[%s10424_s7 + $0x110] sm:$0xff]  ;;  %v7010_v53 = vpack.c.bf16 %v5566_v56, %v5565_v54 }
 0x526   : > { %6452 = vmatprep.mubr.msk.f32.mxu1 %vm4921_vm1, %v4894_v31  ;;  %v5537_v31 = vld [vmem:[%s10424_s7 + $0xe0] sm:$0xff]  ;;  %v7000_v21 = vpack.c.bf16 %v5544_v0, %v5543_v61 }
 0x527   : > { %5100 = vmatmul.mubr.f32.gmra.mrb[226].mxu1 %v4893_v59  ;;  %v4813_v6 = vpop.permute.xlu1 %4812  ;;  %6999 = vmatprep.subr.bf16.mxu1 %v6998_v33  ;;  %v5538_v59 = vld [vmem:[%s10424_s7 + $0xe8] sm:$0xff]  ;;  %v5549_v33 = vld [vmem:[%s10424_s7 + $0x140] sm:$0xff] }
 0x528   : > { %v4833_v34 = vsel %vm4818_vm0, %v4811_v50, %v4813_v6  ;;  %v4896_v60 = vmax.f32 %v10643_v12, %v4813_v6  ;;  %v5561_v50 = vld [vmem:[%s10424_s7 + $0x1a0] sm:$0xff]  ;;  %v5562_v6 = vld [vmem:[%s10424_s7 + $0x1a8] sm:$0xff]  ;;  %6985 = vmatpush3.bf16.msra.mxu0 %v6984_v23  ;;  %7001 = vmatpush3.bf16.msra.mxu1 %v7000_v21  ;;  %v7012_v0 = vpack.c.bf16 %v5550_v46, %v5549_v33 }
 0x529   : > { %v4895_v3 = vmax.f32 %v10644_v15, %v4833_v34  ;;  %v6986_v34 = vpack.c.bf16 %v5538_v59, %v5537_v31  ;;  %v7002_v12 = vpack.c.bf16 %v5562_v6, %v5561_v50  ;;  %v5522_v15 = vld [vmem:[%s10424_s7 + $0x68] sm:$0xff] }
 0x52a   : > { %6453 = vmatprep.mubr.msk.f32.mxu1 %vm4921_vm1, %v4896_v60  ;;  %v5521_v60 = vld [vmem:[%s10424_s7 + $0x60] sm:$0xff] }
 0x52b   : > { %5105 = vmatmul.mubr.f32.gmra.mrb[228].mxu1 %v4895_v3  ;;  %v4817_v2 = vpop.permute.xlu1 %4816  ;;  %v5545_v3 = vld [vmem:[%s10424_s7 + $0x120] sm:$0xff]  ;;  %6987 = vmatprep.subr.bf16.mxu0 %v6986_v34 }
 0x52c   : > { %v4834_v36 = vsel %vm4818_vm0, %v4815_v7, %v4817_v2  ;;  %v4898_v9 = vmax.f32 %v10645_v29, %v4817_v2  ;;  %v6988_v7 = vpack.c.bf16 %v5522_v15, %v5521_v60  ;;  %v5546_v2 = vld [vmem:[%s10424_s7 + $0x128] sm:$0xff]  ;;  %7003 = vmatprep.subr.bf16.mxu1 %v7002_v12 }
 0x52d   : > { %v4897_v62 = vmax.f32 %v10646_v55, %v4834_v36  ;;  %v7004_v36 = vpack.c.bf16 %v5546_v2, %v5545_v3  ;;  %v5567_v3 = vld [vmem:[%s10424_s7 + $0x1d0] sm:$0xff] }
 0x52e   : > { %6454 = vmatprep.mubr.msk.f32.mxu1 %vm4921_vm1, %v4898_v9  ;;  %6989 = vmatpush3.bf16.msra.mxu0 %v6988_v7 }
 0x52f   : > { %5110 = vmatmul.mubr.f32.gmra.mrb[230].mxu1 %v4897_v62  ;;  %6991 = vmatprep.subr.bf16.mxu0 %v6990_v37 }
 0x530   : > { %7005 = vmatpush3.bf16.msra.mxu1 %v7004_v36  ;;  %v5568_v36 = vld [vmem:[%s10424_s7 + $0x1d8] sm:$0xff] }
 0x531   : > { %7007 = vmatprep.subr.bf16.mxu1 %v7006_v11 }
 0x532   : > { %6993 = vmatpush3.bf16.msra.mxu0 %v6992_v52  ;;  %v5553_v52 = vld [vmem:[%s10424_s7 + $0x160] sm:$0xff] }
 0x533   : > { %7027 = vmatprep.subr.bf16.mxu0 %v10006_v51 }
 0x534   : > { %7009 = vmatpush3.bf16.msra.mxu1 %v7008_v47 }
 0x535   : > { %7011 = vmatprep.subr.bf16.mxu1 %v7010_v53 }
 0x538   : > { %7013 = vmatpush3.bf16.msra.mxu1 %v7012_v0 }
 0x5c6   : > { %v5036_v29 = vpop.f32.mrb[200].mxu1 }
 0x5c7   : > { %5117 = vst.msk [vmem:[#allocation7] sm:$0xff] %vm800_vm4, %v5036_v29  ;;  %v5038_v9 = vpop.f32.mrb[201].mxu1  ;;  %v5551_v29 = vld [vmem:[%s10424_s7 + $0x150] sm:$0xff] }
 0x5c8   : > { %v5552_v9 = vld [vmem:[%s10424_s7 + $0x158] sm:$0xff] }
 0x5ca   : > { %v5041_v55 = vpop.f32.mrb[202].mxu1 }
 0x5cb   : > { %5118 = vst.msk [vmem:[#allocation7 + $0x8] sm:$0xff] %vm800_vm4, %v5041_v55  ;;  %v5043_v62 = vpop.f32.mrb[203].mxu1  ;;  %v7014_v55 = vpack.c.bf16 %v5568_v36, %v5567_v3 }
 0x5cc   : > { %v7016_v62 = vpack.c.bf16 %v5552_v9, %v5551_v29 }
 0x5cd   : > { %7015 = vmatprep.subr.bf16.mxu1 %v7014_v55 }
 0x5ce   : > { %v5046_v4 = vpop.f32.mrb[204].mxu1  ;;  %v5133_v26 = vld [vmem:[#allocation7] sm:$0xff]  ;;  %7017 = vmatpush3.bf16.msra.mxu1 %v7016_v62 }
 0x5cf   : > { %5119 = vst.msk [vmem:[#allocation7 + $0x10] sm:$0xff] %vm800_vm4, %v5046_v4  ;;  %v5048_v13 = vpop.f32.mrb[205].mxu1 }
 0x5d2   : > { %v5149_v57 = vld [vmem:[#allocation7 + $0x1] sm:$0xff]  ;;  %v5051_v17 = vpop.f32.mrb[206].mxu1 }
 0x5d3   : > { %v5165_v43 = vmax.f32 %v5133_v26, %v5149_v57  ;;  %5120 = vst.msk [vmem:[#allocation7 + $0x18] sm:$0xff] %vm800_vm4, %v5051_v17  ;;  %v5053_v45 = vpop.f32.mrb[207].mxu1  ;;  %v5134_v41 = vld [vmem:[#allocation7 + $0x8] sm:$0xff] }
 0x5d5   : > { %5181 = vst.msk [vmem:[#allocation7] sm:$0xff] %vm800_vm4, %v5165_v43 }
 0x5d6   : > { %v5150_v22 = vld [vmem:[#allocation7 + $0x9] sm:$0xff]  ;;  %v5056_v10 = vpop.f32.mrb[208].mxu1 }
 0x5d7   : > { %v5166_v20 = vmax.f32 %v5134_v41, %v5150_v22  ;;  %5121 = vst.msk [vmem:[#allocation7 + $0x20] sm:$0xff] %vm800_vm4, %v5056_v10  ;;  %v5058_v44 = vpop.f32.mrb[209].mxu1  ;;  %v5135_v63 = vld [vmem:[#allocation7 + $0x10] sm:$0xff]  ;;  %v5570_v10 = vld [vmem:[%s10424_s7 + $0x1e8] sm:$0xff] }
 0x5d8   : > { %v7018_v11 = vpack.c.bf16 %v5570_v10, %v5569_v16 }
 0x5d9   : > { %5182 = vst.msk [vmem:[#allocation7 + $0x8] sm:$0xff] %vm800_vm4, %v5166_v20 }
 0x5da   : > { %v5151_v8 = vld [vmem:[#allocation7 + $0x11] sm:$0xff]  ;;  %v5061_v58 = vpop.f32.mrb[210].mxu1  ;;  %7019 = vmatprep.subr.bf16.mxu1 %v7018_v11 }
 0x5db   : > { %v5167_v49 = vmax.f32 %v5135_v63, %v5151_v8  ;;  %5122 = vst.msk [vmem:[#allocation7 + $0x28] sm:$0xff] %vm800_vm4, %v5061_v58  ;;  %v5063_v30 = vpop.f32.mrb[211].mxu1  ;;  %v5136_v18 = vld [vmem:[#allocation7 + $0x18] sm:$0xff]  ;;  %v7020_v63 = vpack.c.bf16 %v5554_v5, %v5553_v52 }
 0x5dc   : > { %v5572_v30 = vld [vmem:[%s10424_s7 + $0x1f8] sm:$0xff] }
 0x5dd   : > { %5183 = vst.msk [vmem:[#allocation7 + $0x10] sm:$0xff] %vm800_vm4, %v5167_v49  ;;  %v5571_v49 = vld [vmem:[%s10424_s7 + $0x1f0] sm:$0xff]  ;;  %7021 = vmatpush3.bf16.msra.mxu1 %v7020_v63 }
 0x5de   : > { %v5152_v42 = vld [vmem:[#allocation7 + $0x19] sm:$0xff]  ;;  %v5066_v28 = vpop.f32.mrb[212].mxu1 }
 0x5df   : > { %v5168_v40 = vmax.f32 %v5136_v18, %v5152_v42  ;;  %5123 = vst.msk [vmem:[#allocation7 + $0x30] sm:$0xff] %vm800_vm4, %v5066_v28  ;;  %v5068_v32 = vpop.f32.mrb[213].mxu1  ;;  %v5137_v24 = vld [vmem:[#allocation7 + $0x20] sm:$0xff]  ;;  %v7022_v28 = vpack.c.bf16 %v5572_v30, %v5571_v49 }
 0x5e0   : > { %v5213_v35 = vld [vmem:[#allocation7 + $0x2] sm:$0xff] }
 0x5e1   : > { %5184 = vst.msk [vmem:[#allocation7 + $0x18] sm:$0xff] %vm800_vm4, %v5168_v40  ;;  %5279 = vrot.lane.b32.xlu0 %v5213_v35, %s7222_s14  ;;  %v5229_v50 = vld [vmem:[#allocation7 + $0x4] sm:$0xff]  ;;  %7023 = vmatprep.subr.bf16.mxu1 %v7022_v28 }
 0x5e2   : > { %v5153_v23 = vld [vmem:[#allocation7 + $0x21] sm:$0xff]  ;;  %v5071_v61 = vpop.f32.mrb[214].mxu1 }
 0x5e3   : > { %v5169_v31 = vmax.f32 %v5137_v24, %v5153_v23  ;;  %5124 = vst.msk [vmem:[#allocation7 + $0x38] sm:$0xff] %vm800_vm4, %v5071_v61  ;;  %v5073_v21 = vpop.f32.mrb[215].mxu1  ;;  %v5138_v12 = vld [vmem:[#allocation7 + $0x28] sm:$0xff]  ;;  %v5555_v40 = vld [vmem:[%s10424_s7 + $0x170] sm:$0xff] }
 0x5e4   : > { %v5214_v59 = vld [vmem:[#allocation7 + $0xa] sm:$0xff] }
 0x5e5   : > { %v5230_v6 = vld [vmem:[#allocation7 + $0xc] sm:$0xff]  ;;  %5185 = vst.msk [vmem:[#allocation7 + $0x20] sm:$0xff] %vm800_vm4, %v5169_v31  ;;  %5281 = vrot.lane.b32.xlu0 %v5214_v59, %s7222_s14 }
 0x5e6   : > { %v7093_v34 = vpack.i.bf16 %v5230_v6, %v5229_v50  ;;  %v5154_v60 = vld [vmem:[#allocation7 + $0x29] sm:$0xff]  ;;  %v5076_v15 = vpop.f32.mrb[216].mxu1 }
 0x5e7   : > { %v5170_v7 = vmax.f32 %v5138_v12, %v5154_v60  ;;  %5125 = vst.msk [vmem:[#allocation7 + $0x40] sm:$0xff] %vm800_vm4, %v5076_v15  ;;  %v5078_v2 = vpop.f32.mrb[217].mxu1  ;;  %v5139_v4 = vld [vmem:[#allocation7 + $0x30] sm:$0xff]  ;;  %v5556_v32 = vld [vmem:[%s10424_s7 + $0x178] sm:$0xff] }
 0x5e8   : > { %7094 = vrot.lane.b32.xlu1 %v7093_v34, %s7223_s21  ;;  %v5215_v57 = vld [vmem:[#allocation7 + $0x12] sm:$0xff]  ;;  %v7024_v53 = vpack.c.bf16 %v5556_v32, %v5555_v40  ;;  %v5245_v36 = vld [vmem:[#allocation7 + $0x6] sm:$0xff] }
 0x5e9   : > { %5186 = vst.msk [vmem:[#allocation7 + $0x28] sm:$0xff] %vm800_vm4, %v5170_v7  ;;  %v5231_v45 = vld [vmem:[#allocation7 + $0x14] sm:$0xff] }
 0x5ea   : > { %v5155_v13 = vld [vmem:[#allocation7 + $0x31] sm:$0xff]  ;;  %v5081_v26 = vpop.f32.mrb[218].mxu1  ;;  %7025 = vmatpush3.bf16.msra.mxu1 %v7024_v53 }
 0x5eb   : > { %v5171_v17 = vmax.f32 %v5139_v4, %v5155_v13  ;;  %5126 = vst.msk [vmem:[#allocation7 + $0x48] sm:$0xff] %vm800_vm4, %v5081_v26  ;;  %v5083_v43 = vpop.f32.mrb[219].mxu1  ;;  %v5140_v48 = vld [vmem:[#allocation7 + $0x38] sm:$0xff]  ;;  %v5246_v34 = vld [vmem:[#allocation7 + $0xe] sm:$0xff] }
 0x5ec   : > { %5283 = vrot.lane.b32.xlu1 %v5215_v57, %s7222_s14  ;;  %v5232_v1 = vld [vmem:[#allocation7 + $0x1c] sm:$0xff]  ;;  %v7113_v29 = vpack.i.bf16 %v5246_v34, %v5245_v36 }
 0x5ed   : > { %5187 = vst.msk [vmem:[#allocation7 + $0x30] sm:$0xff] %vm800_vm4, %v5171_v17  ;;  %v7098_v39 = vpack.i.bf16 %v5232_v1, %v5231_v45  ;;  %v5216_v25 = vld [vmem:[#allocation7 + $0x1a] sm:$0xff] }
 0x5ee   : > { %v5156_v37 = vld [vmem:[#allocation7 + $0x39] sm:$0xff]  ;;  %v5086_v38 = vpop.f32.mrb[220].mxu1 }
 0x5ef   : > { %v5172_v41 = vmax.f32 %v5140_v48, %v5156_v37  ;;  %5127 = vst.msk [vmem:[#allocation7 + $0x50] sm:$0xff] %vm800_vm4, %v5086_v38  ;;  %7099 = vrot.lane.b32.xlu0 %v7098_v39, %s7223_s21  ;;  %v5088_v22 = vpop.f32.mrb[221].mxu1  ;;  %v5141_v20 = vld [vmem:[#allocation7 + $0x40] sm:$0xff]  ;;  %v5247_v37 = vld [vmem:[#allocation7 + $0x16] sm:$0xff] }
 0x5f0   : > { %5285 = vrot.lane.b32.xlu1 %v5216_v25, %s7222_s14  ;;  %v5217_v47 = vld [vmem:[#allocation7 + $0x22] sm:$0xff] }
 0x5f1   : > { %5188 = vst.msk [vmem:[#allocation7 + $0x38] sm:$0xff] %vm800_vm4, %v5172_v41  ;;  %v5233_v18 = vld [vmem:[#allocation7 + $0x24] sm:$0xff] }
 0x5f2   : > { %v5157_v44 = vld [vmem:[#allocation7 + $0x41] sm:$0xff]  ;;  %v5091_v27 = vpop.f32.mrb[222].mxu1 }
 0x5f3   : > { %v5173_v8 = vmax.f32 %v5141_v20, %v5157_v44  ;;  %5128 = vst.msk [vmem:[#allocation7 + $0x58] sm:$0xff] %vm800_vm4, %v5091_v27  ;;  %5287 = vrot.lane.b32.xlu0 %v5217_v47, %s7222_s14  ;;  %v5093_v58 = vpop.f32.mrb[223].mxu1  ;;  %v5142_v56 = vld [vmem:[#allocation7 + $0x48] sm:$0xff]  ;;  %v5248_v43 = vld [vmem:[#allocation7 + $0x1e] sm:$0xff] }
 0x5f4   : > { %v5234_v42 = vld [vmem:[#allocation7 + $0x2c] sm:$0xff]  ;;  %v7118_v25 = vpack.i.bf16 %v5248_v43, %v5247_v37 }
 0x5f5   : > { %5189 = vst.msk [vmem:[#allocation7 + $0x40] sm:$0xff] %vm800_vm4, %v5173_v8  ;;  %v7103_v54 = vpack.i.bf16 %v5234_v42, %v5233_v18  ;;  %v5218_v35 = vld [vmem:[#allocation7 + $0x2a] sm:$0xff] }
 0x5f6   : > { %v5158_v19 = vld [vmem:[#allocation7 + $0x49] sm:$0xff]  ;;  %v5096_v14 = vpop.f32.mrb[224].mxu1 }
 0x5f7   : > { %v5174_v33 = vmax.f32 %v5142_v56, %v5158_v19  ;;  %5129 = vst.msk [vmem:[#allocation7 + $0x60] sm:$0xff] %vm800_vm4, %v5096_v14  ;;  %5289 = vrot.lane.b32.xlu0 %v5218_v35, %s7222_s14  ;;  %v5098_v46 = vpop.f32.mrb[225].mxu1  ;;  %7104 = vrot.lane.b32.xlu1 %v7103_v54, %s7223_s21  ;;  %v5143_v24 = vld [vmem:[#allocation7 + $0x50] sm:$0xff]  ;;  %v5249_v63 = vld [vmem:[#allocation7 + $0x26] sm:$0xff] }
 0x5f8   : > { %v5219_v0 = vld [vmem:[#allocation7 + $0x32] sm:$0xff] }
 0x5f9   : > { %5190 = vst.msk [vmem:[#allocation7 + $0x48] sm:$0xff] %vm800_vm4, %v5174_v33  ;;  %v5235_v59 = vld [vmem:[#allocation7 + $0x34] sm:$0xff] }
 0x5fa   : > { %v5159_v23 = vld [vmem:[#allocation7 + $0x51] sm:$0xff]  ;;  %v5101_v61 = vpop.f32.mrb[226].mxu1 }
 0x5fb   : > { %v5175_v31 = vmax.f32 %v5143_v24, %v5159_v23  ;;  %5130 = vst.msk [vmem:[#allocation7 + $0x68] sm:$0xff] %vm800_vm4, %v5101_v61  ;;  %v5103_v21 = vpop.f32.mrb[227].mxu1  ;;  %5291 = vrot.lane.b32.xlu1 %v5219_v0, %s7222_s14  ;;  %v5144_v12 = vld [vmem:[#allocation7 + $0x58] sm:$0xff]  ;;  %v5250_v47 = vld [vmem:[#allocation7 + $0x2e] sm:$0xff]  ;;  %v5262_v0 = vld [vmem:[#allocation7 + $0x82] sm:$0xff] }
 0x5fc   : > { %v5236_v50 = vld [vmem:[#allocation7 + $0x3c] sm:$0xff]  ;;  %v7128_v8 = vpack.i.bf16 %v5250_v47, %v5249_v63  ;;  %v5202_v63 = vld [vmem:[#allocation7 + $0x28] sm:$0xff] }
 0x5fd   : > { %5191 = vst.msk [vmem:[#allocation7 + $0x50] sm:$0xff] %vm800_vm4, %v5175_v31  ;;  %v7108_v6 = vpack.i.bf16 %v5236_v50, %v5235_v59  ;;  %v5220_v3 = vld [vmem:[#allocation7 + $0x3a] sm:$0xff]  ;;  %v5198_v50 = vld [vmem:[#allocation7 + $0x8] sm:$0xff] }
 0x5fe   : > { %v5160_v60 = vld [vmem:[#allocation7 + $0x59] sm:$0xff]  ;;  %v5106_v15 = vpop.f32.mrb[228].mxu1 }
 0x5ff   : > { %v5176_v7 = vmax.f32 %v5144_v12, %v5160_v60  ;;  %5131 = vst.msk [vmem:[#allocation7 + $0x70] sm:$0xff] %vm800_vm4, %v5106_v15  ;;  %7109 = vrot.lane.b32.xlu0 %v7108_v6, %s7223_s21  ;;  %v5108_v2 = vpop.f32.mrb[229].mxu1  ;;  %5293 = vrot.lane.b32.xlu1 %v5220_v3, %s7222_s14  ;;  %v5145_v9 = vld [vmem:[#allocation7 + $0x60] sm:$0xff]  ;;  %v5251_v28 = vld [vmem:[#allocation7 + $0x36] sm:$0xff]  ;;  %v5576_v60 = vld [vmem:[%s10424_s7 + $0x218] sm:$0xff] }
 0x600   : > { %v5237_v26 = vld [vmem:[#allocation7 + $0x44] sm:$0xff] }
 0x601   : > { %5192 = vst.msk [vmem:[#allocation7 + $0x58] sm:$0xff] %vm800_vm4, %v5176_v7  ;;  %v5221_v48 = vld [vmem:[#allocation7 + $0x42] sm:$0xff] }
 0x602   : > { %v5161_v55 = vld [vmem:[#allocation7 + $0x61] sm:$0xff]  ;;  %v5111_v62 = vpop.f32.mrb[230].mxu1 }
 0x603   : > { %v5177_v4 = vmax.f32 %v5145_v9, %v5161_v55  ;;  %5132 = vst.msk [vmem:[#allocation7 + $0x78] sm:$0xff] %vm800_vm4, %v5111_v62  ;;  %7114 = vrot.lane.b32.xlu0 %v7113_v29, %s7224_s28  ;;  %v5113_v13 = vpop.f32.mrb[231].mxu1  ;;  %v5146_v45 = vld [vmem:[#allocation7 + $0x68] sm:$0xff]  ;;  %v5252_v14 = vld [vmem:[#allocation7 + $0x3e] sm:$0xff]  ;;  %v5577_v9 = vld [vmem:[%s10424_s7 + $0x220] sm:$0xff] }
 0x604   : > { %v5238_v57 = vld [vmem:[#allocation7 + $0x4c] sm:$0xff]  ;;  %v5575_v12 = vld [vmem:[%s10424_s7 + $0x210] sm:$0xff]  ;;  %v5578_v55 = vld [vmem:[%s10424_s7 + $0x228] sm:$0xff] }
 0x605   : > { %5193 = vst.msk [vmem:[#allocation7 + $0x60] sm:$0xff] %vm800_vm4, %v5177_v4  ;;  %v7123_v17 = vpack.i.bf16 %v5238_v57, %v5237_v26  ;;  %v5222_v16 = vld [vmem:[#allocation7 + $0x4a] sm:$0xff]  ;;  %v5197_v7 = vld [vmem:[#allocation7] sm:$0xff]  ;;  %v7030_v36 = vpack.c.bf16 %v5576_v60, %v5575_v12  ;;  %v7034_v13 = vpack.c.bf16 %v5578_v55, %v5577_v9 }
 0x606   : > { %v5162_v1 = vld [vmem:[#allocation7 + $0x69] sm:$0xff]  ;;  %v5579_v57 = vld [vmem:[%s10424_s7 + $0x230] sm:$0xff] }
 0x607   : > { %v5178_v39 = vmax.f32 %v5146_v45, %v5162_v1  ;;  %5295 = vrot.lane.b32.xlu0 %v5221_v48, %s7222_s14  ;;  %7124 = vrot.lane.b32.xlu1 %v7123_v17, %s7223_s21  ;;  %v5147_v38 = vld [vmem:[#allocation7 + $0x70] sm:$0xff]  ;;  %v5253_v35 = vld [vmem:[#allocation7 + $0x46] sm:$0xff] }
 0x608   : > { %v5239_v5 = vld [vmem:[#allocation7 + $0x54] sm:$0xff]  ;;  %v5580_v17 = vld [vmem:[%s10424_s7 + $0x238] sm:$0xff] }
 0x609   : > { %5194 = vst.msk [vmem:[#allocation7 + $0x68] sm:$0xff] %vm800_vm4, %v5178_v39  ;;  %v5223_v27 = vld [vmem:[#allocation7 + $0x52] sm:$0xff]  ;;  %v7038_v48 = vpack.c.bf16 %v5580_v17, %v5579_v57 }
 0x60a   : > { %v5148_v41 = vld [vmem:[#allocation7 + $0x78] sm:$0xff]  ;;  %v5254_v53 = vld [vmem:[#allocation7 + $0x4e] sm:$0xff] }
 0x60b   : > { %v5163_v22 = vld [vmem:[#allocation7 + $0x71] sm:$0xff]  ;;  %v5164_v10 = vld [vmem:[#allocation7 + $0x79] sm:$0xff]  ;;  %7119 = vrot.lane.b32.xlu0 %v7118_v25, %s7224_s28  ;;  %5297 = vrot.lane.b32.xlu1 %v5222_v16, %s7222_s14 }
 0x60c   : > { %v5179_v11 = vmax.f32 %v5147_v38, %v5163_v22  ;;  %v5180_v52 = vmax.f32 %v5148_v41, %v5164_v10  ;;  %v5240_v20 = vld [vmem:[#allocation7 + $0x5c] sm:$0xff]  ;;  %v5199_v1 = vld [vmem:[#allocation7 + $0x10] sm:$0xff] }
 0x60d   : > { %v7133_v44 = vpack.i.bf16 %v5240_v20, %v5239_v5  ;;  %v5224_v58 = vld [vmem:[#allocation7 + $0x5a] sm:$0xff] }
 0x60e   : > { %5195 = vst.msk [vmem:[#allocation7 + $0x70] sm:$0xff] %vm800_vm4, %v5179_v11  ;;  %5196 = vst.msk [vmem:[#allocation7 + $0x78] sm:$0xff] %vm800_vm4, %v5180_v52  ;;  %v5255_v33 = vld [vmem:[#allocation7 + $0x56] sm:$0xff]  ;;  %v5256_v46 = vld [vmem:[#allocation7 + $0x5e] sm:$0xff] }
 0x60f   : > { %5299 = vrot.lane.b32.xlu0 %v5223_v27, %s7222_s14  ;;  %7134 = vrot.lane.b32.xlu1 %v7133_v44, %s7223_s21  ;;  %v5200_v16 = vld [vmem:[#allocation7 + $0x18] sm:$0xff]  ;;  %v5201_v5 = vld [vmem:[#allocation7 + $0x20] sm:$0xff] }
 0x610   : > { %v5241_v49 = vld [vmem:[#allocation7 + $0x64] sm:$0xff] }
 0x611   : > { %v5225_v42 = vld [vmem:[#allocation7 + $0x62] sm:$0xff] }
 0x612   : > { %v5257_v24 = vld [vmem:[#allocation7 + $0x66] sm:$0xff] }
 0x613   : > { %7129 = vrot.lane.b32.xlu0 %v7128_v8, %s7224_s28  ;;  %5301 = vrot.lane.b32.xlu1 %v5224_v58, %s7222_s14 }
 0x615   : > { %v5242_v30 = vld [vmem:[#allocation7 + $0x6c] sm:$0xff]  ;;  %v5243_v40 = vld [vmem:[#allocation7 + $0x74] sm:$0xff]  ;;  %v5244_v19 = vld [vmem:[#allocation7 + $0x7c] sm:$0xff] }
 0x616   : > { %v7138_v18 = vpack.i.bf16 %v5242_v30, %v5241_v49  ;;  %v5226_v54 = vld [vmem:[#allocation7 + $0x6a] sm:$0xff]  ;;  %v5227_v32 = vld [vmem:[#allocation7 + $0x72] sm:$0xff]  ;;  %v5228_v56 = vld [vmem:[#allocation7 + $0x7a] sm:$0xff] }
 0x617   : > { %5303 = vrot.lane.b32.xlu0 %v5225_v42, %s7222_s14  ;;  %v5258_v23 = vld [vmem:[#allocation7 + $0x6e] sm:$0xff]  ;;  %v5259_v61 = vld [vmem:[#allocation7 + $0x76] sm:$0xff]  ;;  %v5260_v31 = vld [vmem:[#allocation7 + $0x7e] sm:$0xff] }
 0x618   : > { %7139 = vrot.lane.b32.xlu1 %v7138_v18, %s7223_s21  ;;  %v5203_v42 = vld [vmem:[#allocation7 + $0x30] sm:$0xff] }
 0x61b   : > { %5419 = vrot.lane.b32.xlu0 %v5251_v28, %s7224_s28 }
 0x61c   : > { %5305 = vrot.lane.b32.xlu1 %v5226_v54, %s7222_s14 }
 0x61f   : > { %5307 = vrot.lane.b32.xlu0 %v5227_v32, %s7222_s14 }
 0x620   : > { %5371 = vrot.lane.b32.xlu1 %v5243_v40, %s7223_s21 }
 0x623   : > { %5373 = vrot.lane.b32.xlu0 %v5244_v19, %s7223_s21  ;;  %s324_s21 = sand.u32 1, %s7207_s10  }
 0x624   : > { %5309 = vrot.lane.b32.xlu1 %v5228_v56, %s7222_s14  ;;  %s6158_s29 = sshll.u32 %s324_s21, 3  ;;  %s6082_s26 = scalar_lea.sflag [#allocation10], %s324_s21 }
 0x625   : > { %s326_s22 = scalar_lea.vmem [#allocation9], %s6158_s29 }
 0x626   : > { %s6095_s23 = sshll.u32 %s326_s22, 4  ;;  %s10376_s23 = int_to_ptr.vmem [resolvable:$true] %s6095_s23 }
 0x627   : > { %5423 = vrot.lane.b32.xlu0 %v5253_v35, %s7224_s28  ;;  %v5204_v35 = vld [vmem:[#allocation7 + $0x38] sm:$0xff] }
 0x628   : > { %5421 = vrot.lane.b32.xlu1 %v5252_v14, %s7224_s28 }
 0x62b   : > { %5427 = vrot.lane.b32.xlu0 %v5255_v33, %s7224_s28 }
 0x62c   : > { %5425 = vrot.lane.b32.xlu1 %v5254_v53, %s7224_s28 }
 0x62f   : > { %5431 = vrot.lane.b32.xlu0 %v5257_v24, %s7224_s28 }
 0x630   : > { %5429 = vrot.lane.b32.xlu1 %v5256_v46, %s7224_s28 }
 0x633   : > { %5435 = vrot.lane.b32.xlu0 %v5259_v61, %s7224_s28 }
 0x634   : > { %5433 = vrot.lane.b32.xlu1 %v5258_v23, %s7224_s28 }
 0x637   : > { %5437 = vrot.lane.b32.xlu0 %v5260_v31, %s7224_s28  ;;  %v5205_v31 = vld [vmem:[#allocation7 + $0x40] sm:$0xff]  ;;  %s7153_s28 = scalar_lea.vmem %s10376_s23, 128 }
 0x638   : > { %5456 = vrot.lane.b32.xlu1 %v5262_v0, %s7222_s14  ;;  %s6473_s14 = sshll.u32 %s7297_s13, 7  ;;  %p7154_p11 = scmp.ne.s32.totalorder %s10376_s23, %s7153_s28 }
 0x639   : > { %s10374_s27 = scalar_lea.hbm %s10426_s9, %s6473_s14  ;;  %s7225_s13 = smov [#allocation9]  }
 0x63a   : > { %p7155_p12 = pnand %p7154_p11, %p7314_p5  ;;  %s7157_s29 = sshll.u32 %s7225_s13, 4  ;;  %s7158_s29 = int_to_ptr.vmem [resolvable:$false] %s7157_s29 }
 0x63b   : > { %s7159_s16 = scalar_lea.vmem %s7158_s29, 256  ;;  %p7160_p0 = scmp.lt.s32.totalorder %s10376_s23, %s7158_s29 }
 0x63c   : > { %p7156_p13 = pneg %p7155_p12  ;;  %p7161_p1 = scmp.lt.s32.totalorder %s7159_s16, %s7153_s28 }
 0x63e   : > { %p7162_p2 = por %p7161_p1, %p7160_p0 }
 0x640   : > { %p7163_p3 = pnand %p7162_p2, %p7156_p13 }
 0x653   : > { %v5280_v21 = vpop.permute.xlu0 %5279 }
 0x654   : > { %v5459_v29 = vsel %vm800_vm4, %v5197_v7, %v5280_v21 }
 0x657   : > { %v10112_v59 = vpop.permute.xlu0 %5281 }
 0x658   : > { %v5460_v6 = vsel %vm800_vm4, %v5198_v50, %v10112_v59 }
 0x659   : > { %5822 = vmatprep.mubr.f32.mxu1 %v5460_v6 }
 0x65a   : > { %v10116_v34 = vpop.permute.xlu1 %7094 }
 0x65b   : > { %v7097_v15 = vunpack.i.h.bf16 %v10116_v34  ;;  %v7096_v3 = vunpack.i.l.bf16 %v10116_v34 }
 0x65d   : > { %v5475_v2 = vsel %vm3358_vm15, %v5280_v21, %v7096_v3  ;;  %v5476_v62 = vsel %vm3358_vm15, %v10112_v59, %v7097_v15 }
 0x65e   : > { %5677 = vmatprep.mubr.f32.mxu0 %v5475_v2  ;;  %v10140_v4 = vpop.permute.xlu1 %5283 }
 0x65f   : > { %5678 = vmatmul.mubr.f32.vlgmr.msra.gmra.mrb[216].mxu0 %v5459_v29  ;;  %v5461_v37 = vsel %vm800_vm4, %v5199_v1, %v10140_v4 }
 0x660   : > { %5682 = vmatprep.mubr.f32.mxu0 %v5476_v62  ;;  %7029 = vmatpush3.bf16.msra.mxu0 %v10006_v51 }
 0x661   : > { %7031 = vmatprep.subr.bf16.mxu0 %v7030_v36  ;;  %v10143_v26 = vpop.permute.xlu0 %7099 }
 0x662   : > { %v7102_v43 = vunpack.i.h.bf16 %v10143_v26  ;;  %v7101_v45 = vunpack.i.l.bf16 %v10143_v26  ;;  %v10157_v39 = vpop.permute.xlu1 %5285 }
 0x663   : > { %5683 = vmatmul.mubr.f32.gmra.mrb[218].mxu0 %v5460_v6  ;;  %v5462_v22 = vsel %vm800_vm4, %v5200_v16, %v10157_v39 }
 0x664   : > { %7033 = vmatpush3.bf16.msra.mxu0 %v7030_v36  ;;  %v5477_v51 = vsel %vm3358_vm15, %v10140_v4, %v7101_v45  ;;  %v5478_v38 = vsel %vm3358_vm15, %v10157_v39, %v7102_v43 }
 0x665   : > { %7035 = vmatprep.subr.bf16.mxu0 %v7034_v13  ;;  %5687 = vmatprep.mubr.f32.mxu0 %v5477_v51  ;;  %v10165_v25 = vpop.permute.xlu0 %5287 }
 0x666   : > { %v5463_v44 = vsel %vm800_vm4, %v5201_v5, %v10165_v25 }
 0x667   : > { %5688 = vmatmul.mubr.f32.gmra.mrb[220].mxu0 %v5461_v37 }
 0x668   : > { %5692 = vmatprep.mubr.f32.mxu0 %v5478_v38  ;;  %7037 = vmatpush3.bf16.msra.mxu0 %v7034_v13  ;;  %v5207_v13 = vld [vmem:[#allocation7 + $0x50] sm:$0xff] }
 0x669   : > { %7039 = vmatprep.subr.bf16.mxu0 %v7038_v48  ;;  %v10167_v41 = vpop.permute.xlu1 %7104  ;;  %v10177_v20 = vpop.permute.xlu0 %5289 }
 0x66a   : > { %v7107_v10 = vunpack.i.h.bf16 %v10167_v41  ;;  %v7106_v11 = vunpack.i.l.bf16 %v10167_v41  ;;  %v5464_v58 = vsel %vm800_vm4, %v5202_v63, %v10177_v20 }
 0x66b   : > { %5693 = vmatmul.mubr.f32.gmra.mrb[222].mxu0 %v5462_v22 }
 0x66c   : > { %7041 = vmatpush3.bf16.msra.mxu0 %v7038_v48  ;;  %v5479_v52 = vsel %vm3358_vm15, %v10165_v25, %v7106_v11  ;;  %v5480_v27 = vsel %vm3358_vm15, %v10177_v20, %v7107_v10  ;;  %v5208_v48 = vld [vmem:[#allocation7 + $0x58] sm:$0xff] }
 0x66d   : > { %5697 = vmatprep.mubr.f32.mxu0 %v5479_v52  ;;  %v10185_v47 = vpop.permute.xlu1 %5291 }
 0x66e   : > { %v5465_v40 = vsel %vm800_vm4, %v5203_v42, %v10185_v47 }
 0x66f   : > { %5698 = vmatmul.mubr.f32.gmra.mrb[224].mxu0 %v5463_v44 }
 0x670   : > { %5702 = vmatprep.mubr.f32.mxu0 %v5480_v27 }
 0x671   : > { %v10187_v8 = vpop.permute.xlu0 %7109  ;;  %v10197_v28 = vpop.permute.xlu1 %5293 }
 0x672   : > { %v7112_v49 = vunpack.i.h.bf16 %v10187_v8  ;;  %v7111_v30 = vunpack.i.l.bf16 %v10187_v8  ;;  %v5466_v46 = vsel %vm800_vm4, %v5204_v35, %v10197_v28 }
 0x673   : > { %5703 = vmatmul.mubr.f32.gmra.mrb[226].mxu0 %v5464_v58 }
 0x674   : > { %v5481_v18 = vsel %vm3358_vm15, %v10185_v47, %v7111_v30  ;;  %v5482_v56 = vsel %vm3358_vm15, %v10197_v28, %v7112_v49 }
 0x675   : > { %v7115_v54 = vpop.permute.xlu0 %7114  ;;  %5707 = vmatprep.mubr.f32.mxu0 %v5481_v18 }
 0x676   : > { %v7116_v32 = vunpack.i.l.bf16 %v7115_v54  ;;  %v7117_v19 = vunpack.i.h.bf16 %v7115_v54 }
 0x677   : > { %5708 = vmatmul.mubr.f32.gmra.mrb[228].mxu0 %v5465_v40 }
 0x678   : > { %5712 = vmatprep.mubr.f32.mxu0 %v5482_v56  ;;  %v5492_v14 = vsel %vm5491_vm2, %v7096_v3, %v7116_v32  ;;  %v5493_v0 = vsel %vm5491_vm2, %v7097_v15, %v7117_v19  ;;  %v5206_v3 = vld [vmem:[#allocation7 + $0x48] sm:$0xff]  ;;  %v5211_v56 = vld [vmem:[#allocation7 + $0x70] sm:$0xff] }
 0x679   : > { %v10208_v53 = vpop.permute.xlu0 %5295  ;;  %v10210_v33 = vpop.permute.xlu1 %7124  ;;  %5823 = vmatmul.mubr.f32.vlgmr.msra.gmra.mrb[232].mxu1 %v5492_v14 }
 0x67a   : > { %v7126_v24 = vunpack.i.l.bf16 %v10210_v33  ;;  %5827 = vmatprep.mubr.f32.mxu1 %v5461_v37  ;;  %v7127_v23 = vunpack.i.h.bf16 %v10210_v33  ;;  %v5467_v6 = vsel %vm800_vm4, %v5205_v31, %v10208_v53 }
 0x67b   : > { %5713 = vmatmul.mubr.f32.gmra.mrb[230].mxu0 %v5466_v46 }
 0x67c   : > { %v5483_v61 = vsel %vm3358_vm15, %v10208_v53, %v7126_v24 }
 0x67d   : > { %v7120_v21 = vpop.permute.xlu0 %7119  ;;  %v10223_v50 = vpop.permute.xlu1 %5297  ;;  %5717 = vmatprep.mubr.f32.mxu0 %v5483_v61  ;;  %5828 = vmatmul.mubr.f32.gmra.mrb[234].mxu1 %v5493_v0 }
 0x67e   : > { %v7121_v12 = vunpack.i.l.bf16 %v7120_v21  ;;  %5832 = vmatprep.mubr.f32.mxu1 %v5462_v22  ;;  %v5484_v60 = vsel %vm3358_vm15, %v10223_v50, %v7127_v23  ;;  %v7122_v34 = vunpack.i.h.bf16 %v7120_v21  ;;  %v10240_v36 = vsel %vm800_vm4, %v5206_v3, %v10223_v50 }
 0x67f   : > { %5718 = vmatmul.mubr.f32.gmra.mrb[232].mxu0 %v5467_v6 }
 0x680   : > { %5722 = vmatprep.mubr.f32.mxu0 %v5484_v60  ;;  %v5494_v15 = vsel %vm5491_vm2, %v7101_v45, %v7121_v12  ;;  %v5495_v62 = vsel %vm5491_vm2, %v7102_v43, %v7122_v34 }
 0x681   : > { %v10234_v7 = vpop.permute.xlu0 %5299  ;;  %v10236_v2 = vpop.permute.xlu1 %7134  ;;  %5833 = vmatmul.mubr.f32.gmra.mrb[236].mxu1 %v5494_v15 }
 0x682   : > { %v7136_v29 = vunpack.i.l.bf16 %v10236_v2  ;;  %5837 = vmatprep.mubr.f32.mxu1 %v5463_v44  ;;  %v7137_v9 = vunpack.i.h.bf16 %v10236_v2  ;;  %v5469_v45 = vsel %vm800_vm4, %v5207_v13, %v10234_v7  ;;  %v5209_v44 = vld [vmem:[#allocation7 + $0x60] sm:$0xff] }
 0x683   : > { %5723 = vmatmul.mubr.f32.gmra.mrb[234].mxu0 %v10240_v36 }
 0x684   : > { %v5485_v55 = vsel %vm3358_vm15, %v10234_v7, %v7136_v29 }
 0x685   : > { %v7130_v57 = vpop.permute.xlu0 %7129  ;;  %v10252_v17 = vpop.permute.xlu1 %5301  ;;  %5727 = vmatprep.mubr.f32.mxu0 %v5485_v55  ;;  %5838 = vmatmul.mubr.f32.gmra.mrb[238].mxu1 %v5495_v62 }
 0x686   : > { %v7131_v51 = vunpack.i.l.bf16 %v7130_v57  ;;  %5842 = vmatprep.mubr.f32.mxu1 %v5464_v58  ;;  %v5486_v1 = vsel %vm3358_vm15, %v10252_v17, %v7137_v9  ;;  %v7132_v26 = vunpack.i.h.bf16 %v7130_v57  ;;  %v5470_v16 = vsel %vm800_vm4, %v5208_v48, %v10252_v17 }
 0x687   : > { %5728 = vmatmul.mubr.f32.gmra.mrb[236].mxu0 %v5469_v45 }
 0x688   : > { %5732 = vmatprep.mubr.f32.mxu0 %v5486_v1  ;;  %v5496_v43 = vsel %vm5491_vm2, %v7106_v11, %v7131_v51  ;;  %v5497_v5 = vsel %vm5491_vm2, %v7107_v10, %v7132_v26  ;;  %v5210_v10 = vld [vmem:[#allocation7 + $0x68] sm:$0xff] }
 0x689   : > { %v10263_v37 = vpop.permute.xlu0 %5303  ;;  %5843 = vmatmul.mubr.f32.gmra.mrb[240].mxu1 %v5496_v43 }
 0x68a   : > { %v10265_v38 = vpop.permute.xlu1 %7139  ;;  %5847 = vmatprep.mubr.f32.mxu1 %v5465_v40  ;;  %v5471_v58 = vsel %vm800_vm4, %v5209_v44, %v10263_v37 }
 0x68b   : > { %v7141_v22 = vunpack.i.l.bf16 %v10265_v38  ;;  %5733 = vmatmul.mubr.f32.gmra.mrb[238].mxu0 %v5470_v16  ;;  %v7142_v52 = vunpack.i.h.bf16 %v10265_v38 }
 0x68d   : > { %v5487_v11 = vsel %vm3358_vm15, %v10263_v37, %v7141_v22  ;;  %v5420_v27 = vpop.permute.xlu0 %5419  ;;  %5848 = vmatmul.mubr.f32.gmra.mrb[242].mxu1 %v5497_v5 }
 0x68e   : > { %v10278_v63 = vpop.permute.xlu1 %5305  ;;  %5737 = vmatprep.mubr.f32.mxu0 %v5487_v11  ;;  %5852 = vmatprep.mubr.f32.mxu1 %v5466_v46  ;;  %v5498_v41 = vsel %vm5491_vm2, %v7111_v30, %v5420_v27  ;;  %v5212_v46 = vld [vmem:[#allocation7 + $0x78] sm:$0xff] }
 0x68f   : > { %5738 = vmatmul.mubr.f32.gmra.mrb[240].mxu0 %v5471_v58  ;;  %v5488_v18 = vsel %vm3358_vm15, %v10278_v63, %v7142_v52  ;;  %v5472_v40 = vsel %vm800_vm4, %v5210_v10, %v10278_v63 }
 0x690   : > { %5742 = vmatprep.mubr.f32.mxu0 %v5488_v18 }
 0x691   : > { %v10289_v42 = vpop.permute.xlu0 %5307  ;;  %5853 = vmatmul.mubr.f32.gmra.mrb[244].mxu1 %v5498_v41 }
 0x692   : > { %v10291_v54 = vpop.permute.xlu1 %5371  ;;  %5857 = vmatprep.mubr.f32.mxu1 %v5467_v6  ;;  %v5473_v30 = vsel %vm800_vm4, %v5211_v56, %v10289_v42 }
 0x693   : > { %5743 = vmatmul.mubr.f32.gmra.mrb[242].mxu0 %v5472_v40  ;;  %v5489_v32 = vsel %vm3358_vm15, %v10289_v42, %v10291_v54 }
 0x694   : > { %5747 = vmatprep.mubr.f32.mxu0 %v5489_v32 }
 0x695   : > { %v5374_v19 = vpop.permute.xlu0 %5373 }
 0x696   : > { %v5310_v14 = vpop.permute.xlu1 %5309 }
 0x697   : > { %5748 = vmatmul.mubr.f32.gmra.mrb[244].mxu0 %v5473_v30  ;;  %v5490_v35 = vsel %vm3358_vm15, %v5310_v14, %v5374_v19  ;;  %v5474_v0 = vsel %vm800_vm4, %v5212_v46, %v5310_v14 }
 0x698   : > { %5752 = vmatprep.mubr.f32.mxu0 %v5490_v35 }
 0x699   : > { %v5424_v21 = vpop.permute.xlu0 %5423 }
 0x69a   : > { %v5422_v61 = vpop.permute.xlu1 %5421  ;;  %v5500_v6 = vsel %vm5491_vm2, %v7126_v24, %v5424_v21  ;;  %v5261_v24 = vld [vmem:[#allocation7 + $0x80] sm:$0xff] }
 0x69b   : > { %5753 = vmatmul.mubr.f32.gmra.mrb[246].mxu0 %v5474_v0  ;;  %v5499_v31 = vsel %vm5491_vm2, %v7112_v49, %v5422_v61 }
 0x69c   : > { %5858 = vmatmul.mubr.f32.gmra.mrb[246].mxu1 %v5499_v31  ;;  %6676 = vmatprep.mubr.msk.f32.mxu0 %vm3358_vm15, %v10112_v59 }
 0x69d   : > { %5862 = vmatprep.mubr.f32.mxu1 %v10240_v36  ;;  %v5428_v8 = vpop.permute.xlu0 %5427 }
 0x69e   : > { %v5426_v12 = vpop.permute.xlu1 %5425 }
 0x69f   : > { %6677 = vmatmul.mubr.msk.f32.vlgmr.msra.gmra.mrb[248].mxu0 %vm3358_vm15, %v10140_v4  ;;  %v5501_v59 = vsel %vm5491_vm2, %v7127_v23, %v5426_v12  ;;  %v5502_v4 = vsel %vm5491_vm2, %v7136_v29, %v5428_v8 }
 0x6a0   : > { %5863 = vmatmul.mubr.f32.gmra.mrb[248].mxu1 %v5500_v6  ;;  %6679 = vmatprep.mubr.msk.f32.mxu0 %vm3358_vm15, %v10157_v39 }
 0x6a1   : > { %5867 = vmatprep.mubr.f32.mxu1 %v5469_v45 }
 0x6a2   : > { %v5430_v39 = vpop.permute.xlu1 %5429 }
 0x6a3   : > { %6680 = vmatmul.mubr.msk.f32.gmra.mrb[250].mxu0 %vm3358_vm15, %v10165_v25  ;;  %v5503_v25 = vsel %vm5491_vm2, %v7137_v9, %v5430_v39 }
 0x6a4   : > { %5868 = vmatmul.mubr.f32.gmra.mrb[250].mxu1 %v5501_v59  ;;  %6682 = vmatprep.mubr.msk.f32.mxu0 %vm3358_vm15, %v10177_v20  ;;  %v5432_v20 = vpop.permute.xlu0 %5431 }
 0x6a5   : > { %5872 = vmatprep.mubr.f32.mxu1 %v5470_v16 }
 0x6a6   : > { %v5434_v49 = vpop.permute.xlu1 %5433 }
 0x6a7   : > { %6683 = vmatmul.mubr.msk.f32.gmra.mrb[252].mxu0 %vm3358_vm15, %v10185_v47  ;;  %v5504_v47 = vsel %vm5491_vm2, %v7141_v22, %v5432_v20 }
 0x6a8   : > { %5873 = vmatmul.mubr.f32.gmra.mrb[252].mxu1 %v5502_v4  ;;  %6685 = vmatprep.mubr.msk.f32.mxu0 %vm3358_vm15, %v10197_v28  ;;  %v5436_v28 = vpop.permute.xlu0 %5435 }
 0x6a9   : > { %5877 = vmatprep.mubr.f32.mxu1 %v5471_v58 }
 0x6aa   : > { %v5457_v33 = vpop.permute.xlu1 %5456 }
 0x6ab   : > { %6686 = vmatmul.mubr.msk.f32.gmra.mrb[254].mxu0 %vm3358_vm15, %v10208_v53  ;;  %v5505_v53 = vsel %vm5491_vm2, %v7142_v52, %v5434_v49  ;;  %v5508_v23 = vsel %vm800_vm4, %v5261_v24, %v5457_v33 }
 0x6ac   : > { %5878 = vmatmul.mubr.f32.gmra.mrb[254].mxu1 %v5503_v25  ;;  %6688 = vmatprep.mubr.msk.f32.mxu0 %vm3358_vm15, %v10223_v50  ;;  %v5506_v50 = vsel %vm5491_vm2, %v10291_v54, %v5436_v28  ;;  %v5438_v60 = vpop.permute.xlu0 %5437 }
 0x6ad   : > { %5882 = vmatprep.mubr.f32.mxu1 %v5472_v40  ;;  %v5507_v34 = vsel %vm5491_vm2, %v5374_v19, %v5438_v60 }
 0x6af   : > { %6689 = vmatmul.mubr.msk.f32.gmra.mrb[0].mxu0 %vm3358_vm15, %v10234_v7 }
 0x6b0   : > { %5883 = vmatmul.mubr.f32.gmra.mrb[0].mxu1 %v5504_v47  ;;  %6691 = vmatprep.mubr.msk.f32.mxu0 %vm3358_vm15, %v10252_v17 }
 0x6b1   : > { %5887 = vmatprep.mubr.f32.mxu1 %v5473_v30 }
 0x6b3   : > { %6692 = vmatmul.mubr.msk.f32.gmra.mrb[2].mxu0 %vm3358_vm15, %v10263_v37 }
 0x6b4   : > { %5888 = vmatmul.mubr.f32.gmra.mrb[2].mxu1 %v5505_v53  ;;  %6694 = vmatprep.mubr.msk.f32.mxu0 %vm3358_vm15, %v10278_v63 }
 0x6b5   : > { %5892 = vmatprep.mubr.f32.mxu1 %v5474_v0 }
 0x6b7   : > { %6695 = vmatmul.mubr.msk.f32.gmra.mrb[4].mxu0 %vm3358_vm15, %v10289_v42 }
 0x6b8   : > { %5893 = vmatmul.mubr.f32.gmra.mrb[4].mxu1 %v5506_v50  ;;  %6697 = vmatprep.mubr.msk.f32.mxu0 %vm3358_vm15, %v5310_v14 }
 0x6b9   : > { %5897 = vmatprep.mubr.f32.mxu1 %v5508_v23 }
 0x6bb   : > { %6698 = vmatmul.mubr.msk.f32.gmra.mrb[6].mxu0 %vm3358_vm15, %v5457_v33 }
 0x6bc   : > { %5898 = vmatmul.mubr.f32.gmra.mrb[6].mxu1 %v5507_v34 }
 0x732   : > { %v6508_v15 = vpop.f32.mrb[216].mxu0 }
 0x733   : > { %v6509_v3 = vpop.f32.mrb[217].mxu0 }
 0x734   : > { %v6510_v7 = vadd.f32 %v6509_v3, %v6508_v15 }
 0x736   : > { %v6511_v2 = vpop.f32.mrb[218].mxu0 }
 0x737   : > { %v6512_v36 = vpop.f32.mrb[219].mxu0 }
 0x73a   : > { %v6514_v29 = vpop.f32.mrb[220].mxu0 }
 0x73b   : > { %v6515_v9 = vpop.f32.mrb[221].mxu0 }
 0x73c   : > { %v6516_v55 = vadd.f32 %v6515_v9, %v6514_v29 }
 0x73e   : > { %v6517_v62 = vpop.f32.mrb[222].mxu0 }
 0x73f   : > { %v6518_v13 = vpop.f32.mrb[223].mxu0 }
 0x742   : > { %v6520_v57 = vpop.f32.mrb[224].mxu0 }
 0x743   : > { %v6521_v17 = vpop.f32.mrb[225].mxu0 }
 0x744   : > { %v6522_v45 = vadd.f32 %v6521_v17, %v6520_v57 }
 0x746   : > { %v6523_v51 = vpop.f32.mrb[226].mxu0 }
 0x747   : > { %v6524_v1 = vpop.f32.mrb[227].mxu0 }
 0x74a   : > { %v6526_v26 = vpop.f32.mrb[228].mxu0 }
 0x74b   : > { %v6527_v43 = vpop.f32.mrb[229].mxu0 }
 0x74c   : > { %v6528_v48 = vadd.f32 %v6527_v43, %v6526_v26  ;;  %v6588_v37 = vpop.f32.mrb[232].mxu1 }
 0x74d   : > { %v6589_v16 = vpop.f32.mrb[233].mxu1 }
 0x74e   : > { %v6529_v38 = vpop.f32.mrb[230].mxu0  ;;  %v6590_v22 = vadd.f32 %v6589_v16, %v6588_v37 }
 0x74f   : > { %v6530_v52 = vpop.f32.mrb[231].mxu0 }
 0x750   : > { %v6591_v11 = vpop.f32.mrb[234].mxu1  ;;  %v5825_v5 = vadd.f32 %v6590_v22, %v6510_v7 }
 0x751   : > { %v6592_v27 = vpop.f32.mrb[235].mxu1 }
 0x752   : > { %v6532_v44 = vpop.f32.mrb[232].mxu0 }
 0x753   : > { %v6533_v63 = vpop.f32.mrb[233].mxu0 }
 0x754   : > { %v6534_v58 = vadd.f32 %v6533_v63, %v6532_v44  ;;  %v6594_v18 = vpop.f32.mrb[236].mxu1 }
 0x755   : > { %v6595_v10 = vpop.f32.mrb[237].mxu1 }
 0x756   : > { %v6535_v41 = vpop.f32.mrb[234].mxu0  ;;  %v6596_v42 = vadd.f32 %v6595_v10, %v6594_v18 }
 0x757   : > { %v6536_v54 = vpop.f32.mrb[235].mxu0 }
 0x758   : > { %v6597_v40 = vpop.f32.mrb[238].mxu1  ;;  %v5835_v32 = vadd.f32 %v6596_v42, %v6516_v55 }
 0x759   : > { %v6598_v19 = vpop.f32.mrb[239].mxu1 }
 0x75a   : > { %v6538_v56 = vpop.f32.mrb[236].mxu0 }
 0x75b   : > { %v6539_v14 = vpop.f32.mrb[237].mxu0 }
 0x75c   : > { %v6540_v30 = vadd.f32 %v6539_v14, %v6538_v56  ;;  %v6600_v35 = vpop.f32.mrb[240].mxu1 }
 0x75d   : > { %v6601_v61 = vpop.f32.mrb[241].mxu1 }
 0x75e   : > { %v6541_v46 = vpop.f32.mrb[238].mxu0  ;;  %v6602_v0 = vadd.f32 %v6601_v61, %v6600_v35 }
 0x75f   : > { %v6542_v31 = vpop.f32.mrb[239].mxu0 }
 0x760   : > { %v6603_v21 = vpop.f32.mrb[242].mxu1  ;;  %v5845_v6 = vadd.f32 %v6602_v0, %v6522_v45 }
 0x761   : > { %v6604_v59 = vpop.f32.mrb[243].mxu1 }
 0x762   : > { %v6544_v12 = vpop.f32.mrb[240].mxu0 }
 0x763   : > { %v6545_v8 = vpop.f32.mrb[241].mxu0 }
 0x764   : > { %v6546_v4 = vadd.f32 %v6545_v8, %v6544_v12  ;;  %v6606_v39 = vpop.f32.mrb[244].mxu1 }
 0x765   : > { %v6607_v20 = vpop.f32.mrb[245].mxu1 }
 0x766   : > { %v6547_v25 = vpop.f32.mrb[242].mxu0  ;;  %v6608_v47 = vadd.f32 %v6607_v20, %v6606_v39  ;;  %v6471_v20 = vld [vmem:[%s10425_s8] ss:$0 sm:$0xff] }
 0x767   : > { %v6548_v49 = vpop.f32.mrb[243].mxu0 }
 0x768   : > { %v5855_v28 = vadd.f32 %v6608_v47, %v6528_v48 }
 0x76a   : > { %v6550_v53 = vpop.f32.mrb[244].mxu0 }
 0x76b   : > { %v6551_v33 = vpop.f32.mrb[245].mxu0 }
 0x76c   : > { %v6552_v24 = vadd.f32 %v6551_v33, %v6550_v53 }
 0x76e   : > { %v6553_v23 = vpop.f32.mrb[246].mxu0 }
 0x76f   : > { %v6554_v50 = vpop.f32.mrb[247].mxu0  ;;  %v6609_v60 = vpop.f32.mrb[246].mxu1 }
 0x770   : > { %v6610_v34 = vpop.f32.mrb[247].mxu1 }
 0x772   : > { %v6678_v15 = vpop.f32.mrb[248].mxu0 }
 0x773   : > { %v6612_v3 = vpop.f32.mrb[248].mxu1  ;;  %v5969_v7 = vpop.f32.mrb[249].mxu0 }
 0x774   : > { %v5970_v2 = vadd.f32 %v5969_v7, %v5825_v5  ;;  %v6613_v36 = vpop.f32.mrb[249].mxu1 }
 0x775   : > { %v6614_v29 = vadd.f32 %v6613_v36, %v6612_v3 }
 0x776   : > { %6049 = vst.msk [vmem:[#allocation8] sm:$0xff] %vm6048_vm3, %v5970_v2  ;;  %v6681_v9 = vpop.f32.mrb[250].mxu0 }
 0x777   : > { %v6615_v55 = vpop.f32.mrb[250].mxu1  ;;  %v5979_v62 = vpop.f32.mrb[251].mxu0  ;;  %v5865_v13 = vadd.f32 %v6614_v29, %v6534_v58 }
 0x778   : > { %v5980_v57 = vadd.f32 %v5979_v62, %v5835_v32  ;;  %v6616_v17 = vpop.f32.mrb[251].mxu1 }
 0x77a   : > { %6051 = vst.msk [vmem:[#allocation8 + $0x10] sm:$0xff] %vm6048_vm3, %v5980_v57  ;;  %v6684_v45 = vpop.f32.mrb[252].mxu0 }
 0x77b   : > { %v6618_v51 = vpop.f32.mrb[252].mxu1  ;;  %v5989_v1 = vpop.f32.mrb[253].mxu0 }
 0x77c   : > { %v5990_v26 = vadd.f32 %v5989_v1, %v5845_v6  ;;  %v6619_v43 = vpop.f32.mrb[253].mxu1 }
 0x77d   : > { %v6620_v48 = vadd.f32 %v6619_v43, %v6618_v51 }
 0x77e   : > { %6053 = vst.msk [vmem:[#allocation8 + $0x20] sm:$0xff] %vm6048_vm3, %v5990_v26  ;;  %v6687_v37 = vpop.f32.mrb[254].mxu0 }
 0x77f   : > { %v6621_v38 = vpop.f32.mrb[254].mxu1  ;;  %v5999_v16 = vpop.f32.mrb[255].mxu0  ;;  %v5875_v22 = vadd.f32 %v6620_v48, %v6540_v30 }
 0x780   : > { %v6000_v52 = vadd.f32 %v5999_v16, %v5855_v28  ;;  %v6622_v11 = vpop.f32.mrb[255].mxu1 }
 0x781   : > { %v6065_v8 = vld [vmem:[#allocation8] ss:$16 sm:$0x3] }
 0x782   : > { %6055 = vst.msk [vmem:[#allocation8 + $0x30] sm:$0xff] %vm6048_vm3, %v6000_v52  ;;  %v6690_v5 = vpop.f32.mrb[0].mxu0 }
 0x783   : > { %v6624_v44 = vpop.f32.mrb[0].mxu1  ;;  %v6009_v27 = vpop.f32.mrb[1].mxu0 }
 0x784   : > { %v6010_v63 = vadd.f32 %v6009_v27, %v5865_v13  ;;  %v6625_v58 = vpop.f32.mrb[1].mxu1 }
 0x785   : > { %v6626_v18 = vadd.f32 %v6625_v58, %v6624_v44 }
 0x786   : > { %6057 = vst.msk [vmem:[#allocation8 + $0x40] sm:$0xff] %vm6048_vm3, %v6010_v63  ;;  %v6693_v41 = vpop.f32.mrb[2].mxu0 }
 0x787   : > { %v6627_v10 = vpop.f32.mrb[2].mxu1  ;;  %v6019_v42 = vpop.f32.mrb[3].mxu0  ;;  %v5885_v54 = vadd.f32 %v6626_v18, %v6546_v4 }
 0x788   : > { %v6020_v40 = vadd.f32 %v6019_v42, %v5875_v22  ;;  %v6628_v32 = vpop.f32.mrb[3].mxu1 }
 0x789   : > { %v6066_v59 = vld [vmem:[#allocation8] ss:$16 sm:$0xc] }
 0x78a   : > { %6059 = vst.msk [vmem:[#allocation8 + $0x50] sm:$0xff] %vm6048_vm3, %v6020_v40  ;;  %v6696_v56 = vpop.f32.mrb[4].mxu0  ;;  %v6067_v39 = vor.u32 %v6066_v59, %v6065_v8 }
 0x78b   : > { %v6630_v19 = vpop.f32.mrb[4].mxu1  ;;  %v6029_v14 = vpop.f32.mrb[5].mxu0 }
 0x78c   : > { %v6030_v30 = vadd.f32 %v6029_v14, %v5885_v54  ;;  %v6631_v35 = vpop.f32.mrb[5].mxu1 }
 0x78d   : > { %v6632_v46 = vadd.f32 %v6631_v35, %v6630_v19 }
 0x78e   : > { %6061 = vst.msk [vmem:[#allocation8 + $0x60] sm:$0xff] %vm6048_vm3, %v6030_v30  ;;  %v6699_v61 = vpop.f32.mrb[6].mxu0 }
 0x78f   : > { %v6633_v0 = vpop.f32.mrb[6].mxu1  ;;  %v5895_v31 = vadd.f32 %v6632_v46, %v6552_v24  ;;  %v6039_v21 = vpop.f32.mrb[7].mxu0 }
 0x790   : > { %v6634_v6 = vpop.f32.mrb[7].mxu1 }
 0x791   : > { %v6040_v12 = vadd.f32 %v6039_v21, %v5895_v31  ;;  %v6068_v4 = vld [vmem:[#allocation8] ss:$16 sm:$0x30] }
 0x792   : > { %v6069_v25 = vor.u32 %v6068_v4, %v6067_v39 }
 0x793   : > { %6063 = vst.msk [vmem:[#allocation8 + $0x70] sm:$0xff] %vm6048_vm3, %v6040_v12 }
 0x79a   : > { %v6070_v47 = vld [vmem:[#allocation8] ss:$16 sm:$0xc0] }
 0x79b   : > { %v6071_v49 = vor.u32 %v6070_v47, %v6069_v25 }
 0x79d   : > { %v6079_v28 = vadd.f32 %v6471_v20, %v6071_v49 }
 0x79f   : > { %6080 = vst.msk [vmem:[%s326_s22] sm:$0xff] %vm6048_vm3, %v6079_v28 }
 0x7a0   : > { %7166 = shalt.err (!%p7163_p3)
}
 0x7a1   : > { %s7167_s21 = scalar_lea.hbm %s10374_s27, 128  ;;  %s7171_s22 = scalar_lea.hbm %s10426_s9, 256 }
 0x7a2   : > { %p7168_p4 = scmp.ne.s32.totalorder %s10374_s27, %s7167_s21  ;;  %p7172_p9 = scmp.lt.u32.totalorder %s10374_s27, %s10426_s9 }
 0x7a3   : > { %p7173_p10 = scmp.lt.u32.totalorder %s7171_s22, %s7167_s21  ;;  %p7175_p12 = scmp.lt.u32.totalorder %s7167_s21, %s10374_s27 }
 0x7a4   : > { %p7169_p7 = pnand %p7168_p4, %p7314_p5 }
 0x7a5   : > { %p7174_p11 = por %p7173_p10, %p7172_p9 }
 0x7a6   : > { %p7170_p8 = pneg %p7169_p7 }
 0x7a7   : > { %p7176_p13 = por %p7175_p12, %p7174_p11 }
 0x7a9   : > { %p7177_p0 = pnand %p7176_p13, %p7170_p8 }
 0x7ab   : > { %7180 = shalt.err (!%p7177_p0)
}
 0x7ac   : > { %7046 = dma.vmem_to_hbm [thread:$0]  (%p7314_p5), %s10376_s23, 128, %s10374_s27, %s6082_s26  }
 0x7ad PF: > { %p7052_p1 = scmp.ge.s32.totalorder %s7215_s12, 2  ;;  %s6107_s28 = sand.u32 1, %s7203_s30  }
 0x7ae   : > { %s6108_s13 = scalar_lea.sflag [#allocation10], %s6107_s28 }
 0x7af   : > { %p7049_p2 = pnand %p7052_p1, %p7318_p6 }
 0x7b1   : > { %7198 = dma.done.wait (!%p7049_p2), %s6108_s13, 128  }
 0x7b2   : > { %7200 = vsyncadd (!%p7049_p2), %s6108_s13, 4294967168  ;;  %p19_p3 = scmp.ge.s32.totalorder %s7301_s15, 4   ;;  %s10647_s30 = smov %s7207_s10 }
 0x7b3   : > { %s10648_s10 = smov %s7211_s11  ;;  %s10649_s11 = smov %s7312_s18 }
 0x7b4   : > { %s10650_s12 = smov %s7301_s15  ;;  %21 = sbr.rel (!%p19_p3) target bundleno = 3 (0x3), region = 128 }
 0x7bb   :  { %6113 = vsyncpa [#allocation10], 1 }
 0x7bc   :  { %6115 = vsyncpa [#allocation10 + $0x1], 1 }

</bundles_post_ra>
